<compile_context>
chip_gen: v5e
topology: v5e:2x2
jax: 0.10.0
libtpu: 0.0.40
codegen_flags: <defaults>
</compile_context>

<pallas_src>
import functools
import math

import numpy as np
import jax
import jax.numpy as jnp
from jax.experimental import pallas as pl
from jax.experimental.pallas import tpu as pltpu


# =============================================================================
# Fused GPG_4 forward kernel (one grid step per batch element).
# =============================================================================
def _gpg4_fused_kernel(x5_ref, x4_ref, g_ref, msk_ref, w5_ref, w4_ref,
                       wd_ref, wo_ref, t2_ref, pcp_ref, o_ref,
                       *, H4, W4, width):
    f32 = jnp.float32
    HW4 = H4 * W4

    def shifted(x, dy, dx, mrow):
        """x[:, (h+dy)*W4 + (w+dx)] with zeros outside the (H4, W4) map.

        x is (C, HW4), row-major over (H4, W4).  Implemented as a lane-axis
        roll (XLU) times a precomputed 0/1 boundary mask (broadcast over the
        channel sublanes) -- no padded scratch, no relayout copies.
        """
        if dy == 0 and dx == 0:
            return x
        s = dy * W4 + dx
        rolled = pltpu.roll(x, shift=(-s) % HW4, axis=1)
        return rolled * msk_ref[mrow]                       # (C,HW4)*(1,HW4)

    def scale_bias(acc, col, relu=True):
        """Per-channel (sublane) BN scale/bias taken from pcp columns col/col+1."""
        y = acc * pcp_ref[:, col:col + 1] + pcp_ref[:, col + 1:col + 2]
        return jnp.maximum(y, 0.0) if relu else y

    def conv_taps(x, wget, dil, mrow0):
        """Sum over the 9 taps of wget(k) @ shifted(x, tap_k * dil)."""
        acc = jnp.zeros((width, HW4), f32)
        for k in range(9):
            dy = (k // 3 - 1) * dil
            dx = (k % 3 - 1) * dil
            acc = acc + jnp.dot(wget(k), shifted(x, dy, dx, mrow0 + k),
                                preferred_element_type=f32)
        return acc

    # ---- conv5 (+BN+ReLU) fused with the nearest upsample ------------------
    # f5u_raw = sum_k (w5_k @ x5) @ G_k ; G_k = (tap-k shift) o (nearest
    # gather), built host-side.  BN+ReLU are per-channel elementwise and so
    # commute with the gather -> applied after upsampling.
    x5 = x5_ref[0]                                          # (C5, HW5)
    acc5 = jnp.zeros((width, HW4), f32)
    for k in range(9):
        t = jnp.dot(w5_ref[k], x5, preferred_element_type=f32)      # (w, HW5)
        acc5 = acc5 + jnp.dot(t, g_ref[k], preferred_element_type=f32)
    f5u = scale_bias(acc5, 0)                               # (width, HW4)

    # ---- conv4 + BN + ReLU --------------------------------------------------
    f4 = scale_bias(conv_taps(x4_ref[0], lambda k: w4_ref[k], 1, 0), 2)

    # ---- feat = concat([f5u, f4]) on the channel (sublane) axis -------------
    feat = jnp.concatenate([f5u, f4], axis=0)               # (2*width, HW4)

    # ---- dilation branch -> shared ECA -> conv_out contribution -------------
    # (each branch is fully consumed before the next one is produced)
    def branch(b, dil, col, mrow0):
        d = scale_bias(conv_taps(feat, lambda k: wd_ref[b, k], dil, mrow0),
                       col)                                  # (width, HW4)
        # ECA: global average pool -> k=3 channel conv (tridiagonal matrix,
        # moved before the lane reduction by linearity) -> sigmoid gate.
        t2d = jnp.dot(t2_ref[...], d, preferred_element_type=f32)
        gate = jax.nn.sigmoid(jnp.mean(t2d, axis=1, keepdims=True))  # (w, 1)
        return jnp.dot(wo_ref[b], d * gate, preferred_element_type=f32)

    out = branch(0, 1, 4, 0) + branch(1, 2, 6, 9)

    # ---- conv_out BN (no ReLU), lane-dense (width, HW4) store ---------------
    o_ref[0] = scale_bias(out, 8, relu=False)


# =============================================================================
# Host-side trace-time constants
# =============================================================================
def _nearest_tap_gather(h_in, w_in, h_out, w_out):
    """(9, h_in*w_in, h_out*w_out) 0/1 matrices.

    G[k, src, dst] = 1 iff `src` is the tap-k source (3x3, pad 1, zero-padded)
    of the conv output at the (h_in, w_in) position that the nearest-neighbour
    upsample (F.interpolate default floor indexing) maps `dst` to.
    """
    ih = (np.arange(h_out) * h_in) // h_out
    iw = (np.arange(w_out) * w_in) // w_out
    g = np.zeros((9, h_in * w_in, h_out * w_out), np.float32)
    for k in range(9):
        dy, dx = k // 3 - 1, k % 3 - 1
        for a in range(h_out):
            hh = ih[a] + dy
            if not 0 <= hh < h_in:
                continue
            for b in range(w_out):
                ww = iw[b] + dx
                if 0 <= ww < w_in:
                    g[k, hh * w_in + ww, a * w_out + b] = 1.0
    return g


def _shift_masks(h, w, dilations):
    """(9*len(dilations), 1, h*w) 0/1 masks: tap (dy,dx) of each dilation is
    in-bounds at the given row-major flattened position."""
    hw = h * w
    h_idx, w_idx = np.divmod(np.arange(hw), w)
    m = np.zeros((9 * len(dilations), 1, hw), np.float32)
    for di, d in enumerate(dilations):
        for k in range(9):
            dy, dx = (k // 3 - 1) * d, (k % 3 - 1) * d
            ok = ((h_idx + dy >= 0) & (h_idx + dy < h)
                  & (w_idx + dx >= 0) & (w_idx + dx < w))
            m[di * 9 + k, 0] = ok
    return m


# =============================================================================
# Host-side glue
# =============================================================================
def gpg4_forward(prepped, x_m2_nchw, x_m1_nchw):
    """GPG_4 forward.  x_m1 == inputs[-1] (-> conv5), x_m2 == inputs[-2] (-> conv4)."""
    N, C5, H5, W5 = x_m1_nchw.shape
    _, C4, H4, W4 = x_m2_nchw.shape
    width = prepped["w5"].shape[1]
    HW5, HW4 = H5 * W5, H4 * W4

    # NCHW -> (N, C, H*W) is a free reshape; channels land on the sublane axis
    # inside the kernel and H*W is the lane axis (no host transposes).
    x5 = x_m1_nchw.reshape(N, C5, HW5)
    x4 = x_m2_nchw.reshape(N, C4, HW4)

    # Trace-time numpy constants.
    g = jnp.asarray(_nearest_tap_gather(H5, W5, H4, W4))     # (9, HW5, HW4)
    msk = jnp.asarray(_shift_masks(H4, W4, (1, 2)))          # (18, 1, HW4)

    kernel = functools.partial(_gpg4_fused_kernel, H4=H4, W4=W4, width=width)

    out = pl.pallas_call(
        kernel,
        out_shape=jax.ShapeDtypeStruct((N, width, HW4), jnp.float32),
        grid=(N,),
        in_specs=[
            pl.BlockSpec((1, C5, HW5), lambda n: (n, 0, 0)),            # x5
            pl.BlockSpec((1, C4, HW4), lambda n: (n, 0, 0)),            # x4
            pl.BlockSpec((9, HW5, HW4), lambda n: (0, 0, 0)),           # G
            pl.BlockSpec((18, 1, HW4), lambda n: (0, 0, 0)),            # masks
            pl.BlockSpec((9, width, C5), lambda n: (0, 0, 0)),          # w5
            pl.BlockSpec((9, width, C4), lambda n: (0, 0, 0)),          # w4
            pl.BlockSpec((2, 9, width, 2 * width),
                         lambda n: (0, 0, 0, 0)),                       # wd
            pl.BlockSpec((2, width, width), lambda n: (0, 0, 0)),       # wo
            pl.BlockSpec((width, width), lambda n: (0, 0)),             # ECA T
            pl.BlockSpec((width, 10), lambda n: (0, 0)),                # BN s/b
        ],
        out_specs=pl.BlockSpec((1, width, HW4), lambda n: (n, 0, 0)),
        compiler_params=pltpu.CompilerParams(
            dimension_semantics=("parallel",)),
    )(x5, x4, g, msk, prepped["w5"], prepped["w4"], prepped["wd"],
      prepped["wo"], prepped["t2"], prepped["pcp"])

    return out.reshape(N, width, H4, W4)       # already NCHW, free reshape


# =============================================================================
# Parameter init (mirrors the PyTorch module) + one-time kernel-layout packing
# =============================================================================
def _kaiming_uniform(key, shape, fan_in):
    bound = math.sqrt(2.0) * math.sqrt(3.0 / fan_in)
    return jax.random.uniform(key, shape, jnp.float32, -bound, bound)


def _bn_scale_bias(key, c, eps=1e-5):
    gamma = 1.0 + 0.02 * jax.random.normal(key, (1, c), jnp.float32)
    beta = jnp.zeros((1, c), jnp.float32)
    # eval-mode BN with running_mean=0, running_var=1
    return gamma / jnp.sqrt(1.0 + eps), beta


def init_params(key, in_channels, width):
    ks = jax.random.split(key, 12)
    c5_in, c4_in = in_channels[-1], in_channels[-2]
    p = {}
    p["conv5_w"] = _kaiming_uniform(ks[0], (3, 3, c5_in, width), c5_in * 9)
    p["conv5_s"], p["conv5_b"] = _bn_scale_bias(ks[1], width)
    p["conv4_w"] = _kaiming_uniform(ks[2], (3, 3, c4_in, width), c4_in * 9)
    p["conv4_s"], p["conv4_b"] = _bn_scale_bias(ks[3], width)
    p["dil1_w"] = _kaiming_uniform(ks[4], (3, 3, 2 * width, width), 2 * width * 9)
    p["dil1_s"], p["dil1_b"] = _bn_scale_bias(ks[5], width)
    p["dil2_w"] = _kaiming_uniform(ks[6], (3, 3, 2 * width, width), 2 * width * 9)
    p["dil2_s"], p["dil2_b"] = _bn_scale_bias(ks[7], width)
    p["out_w"] = _kaiming_uniform(ks[8], (2 * width, width), 2 * width)
    p["out_s"], p["out_b"] = _bn_scale_bias(ks[9], width)
    # ECA Conv1d(1,1,k=3,bias=False) default init: U(-1/sqrt(3), 1/sqrt(3))
    p["eca_w"] = jax.random.uniform(ks[10], (3,), jnp.float32,
                                    -1.0 / math.sqrt(3.0), 1.0 / math.sqrt(3.0))
    return p


def prepare_params(params):
    """Repack parameters into kernel-ready layouts (runs once, outside jit)."""
    width = params["conv5_w"].shape[-1]

    def pack3x3(w):  # (3, 3, cin, cout) -> (9, cout, cin), tap k = kh*3 + kw
        return jnp.transpose(w, (0, 1, 3, 2)).reshape(9, width, w.shape[2])

    # ECA conv1d(k=3, pad=1, no bias) as a tridiagonal (width, width) matrix
    # acting on the channel (sublane) axis: gate[c] = w0*m[c-1]+w1*m[c]+w2*m[c+1].
    w0, w1, w2 = params["eca_w"][0], params["eca_w"][1], params["eca_w"][2]
    t2 = (w0 * jnp.eye(width, k=-1, dtype=jnp.float32)
          + w1 * jnp.eye(width, dtype=jnp.float32)
          + w2 * jnp.eye(width, k=1, dtype=jnp.float32))

    # Per-channel BN scale/bias columns:
    # [c5 s, c5 b, c4 s, c4 b, d1 s, d1 b, d2 s, d2 b, out s, out b]
    pcp = jnp.stack([
        params["conv5_s"].reshape(width), params["conv5_b"].reshape(width),
        params["conv4_s"].reshape(width), params["conv4_b"].reshape(width),
        params["dil1_s"].reshape(width), params["dil1_b"].reshape(width),
        params["dil2_s"].reshape(width), params["dil2_b"].reshape(width),
        params["out_s"].reshape(width), params["out_b"].reshape(width),
    ], axis=1)                                              # (width, 10)

    return {
        "w5": pack3x3(params["conv5_w"]),                   # (9, width, C5)
        "w4": pack3x3(params["conv4_w"]),                   # (9, width, C4)
        # concat halves fused: input channels 0..w-1 -> f5u, w..2w-1 -> f4
        "wd": jnp.stack([pack3x3(params["dil1_w"]),
                         pack3x3(params["dil2_w"])], axis=0),  # (2,9,w,2w)
        "wo": jnp.stack([params["out_w"][:width].T,
                         params["out_w"][width:].T], axis=0),  # (2, w, w)
        "t2": t2,
        "pcp": pcp,
    }


if __name__ == "__main__":
    key = jax.random.PRNGKey(0)
    k_x4, k_x5, k_p = jax.random.split(key, 3)

    in_channels = (8, 4)   # in_channels[-2]=8 (conv4), in_channels[-1]=4 (conv5)
    width = 32

    # inputs[-2]: (N, 8, 16, 16)   inputs[-1]: (N, 4, 8, 8)   (NCHW)
    x_m2 = jax.random.normal(k_x4, (2, 8, 16, 16), jnp.float32)
    x_m1 = jax.random.normal(k_x5, (2, 4, 8, 8), jnp.float32)

    params = init_params(k_p, in_channels, width)
    prepped = prepare_params(params)

    fwd = jax.jit(functools.partial(gpg4_forward, prepped))
    out = fwd(x_m2, x_m1)
    jax.block_until_ready(out)

    assert out.shape == (2, width, 16, 16), out.shape
    assert out.dtype == jnp.float32
    print("KERNEL_OK")
</pallas_src>

<mosaic_0001>
module attributes {stable_mosaic.version = 11 : i64} {
  func.func @_gpg4_fused_kernel(%arg0: i32, %arg1: memref<1x4x64xf32, #tpu.memory_space<vmem>>, %arg2: memref<1x8x256xf32, #tpu.memory_space<vmem>>, %arg3: memref<9x64x256xf32, #tpu.memory_space<vmem>>, %arg4: memref<18x1x256xf32, #tpu.memory_space<vmem>>, %arg5: memref<9x32x4xf32, #tpu.memory_space<vmem>>, %arg6: memref<9x32x8xf32, #tpu.memory_space<vmem>>, %arg7: memref<2x9x32x64xf32, #tpu.memory_space<vmem>>, %arg8: memref<2x32x32xf32, #tpu.memory_space<vmem>>, %arg9: memref<32x32xf32, #tpu.memory_space<vmem>>, %arg10: memref<32x10xf32, #tpu.memory_space<vmem>>, %arg11: memref<1x32x256xf32, #tpu.memory_space<vmem>>) attributes {dimension_semantics = [#tpu.dimension_semantics<parallel>], iteration_bounds = array<i64: 2>, scalar_prefetch = 0 : i64, scratch_operands = 0 : i64, tpu.core_type = #tpu.core_type<tc>, window_params = [{transform_indices = @transform_0, window_bounds = array<i64: 1, 4, 64>}, {transform_indices = @transform_1, window_bounds = array<i64: 1, 8, 256>}, {pipeline_mode = #tpu.pipeline_mode<synchronous>, transform_indices = @transform_2, window_bounds = array<i64: 9, 64, 256>}, {pipeline_mode = #tpu.pipeline_mode<synchronous>, transform_indices = @transform_3, window_bounds = array<i64: 18, 1, 256>}, {pipeline_mode = #tpu.pipeline_mode<synchronous>, transform_indices = @transform_4, window_bounds = array<i64: 9, 32, 4>}, {pipeline_mode = #tpu.pipeline_mode<synchronous>, transform_indices = @transform_5, window_bounds = array<i64: 9, 32, 8>}, {pipeline_mode = #tpu.pipeline_mode<synchronous>, transform_indices = @transform_6, window_bounds = array<i64: 2, 9, 32, 64>}, {pipeline_mode = #tpu.pipeline_mode<synchronous>, transform_indices = @transform_7, window_bounds = array<i64: 2, 32, 32>}, {pipeline_mode = #tpu.pipeline_mode<synchronous>, transform_indices = @transform_8, window_bounds = array<i64: 32, 32>}, {pipeline_mode = #tpu.pipeline_mode<synchronous>, transform_indices = @transform_9, window_bounds = array<i64: 32, 10>}, {transform_indices = @transform_10, window_bounds = array<i64: 1, 32, 256>}]} {
    %c0 = arith.constant 0 : index
    %c0_0 = arith.constant 0 : index
    %c0_1 = arith.constant 0 : index
    %0 = vector.load %arg1[%c0, %c0_0, %c0_1] : memref<1x4x64xf32, #tpu.memory_space<vmem>>, vector<1x4x64xf32>
    %1 = vector.shape_cast %0 : vector<1x4x64xf32> to vector<4x64xf32>
    %cst = arith.constant 0.000000e+00 : f32
    %2 = vector.broadcast %cst : f32 to vector<32x256xf32>
    %c0_2 = arith.constant 0 : index
    %c0_3 = arith.constant 0 : index
    %c0_4 = arith.constant 0 : index
    %3 = vector.load %arg5[%c0_2, %c0_3, %c0_4] : memref<9x32x4xf32, #tpu.memory_space<vmem>>, vector<1x32x4xf32>
    %4 = vector.shape_cast %3 : vector<1x32x4xf32> to vector<32x4xf32>
    %cst_5 = arith.constant dense<0.000000e+00> : vector<32x64xf32>
    %5 = tpu.matmul %4, %1, %cst_5 {dimension_numbers = #tpu.dot_dimension_numbers<[1], [0], [0], [1], [0, 0, 1, 1], [], []>} : vector<32x4xf32>, vector<4x64xf32>, vector<32x64xf32> -> vector<32x64xf32>
    %c0_6 = arith.constant 0 : index
    %c0_7 = arith.constant 0 : index
    %c0_8 = arith.constant 0 : index
    %6 = vector.load %arg3[%c0_6, %c0_7, %c0_8] : memref<9x64x256xf32, #tpu.memory_space<vmem>>, vector<1x64x256xf32>
    %7 = vector.shape_cast %6 : vector<1x64x256xf32> to vector<64x256xf32>
    %cst_9 = arith.constant dense<0.000000e+00> : vector<32x256xf32>
    %8 = tpu.matmul %5, %7, %cst_9 {dimension_numbers = #tpu.dot_dimension_numbers<[1], [0], [0], [1], [0, 0, 1, 1], [], []>} : vector<32x64xf32>, vector<64x256xf32>, vector<32x256xf32> -> vector<32x256xf32>
    %9 = arith.addf %2, %8 : vector<32x256xf32>
    %c1 = arith.constant 1 : index
    %c0_10 = arith.constant 0 : index
    %c0_11 = arith.constant 0 : index
    %10 = vector.load %arg5[%c1, %c0_10, %c0_11] : memref<9x32x4xf32, #tpu.memory_space<vmem>>, vector<1x32x4xf32>
    %11 = vector.shape_cast %10 : vector<1x32x4xf32> to vector<32x4xf32>
    %cst_12 = arith.constant dense<0.000000e+00> : vector<32x64xf32>
    %12 = tpu.matmul %11, %1, %cst_12 {dimension_numbers = #tpu.dot_dimension_numbers<[1], [0], [0], [1], [0, 0, 1, 1], [], []>} : vector<32x4xf32>, vector<4x64xf32>, vector<32x64xf32> -> vector<32x64xf32>
    %c1_13 = arith.constant 1 : index
    %c0_14 = arith.constant 0 : index
    %c0_15 = arith.constant 0 : index
    %13 = vector.load %arg3[%c1_13, %c0_14, %c0_15] : memref<9x64x256xf32, #tpu.memory_space<vmem>>, vector<1x64x256xf32>
    %14 = vector.shape_cast %13 : vector<1x64x256xf32> to vector<64x256xf32>
    %cst_16 = arith.constant dense<0.000000e+00> : vector<32x256xf32>
    %15 = tpu.matmul %12, %14, %cst_16 {dimension_numbers = #tpu.dot_dimension_numbers<[1], [0], [0], [1], [0, 0, 1, 1], [], []>} : vector<32x64xf32>, vector<64x256xf32>, vector<32x256xf32> -> vector<32x256xf32>
    %16 = arith.addf %9, %15 : vector<32x256xf32>
    %c2 = arith.constant 2 : index
    %c0_17 = arith.constant 0 : index
    %c0_18 = arith.constant 0 : index
    %17 = vector.load %arg5[%c2, %c0_17, %c0_18] : memref<9x32x4xf32, #tpu.memory_space<vmem>>, vector<1x32x4xf32>
    %18 = vector.shape_cast %17 : vector<1x32x4xf32> to vector<32x4xf32>
    %cst_19 = arith.constant dense<0.000000e+00> : vector<32x64xf32>
    %19 = tpu.matmul %18, %1, %cst_19 {dimension_numbers = #tpu.dot_dimension_numbers<[1], [0], [0], [1], [0, 0, 1, 1], [], []>} : vector<32x4xf32>, vector<4x64xf32>, vector<32x64xf32> -> vector<32x64xf32>
    %c2_20 = arith.constant 2 : index
    %c0_21 = arith.constant 0 : index
    %c0_22 = arith.constant 0 : index
    %20 = vector.load %arg3[%c2_20, %c0_21, %c0_22] : memref<9x64x256xf32, #tpu.memory_space<vmem>>, vector<1x64x256xf32>
    %21 = vector.shape_cast %20 : vector<1x64x256xf32> to vector<64x256xf32>
    %cst_23 = arith.constant dense<0.000000e+00> : vector<32x256xf32>
    %22 = tpu.matmul %19, %21, %cst_23 {dimension_numbers = #tpu.dot_dimension_numbers<[1], [0], [0], [1], [0, 0, 1, 1], [], []>} : vector<32x64xf32>, vector<64x256xf32>, vector<32x256xf32> -> vector<32x256xf32>
    %23 = arith.addf %16, %22 : vector<32x256xf32>
    %c3 = arith.constant 3 : index
    %c0_24 = arith.constant 0 : index
    %c0_25 = arith.constant 0 : index
    %24 = vector.load %arg5[%c3, %c0_24, %c0_25] : memref<9x32x4xf32, #tpu.memory_space<vmem>>, vector<1x32x4xf32>
    %25 = vector.shape_cast %24 : vector<1x32x4xf32> to vector<32x4xf32>
    %cst_26 = arith.constant dense<0.000000e+00> : vector<32x64xf32>
    %26 = tpu.matmul %25, %1, %cst_26 {dimension_numbers = #tpu.dot_dimension_numbers<[1], [0], [0], [1], [0, 0, 1, 1], [], []>} : vector<32x4xf32>, vector<4x64xf32>, vector<32x64xf32> -> vector<32x64xf32>
    %c3_27 = arith.constant 3 : index
    %c0_28 = arith.constant 0 : index
    %c0_29 = arith.constant 0 : index
    %27 = vector.load %arg3[%c3_27, %c0_28, %c0_29] : memref<9x64x256xf32, #tpu.memory_space<vmem>>, vector<1x64x256xf32>
    %28 = vector.shape_cast %27 : vector<1x64x256xf32> to vector<64x256xf32>
    %cst_30 = arith.constant dense<0.000000e+00> : vector<32x256xf32>
    %29 = tpu.matmul %26, %28, %cst_30 {dimension_numbers = #tpu.dot_dimension_numbers<[1], [0], [0], [1], [0, 0, 1, 1], [], []>} : vector<32x64xf32>, vector<64x256xf32>, vector<32x256xf32> -> vector<32x256xf32>
    %30 = arith.addf %23, %29 : vector<32x256xf32>
    %c4 = arith.constant 4 : index
    %c0_31 = arith.constant 0 : index
    %c0_32 = arith.constant 0 : index
    %31 = vector.load %arg5[%c4, %c0_31, %c0_32] : memref<9x32x4xf32, #tpu.memory_space<vmem>>, vector<1x32x4xf32>
    %32 = vector.shape_cast %31 : vector<1x32x4xf32> to vector<32x4xf32>
    %cst_33 = arith.constant dense<0.000000e+00> : vector<32x64xf32>
    %33 = tpu.matmul %32, %1, %cst_33 {dimension_numbers = #tpu.dot_dimension_numbers<[1], [0], [0], [1], [0, 0, 1, 1], [], []>} : vector<32x4xf32>, vector<4x64xf32>, vector<32x64xf32> -> vector<32x64xf32>
    %c4_34 = arith.constant 4 : index
    %c0_35 = arith.constant 0 : index
    %c0_36 = arith.constant 0 : index
    %34 = vector.load %arg3[%c4_34, %c0_35, %c0_36] : memref<9x64x256xf32, #tpu.memory_space<vmem>>, vector<1x64x256xf32>
    %35 = vector.shape_cast %34 : vector<1x64x256xf32> to vector<64x256xf32>
    %cst_37 = arith.constant dense<0.000000e+00> : vector<32x256xf32>
    %36 = tpu.matmul %33, %35, %cst_37 {dimension_numbers = #tpu.dot_dimension_numbers<[1], [0], [0], [1], [0, 0, 1, 1], [], []>} : vector<32x64xf32>, vector<64x256xf32>, vector<32x256xf32> -> vector<32x256xf32>
    %37 = arith.addf %30, %36 : vector<32x256xf32>
    %c5 = arith.constant 5 : index
    %c0_38 = arith.constant 0 : index
    %c0_39 = arith.constant 0 : index
    %38 = vector.load %arg5[%c5, %c0_38, %c0_39] : memref<9x32x4xf32, #tpu.memory_space<vmem>>, vector<1x32x4xf32>
    %39 = vector.shape_cast %38 : vector<1x32x4xf32> to vector<32x4xf32>
    %cst_40 = arith.constant dense<0.000000e+00> : vector<32x64xf32>
    %40 = tpu.matmul %39, %1, %cst_40 {dimension_numbers = #tpu.dot_dimension_numbers<[1], [0], [0], [1], [0, 0, 1, 1], [], []>} : vector<32x4xf32>, vector<4x64xf32>, vector<32x64xf32> -> vector<32x64xf32>
    %c5_41 = arith.constant 5 : index
    %c0_42 = arith.constant 0 : index
    %c0_43 = arith.constant 0 : index
    %41 = vector.load %arg3[%c5_41, %c0_42, %c0_43] : memref<9x64x256xf32, #tpu.memory_space<vmem>>, vector<1x64x256xf32>
    %42 = vector.shape_cast %41 : vector<1x64x256xf32> to vector<64x256xf32>
    %cst_44 = arith.constant dense<0.000000e+00> : vector<32x256xf32>
    %43 = tpu.matmul %40, %42, %cst_44 {dimension_numbers = #tpu.dot_dimension_numbers<[1], [0], [0], [1], [0, 0, 1, 1], [], []>} : vector<32x64xf32>, vector<64x256xf32>, vector<32x256xf32> -> vector<32x256xf32>
    %44 = arith.addf %37, %43 : vector<32x256xf32>
    %c6 = arith.constant 6 : index
    %c0_45 = arith.constant 0 : index
    %c0_46 = arith.constant 0 : index
    %45 = vector.load %arg5[%c6, %c0_45, %c0_46] : memref<9x32x4xf32, #tpu.memory_space<vmem>>, vector<1x32x4xf32>
    %46 = vector.shape_cast %45 : vector<1x32x4xf32> to vector<32x4xf32>
    %cst_47 = arith.constant dense<0.000000e+00> : vector<32x64xf32>
    %47 = tpu.matmul %46, %1, %cst_47 {dimension_numbers = #tpu.dot_dimension_numbers<[1], [0], [0], [1], [0, 0, 1, 1], [], []>} : vector<32x4xf32>, vector<4x64xf32>, vector<32x64xf32> -> vector<32x64xf32>
    %c6_48 = arith.constant 6 : index
    %c0_49 = arith.constant 0 : index
    %c0_50 = arith.constant 0 : index
    %48 = vector.load %arg3[%c6_48, %c0_49, %c0_50] : memref<9x64x256xf32, #tpu.memory_space<vmem>>, vector<1x64x256xf32>
    %49 = vector.shape_cast %48 : vector<1x64x256xf32> to vector<64x256xf32>
    %cst_51 = arith.constant dense<0.000000e+00> : vector<32x256xf32>
    %50 = tpu.matmul %47, %49, %cst_51 {dimension_numbers = #tpu.dot_dimension_numbers<[1], [0], [0], [1], [0, 0, 1, 1], [], []>} : vector<32x64xf32>, vector<64x256xf32>, vector<32x256xf32> -> vector<32x256xf32>
    %51 = arith.addf %44, %50 : vector<32x256xf32>
    %c7 = arith.constant 7 : index
    %c0_52 = arith.constant 0 : index
    %c0_53 = arith.constant 0 : index
    %52 = vector.load %arg5[%c7, %c0_52, %c0_53] : memref<9x32x4xf32, #tpu.memory_space<vmem>>, vector<1x32x4xf32>
    %53 = vector.shape_cast %52 : vector<1x32x4xf32> to vector<32x4xf32>
    %cst_54 = arith.constant dense<0.000000e+00> : vector<32x64xf32>
    %54 = tpu.matmul %53, %1, %cst_54 {dimension_numbers = #tpu.dot_dimension_numbers<[1], [0], [0], [1], [0, 0, 1, 1], [], []>} : vector<32x4xf32>, vector<4x64xf32>, vector<32x64xf32> -> vector<32x64xf32>
    %c7_55 = arith.constant 7 : index
    %c0_56 = arith.constant 0 : index
    %c0_57 = arith.constant 0 : index
    %55 = vector.load %arg3[%c7_55, %c0_56, %c0_57] : memref<9x64x256xf32, #tpu.memory_space<vmem>>, vector<1x64x256xf32>
    %56 = vector.shape_cast %55 : vector<1x64x256xf32> to vector<64x256xf32>
    %cst_58 = arith.constant dense<0.000000e+00> : vector<32x256xf32>
    %57 = tpu.matmul %54, %56, %cst_58 {dimension_numbers = #tpu.dot_dimension_numbers<[1], [0], [0], [1], [0, 0, 1, 1], [], []>} : vector<32x64xf32>, vector<64x256xf32>, vector<32x256xf32> -> vector<32x256xf32>
    %58 = arith.addf %51, %57 : vector<32x256xf32>
    %c8 = arith.constant 8 : index
    %c0_59 = arith.constant 0 : index
    %c0_60 = arith.constant 0 : index
    %59 = vector.load %arg5[%c8, %c0_59, %c0_60] : memref<9x32x4xf32, #tpu.memory_space<vmem>>, vector<1x32x4xf32>
    %60 = vector.shape_cast %59 : vector<1x32x4xf32> to vector<32x4xf32>
    %cst_61 = arith.constant dense<0.000000e+00> : vector<32x64xf32>
    %61 = tpu.matmul %60, %1, %cst_61 {dimension_numbers = #tpu.dot_dimension_numbers<[1], [0], [0], [1], [0, 0, 1, 1], [], []>} : vector<32x4xf32>, vector<4x64xf32>, vector<32x64xf32> -> vector<32x64xf32>
    %c8_62 = arith.constant 8 : index
    %c0_63 = arith.constant 0 : index
    %c0_64 = arith.constant 0 : index
    %62 = vector.load %arg3[%c8_62, %c0_63, %c0_64] : memref<9x64x256xf32, #tpu.memory_space<vmem>>, vector<1x64x256xf32>
    %63 = vector.shape_cast %62 : vector<1x64x256xf32> to vector<64x256xf32>
    %cst_65 = arith.constant dense<0.000000e+00> : vector<32x256xf32>
    %64 = tpu.matmul %61, %63, %cst_65 {dimension_numbers = #tpu.dot_dimension_numbers<[1], [0], [0], [1], [0, 0, 1, 1], [], []>} : vector<32x64xf32>, vector<64x256xf32>, vector<32x256xf32> -> vector<32x256xf32>
    %65 = arith.addf %58, %64 : vector<32x256xf32>
    %c0_66 = arith.constant 0 : index
    %c0_67 = arith.constant 0 : index
    %66 = vector.load %arg10[%c0_66, %c0_67] : memref<32x10xf32, #tpu.memory_space<vmem>>, vector<32x1xf32>
    %67 = vector.broadcast %66 : vector<32x1xf32> to vector<32x256xf32>
    %68 = arith.mulf %65, %67 : vector<32x256xf32>
    %c0_68 = arith.constant 0 : index
    %c1_69 = arith.constant 1 : index
    %69 = vector.load %arg10[%c0_68, %c1_69] : memref<32x10xf32, #tpu.memory_space<vmem>>, vector<32x1xf32>
    %70 = vector.broadcast %69 : vector<32x1xf32> to vector<32x256xf32>
    %71 = arith.addf %68, %70 : vector<32x256xf32>
    %cst_70 = arith.constant 0.000000e+00 : f32
    %72 = vector.broadcast %cst_70 : f32 to vector<32x256xf32>
    %73 = arith.maximumf %71, %72 : vector<32x256xf32>
    %c0_71 = arith.constant 0 : index
    %c0_72 = arith.constant 0 : index
    %c0_73 = arith.constant 0 : index
    %74 = vector.load %arg2[%c0_71, %c0_72, %c0_73] : memref<1x8x256xf32, #tpu.memory_space<vmem>>, vector<1x8x256xf32>
    %75 = vector.shape_cast %74 : vector<1x8x256xf32> to vector<8x256xf32>
    %cst_74 = arith.constant 0.000000e+00 : f32
    %76 = vector.broadcast %cst_74 : f32 to vector<32x256xf32>
    %c0_75 = arith.constant 0 : index
    %c0_76 = arith.constant 0 : index
    %c0_77 = arith.constant 0 : index
    %77 = vector.load %arg6[%c0_75, %c0_76, %c0_77] : memref<9x32x8xf32, #tpu.memory_space<vmem>>, vector<1x32x8xf32>
    %78 = vector.shape_cast %77 : vector<1x32x8xf32> to vector<32x8xf32>
    %c17_i32 = arith.constant 17 : i32
    %79 = tpu.dynamic_rotate %75 by %c17_i32 dim 1 : vector<8x256xf32>, i32 -> vector<8x256xf32>
    %c0_78 = arith.constant 0 : index
    %c0_79 = arith.constant 0 : index
    %c0_80 = arith.constant 0 : index
    %80 = vector.load %arg4[%c0_78, %c0_79, %c0_80] : memref<18x1x256xf32, #tpu.memory_space<vmem>>, vector<1x1x256xf32>
    %81 = vector.shape_cast %80 : vector<1x1x256xf32> to vector<1x256xf32>
    %82 = vector.broadcast %81 : vector<1x256xf32> to vector<8x256xf32>
    %83 = arith.mulf %79, %82 : vector<8x256xf32>
    %cst_81 = arith.constant dense<0.000000e+00> : vector<32x256xf32>
    %84 = tpu.matmul %78, %83, %cst_81 {dimension_numbers = #tpu.dot_dimension_numbers<[1], [0], [0], [1], [0, 0, 1, 1], [], []>} : vector<32x8xf32>, vector<8x256xf32>, vector<32x256xf32> -> vector<32x256xf32>
    %85 = arith.addf %76, %84 : vector<32x256xf32>
    %c1_82 = arith.constant 1 : index
    %c0_83 = arith.constant 0 : index
    %c0_84 = arith.constant 0 : index
    %86 = vector.load %arg6[%c1_82, %c0_83, %c0_84] : memref<9x32x8xf32, #tpu.memory_space<vmem>>, vector<1x32x8xf32>
    %87 = vector.shape_cast %86 : vector<1x32x8xf32> to vector<32x8xf32>
    %c16_i32 = arith.constant 16 : i32
    %88 = tpu.dynamic_rotate %75 by %c16_i32 dim 1 : vector<8x256xf32>, i32 -> vector<8x256xf32>
    %c1_85 = arith.constant 1 : index
    %c0_86 = arith.constant 0 : index
    %c0_87 = arith.constant 0 : index
    %89 = vector.load %arg4[%c1_85, %c0_86, %c0_87] : memref<18x1x256xf32, #tpu.memory_space<vmem>>, vector<1x1x256xf32>
    %90 = vector.shape_cast %89 : vector<1x1x256xf32> to vector<1x256xf32>
    %91 = vector.broadcast %90 : vector<1x256xf32> to vector<8x256xf32>
    %92 = arith.mulf %88, %91 : vector<8x256xf32>
    %cst_88 = arith.constant dense<0.000000e+00> : vector<32x256xf32>
    %93 = tpu.matmul %87, %92, %cst_88 {dimension_numbers = #tpu.dot_dimension_numbers<[1], [0], [0], [1], [0, 0, 1, 1], [], []>} : vector<32x8xf32>, vector<8x256xf32>, vector<32x256xf32> -> vector<32x256xf32>
    %94 = arith.addf %85, %93 : vector<32x256xf32>
    %c2_89 = arith.constant 2 : index
    %c0_90 = arith.constant 0 : index
    %c0_91 = arith.constant 0 : index
    %95 = vector.load %arg6[%c2_89, %c0_90, %c0_91] : memref<9x32x8xf32, #tpu.memory_space<vmem>>, vector<1x32x8xf32>
    %96 = vector.shape_cast %95 : vector<1x32x8xf32> to vector<32x8xf32>
    %c15_i32 = arith.constant 15 : i32
    %97 = tpu.dynamic_rotate %75 by %c15_i32 dim 1 : vector<8x256xf32>, i32 -> vector<8x256xf32>
    %c2_92 = arith.constant 2 : index
    %c0_93 = arith.constant 0 : index
    %c0_94 = arith.constant 0 : index
    %98 = vector.load %arg4[%c2_92, %c0_93, %c0_94] : memref<18x1x256xf32, #tpu.memory_space<vmem>>, vector<1x1x256xf32>
    %99 = vector.shape_cast %98 : vector<1x1x256xf32> to vector<1x256xf32>
    %100 = vector.broadcast %99 : vector<1x256xf32> to vector<8x256xf32>
    %101 = arith.mulf %97, %100 : vector<8x256xf32>
    %cst_95 = arith.constant dense<0.000000e+00> : vector<32x256xf32>
    %102 = tpu.matmul %96, %101, %cst_95 {dimension_numbers = #tpu.dot_dimension_numbers<[1], [0], [0], [1], [0, 0, 1, 1], [], []>} : vector<32x8xf32>, vector<8x256xf32>, vector<32x256xf32> -> vector<32x256xf32>
    %103 = arith.addf %94, %102 : vector<32x256xf32>
    %c3_96 = arith.constant 3 : index
    %c0_97 = arith.constant 0 : index
    %c0_98 = arith.constant 0 : index
    %104 = vector.load %arg6[%c3_96, %c0_97, %c0_98] : memref<9x32x8xf32, #tpu.memory_space<vmem>>, vector<1x32x8xf32>
    %105 = vector.shape_cast %104 : vector<1x32x8xf32> to vector<32x8xf32>
    %c1_i32 = arith.constant 1 : i32
    %106 = tpu.dynamic_rotate %75 by %c1_i32 dim 1 : vector<8x256xf32>, i32 -> vector<8x256xf32>
    %c3_99 = arith.constant 3 : index
    %c0_100 = arith.constant 0 : index
    %c0_101 = arith.constant 0 : index
    %107 = vector.load %arg4[%c3_99, %c0_100, %c0_101] : memref<18x1x256xf32, #tpu.memory_space<vmem>>, vector<1x1x256xf32>
    %108 = vector.shape_cast %107 : vector<1x1x256xf32> to vector<1x256xf32>
    %109 = vector.broadcast %108 : vector<1x256xf32> to vector<8x256xf32>
    %110 = arith.mulf %106, %109 : vector<8x256xf32>
    %cst_102 = arith.constant dense<0.000000e+00> : vector<32x256xf32>
    %111 = tpu.matmul %105, %110, %cst_102 {dimension_numbers = #tpu.dot_dimension_numbers<[1], [0], [0], [1], [0, 0, 1, 1], [], []>} : vector<32x8xf32>, vector<8x256xf32>, vector<32x256xf32> -> vector<32x256xf32>
    %112 = arith.addf %103, %111 : vector<32x256xf32>
    %c4_103 = arith.constant 4 : index
    %c0_104 = arith.constant 0 : index
    %c0_105 = arith.constant 0 : index
    %113 = vector.load %arg6[%c4_103, %c0_104, %c0_105] : memref<9x32x8xf32, #tpu.memory_space<vmem>>, vector<1x32x8xf32>
    %114 = vector.shape_cast %113 : vector<1x32x8xf32> to vector<32x8xf32>
    %cst_106 = arith.constant dense<0.000000e+00> : vector<32x256xf32>
    %115 = tpu.matmul %114, %75, %cst_106 {dimension_numbers = #tpu.dot_dimension_numbers<[1], [0], [0], [1], [0, 0, 1, 1], [], []>} : vector<32x8xf32>, vector<8x256xf32>, vector<32x256xf32> -> vector<32x256xf32>
    %116 = arith.addf %112, %115 : vector<32x256xf32>
    %c5_107 = arith.constant 5 : index
    %c0_108 = arith.constant 0 : index
    %c0_109 = arith.constant 0 : index
    %117 = vector.load %arg6[%c5_107, %c0_108, %c0_109] : memref<9x32x8xf32, #tpu.memory_space<vmem>>, vector<1x32x8xf32>
    %118 = vector.shape_cast %117 : vector<1x32x8xf32> to vector<32x8xf32>
    %c255_i32 = arith.constant 255 : i32
    %119 = tpu.dynamic_rotate %75 by %c255_i32 dim 1 : vector<8x256xf32>, i32 -> vector<8x256xf32>
    %c5_110 = arith.constant 5 : index
    %c0_111 = arith.constant 0 : index
    %c0_112 = arith.constant 0 : index
    %120 = vector.load %arg4[%c5_110, %c0_111, %c0_112] : memref<18x1x256xf32, #tpu.memory_space<vmem>>, vector<1x1x256xf32>
    %121 = vector.shape_cast %120 : vector<1x1x256xf32> to vector<1x256xf32>
    %122 = vector.broadcast %121 : vector<1x256xf32> to vector<8x256xf32>
    %123 = arith.mulf %119, %122 : vector<8x256xf32>
    %cst_113 = arith.constant dense<0.000000e+00> : vector<32x256xf32>
    %124 = tpu.matmul %118, %123, %cst_113 {dimension_numbers = #tpu.dot_dimension_numbers<[1], [0], [0], [1], [0, 0, 1, 1], [], []>} : vector<32x8xf32>, vector<8x256xf32>, vector<32x256xf32> -> vector<32x256xf32>
    %125 = arith.addf %116, %124 : vector<32x256xf32>
    %c6_114 = arith.constant 6 : index
    %c0_115 = arith.constant 0 : index
    %c0_116 = arith.constant 0 : index
    %126 = vector.load %arg6[%c6_114, %c0_115, %c0_116] : memref<9x32x8xf32, #tpu.memory_space<vmem>>, vector<1x32x8xf32>
    %127 = vector.shape_cast %126 : vector<1x32x8xf32> to vector<32x8xf32>
    %c241_i32 = arith.constant 241 : i32
    %128 = tpu.dynamic_rotate %75 by %c241_i32 dim 1 : vector<8x256xf32>, i32 -> vector<8x256xf32>
    %c6_117 = arith.constant 6 : index
    %c0_118 = arith.constant 0 : index
    %c0_119 = arith.constant 0 : index
    %129 = vector.load %arg4[%c6_117, %c0_118, %c0_119] : memref<18x1x256xf32, #tpu.memory_space<vmem>>, vector<1x1x256xf32>
    %130 = vector.shape_cast %129 : vector<1x1x256xf32> to vector<1x256xf32>
    %131 = vector.broadcast %130 : vector<1x256xf32> to vector<8x256xf32>
    %132 = arith.mulf %128, %131 : vector<8x256xf32>
    %cst_120 = arith.constant dense<0.000000e+00> : vector<32x256xf32>
    %133 = tpu.matmul %127, %132, %cst_120 {dimension_numbers = #tpu.dot_dimension_numbers<[1], [0], [0], [1], [0, 0, 1, 1], [], []>} : vector<32x8xf32>, vector<8x256xf32>, vector<32x256xf32> -> vector<32x256xf32>
    %134 = arith.addf %125, %133 : vector<32x256xf32>
    %c7_121 = arith.constant 7 : index
    %c0_122 = arith.constant 0 : index
    %c0_123 = arith.constant 0 : index
    %135 = vector.load %arg6[%c7_121, %c0_122, %c0_123] : memref<9x32x8xf32, #tpu.memory_space<vmem>>, vector<1x32x8xf32>
    %136 = vector.shape_cast %135 : vector<1x32x8xf32> to vector<32x8xf32>
    %c240_i32 = arith.constant 240 : i32
    %137 = tpu.dynamic_rotate %75 by %c240_i32 dim 1 : vector<8x256xf32>, i32 -> vector<8x256xf32>
    %c7_124 = arith.constant 7 : index
    %c0_125 = arith.constant 0 : index
    %c0_126 = arith.constant 0 : index
    %138 = vector.load %arg4[%c7_124, %c0_125, %c0_126] : memref<18x1x256xf32, #tpu.memory_space<vmem>>, vector<1x1x256xf32>
    %139 = vector.shape_cast %138 : vector<1x1x256xf32> to vector<1x256xf32>
    %140 = vector.broadcast %139 : vector<1x256xf32> to vector<8x256xf32>
    %141 = arith.mulf %137, %140 : vector<8x256xf32>
    %cst_127 = arith.constant dense<0.000000e+00> : vector<32x256xf32>
    %142 = tpu.matmul %136, %141, %cst_127 {dimension_numbers = #tpu.dot_dimension_numbers<[1], [0], [0], [1], [0, 0, 1, 1], [], []>} : vector<32x8xf32>, vector<8x256xf32>, vector<32x256xf32> -> vector<32x256xf32>
    %143 = arith.addf %134, %142 : vector<32x256xf32>
    %c8_128 = arith.constant 8 : index
    %c0_129 = arith.constant 0 : index
    %c0_130 = arith.constant 0 : index
    %144 = vector.load %arg6[%c8_128, %c0_129, %c0_130] : memref<9x32x8xf32, #tpu.memory_space<vmem>>, vector<1x32x8xf32>
    %145 = vector.shape_cast %144 : vector<1x32x8xf32> to vector<32x8xf32>
    %c239_i32 = arith.constant 239 : i32
    %146 = tpu.dynamic_rotate %75 by %c239_i32 dim 1 : vector<8x256xf32>, i32 -> vector<8x256xf32>
    %c8_131 = arith.constant 8 : index
    %c0_132 = arith.constant 0 : index
    %c0_133 = arith.constant 0 : index
    %147 = vector.load %arg4[%c8_131, %c0_132, %c0_133] : memref<18x1x256xf32, #tpu.memory_space<vmem>>, vector<1x1x256xf32>
    %148 = vector.shape_cast %147 : vector<1x1x256xf32> to vector<1x256xf32>
    %149 = vector.broadcast %148 : vector<1x256xf32> to vector<8x256xf32>
    %150 = arith.mulf %146, %149 : vector<8x256xf32>
    %cst_134 = arith.constant dense<0.000000e+00> : vector<32x256xf32>
    %151 = tpu.matmul %145, %150, %cst_134 {dimension_numbers = #tpu.dot_dimension_numbers<[1], [0], [0], [1], [0, 0, 1, 1], [], []>} : vector<32x8xf32>, vector<8x256xf32>, vector<32x256xf32> -> vector<32x256xf32>
    %152 = arith.addf %143, %151 : vector<32x256xf32>
    %c0_135 = arith.constant 0 : index
    %c2_136 = arith.constant 2 : index
    %153 = vector.load %arg10[%c0_135, %c2_136] : memref<32x10xf32, #tpu.memory_space<vmem>>, vector<32x1xf32>
    %154 = vector.broadcast %153 : vector<32x1xf32> to vector<32x256xf32>
    %155 = arith.mulf %152, %154 : vector<32x256xf32>
    %c0_137 = arith.constant 0 : index
    %c3_138 = arith.constant 3 : index
    %156 = vector.load %arg10[%c0_137, %c3_138] : memref<32x10xf32, #tpu.memory_space<vmem>>, vector<32x1xf32>
    %157 = vector.broadcast %156 : vector<32x1xf32> to vector<32x256xf32>
    %158 = arith.addf %155, %157 : vector<32x256xf32>
    %cst_139 = arith.constant 0.000000e+00 : f32
    %159 = vector.broadcast %cst_139 : f32 to vector<32x256xf32>
    %160 = arith.maximumf %158, %159 : vector<32x256xf32>
    %161 = tpu.concatenate %73, %160 in 0 : vector<32x256xf32>, vector<32x256xf32> -> vector<64x256xf32>
    %cst_140 = arith.constant 0.000000e+00 : f32
    %162 = vector.broadcast %cst_140 : f32 to vector<32x256xf32>
    %c0_141 = arith.constant 0 : index
    %c0_142 = arith.constant 0 : index
    %c0_143 = arith.constant 0 : index
    %c0_144 = arith.constant 0 : index
    %163 = vector.load %arg7[%c0_141, %c0_142, %c0_143, %c0_144] : memref<2x9x32x64xf32, #tpu.memory_space<vmem>>, vector<1x1x32x64xf32>
    %164 = vector.shape_cast %163 : vector<1x1x32x64xf32> to vector<32x64xf32>
    %c17_i32_145 = arith.constant 17 : i32
    %165 = tpu.dynamic_rotate %161 by %c17_i32_145 dim 1 : vector<64x256xf32>, i32 -> vector<64x256xf32>
    %c0_146 = arith.constant 0 : index
    %c0_147 = arith.constant 0 : index
    %c0_148 = arith.constant 0 : index
    %166 = vector.load %arg4[%c0_146, %c0_147, %c0_148] : memref<18x1x256xf32, #tpu.memory_space<vmem>>, vector<1x1x256xf32>
    %167 = vector.shape_cast %166 : vector<1x1x256xf32> to vector<1x256xf32>
    %168 = vector.broadcast %167 : vector<1x256xf32> to vector<64x256xf32>
    %169 = arith.mulf %165, %168 : vector<64x256xf32>
    %cst_149 = arith.constant dense<0.000000e+00> : vector<32x256xf32>
    %170 = tpu.matmul %164, %169, %cst_149 {dimension_numbers = #tpu.dot_dimension_numbers<[1], [0], [0], [1], [0, 0, 1, 1], [], []>} : vector<32x64xf32>, vector<64x256xf32>, vector<32x256xf32> -> vector<32x256xf32>
    %171 = arith.addf %162, %170 : vector<32x256xf32>
    %c0_150 = arith.constant 0 : index
    %c1_151 = arith.constant 1 : index
    %c0_152 = arith.constant 0 : index
    %c0_153 = arith.constant 0 : index
    %172 = vector.load %arg7[%c0_150, %c1_151, %c0_152, %c0_153] : memref<2x9x32x64xf32, #tpu.memory_space<vmem>>, vector<1x1x32x64xf32>
    %173 = vector.shape_cast %172 : vector<1x1x32x64xf32> to vector<32x64xf32>
    %c16_i32_154 = arith.constant 16 : i32
    %174 = tpu.dynamic_rotate %161 by %c16_i32_154 dim 1 : vector<64x256xf32>, i32 -> vector<64x256xf32>
    %c1_155 = arith.constant 1 : index
    %c0_156 = arith.constant 0 : index
    %c0_157 = arith.constant 0 : index
    %175 = vector.load %arg4[%c1_155, %c0_156, %c0_157] : memref<18x1x256xf32, #tpu.memory_space<vmem>>, vector<1x1x256xf32>
    %176 = vector.shape_cast %175 : vector<1x1x256xf32> to vector<1x256xf32>
    %177 = vector.broadcast %176 : vector<1x256xf32> to vector<64x256xf32>
    %178 = arith.mulf %174, %177 : vector<64x256xf32>
    %cst_158 = arith.constant dense<0.000000e+00> : vector<32x256xf32>
    %179 = tpu.matmul %173, %178, %cst_158 {dimension_numbers = #tpu.dot_dimension_numbers<[1], [0], [0], [1], [0, 0, 1, 1], [], []>} : vector<32x64xf32>, vector<64x256xf32>, vector<32x256xf32> -> vector<32x256xf32>
    %180 = arith.addf %171, %179 : vector<32x256xf32>
    %c0_159 = arith.constant 0 : index
    %c2_160 = arith.constant 2 : index
    %c0_161 = arith.constant 0 : index
    %c0_162 = arith.constant 0 : index
    %181 = vector.load %arg7[%c0_159, %c2_160, %c0_161, %c0_162] : memref<2x9x32x64xf32, #tpu.memory_space<vmem>>, vector<1x1x32x64xf32>
    %182 = vector.shape_cast %181 : vector<1x1x32x64xf32> to vector<32x64xf32>
    %c15_i32_163 = arith.constant 15 : i32
    %183 = tpu.dynamic_rotate %161 by %c15_i32_163 dim 1 : vector<64x256xf32>, i32 -> vector<64x256xf32>
    %c2_164 = arith.constant 2 : index
    %c0_165 = arith.constant 0 : index
    %c0_166 = arith.constant 0 : index
    %184 = vector.load %arg4[%c2_164, %c0_165, %c0_166] : memref<18x1x256xf32, #tpu.memory_space<vmem>>, vector<1x1x256xf32>
    %185 = vector.shape_cast %184 : vector<1x1x256xf32> to vector<1x256xf32>
    %186 = vector.broadcast %185 : vector<1x256xf32> to vector<64x256xf32>
    %187 = arith.mulf %183, %186 : vector<64x256xf32>
    %cst_167 = arith.constant dense<0.000000e+00> : vector<32x256xf32>
    %188 = tpu.matmul %182, %187, %cst_167 {dimension_numbers = #tpu.dot_dimension_numbers<[1], [0], [0], [1], [0, 0, 1, 1], [], []>} : vector<32x64xf32>, vector<64x256xf32>, vector<32x256xf32> -> vector<32x256xf32>
    %189 = arith.addf %180, %188 : vector<32x256xf32>
    %c0_168 = arith.constant 0 : index
    %c3_169 = arith.constant 3 : index
    %c0_170 = arith.constant 0 : index
    %c0_171 = arith.constant 0 : index
    %190 = vector.load %arg7[%c0_168, %c3_169, %c0_170, %c0_171] : memref<2x9x32x64xf32, #tpu.memory_space<vmem>>, vector<1x1x32x64xf32>
    %191 = vector.shape_cast %190 : vector<1x1x32x64xf32> to vector<32x64xf32>
    %c1_i32_172 = arith.constant 1 : i32
    %192 = tpu.dynamic_rotate %161 by %c1_i32_172 dim 1 : vector<64x256xf32>, i32 -> vector<64x256xf32>
    %c3_173 = arith.constant 3 : index
    %c0_174 = arith.constant 0 : index
    %c0_175 = arith.constant 0 : index
    %193 = vector.load %arg4[%c3_173, %c0_174, %c0_175] : memref<18x1x256xf32, #tpu.memory_space<vmem>>, vector<1x1x256xf32>
    %194 = vector.shape_cast %193 : vector<1x1x256xf32> to vector<1x256xf32>
    %195 = vector.broadcast %194 : vector<1x256xf32> to vector<64x256xf32>
    %196 = arith.mulf %192, %195 : vector<64x256xf32>
    %cst_176 = arith.constant dense<0.000000e+00> : vector<32x256xf32>
    %197 = tpu.matmul %191, %196, %cst_176 {dimension_numbers = #tpu.dot_dimension_numbers<[1], [0], [0], [1], [0, 0, 1, 1], [], []>} : vector<32x64xf32>, vector<64x256xf32>, vector<32x256xf32> -> vector<32x256xf32>
    %198 = arith.addf %189, %197 : vector<32x256xf32>
    %c0_177 = arith.constant 0 : index
    %c4_178 = arith.constant 4 : index
    %c0_179 = arith.constant 0 : index
    %c0_180 = arith.constant 0 : index
    %199 = vector.load %arg7[%c0_177, %c4_178, %c0_179, %c0_180] : memref<2x9x32x64xf32, #tpu.memory_space<vmem>>, vector<1x1x32x64xf32>
    %200 = vector.shape_cast %199 : vector<1x1x32x64xf32> to vector<32x64xf32>
    %cst_181 = arith.constant dense<0.000000e+00> : vector<32x256xf32>
    %201 = tpu.matmul %200, %161, %cst_181 {dimension_numbers = #tpu.dot_dimension_numbers<[1], [0], [0], [1], [0, 0, 1, 1], [], []>} : vector<32x64xf32>, vector<64x256xf32>, vector<32x256xf32> -> vector<32x256xf32>
    %202 = arith.addf %198, %201 : vector<32x256xf32>
    %c0_182 = arith.constant 0 : index
    %c5_183 = arith.constant 5 : index
    %c0_184 = arith.constant 0 : index
    %c0_185 = arith.constant 0 : index
    %203 = vector.load %arg7[%c0_182, %c5_183, %c0_184, %c0_185] : memref<2x9x32x64xf32, #tpu.memory_space<vmem>>, vector<1x1x32x64xf32>
    %204 = vector.shape_cast %203 : vector<1x1x32x64xf32> to vector<32x64xf32>
    %c255_i32_186 = arith.constant 255 : i32
    %205 = tpu.dynamic_rotate %161 by %c255_i32_186 dim 1 : vector<64x256xf32>, i32 -> vector<64x256xf32>
    %c5_187 = arith.constant 5 : index
    %c0_188 = arith.constant 0 : index
    %c0_189 = arith.constant 0 : index
    %206 = vector.load %arg4[%c5_187, %c0_188, %c0_189] : memref<18x1x256xf32, #tpu.memory_space<vmem>>, vector<1x1x256xf32>
    %207 = vector.shape_cast %206 : vector<1x1x256xf32> to vector<1x256xf32>
    %208 = vector.broadcast %207 : vector<1x256xf32> to vector<64x256xf32>
    %209 = arith.mulf %205, %208 : vector<64x256xf32>
    %cst_190 = arith.constant dense<0.000000e+00> : vector<32x256xf32>
    %210 = tpu.matmul %204, %209, %cst_190 {dimension_numbers = #tpu.dot_dimension_numbers<[1], [0], [0], [1], [0, 0, 1, 1], [], []>} : vector<32x64xf32>, vector<64x256xf32>, vector<32x256xf32> -> vector<32x256xf32>
    %211 = arith.addf %202, %210 : vector<32x256xf32>
    %c0_191 = arith.constant 0 : index
    %c6_192 = arith.constant 6 : index
    %c0_193 = arith.constant 0 : index
    %c0_194 = arith.constant 0 : index
    %212 = vector.load %arg7[%c0_191, %c6_192, %c0_193, %c0_194] : memref<2x9x32x64xf32, #tpu.memory_space<vmem>>, vector<1x1x32x64xf32>
    %213 = vector.shape_cast %212 : vector<1x1x32x64xf32> to vector<32x64xf32>
    %c241_i32_195 = arith.constant 241 : i32
    %214 = tpu.dynamic_rotate %161 by %c241_i32_195 dim 1 : vector<64x256xf32>, i32 -> vector<64x256xf32>
    %c6_196 = arith.constant 6 : index
    %c0_197 = arith.constant 0 : index
    %c0_198 = arith.constant 0 : index
    %215 = vector.load %arg4[%c6_196, %c0_197, %c0_198] : memref<18x1x256xf32, #tpu.memory_space<vmem>>, vector<1x1x256xf32>
    %216 = vector.shape_cast %215 : vector<1x1x256xf32> to vector<1x256xf32>
    %217 = vector.broadcast %216 : vector<1x256xf32> to vector<64x256xf32>
    %218 = arith.mulf %214, %217 : vector<64x256xf32>
    %cst_199 = arith.constant dense<0.000000e+00> : vector<32x256xf32>
    %219 = tpu.matmul %213, %218, %cst_199 {dimension_numbers = #tpu.dot_dimension_numbers<[1], [0], [0], [1], [0, 0, 1, 1], [], []>} : vector<32x64xf32>, vector<64x256xf32>, vector<32x256xf32> -> vector<32x256xf32>
    %220 = arith.addf %211, %219 : vector<32x256xf32>
    %c0_200 = arith.constant 0 : index
    %c7_201 = arith.constant 7 : index
    %c0_202 = arith.constant 0 : index
    %c0_203 = arith.constant 0 : index
    %221 = vector.load %arg7[%c0_200, %c7_201, %c0_202, %c0_203] : memref<2x9x32x64xf32, #tpu.memory_space<vmem>>, vector<1x1x32x64xf32>
    %222 = vector.shape_cast %221 : vector<1x1x32x64xf32> to vector<32x64xf32>
    %c240_i32_204 = arith.constant 240 : i32
    %223 = tpu.dynamic_rotate %161 by %c240_i32_204 dim 1 : vector<64x256xf32>, i32 -> vector<64x256xf32>
    %c7_205 = arith.constant 7 : index
    %c0_206 = arith.constant 0 : index
    %c0_207 = arith.constant 0 : index
    %224 = vector.load %arg4[%c7_205, %c0_206, %c0_207] : memref<18x1x256xf32, #tpu.memory_space<vmem>>, vector<1x1x256xf32>
    %225 = vector.shape_cast %224 : vector<1x1x256xf32> to vector<1x256xf32>
    %226 = vector.broadcast %225 : vector<1x256xf32> to vector<64x256xf32>
    %227 = arith.mulf %223, %226 : vector<64x256xf32>
    %cst_208 = arith.constant dense<0.000000e+00> : vector<32x256xf32>
    %228 = tpu.matmul %222, %227, %cst_208 {dimension_numbers = #tpu.dot_dimension_numbers<[1], [0], [0], [1], [0, 0, 1, 1], [], []>} : vector<32x64xf32>, vector<64x256xf32>, vector<32x256xf32> -> vector<32x256xf32>
    %229 = arith.addf %220, %228 : vector<32x256xf32>
    %c0_209 = arith.constant 0 : index
    %c8_210 = arith.constant 8 : index
    %c0_211 = arith.constant 0 : index
    %c0_212 = arith.constant 0 : index
    %230 = vector.load %arg7[%c0_209, %c8_210, %c0_211, %c0_212] : memref<2x9x32x64xf32, #tpu.memory_space<vmem>>, vector<1x1x32x64xf32>
    %231 = vector.shape_cast %230 : vector<1x1x32x64xf32> to vector<32x64xf32>
    %c239_i32_213 = arith.constant 239 : i32
    %232 = tpu.dynamic_rotate %161 by %c239_i32_213 dim 1 : vector<64x256xf32>, i32 -> vector<64x256xf32>
    %c8_214 = arith.constant 8 : index
    %c0_215 = arith.constant 0 : index
    %c0_216 = arith.constant 0 : index
    %233 = vector.load %arg4[%c8_214, %c0_215, %c0_216] : memref<18x1x256xf32, #tpu.memory_space<vmem>>, vector<1x1x256xf32>
    %234 = vector.shape_cast %233 : vector<1x1x256xf32> to vector<1x256xf32>
    %235 = vector.broadcast %234 : vector<1x256xf32> to vector<64x256xf32>
    %236 = arith.mulf %232, %235 : vector<64x256xf32>
    %cst_217 = arith.constant dense<0.000000e+00> : vector<32x256xf32>
    %237 = tpu.matmul %231, %236, %cst_217 {dimension_numbers = #tpu.dot_dimension_numbers<[1], [0], [0], [1], [0, 0, 1, 1], [], []>} : vector<32x64xf32>, vector<64x256xf32>, vector<32x256xf32> -> vector<32x256xf32>
    %238 = arith.addf %229, %237 : vector<32x256xf32>
    %c0_218 = arith.constant 0 : index
    %c4_219 = arith.constant 4 : index
    %239 = vector.load %arg10[%c0_218, %c4_219] : memref<32x10xf32, #tpu.memory_space<vmem>>, vector<32x1xf32>
    %240 = vector.broadcast %239 : vector<32x1xf32> to vector<32x256xf32>
    %241 = arith.mulf %238, %240 : vector<32x256xf32>
    %c0_220 = arith.constant 0 : index
    %c5_221 = arith.constant 5 : index
    %242 = vector.load %arg10[%c0_220, %c5_221] : memref<32x10xf32, #tpu.memory_space<vmem>>, vector<32x1xf32>
    %243 = vector.broadcast %242 : vector<32x1xf32> to vector<32x256xf32>
    %244 = arith.addf %241, %243 : vector<32x256xf32>
    %cst_222 = arith.constant 0.000000e+00 : f32
    %245 = vector.broadcast %cst_222 : f32 to vector<32x256xf32>
    %246 = arith.maximumf %244, %245 : vector<32x256xf32>
    %c0_223 = arith.constant 0 : index
    %c0_224 = arith.constant 0 : index
    %247 = vector.load %arg9[%c0_223, %c0_224] : memref<32x32xf32, #tpu.memory_space<vmem>>, vector<32x32xf32>
    %cst_225 = arith.constant dense<0.000000e+00> : vector<32x256xf32>
    %248 = tpu.matmul %247, %246, %cst_225 {dimension_numbers = #tpu.dot_dimension_numbers<[1], [0], [0], [1], [0, 0, 1, 1], [], []>} : vector<32x32xf32>, vector<32x256xf32>, vector<32x256xf32> -> vector<32x256xf32>
    %cst_226 = arith.constant dense<0.000000e+00> : vector<32xf32>
    %249 = vector.multi_reduction <add>, %248, %cst_226 [1] : vector<32x256xf32> to vector<32xf32>
    %250 = vector.shape_cast %249 : vector<32xf32> to vector<32x1xf32>
    %cst_227 = arith.constant 2.560000e+02 : f32
    %251 = vector.broadcast %cst_227 : f32 to vector<32x1xf32>
    %252 = arith.divf %250, %251 : vector<32x1xf32>
    %253 = arith.negf %252 : vector<32x1xf32>
    %254 = math.exp %253 : vector<32x1xf32>
    %cst_228 = arith.constant 1.000000e+00 : f32
    %255 = vector.broadcast %cst_228 : f32 to vector<32x1xf32>
    %256 = arith.addf %255, %254 : vector<32x1xf32>
    %257 = arith.divf %255, %256 : vector<32x1xf32>
    %c0_229 = arith.constant 0 : index
    %c0_230 = arith.constant 0 : index
    %c0_231 = arith.constant 0 : index
    %258 = vector.load %arg8[%c0_229, %c0_230, %c0_231] : memref<2x32x32xf32, #tpu.memory_space<vmem>>, vector<1x32x32xf32>
    %259 = vector.shape_cast %258 : vector<1x32x32xf32> to vector<32x32xf32>
    %260 = vector.broadcast %257 : vector<32x1xf32> to vector<32x256xf32>
    %261 = arith.mulf %246, %260 : vector<32x256xf32>
    %cst_232 = arith.constant dense<0.000000e+00> : vector<32x256xf32>
    %262 = tpu.matmul %259, %261, %cst_232 {dimension_numbers = #tpu.dot_dimension_numbers<[1], [0], [0], [1], [0, 0, 1, 1], [], []>} : vector<32x32xf32>, vector<32x256xf32>, vector<32x256xf32> -> vector<32x256xf32>
    %cst_233 = arith.constant 0.000000e+00 : f32
    %263 = vector.broadcast %cst_233 : f32 to vector<32x256xf32>
    %c1_234 = arith.constant 1 : index
    %c0_235 = arith.constant 0 : index
    %c0_236 = arith.constant 0 : index
    %c0_237 = arith.constant 0 : index
    %264 = vector.load %arg7[%c1_234, %c0_235, %c0_236, %c0_237] : memref<2x9x32x64xf32, #tpu.memory_space<vmem>>, vector<1x1x32x64xf32>
    %265 = vector.shape_cast %264 : vector<1x1x32x64xf32> to vector<32x64xf32>
    %c34_i32 = arith.constant 34 : i32
    %266 = tpu.dynamic_rotate %161 by %c34_i32 dim 1 : vector<64x256xf32>, i32 -> vector<64x256xf32>
    %c9 = arith.constant 9 : index
    %c0_238 = arith.constant 0 : index
    %c0_239 = arith.constant 0 : index
    %267 = vector.load %arg4[%c9, %c0_238, %c0_239] : memref<18x1x256xf32, #tpu.memory_space<vmem>>, vector<1x1x256xf32>
    %268 = vector.shape_cast %267 : vector<1x1x256xf32> to vector<1x256xf32>
    %269 = vector.broadcast %268 : vector<1x256xf32> to vector<64x256xf32>
    %270 = arith.mulf %266, %269 : vector<64x256xf32>
    %cst_240 = arith.constant dense<0.000000e+00> : vector<32x256xf32>
    %271 = tpu.matmul %265, %270, %cst_240 {dimension_numbers = #tpu.dot_dimension_numbers<[1], [0], [0], [1], [0, 0, 1, 1], [], []>} : vector<32x64xf32>, vector<64x256xf32>, vector<32x256xf32> -> vector<32x256xf32>
    %272 = arith.addf %263, %271 : vector<32x256xf32>
    %c1_241 = arith.constant 1 : index
    %c1_242 = arith.constant 1 : index
    %c0_243 = arith.constant 0 : index
    %c0_244 = arith.constant 0 : index
    %273 = vector.load %arg7[%c1_241, %c1_242, %c0_243, %c0_244] : memref<2x9x32x64xf32, #tpu.memory_space<vmem>>, vector<1x1x32x64xf32>
    %274 = vector.shape_cast %273 : vector<1x1x32x64xf32> to vector<32x64xf32>
    %c32_i32 = arith.constant 32 : i32
    %275 = tpu.dynamic_rotate %161 by %c32_i32 dim 1 : vector<64x256xf32>, i32 -> vector<64x256xf32>
    %c10 = arith.constant 10 : index
    %c0_245 = arith.constant 0 : index
    %c0_246 = arith.constant 0 : index
    %276 = vector.load %arg4[%c10, %c0_245, %c0_246] : memref<18x1x256xf32, #tpu.memory_space<vmem>>, vector<1x1x256xf32>
    %277 = vector.shape_cast %276 : vector<1x1x256xf32> to vector<1x256xf32>
    %278 = vector.broadcast %277 : vector<1x256xf32> to vector<64x256xf32>
    %279 = arith.mulf %275, %278 : vector<64x256xf32>
    %cst_247 = arith.constant dense<0.000000e+00> : vector<32x256xf32>
    %280 = tpu.matmul %274, %279, %cst_247 {dimension_numbers = #tpu.dot_dimension_numbers<[1], [0], [0], [1], [0, 0, 1, 1], [], []>} : vector<32x64xf32>, vector<64x256xf32>, vector<32x256xf32> -> vector<32x256xf32>
    %281 = arith.addf %272, %280 : vector<32x256xf32>
    %c1_248 = arith.constant 1 : index
    %c2_249 = arith.constant 2 : index
    %c0_250 = arith.constant 0 : index
    %c0_251 = arith.constant 0 : index
    %282 = vector.load %arg7[%c1_248, %c2_249, %c0_250, %c0_251] : memref<2x9x32x64xf32, #tpu.memory_space<vmem>>, vector<1x1x32x64xf32>
    %283 = vector.shape_cast %282 : vector<1x1x32x64xf32> to vector<32x64xf32>
    %c30_i32 = arith.constant 30 : i32
    %284 = tpu.dynamic_rotate %161 by %c30_i32 dim 1 : vector<64x256xf32>, i32 -> vector<64x256xf32>
    %c11 = arith.constant 11 : index
    %c0_252 = arith.constant 0 : index
    %c0_253 = arith.constant 0 : index
    %285 = vector.load %arg4[%c11, %c0_252, %c0_253] : memref<18x1x256xf32, #tpu.memory_space<vmem>>, vector<1x1x256xf32>
    %286 = vector.shape_cast %285 : vector<1x1x256xf32> to vector<1x256xf32>
    %287 = vector.broadcast %286 : vector<1x256xf32> to vector<64x256xf32>
    %288 = arith.mulf %284, %287 : vector<64x256xf32>
    %cst_254 = arith.constant dense<0.000000e+00> : vector<32x256xf32>
    %289 = tpu.matmul %283, %288, %cst_254 {dimension_numbers = #tpu.dot_dimension_numbers<[1], [0], [0], [1], [0, 0, 1, 1], [], []>} : vector<32x64xf32>, vector<64x256xf32>, vector<32x256xf32> -> vector<32x256xf32>
    %290 = arith.addf %281, %289 : vector<32x256xf32>
    %c1_255 = arith.constant 1 : index
    %c3_256 = arith.constant 3 : index
    %c0_257 = arith.constant 0 : index
    %c0_258 = arith.constant 0 : index
    %291 = vector.load %arg7[%c1_255, %c3_256, %c0_257, %c0_258] : memref<2x9x32x64xf32, #tpu.memory_space<vmem>>, vector<1x1x32x64xf32>
    %292 = vector.shape_cast %291 : vector<1x1x32x64xf32> to vector<32x64xf32>
    %c2_i32 = arith.constant 2 : i32
    %293 = tpu.dynamic_rotate %161 by %c2_i32 dim 1 : vector<64x256xf32>, i32 -> vector<64x256xf32>
    %c12 = arith.constant 12 : index
    %c0_259 = arith.constant 0 : index
    %c0_260 = arith.constant 0 : index
    %294 = vector.load %arg4[%c12, %c0_259, %c0_260] : memref<18x1x256xf32, #tpu.memory_space<vmem>>, vector<1x1x256xf32>
    %295 = vector.shape_cast %294 : vector<1x1x256xf32> to vector<1x256xf32>
    %296 = vector.broadcast %295 : vector<1x256xf32> to vector<64x256xf32>
    %297 = arith.mulf %293, %296 : vector<64x256xf32>
    %cst_261 = arith.constant dense<0.000000e+00> : vector<32x256xf32>
    %298 = tpu.matmul %292, %297, %cst_261 {dimension_numbers = #tpu.dot_dimension_numbers<[1], [0], [0], [1], [0, 0, 1, 1], [], []>} : vector<32x64xf32>, vector<64x256xf32>, vector<32x256xf32> -> vector<32x256xf32>
    %299 = arith.addf %290, %298 : vector<32x256xf32>
    %c1_262 = arith.constant 1 : index
    %c4_263 = arith.constant 4 : index
    %c0_264 = arith.constant 0 : index
    %c0_265 = arith.constant 0 : index
    %300 = vector.load %arg7[%c1_262, %c4_263, %c0_264, %c0_265] : memref<2x9x32x64xf32, #tpu.memory_space<vmem>>, vector<1x1x32x64xf32>
    %301 = vector.shape_cast %300 : vector<1x1x32x64xf32> to vector<32x64xf32>
    %cst_266 = arith.constant dense<0.000000e+00> : vector<32x256xf32>
    %302 = tpu.matmul %301, %161, %cst_266 {dimension_numbers = #tpu.dot_dimension_numbers<[1], [0], [0], [1], [0, 0, 1, 1], [], []>} : vector<32x64xf32>, vector<64x256xf32>, vector<32x256xf32> -> vector<32x256xf32>
    %303 = arith.addf %299, %302 : vector<32x256xf32>
    %c1_267 = arith.constant 1 : index
    %c5_268 = arith.constant 5 : index
    %c0_269 = arith.constant 0 : index
    %c0_270 = arith.constant 0 : index
    %304 = vector.load %arg7[%c1_267, %c5_268, %c0_269, %c0_270] : memref<2x9x32x64xf32, #tpu.memory_space<vmem>>, vector<1x1x32x64xf32>
    %305 = vector.shape_cast %304 : vector<1x1x32x64xf32> to vector<32x64xf32>
    %c254_i32 = arith.constant 254 : i32
    %306 = tpu.dynamic_rotate %161 by %c254_i32 dim 1 : vector<64x256xf32>, i32 -> vector<64x256xf32>
    %c14 = arith.constant 14 : index
    %c0_271 = arith.constant 0 : index
    %c0_272 = arith.constant 0 : index
    %307 = vector.load %arg4[%c14, %c0_271, %c0_272] : memref<18x1x256xf32, #tpu.memory_space<vmem>>, vector<1x1x256xf32>
    %308 = vector.shape_cast %307 : vector<1x1x256xf32> to vector<1x256xf32>
    %309 = vector.broadcast %308 : vector<1x256xf32> to vector<64x256xf32>
    %310 = arith.mulf %306, %309 : vector<64x256xf32>
    %cst_273 = arith.constant dense<0.000000e+00> : vector<32x256xf32>
    %311 = tpu.matmul %305, %310, %cst_273 {dimension_numbers = #tpu.dot_dimension_numbers<[1], [0], [0], [1], [0, 0, 1, 1], [], []>} : vector<32x64xf32>, vector<64x256xf32>, vector<32x256xf32> -> vector<32x256xf32>
    %312 = arith.addf %303, %311 : vector<32x256xf32>
    %c1_274 = arith.constant 1 : index
    %c6_275 = arith.constant 6 : index
    %c0_276 = arith.constant 0 : index
    %c0_277 = arith.constant 0 : index
    %313 = vector.load %arg7[%c1_274, %c6_275, %c0_276, %c0_277] : memref<2x9x32x64xf32, #tpu.memory_space<vmem>>, vector<1x1x32x64xf32>
    %314 = vector.shape_cast %313 : vector<1x1x32x64xf32> to vector<32x64xf32>
    %c226_i32 = arith.constant 226 : i32
    %315 = tpu.dynamic_rotate %161 by %c226_i32 dim 1 : vector<64x256xf32>, i32 -> vector<64x256xf32>
    %c15 = arith.constant 15 : index
    %c0_278 = arith.constant 0 : index
    %c0_279 = arith.constant 0 : index
    %316 = vector.load %arg4[%c15, %c0_278, %c0_279] : memref<18x1x256xf32, #tpu.memory_space<vmem>>, vector<1x1x256xf32>
    %317 = vector.shape_cast %316 : vector<1x1x256xf32> to vector<1x256xf32>
    %318 = vector.broadcast %317 : vector<1x256xf32> to vector<64x256xf32>
    %319 = arith.mulf %315, %318 : vector<64x256xf32>
    %cst_280 = arith.constant dense<0.000000e+00> : vector<32x256xf32>
    %320 = tpu.matmul %314, %319, %cst_280 {dimension_numbers = #tpu.dot_dimension_numbers<[1], [0], [0], [1], [0, 0, 1, 1], [], []>} : vector<32x64xf32>, vector<64x256xf32>, vector<32x256xf32> -> vector<32x256xf32>
    %321 = arith.addf %312, %320 : vector<32x256xf32>
    %c1_281 = arith.constant 1 : index
    %c7_282 = arith.constant 7 : index
    %c0_283 = arith.constant 0 : index
    %c0_284 = arith.constant 0 : index
    %322 = vector.load %arg7[%c1_281, %c7_282, %c0_283, %c0_284] : memref<2x9x32x64xf32, #tpu.memory_space<vmem>>, vector<1x1x32x64xf32>
    %323 = vector.shape_cast %322 : vector<1x1x32x64xf32> to vector<32x64xf32>
    %c224_i32 = arith.constant 224 : i32
    %324 = tpu.dynamic_rotate %161 by %c224_i32 dim 1 : vector<64x256xf32>, i32 -> vector<64x256xf32>
    %c16 = arith.constant 16 : index
    %c0_285 = arith.constant 0 : index
    %c0_286 = arith.constant 0 : index
    %325 = vector.load %arg4[%c16, %c0_285, %c0_286] : memref<18x1x256xf32, #tpu.memory_space<vmem>>, vector<1x1x256xf32>
    %326 = vector.shape_cast %325 : vector<1x1x256xf32> to vector<1x256xf32>
    %327 = vector.broadcast %326 : vector<1x256xf32> to vector<64x256xf32>
    %328 = arith.mulf %324, %327 : vector<64x256xf32>
    %cst_287 = arith.constant dense<0.000000e+00> : vector<32x256xf32>
    %329 = tpu.matmul %323, %328, %cst_287 {dimension_numbers = #tpu.dot_dimension_numbers<[1], [0], [0], [1], [0, 0, 1, 1], [], []>} : vector<32x64xf32>, vector<64x256xf32>, vector<32x256xf32> -> vector<32x256xf32>
    %330 = arith.addf %321, %329 : vector<32x256xf32>
    %c1_288 = arith.constant 1 : index
    %c8_289 = arith.constant 8 : index
    %c0_290 = arith.constant 0 : index
    %c0_291 = arith.constant 0 : index
    %331 = vector.load %arg7[%c1_288, %c8_289, %c0_290, %c0_291] : memref<2x9x32x64xf32, #tpu.memory_space<vmem>>, vector<1x1x32x64xf32>
    %332 = vector.shape_cast %331 : vector<1x1x32x64xf32> to vector<32x64xf32>
    %c222_i32 = arith.constant 222 : i32
    %333 = tpu.dynamic_rotate %161 by %c222_i32 dim 1 : vector<64x256xf32>, i32 -> vector<64x256xf32>
    %c17 = arith.constant 17 : index
    %c0_292 = arith.constant 0 : index
    %c0_293 = arith.constant 0 : index
    %334 = vector.load %arg4[%c17, %c0_292, %c0_293] : memref<18x1x256xf32, #tpu.memory_space<vmem>>, vector<1x1x256xf32>
    %335 = vector.shape_cast %334 : vector<1x1x256xf32> to vector<1x256xf32>
    %336 = vector.broadcast %335 : vector<1x256xf32> to vector<64x256xf32>
    %337 = arith.mulf %333, %336 : vector<64x256xf32>
    %cst_294 = arith.constant dense<0.000000e+00> : vector<32x256xf32>
    %338 = tpu.matmul %332, %337, %cst_294 {dimension_numbers = #tpu.dot_dimension_numbers<[1], [0], [0], [1], [0, 0, 1, 1], [], []>} : vector<32x64xf32>, vector<64x256xf32>, vector<32x256xf32> -> vector<32x256xf32>
    %339 = arith.addf %330, %338 : vector<32x256xf32>
    %c0_295 = arith.constant 0 : index
    %c6_296 = arith.constant 6 : index
    %340 = vector.load %arg10[%c0_295, %c6_296] : memref<32x10xf32, #tpu.memory_space<vmem>>, vector<32x1xf32>
    %341 = vector.broadcast %340 : vector<32x1xf32> to vector<32x256xf32>
    %342 = arith.mulf %339, %341 : vector<32x256xf32>
    %c0_297 = arith.constant 0 : index
    %c7_298 = arith.constant 7 : index
    %343 = vector.load %arg10[%c0_297, %c7_298] : memref<32x10xf32, #tpu.memory_space<vmem>>, vector<32x1xf32>
    %344 = vector.broadcast %343 : vector<32x1xf32> to vector<32x256xf32>
    %345 = arith.addf %342, %344 : vector<32x256xf32>
    %cst_299 = arith.constant 0.000000e+00 : f32
    %346 = vector.broadcast %cst_299 : f32 to vector<32x256xf32>
    %347 = arith.maximumf %345, %346 : vector<32x256xf32>
    %c0_300 = arith.constant 0 : index
    %c0_301 = arith.constant 0 : index
    %348 = vector.load %arg9[%c0_300, %c0_301] : memref<32x32xf32, #tpu.memory_space<vmem>>, vector<32x32xf32>
    %cst_302 = arith.constant dense<0.000000e+00> : vector<32x256xf32>
    %349 = tpu.matmul %348, %347, %cst_302 {dimension_numbers = #tpu.dot_dimension_numbers<[1], [0], [0], [1], [0, 0, 1, 1], [], []>} : vector<32x32xf32>, vector<32x256xf32>, vector<32x256xf32> -> vector<32x256xf32>
    %cst_303 = arith.constant dense<0.000000e+00> : vector<32xf32>
    %350 = vector.multi_reduction <add>, %349, %cst_303 [1] : vector<32x256xf32> to vector<32xf32>
    %351 = vector.shape_cast %350 : vector<32xf32> to vector<32x1xf32>
    %cst_304 = arith.constant 2.560000e+02 : f32
    %352 = vector.broadcast %cst_304 : f32 to vector<32x1xf32>
    %353 = arith.divf %351, %352 : vector<32x1xf32>
    %354 = arith.negf %353 : vector<32x1xf32>
    %355 = math.exp %354 : vector<32x1xf32>
    %cst_305 = arith.constant 1.000000e+00 : f32
    %356 = vector.broadcast %cst_305 : f32 to vector<32x1xf32>
    %357 = arith.addf %356, %355 : vector<32x1xf32>
    %358 = arith.divf %356, %357 : vector<32x1xf32>
    %c1_306 = arith.constant 1 : index
    %c0_307 = arith.constant 0 : index
    %c0_308 = arith.constant 0 : index
    %359 = vector.load %arg8[%c1_306, %c0_307, %c0_308] : memref<2x32x32xf32, #tpu.memory_space<vmem>>, vector<1x32x32xf32>
    %360 = vector.shape_cast %359 : vector<1x32x32xf32> to vector<32x32xf32>
    %361 = vector.broadcast %358 : vector<32x1xf32> to vector<32x256xf32>
    %362 = arith.mulf %347, %361 : vector<32x256xf32>
    %cst_309 = arith.constant dense<0.000000e+00> : vector<32x256xf32>
    %363 = tpu.matmul %360, %362, %cst_309 {dimension_numbers = #tpu.dot_dimension_numbers<[1], [0], [0], [1], [0, 0, 1, 1], [], []>} : vector<32x32xf32>, vector<32x256xf32>, vector<32x256xf32> -> vector<32x256xf32>
    %364 = arith.addf %262, %363 : vector<32x256xf32>
    %c0_310 = arith.constant 0 : index
    %c8_311 = arith.constant 8 : index
    %365 = vector.load %arg10[%c0_310, %c8_311] : memref<32x10xf32, #tpu.memory_space<vmem>>, vector<32x1xf32>
    %366 = vector.broadcast %365 : vector<32x1xf32> to vector<32x256xf32>
    %367 = arith.mulf %364, %366 : vector<32x256xf32>
    %c0_312 = arith.constant 0 : index
    %c9_313 = arith.constant 9 : index
    %368 = vector.load %arg10[%c0_312, %c9_313] : memref<32x10xf32, #tpu.memory_space<vmem>>, vector<32x1xf32>
    %369 = vector.broadcast %368 : vector<32x1xf32> to vector<32x256xf32>
    %370 = arith.addf %367, %369 : vector<32x256xf32>
    %c0_314 = arith.constant 0 : index
    %c0_315 = arith.constant 0 : index
    %c0_316 = arith.constant 0 : index
    %371 = vector.load %arg11[%c0_314, %c0_315, %c0_316] : memref<1x32x256xf32, #tpu.memory_space<vmem>>, vector<1x32x256xf32>
    %372 = vector.shape_cast %371 : vector<1x32x256xf32> to vector<32x256xf32>
    %373 = vector.shape_cast %370 : vector<32x256xf32> to vector<1x32x256xf32>
    tpu.vector_store %arg11[%c0_314, %c0_315, %c0_316], %373 {strides = array<i32>} : memref<1x32x256xf32, #tpu.memory_space<vmem>>, vector<1x32x256xf32>,
    return
  }
  func.func @transform_0(%arg0: i32) -> (i32, i32, i32) {
    %c0_i32 = arith.constant 0 : i32
    %c0_i32_0 = arith.constant 0 : i32
    %c0_i32_1 = arith.constant 0 : i32
    return %arg0, %c0_i32, %c0_i32_0 : i32, i32, i32
  }
  func.func @transform_1(%arg0: i32) -> (i32, i32, i32) {
    %c0_i32 = arith.constant 0 : i32
    %c0_i32_0 = arith.constant 0 : i32
    %c0_i32_1 = arith.constant 0 : i32
    return %arg0, %c0_i32, %c0_i32_0 : i32, i32, i32
  }
  func.func @transform_2(%arg0: i32) -> (i32, i32, i32) {
    %c0_i32 = arith.constant 0 : i32
    %c0_i32_0 = arith.constant 0 : i32
    %c0_i32_1 = arith.constant 0 : i32
    %c0_i32_2 = arith.constant 0 : i32
    return %c0_i32, %c0_i32_0, %c0_i32_1 : i32, i32, i32
  }
  func.func @transform_3(%arg0: i32) -> (i32, i32, i32) {
    %c0_i32 = arith.constant 0 : i32
    %c0_i32_0 = arith.constant 0 : i32
    %c0_i32_1 = arith.constant 0 : i32
    %c0_i32_2 = arith.constant 0 : i32
    return %c0_i32, %c0_i32_0, %c0_i32_1 : i32, i32, i32
  }
  func.func @transform_4(%arg0: i32) -> (i32, i32, i32) {
    %c0_i32 = arith.constant 0 : i32
    %c0_i32_0 = arith.constant 0 : i32
    %c0_i32_1 = arith.constant 0 : i32
    %c0_i32_2 = arith.constant 0 : i32
    return %c0_i32, %c0_i32_0, %c0_i32_1 : i32, i32, i32
  }
  func.func @transform_5(%arg0: i32) -> (i32, i32, i32) {
    %c0_i32 = arith.constant 0 : i32
    %c0_i32_0 = arith.constant 0 : i32
    %c0_i32_1 = arith.constant 0 : i32
    %c0_i32_2 = arith.constant 0 : i32
    return %c0_i32, %c0_i32_0, %c0_i32_1 : i32, i32, i32
  }
  func.func @transform_6(%arg0: i32) -> (i32, i32, i32, i32) {
    %c0_i32 = arith.constant 0 : i32
    %c0_i32_0 = arith.constant 0 : i32
    %c0_i32_1 = arith.constant 0 : i32
    %c0_i32_2 = arith.constant 0 : i32
    %c0_i32_3 = arith.constant 0 : i32
    return %c0_i32, %c0_i32_0, %c0_i32_1, %c0_i32_2 : i32, i32, i32, i32
  }
  func.func @transform_7(%arg0: i32) -> (i32, i32, i32) {
    %c0_i32 = arith.constant 0 : i32
    %c0_i32_0 = arith.constant 0 : i32
    %c0_i32_1 = arith.constant 0 : i32
    %c0_i32_2 = arith.constant 0 : i32
    return %c0_i32, %c0_i32_0, %c0_i32_1 : i32, i32, i32
  }
  func.func @transform_8(%arg0: i32) -> (i32, i32) {
    %c0_i32 = arith.constant 0 : i32
    %c0_i32_0 = arith.constant 0 : i32
    %c0_i32_1 = arith.constant 0 : i32
    return %c0_i32, %c0_i32_0 : i32, i32
  }
  func.func @transform_9(%arg0: i32) -> (i32, i32) {
    %c0_i32 = arith.constant 0 : i32
    %c0_i32_0 = arith.constant 0 : i32
    %c0_i32_1 = arith.constant 0 : i32
    return %c0_i32, %c0_i32_0 : i32, i32
  }
  func.func @transform_10(%arg0: i32) -> (i32, i32, i32) {
    %c0_i32 = arith.constant 0 : i32
    %c0_i32_0 = arith.constant 0 : i32
    %c0_i32_1 = arith.constant 0 : i32
    return %arg0, %c0_i32, %c0_i32_0 : i32, i32, i32
  }
}

</mosaic_0001>

<bundles_post_ra>
// kernel: gpg4_forward.1
= control target key start
LH: loop header
LB: loop body
LE: loop exit
PB: predicated region body
PF: predicated region fallthrough
CT: control target
= control target key end

     0   :  { %15 = vsyncpa [#allocation3], 0  ;;  %s10964_s0 = inlined_call_operand.vmem [shape: f32[2,4,64], index: 0, kind: input, shape index: {}]   ;;  %s10965_s1 = inlined_call_operand.vmem [shape: f32[2,8,256], index: 1, kind: input, shape index: {}]   ;;  %s10966_s2 = inlined_call_operand.hbm [shape: f32[9,64,256], index: 2, kind: input, shape index: {}]   ;;  %s10967_s3 = inlined_call_operand.hbm [shape: f32[18,1,256], index: 3, kind: input, shape index: {}]   ;;  %s10968_s4 = inlined_call_operand.hbm [shape: f32[9,32,4], index: 4, kind: input, shape index: {}]   ;;  %s10969_s5 = inlined_call_operand.vmem [shape: f32[9,32,8], index: 5, kind: input, shape index: {}]   ;;  %s10970_s6 = inlined_call_operand.hbm [shape: f32[2,9,32,64], index: 6, kind: input, shape index: {}]   ;;  %s10971_s7 = inlined_call_operand.vmem [shape: f32[2,32,32], index: 7, kind: input, shape index: {}]   ;;  %s10972_s8 = inlined_call_operand.hbm [shape: f32[32,32], index: 8, kind: input, shape index: {}]   ;;  %s10973_s9 = inlined_call_operand.hbm [shape: f32[32,10], index: 9, kind: input, shape index: {}]   ;;  %s10974_s10 = inlined_call_operand.vmem [shape: f32[2,32,256], index: 10, kind: output, shape index: {}]  }
   0x1   :  { %16 = vsyncpa [#allocation5], 0 }
   0x2   :  { %17 = vsyncpa [#allocation8], 0 }
   0x3   :  { %18 = vsyncpa [#allocation11], 0  ;;  %s6963_s13 = smov 0  }
   0x4 LB: > { %s300_s16 = sshll.u32 %s10967_s3, 4  ;;  %s6972_s17 = sadd.s32 4294967295, %s6867_s13   ;;  %s6867_s13 = sphi %s6963_s13, %s24_s13   ;;  %s301_s16 = int_to_ptr.hbm [resolvable:$true] %s300_s16 }
   0x5   : > { %p6052_p0 = scmp.ge.s32.totalorder %s6867_s13, 1  ;;  %p275_p1 = scmp.lt.s32.totalorder %s6867_s13, 3 }
   0x6   : > { %p6529_p2 = scmp.eq.s32.totalorder %s6972_s17, 0  ;;  %s6869_s19 = smov [#allocation4]  }
   0x7   : > { %p6977_p3 = pnand %p6052_p0, %p275_p1  ;;  %s302_s20 = sshll.u32 %s6869_s19, 4  ;;  %s303_s20 = int_to_ptr.vmem [resolvable:$true] %s302_s20 }
   0x8   : > { %s331_s24 = sshll.u32 %s10970_s6, 4  ;;  %s6870_s25 = smov [#allocation7]   ;;  %s332_s24 = int_to_ptr.hbm [resolvable:$true] %s331_s24 }
   0x9   : > { %p6510_p4 = pneg %p6977_p3  ;;  %s333_s26 = sshll.u32 %s6870_s25, 4  ;;  %s334_s26 = int_to_ptr.vmem [resolvable:$true] %s333_s26 }
   0xa   : > { %s6871_s27 = smov 32   ;;  %s6872_s28 = smov 2  }
   0xb   : > { %p6985_p5 = pnand %p6529_p2, %p6510_p4  ;;  %s286_s11 = sshll.u32 %s10966_s2, 4  ;;  %s287_s11 = int_to_ptr.hbm [resolvable:$true] %s286_s11 }
   0xc   : > { %s6873_s12 = smov 128   ;;  %s6874_s14 = smov 8  }
   0xd   : > { %6516 = dma.hbm_to_vmem [thread:$0]  (!%p6985_p5), %s301_s16, 576, %s303_s20, [#allocation5], %s6871_s27, %s6871_s27, %s6872_s28  }
   0xe   : > { %6522 = dma.hbm_to_vmem [thread:$0]  (!%p6985_p5), %s332_s24, 9216, %s334_s26, [#allocation8], %s6873_s12, %s6873_s12, %s6874_s14  }
   0xf   : > { %s6875_s15 = smov [#allocation2]   ;;  %s6876_s22 = smov 256  }
  0x10   : > { %s288_s19 = sshll.u32 %s6875_s15, 4  ;;  %s6877_s16 = smov 16   ;;  %s289_s19 = int_to_ptr.vmem [resolvable:$true] %s288_s19 }
  0x11   : > { %6513 = dma.hbm_to_vmem [thread:$0]  (!%p6985_p5), %s287_s11, 18432, %s289_s19, [#allocation3], %s6876_s22, %s6876_s22, %s6877_s16  }
  0x12   : > { %s314_s25 = sshll.u32 %s10968_s4, 4  ;;  %s6878_s27 = smov [#allocation6]   ;;  %s315_s25 = int_to_ptr.hbm [resolvable:$true] %s314_s25 }
  0x13   : > { %s316_s28 = sshll.u32 %s6878_s27, 4  ;;  %s348_s26 = sshll.u32 %s10972_s8, 4  ;;  %s317_s28 = int_to_ptr.vmem [resolvable:$true] %s316_s28  ;;  %s349_s26 = int_to_ptr.hbm [resolvable:$true] %s348_s26 }
  0x14   : > { %6519 = dma.hbm_to_vmem [thread:$0]  (!%p6985_p5), %s315_s25, 4608, %s317_s28, [#allocation5], %s6873_s12, %s6873_s12, %s6874_s14  }
  0x15   : > { %s6879_s30 = smov [#allocation9]   ;;  %s362_s22 = sshll.u32 %s10973_s9, 4  ;;  %s363_s22 = int_to_ptr.hbm [resolvable:$true] %s362_s22 }
  0x16   : > { %s350_s11 = sshll.u32 %s6879_s30, 4  ;;  %s6880_s16 = smov [#allocation10]   ;;  %s351_s11 = int_to_ptr.vmem [resolvable:$true] %s350_s11 }
  0x17   : > { %6525 = dma.hbm_to_vmem [thread:$0]  (!%p6985_p5), %s349_s26, 512, %s351_s11, [#allocation8], %s6873_s12, %s6873_s12, %s6874_s14  }
  0x18   : > { %s364_s20 = sshll.u32 %s6880_s16, 4  ;;  %395 = sbr.rel (%p6977_p3) target bundleno = 2438 (0x986), region = 60  ;;  %s365_s20 = int_to_ptr.vmem [resolvable:$true] %s364_s20 }
  0x19   : > { %6528 = dma.hbm_to_vmem [thread:$0]  (!%p6985_p5), %s363_s22, 512, %s365_s20, [#allocation11], %s6873_s12, %s6873_s12, %s6874_s14  }
  0x1d   : > { %6850 = dma.done.wait (%p6529_p2), [#allocation3], 18432  }
  0x1e   : > { %6852 = vsyncadd (%p6529_p2), [#allocation3], 4294948864 }
  0x1f   : > { %6854 = dma.done.wait (%p6529_p2), [#allocation5], 5184  }
  0x20   : > { %6856 = vsyncadd (%p6529_p2), [#allocation5], 4294962112 }
  0x21   : > { %6858 = dma.done.wait (%p6529_p2), [#allocation8], 9728  }
  0x22   : > { %6860 = vsyncadd (%p6529_p2), [#allocation8], 4294957568 }
  0x23   : > { %6862 = dma.done.wait (%p6529_p2), [#allocation11], 512  }
  0x24   : > { %6864 = vsyncadd (%p6529_p2), [#allocation11], 4294966784  ;;  %p463_p6 = scmp.lt.s32.totalorder %s6972_s17, 1  ;;  %vm495_vm0 = vcmask 1043456   ;;  %vm482_vm1 = vcmask 31744   ;;  %v478_v1 = vld [vmem:[#allocation6] sm:$0xff] }
  0x25   : > { %v480_v2 = vld [vmem:[#allocation6 + $0x10] sm:$0xff]  ;;  %v479_v3 = vld [vmem:[#allocation6 + $0x8] sm:$0xff]  ;;  %v481_v4 = vld [vmem:[#allocation6 + $0x18] sm:$0xff]  ;;  %vm607_vm2 = vcmask 523264   ;;  %s6881_s29 = smov 16   ;;  %s6882_s24 = smov 17  }
  0x26   : > { %s11573_s17 = smov (!%p463_p6, %s6972_s17), 1  ;;  %v542_v5 = vld [vmem:[#allocation2 + $0x70] sm:$0xff]  ;;  %v543_v6 = vld [vmem:[#allocation2 + $0x78] sm:$0xff]  ;;  %v540_v7 = vld [vmem:[#allocation2 + $0x60] sm:$0xff]  ;;  %s6883_s26 = smov 15   ;;  %vm1843_vm4 = vcmask 64512  }
  0x27   : > { %s6067_s18 = sshll.u32 %s11573_s17, 2  ;;  %v541_v8 = vld [vmem:[#allocation2 + $0x68] sm:$0xff]  ;;  %v538_v9 = vld [vmem:[#allocation2 + $0x50] sm:$0xff]  ;;  %v539_v10 = vld [vmem:[#allocation2 + $0x58] sm:$0xff]  ;;  %s6483_s23 = sshll.u32 %s11573_s17, 4 }
  0x28   : > { %s466_s14 = scalar_lea.vmem %s10964_s0, %s6067_s18  ;;  %v536_v11 = vld [vmem:[#allocation2 + $0x40] sm:$0xff]  ;;  %v537_v12 = vld [vmem:[#allocation2 + $0x48] sm:$0xff]  ;;  %v534_v14 = vld [vmem:[#allocation2 + $0x30] sm:$0xff]  ;;  %s471_s28 = scalar_lea.vmem %s10965_s1, %s6483_s23 }
  0x29   : > { %v7054_v0 = vld [vmem:[%s466_s14] sm:$0xf]  ;;  %v545_v13 = vld [vmem:[#allocation6 + $0x20] sm:$0xff]  ;;  %v535_v15 = vld [vmem:[#allocation2 + $0x38] sm:$0xff]  ;;  %s6884_s30 = smov 1   ;;  %s6885_s11 = smov 127  }
  0x2a   : > { %6072 = vmatpush.msk.msra.mxu0 %vm495_vm0, %v7054_v0  ;;  %6485 = vmatpush.msk.msra.mxu1 %vm495_vm0, %v7054_v0  ;;  %v532_v16 = vld [vmem:[#allocation2 + $0x20] sm:$0xff]  ;;  %v533_v17 = vld [vmem:[#allocation2 + $0x28] sm:$0xff]  ;;  %v530_v18 = vld [vmem:[#allocation2 + $0x10] sm:$0xff]  ;;  %s6886_s15 = smov 113   ;;  %s6887_s19 = smov 112  }
  0x2b   : > { %6073 = vmatmul.msk.f32.vlgmr.msra.gmra.mxu0 %vm482_vm1, %v478_v1  ;;  %6075 = vmatmul.msk.f32.vlgmr.msra.gmra.mxu1 %vm482_vm1, %v480_v2  ;;  %v531_v19 = vld [vmem:[#allocation2 + $0x18] sm:$0xff]  ;;  %v546_v20 = vld [vmem:[#allocation6 + $0x28] sm:$0xff]  ;;  %v528_v23 = vld [vmem:[#allocation2] sm:$0xff]  ;;  %s6888_s22 = smov 111  }
  0x2c   : > { %6077 = vmatpush.msk.msrb.mxu1 %vm495_vm0, %v7054_v0  ;;  %698 = vmatpush.msrb.mxu0 %v542_v5  ;;  %v547_v21 = vld [vmem:[#allocation6 + $0x30] sm:$0xff]  ;;  %v548_v22 = vld [vmem:[#allocation6 + $0x38] sm:$0xff]  ;;  %v529_v24 = vld [vmem:[#allocation2 + $0x8] sm:$0xff] }
  0x2d   : > { %v605_v25 = vld [vmem:[#allocation2 + $0xf0] sm:$0xff]  ;;  %v606_v26 = vld [vmem:[#allocation2 + $0xf8] sm:$0xff]  ;;  %v603_v27 = vld [vmem:[#allocation2 + $0xe0] sm:$0xff] }
  0x2e   : > { %727 = vmatpush.msra.mxu1 %v543_v6  ;;  %699 = vmatpush.msrb.mxu0 %v540_v7  ;;  %v604_v28 = vld [vmem:[#allocation2 + $0xe8] sm:$0xff]  ;;  %v601_v29 = vld [vmem:[#allocation2 + $0xd0] sm:$0xff]  ;;  %v602_v30 = vld [vmem:[#allocation2 + $0xd8] sm:$0xff] }
  0x2f   : > { %628 = vmatpush.msra.mxu2 %v605_v25  ;;  %657 = vmatpush.msra.mxu3 %v606_v26  ;;  %v599_v31 = vld [vmem:[#allocation2 + $0xc0] sm:$0xff]  ;;  %v600_v32 = vld [vmem:[#allocation2 + $0xc8] sm:$0xff]  ;;  %v597_v33 = vld [vmem:[#allocation2 + $0xb0] sm:$0xff] }
  0x30   : > { %728 = vmatpush.msra.mxu1 %v541_v8  ;;  %700 = vmatpush.msrb.mxu0 %v538_v9  ;;  %v598_v34 = vld [vmem:[#allocation2 + $0xb8] sm:$0xff]  ;;  %v595_v35 = vld [vmem:[#allocation2 + $0xa0] sm:$0xff]  ;;  %v596_v36 = vld [vmem:[#allocation2 + $0xa8] sm:$0xff] }
  0x31   : > { %629 = vmatpush.msra.mxu2 %v603_v27  ;;  %658 = vmatpush.msra.mxu3 %v604_v28  ;;  %v593_v37 = vld [vmem:[#allocation2 + $0x90] sm:$0xff]  ;;  %v594_v38 = vld [vmem:[#allocation2 + $0x98] sm:$0xff]  ;;  %v591_v39 = vld [vmem:[#allocation2 + $0x80] sm:$0xff] }
  0x32   : > { %729 = vmatpush.msra.mxu1 %v539_v10  ;;  %701 = vmatpush.msrb.mxu0 %v536_v11  ;;  %v592_v40 = vld [vmem:[#allocation2 + $0x88] sm:$0xff]  ;;  %v892_v52 = vld [vmem:[#allocation6 + $0x70] sm:$0xff]  ;;  %v893_v54 = vld [vmem:[#allocation6 + $0x78] sm:$0xff] }
  0x33   : > { %6074 = vmatmul.msk.f32.gmra.mxu0 %vm482_vm1, %v479_v3  ;;  %6076 = vmatmul.msk.f32.gmra.mxu1 %vm482_vm1, %v481_v4  ;;  %v890_v47 = vld [vmem:[#allocation6 + $0x60] sm:$0xff]  ;;  %v891_v49 = vld [vmem:[#allocation6 + $0x68] sm:$0xff]  ;;  %v751_v55 = vld [vmem:[#allocation6 + $0x50] sm:$0xff] }
  0x34   : > { %730 = vmatpush.msra.mxu1 %v537_v12  ;;  %702 = vmatpush.msrb.mxu0 %v534_v14  ;;  %v749_v51 = vld [vmem:[#allocation6 + $0x40] sm:$0xff]  ;;  %v750_v53 = vld [vmem:[#allocation6 + $0x48] sm:$0xff]  ;;  %v752_v56 = vld [vmem:[#allocation6 + $0x58] sm:$0xff] }
  0x35   : > { %630 = vmatpush.msra.mxu2 %v601_v29  ;;  %659 = vmatpush.msra.mxu3 %v602_v30  ;;  %v809_v58 = vld [vmem:[#allocation2 + $0x170] sm:$0xff]  ;;  %v810_v59 = vld [vmem:[#allocation2 + $0x178] sm:$0xff]  ;;  %v807_v60 = vld [vmem:[#allocation2 + $0x160] sm:$0xff] }
  0x36   : > { %731 = vmatpush.msra.mxu1 %v535_v15  ;;  %703 = vmatpush.msrb.mxu0 %v532_v16  ;;  %v808_v62 = vld [vmem:[#allocation2 + $0x168] sm:$0xff]  ;;  %v950_v63 = vld [vmem:[#allocation2 + $0x1f0] sm:$0xff]  ;;  %v806_v2 = vld [vmem:[#allocation2 + $0x158] sm:$0xff] }
  0x37   : > { %631 = vmatpush.msra.mxu2 %v599_v31  ;;  %660 = vmatpush.msra.mxu3 %v600_v32  ;;  %v805_v1 = vld [vmem:[#allocation2 + $0x150] sm:$0xff]  ;;  %v948_v3 = vld [vmem:[#allocation2 + $0x1e0] sm:$0xff]  ;;  %v804_v5 = vld [vmem:[#allocation2 + $0x148] sm:$0xff] }
  0x38   : > { %732 = vmatpush.msra.mxu1 %v533_v17  ;;  %704 = vmatpush.msrb.mxu0 %v530_v18  ;;  %v803_v4 = vld [vmem:[#allocation2 + $0x140] sm:$0xff]  ;;  %v946_v6 = vld [vmem:[#allocation2 + $0x1d0] sm:$0xff]  ;;  %v802_v8 = vld [vmem:[#allocation2 + $0x138] sm:$0xff] }
  0x39   : > { %632 = vmatpush.msra.mxu2 %v597_v33  ;;  %661 = vmatpush.msra.mxu3 %v598_v34  ;;  %v801_v7 = vld [vmem:[#allocation2 + $0x130] sm:$0xff]  ;;  %v944_v9 = vld [vmem:[#allocation2 + $0x1c0] sm:$0xff]  ;;  %v800_v11 = vld [vmem:[#allocation2 + $0x128] sm:$0xff] }
  0x3a   : > { %733 = vmatpush.msra.mxu1 %v531_v19  ;;  %705 = vmatpush.msrb.mxu0 %v528_v23  ;;  %v799_v10 = vld [vmem:[#allocation2 + $0x120] sm:$0xff]  ;;  %v797_v14 = vld [vmem:[#allocation2 + $0x110] sm:$0xff]  ;;  %v798_v15 = vld [vmem:[#allocation2 + $0x118] sm:$0xff] }
  0x3b   : > { %6078 = vmatmul.msk.f32.vlgmr.msrb.gmra.mxu1 %vm482_vm1, %v545_v13  ;;  %633 = vmatpush.msra.mxu2 %v595_v35  ;;  %v942_v13 = vld [vmem:[#allocation2 + $0x1b0] sm:$0xff]  ;;  %v940_v16 = vld [vmem:[#allocation2 + $0x1a0] sm:$0xff]  ;;  %v796_v19 = vld [vmem:[#allocation2 + $0x108] sm:$0xff] }
  0x3c   : > { %734 = vmatpush.msra.mxu1 %v529_v24  ;;  %662 = vmatpush.msra.mxu3 %v596_v36  ;;  %v795_v18 = vld [vmem:[#allocation2 + $0x100] sm:$0xff]  ;;  %v951_v26 = vld [vmem:[#allocation2 + $0x1f8] sm:$0xff]  ;;  %v949_v27 = vld [vmem:[#allocation2 + $0x1e8] sm:$0xff] }
  0x3d   : > { %634 = vmatpush.msra.mxu2 %v593_v37  ;;  %860 = vmatpush.msra.mxu0 %v810_v59  ;;  %v947_v29 = vld [vmem:[#allocation2 + $0x1d8] sm:$0xff]  ;;  %v945_v31 = vld [vmem:[#allocation2 + $0x1c8] sm:$0xff] }
  0x3e   : > { %6111 = vmatpush.msk.msrb.mxu1 %vm495_vm0, %v7054_v0  ;;  %663 = vmatpush.msra.mxu3 %v594_v38  ;;  %v943_v32 = vld [vmem:[#allocation2 + $0x1b8] sm:$0xff]  ;;  %v941_v33 = vld [vmem:[#allocation2 + $0x1a8] sm:$0xff] }
  0x3f   : > { %635 = vmatpush.msra.mxu2 %v591_v39  ;;  %861 = vmatpush.msra.mxu0 %v808_v62  ;;  %v939_v35 = vld [vmem:[#allocation2 + $0x198] sm:$0xff]  ;;  %v937_v36 = vld [vmem:[#allocation2 + $0x188] sm:$0xff]  ;;  %v1087_v62 = vld [vmem:[#allocation2 + $0x250] sm:$0xff] }
  0x40   : > { %664 = vmatpush.msra.mxu3 %v592_v40  ;;  %v1090_v59 = vld [vmem:[#allocation2 + $0x268] sm:$0xff] }
  0x41   : > { %6098 = vmatpush.msk.msrb.mxu2 %vm495_vm0, %v7054_v0  ;;  %862 = vmatpush.msra.mxu0 %v806_v2  ;;  %v1085_v2 = vld [vmem:[#allocation2 + $0x240] sm:$0xff] }
  0x42   : > { %831 = vmatpush.msrb.mxu3 %v809_v58  ;;  %v1089_v58 = vld [vmem:[#allocation2 + $0x260] sm:$0xff] }
  0x43   : > { %6079 = vmatmul.msk.f32.gmra.mxu1 %vm482_vm1, %v546_v20  ;;  %863 = vmatpush.msra.mxu0 %v804_v5  ;;  %v938_v20 = vld [vmem:[#allocation2 + $0x190] sm:$0xff]  ;;  %v1084_v5 = vld [vmem:[#allocation2 + $0x238] sm:$0xff] }
  0x44   : > { %832 = vmatpush.msrb.mxu3 %v807_v60 }
  0x45   : > { %864 = vmatpush.msra.mxu0 %v802_v8 }
  0x46   : > { %833 = vmatpush.msrb.mxu3 %v805_v1 }
  0x47   : > { %865 = vmatpush.msra.mxu0 %v800_v11 }
  0x48   : > { %834 = vmatpush.msrb.mxu3 %v803_v4  ;;  %v1083_v4 = vld [vmem:[#allocation2 + $0x230] sm:$0xff] }
  0x49   : > { %866 = vmatpush.msra.mxu0 %v798_v15 }
  0x4a   : > { %835 = vmatpush.msrb.mxu3 %v801_v7  ;;  %v1082_v7 = vld [vmem:[#allocation2 + $0x228] sm:$0xff] }
  0x4b   : > { %6080 = vmatmul.msk.f32.gmra.mxu1 %vm482_vm1, %v547_v21  ;;  %867 = vmatpush.msra.mxu0 %v796_v19  ;;  %v936_v21 = vld [vmem:[#allocation2 + $0x180] sm:$0xff] }
  0x4c   : > { %836 = vmatpush.msrb.mxu3 %v799_v10  ;;  %v1080_v10 = vld [vmem:[#allocation2 + $0x218] sm:$0xff] }
  0x4e   : > { %837 = vmatpush.msrb.mxu3 %v797_v14  ;;  %v1078_v14 = vld [vmem:[#allocation2 + $0x208] sm:$0xff] }
  0x50   : > { %838 = vmatpush.msrb.mxu3 %v795_v18 }
  0x53   : > { %6081 = vmatmul.msk.f32.gmra.mxu1 %vm482_vm1, %v548_v22 }
  0xa8   : > { %v516_v41 = vpop.f32.mrf.mxu0  ;;  %v522_v42 = vpop.f32.mrf.mxu1 }
  0xa9   : > { %6090 = vmatmul.msk.f32.vlgmr.msrb.gmra.mxu0 %vm607_vm2, %v516_v41  ;;  %6094 = vmatmul.msk.f32.vlgmr.msra.gmra.mxu1 %vm607_vm2, %v516_v41 }
  0xaa   : > { %6124 = vmatpush.msk.msrb.mxu0 %vm495_vm0, %v7054_v0 }
  0xb0   : > { %v519_v43 = vpop.f32.mrf.mxu0  ;;  %v525_v44 = vpop.f32.mrf.mxu1 }
  0xb1   : > { %6091 = vmatmul.msk.f32.gmra.mxu0 %vm607_vm2, %v519_v43  ;;  %6095 = vmatmul.msk.f32.gmra.mxu1 %vm607_vm2, %v519_v43  ;;  %v1032_v43 = vld [vmem:[#allocation6 + $0x88] sm:$0xff] }
  0xb8   : > { %v578_v45 = vpop.f32.mrf.mxu1 }
  0xb9   : > { %6082 = vmatmul.msk.f32.vlgmr.msra.gmra.mxu2 %vm607_vm2, %v578_v45  ;;  %6086 = vmatmul.msk.f32.vlgmr.msra.gmra.mxu3 %vm607_vm2, %v578_v45  ;;  %v1034_v45 = vld [vmem:[#allocation6 + $0x98] sm:$0xff] }
  0xba   : > { %6092 = vmatmul.msk.f32.gmra.mxu0 %vm607_vm2, %v522_v42  ;;  %6096 = vmatmul.msk.f32.gmra.mxu1 %vm607_vm2, %v522_v42  ;;  %v1031_v42 = vld [vmem:[#allocation6 + $0x80] sm:$0xff] }
  0xbb   : > { %972 = vmatpush.msra.mxu2 %v950_v63  ;;  %1001 = vmatpush.msra.mxu3 %v951_v26  ;;  %v1088_v63 = vld [vmem:[#allocation2 + $0x258] sm:$0xff] }
  0xbc   : > { %v1233_v26 = vld [vmem:[#allocation2 + $0x2f8] sm:$0xff] }
  0xbd   : > { %973 = vmatpush.msra.mxu2 %v948_v3  ;;  %1002 = vmatpush.msra.mxu3 %v949_v27  ;;  %v1086_v3 = vld [vmem:[#allocation2 + $0x248] sm:$0xff]  ;;  %v1230_v27 = vld [vmem:[#allocation2 + $0x2e0] sm:$0xff] }
  0xbf   : > { %974 = vmatpush.msra.mxu2 %v946_v6  ;;  %1003 = vmatpush.msra.mxu3 %v947_v29  ;;  %v1081_v6 = vld [vmem:[#allocation2 + $0x220] sm:$0xff]  ;;  %v1228_v29 = vld [vmem:[#allocation2 + $0x2d0] sm:$0xff] }
  0xc0   : > { %v581_v46 = vpop.f32.mrf.mxu1 }
  0xc1   : > { %6083 = vmatmul.msk.f32.gmra.mxu2 %vm607_vm2, %v581_v46  ;;  %6087 = vmatmul.msk.f32.gmra.mxu3 %vm607_vm2, %v581_v46  ;;  %v1172_v46 = vld [vmem:[#allocation6 + $0xa0] sm:$0xff] }
  0xc2   : > { %6093 = vmatmul.msk.f32.gmra.mxu0 %vm607_vm2, %v525_v44  ;;  %6097 = vmatmul.msk.f32.gmra.mxu1 %vm607_vm2, %v525_v44  ;;  %v1033_v44 = vld [vmem:[#allocation6 + $0x90] sm:$0xff] }
  0xc3   : > { %975 = vmatpush.msra.mxu2 %v944_v9  ;;  %1004 = vmatpush.msra.mxu3 %v945_v31  ;;  %v1079_v9 = vld [vmem:[#allocation2 + $0x210] sm:$0xff]  ;;  %v1229_v31 = vld [vmem:[#allocation2 + $0x2d8] sm:$0xff] }
  0xc5   : > { %976 = vmatpush.msra.mxu2 %v942_v13  ;;  %1005 = vmatpush.msra.mxu3 %v943_v32  ;;  %v1077_v13 = vld [vmem:[#allocation2 + $0x200] sm:$0xff] }
  0xc7   : > { %977 = vmatpush.msra.mxu2 %v940_v16  ;;  %1006 = vmatpush.msra.mxu3 %v941_v33  ;;  %v1226_v33 = vld [vmem:[#allocation2 + $0x2c0] sm:$0xff] }
  0xc8   : > { %v584_v48 = vpop.f32.mrf.mxu1 }
  0xc9   : > { %6084 = vmatmul.msk.f32.gmra.mxu2 %vm607_vm2, %v584_v48  ;;  %6088 = vmatmul.msk.f32.gmra.mxu3 %vm607_vm2, %v584_v48  ;;  %v1174_v48 = vld [vmem:[#allocation6 + $0xb0] sm:$0xff] }
  0xca   : > { %6112 = vmatmul.msk.f32.vlgmr.msrb.gmra.mxu1 %vm482_vm1, %v890_v47  ;;  %978 = vmatpush.msra.mxu2 %v938_v20  ;;  %v1173_v47 = vld [vmem:[#allocation6 + $0xa8] sm:$0xff] }
  0xcb   : > { %1007 = vmatpush.msra.mxu3 %v939_v35  ;;  %v1224_v35 = vld [vmem:[#allocation2 + $0x2b0] sm:$0xff] }
  0xcc   : > { %979 = vmatpush.msra.mxu2 %v936_v21 }
  0xcd   : > { %1008 = vmatpush.msra.mxu3 %v937_v36  ;;  %v1225_v36 = vld [vmem:[#allocation2 + $0x2b8] sm:$0xff] }
  0xd0   : > { %v587_v50 = vpop.f32.mrf.mxu1 }
  0xd1   : > { %6085 = vmatmul.msk.f32.gmra.mxu2 %vm607_vm2, %v587_v50  ;;  %6089 = vmatmul.msk.f32.gmra.mxu3 %vm607_vm2, %v587_v50 }
  0xd2   : > { %6113 = vmatmul.msk.f32.gmra.mxu1 %vm482_vm1, %v891_v49  ;;  %v1175_v49 = vld [vmem:[#allocation6 + $0xb8] sm:$0xff] }
  0xd9   : > { %6099 = vmatmul.msk.f32.vlgmr.msrb.gmra.mxu2 %vm482_vm1, %v749_v51 }
  0xda   : > { %6114 = vmatmul.msk.f32.gmra.mxu1 %vm482_vm1, %v892_v52 }
  0xe1   : > { %6100 = vmatmul.msk.f32.gmra.mxu2 %vm482_vm1, %v750_v53 }
  0xe2   : > { %6115 = vmatmul.msk.f32.gmra.mxu1 %vm482_vm1, %v893_v54 }
  0xe9   : > { %6101 = vmatmul.msk.f32.gmra.mxu2 %vm482_vm1, %v751_v55  ;;  %v1091_v55 = vld [vmem:[#allocation2 + $0x270] sm:$0xff] }
  0xea   : > { %1113 = vmatpush.msra.mxu1 %v1091_v55 }
  0xec   : > { %1114 = vmatpush.msra.mxu1 %v1089_v58 }
  0xee   : > { %1115 = vmatpush.msra.mxu1 %v1087_v62 }
  0xf0   : > { %1116 = vmatpush.msra.mxu1 %v1085_v2 }
  0xf1   : > { %6102 = vmatmul.msk.f32.gmra.mxu2 %vm482_vm1, %v752_v56  ;;  %v1092_v56 = vld [vmem:[#allocation2 + $0x278] sm:$0xff] }
  0xf2   : > { %1142 = vmatpush.msrb.mxu2 %v1092_v56  ;;  %1117 = vmatpush.msra.mxu1 %v1083_v4  ;;  %v1313_v56 = vld [vmem:[#allocation6 + $0xc0] sm:$0xff] }
  0xf4   : > { %1143 = vmatpush.msrb.mxu2 %v1090_v59  ;;  %1118 = vmatpush.msra.mxu1 %v1081_v6  ;;  %v1314_v59 = vld [vmem:[#allocation6 + $0xc8] sm:$0xff] }
  0xf5   : > { %v1455_v6 = vld [vmem:[#allocation6 + $0xe8] sm:$0xff] }
  0xf6   : > { %1144 = vmatpush.msrb.mxu2 %v1088_v63  ;;  %1119 = vmatpush.msra.mxu1 %v1079_v9  ;;  %v1315_v63 = vld [vmem:[#allocation6 + $0xd0] sm:$0xff]  ;;  %v1457_v9 = vld [vmem:[#allocation6 + $0xf8] sm:$0xff] }
  0xf8   : > { %1145 = vmatpush.msrb.mxu2 %v1086_v3  ;;  %1120 = vmatpush.msra.mxu1 %v1077_v13  ;;  %v1316_v3 = vld [vmem:[#allocation6 + $0xd8] sm:$0xff] }
  0xfa   : > { %1146 = vmatpush.msrb.mxu2 %v1084_v5  ;;  %1283 = vmatpush.msrb.mxu1 %v1233_v26  ;;  %v1454_v5 = vld [vmem:[#allocation6 + $0xe0] sm:$0xff]  ;;  %v1374_v26 = vld [vmem:[#allocation2 + $0x378] sm:$0xff] }
  0xfc   : > { %1147 = vmatpush.msrb.mxu2 %v1082_v7  ;;  %v1456_v7 = vld [vmem:[#allocation6 + $0xf0] sm:$0xff] }
  0xfe   : > { %1148 = vmatpush.msrb.mxu2 %v1080_v10 }
 0x100   : > { %1149 = vmatpush.msrb.mxu2 %v1078_v14 }
 0x126   : > { %v7098_v57 = vpop.f32.mrf.mxu1  ;;  %v7141_v50 = vpop.f32.mrf.mxu0 }
 0x12e   : > { %v7100_v61 = vpop.f32.mrf.mxu1  ;;  %v7146_v52 = vpop.f32.mrf.mxu0 }
 0x137   : > { %v7102_v12 = vpop.f32.mrf.mxu1  ;;  %v7150_v54 = vpop.f32.mrf.mxu0 }
 0x13c   : > { %v7104_v17 = vpop.f32.mrf.mxu2  ;;  %v7144_v51 = vpop.f32.mrf.mxu3 }
 0x13f   : > { %v7108_v22 = vpop.f32.mrf.mxu1  ;;  %v7154_v1 = vpop.f32.mrf.mxu0 }
 0x140   : > { %11142 = vst [vmem:[#allocation16_spill] sm:$0xff] %v7108_v22  ;;  %v1814_v22 = vld [vmem:[#allocation4] sm:$0x3] }
 0x144   : > { %v7110_v23 = vpop.f32.mrf.mxu2  ;;  %v7148_v53 = vpop.f32.mrf.mxu3 }
 0x147   : > { %v923_v24 = vpop.f32.mrf.mxu1 }
 0x148   : > { %6116 = vmatmul.msk.f32.vlgmr.msra.gmra.mxu2 %vm607_vm2, %v923_v24 }
 0x149   : > { %6150 = vmatpush.msk.msra.mxu2 %vm495_vm0, %v7054_v0 }
 0x14c   : > { %v7113_v25 = vpop.f32.mrf.mxu2  ;;  %v7152_v60 = vpop.f32.mrf.mxu3 }
 0x14f   : > { %v926_v28 = vpop.f32.mrf.mxu1 }
 0x150   : > { %6117 = vmatmul.msk.f32.gmra.mxu2 %vm607_vm2, %v926_v28 }
 0x154   : > { %v7116_v30 = vpop.f32.mrf.mxu2  ;;  %v7156_v8 = vpop.f32.mrf.mxu3 }
 0x155   : > { %11143 = vst [vmem:[#allocation17_spill] sm:$0xff] %v7156_v8  ;;  %v7371_v8 = vperm.slane %v1814_v22, 0 }
 0x157   : > { %v929_v34 = vpop.f32.mrf.mxu1  ;;  %11157 = vst [vmem:[#allocation30_spill] sm:$0xff] %v7371_v8 }
 0x158   : > { %6118 = vmatmul.msk.f32.gmra.mxu2 %vm607_vm2, %v929_v34 }
 0x15c   : > { %v782_v37 = vpop.f32.mrf.mxu2 }
 0x15d   : > { %6103 = vmatmul.msk.f32.vlgmr.msrb.gmra.mxu3 %vm607_vm2, %v782_v37  ;;  %6107 = vmatmul.msk.f32.vlgmr.msra.gmra.mxu0 %vm607_vm2, %v782_v37 }
 0x15e   : > { %6137 = vmatpush.msk.msrb.mxu3 %vm495_vm0, %v7054_v0 }
 0x15f   : > { %v932_v38 = vpop.f32.mrf.mxu1 }
 0x160   : > { %6119 = vmatmul.msk.f32.gmra.mxu2 %vm607_vm2, %v932_v38 }
 0x164   : > { %v785_v39 = vpop.f32.mrf.mxu2 }
 0x165   : > { %6104 = vmatmul.msk.f32.gmra.mxu3 %vm607_vm2, %v785_v39  ;;  %6108 = vmatmul.msk.f32.gmra.mxu0 %vm607_vm2, %v785_v39  ;;  %v1223_v39 = vld [vmem:[#allocation2 + $0x2a8] sm:$0xff] }
 0x16c   : > { %v788_v40 = vpop.f32.mrf.mxu2 }
 0x16d   : > { %6105 = vmatmul.msk.f32.gmra.mxu3 %vm607_vm2, %v788_v40  ;;  %6109 = vmatmul.msk.f32.gmra.mxu0 %vm607_vm2, %v788_v40  ;;  %v1220_v40 = vld [vmem:[#allocation2 + $0x290] sm:$0xff] }
 0x174   : > { %v791_v41 = vpop.f32.mrf.mxu2 }
 0x175   : > { %6106 = vmatmul.msk.f32.gmra.mxu3 %vm607_vm2, %v791_v41  ;;  %6110 = vmatmul.msk.f32.gmra.mxu0 %vm607_vm2, %v791_v41  ;;  %v1221_v41 = vld [vmem:[#allocation2 + $0x298] sm:$0xff] }
 0x17d   : > { %6120 = vmatmul.msk.f32.vlgmr.msra.gmra.mxu3 %vm607_vm2, %v923_v24  ;;  %6125 = vmatmul.msk.f32.vlgmr.msrb.gmra.mxu0 %vm482_vm1, %v1031_v42  ;;  %v1232_v24 = vld [vmem:[#allocation2 + $0x2f0] sm:$0xff] }
 0x17e   : > { %1254 = vmatpush.msra.mxu0 %v1232_v24  ;;  %v1373_v24 = vld [vmem:[#allocation2 + $0x370] sm:$0xff] }
 0x17f   : > { %1395 = vmatpush.msra.mxu3 %v1373_v24  ;;  %v1508_v24 = vld [vmem:[#allocation2 + $0x3c0] sm:$0xff] }
 0x180   : > { %1255 = vmatpush.msra.mxu0 %v1230_v27  ;;  %v1371_v27 = vld [vmem:[#allocation2 + $0x360] sm:$0xff] }
 0x181   : > { %1396 = vmatpush.msra.mxu3 %v1371_v27  ;;  %v1506_v27 = vld [vmem:[#allocation2 + $0x3b0] sm:$0xff] }
 0x182   : > { %1256 = vmatpush.msra.mxu0 %v1228_v29  ;;  %v1369_v29 = vld [vmem:[#allocation2 + $0x350] sm:$0xff] }
 0x183   : > { %1397 = vmatpush.msra.mxu3 %v1369_v29  ;;  %v1504_v29 = vld [vmem:[#allocation2 + $0x3a0] sm:$0xff] }
 0x184   : > { %1257 = vmatpush.msra.mxu0 %v1226_v33 }
 0x185   : > { %6121 = vmatmul.msk.f32.gmra.mxu3 %vm607_vm2, %v926_v28  ;;  %6126 = vmatmul.msk.f32.gmra.mxu0 %vm482_vm1, %v1032_v43  ;;  %v1231_v28 = vld [vmem:[#allocation2 + $0x2e8] sm:$0xff]  ;;  %v1218_v43 = vld [vmem:[#allocation2 + $0x280] sm:$0xff] }
 0x186   : > { %1284 = vmatpush.msrb.mxu1 %v1231_v28  ;;  %1258 = vmatpush.msra.mxu0 %v1224_v35  ;;  %v1372_v28 = vld [vmem:[#allocation2 + $0x368] sm:$0xff] }
 0x187   : > { %v1368_v35 = vld [vmem:[#allocation2 + $0x348] sm:$0xff] }
 0x188   : > { %1285 = vmatpush.msrb.mxu1 %v1229_v31  ;;  %v1370_v31 = vld [vmem:[#allocation2 + $0x358] sm:$0xff] }
 0x18d   : > { %6122 = vmatmul.msk.f32.gmra.mxu3 %vm607_vm2, %v929_v34  ;;  %6127 = vmatmul.msk.f32.gmra.mxu0 %vm482_vm1, %v1033_v44  ;;  %v1227_v34 = vld [vmem:[#allocation2 + $0x2c8] sm:$0xff] }
 0x18e   : > { %1286 = vmatpush.msrb.mxu1 %v1227_v34  ;;  %v1219_v44 = vld [vmem:[#allocation2 + $0x288] sm:$0xff]  ;;  %v1367_v34 = vld [vmem:[#allocation2 + $0x340] sm:$0xff] }
 0x18f   : > { %1398 = vmatpush.msra.mxu3 %v1367_v34  ;;  %v1502_v34 = vld [vmem:[#allocation2 + $0x390] sm:$0xff] }
 0x190   : > { %1287 = vmatpush.msrb.mxu1 %v1225_v36  ;;  %v1365_v36 = vld [vmem:[#allocation2 + $0x330] sm:$0xff] }
 0x191   : > { %1399 = vmatpush.msra.mxu3 %v1365_v36 }
 0x192   : > { %1288 = vmatpush.msrb.mxu1 %v1223_v39  ;;  %v1363_v39 = vld [vmem:[#allocation2 + $0x320] sm:$0xff] }
 0x193   : > { %1400 = vmatpush.msra.mxu3 %v1363_v39  ;;  %v1501_v39 = vld [vmem:[#allocation2 + $0x388] sm:$0xff] }
 0x194   : > { %1289 = vmatpush.msrb.mxu1 %v1221_v41  ;;  %v1361_v41 = vld [vmem:[#allocation2 + $0x310] sm:$0xff] }
 0x195   : > { %6123 = vmatmul.msk.f32.gmra.mxu3 %vm607_vm2, %v932_v38  ;;  %6128 = vmatmul.msk.f32.gmra.mxu0 %vm482_vm1, %v1034_v45  ;;  %v1222_v38 = vld [vmem:[#allocation2 + $0x2a0] sm:$0xff] }
 0x196   : > { %1259 = vmatpush.msra.mxu0 %v1222_v38  ;;  %1290 = vmatpush.msrb.mxu1 %v1219_v44 }
 0x197   : > { %1401 = vmatpush.msra.mxu3 %v1361_v41 }
 0x198   : > { %1260 = vmatpush.msra.mxu0 %v1220_v40  ;;  %v1364_v40 = vld [vmem:[#allocation2 + $0x328] sm:$0xff] }
 0x19a   : > { %1261 = vmatpush.msra.mxu0 %v1218_v43  ;;  %v1362_v43 = vld [vmem:[#allocation2 + $0x318] sm:$0xff] }
 0x19c   : > { %1424 = vmatpush.msrb.mxu0 %v1374_v26  ;;  %v1509_v26 = vld [vmem:[#allocation2 + $0x3c8] sm:$0xff] }
 0x19d   : > { %6138 = vmatmul.msk.f32.vlgmr.msrb.gmra.mxu3 %vm482_vm1, %v1172_v46 }
 0x19e   : > { %1425 = vmatpush.msrb.mxu0 %v1372_v28  ;;  %v1507_v28 = vld [vmem:[#allocation2 + $0x3b8] sm:$0xff] }
 0x1a0   : > { %1426 = vmatpush.msrb.mxu0 %v1370_v31  ;;  %v1505_v31 = vld [vmem:[#allocation2 + $0x3a8] sm:$0xff] }
 0x1a2   : > { %1427 = vmatpush.msrb.mxu0 %v1368_v35  ;;  %v1503_v35 = vld [vmem:[#allocation2 + $0x398] sm:$0xff] }
 0x1a5   : > { %6139 = vmatmul.msk.f32.gmra.mxu3 %vm482_vm1, %v1173_v47 }
 0x1ad   : > { %6140 = vmatmul.msk.f32.gmra.mxu3 %vm482_vm1, %v1174_v48 }
 0x1b5   : > { %6141 = vmatmul.msk.f32.gmra.mxu3 %vm482_vm1, %v1175_v49 }
 0x1cb   : > { %v7209_v10 = vpop.f32.mrf.mxu2 }
 0x1d3   : > { %v7212_v13 = vpop.f32.mrf.mxu2 }
 0x1da   : > { %v7158_v11 = vpop.f32.mrf.mxu0 }
 0x1db   : > { %v7214_v14 = vpop.f32.mrf.mxu2 }
 0x1e0   : > { %v7162_v15 = vpop.f32.mrf.mxu3 }
 0x1e2   : > { %v7164_v16 = vpop.f32.mrf.mxu0 }
 0x1e3   : > { %v7216_v33 = vpop.f32.mrf.mxu2 }
 0x1e4   : > { %11146 = vst [vmem:[#allocation20_spill] sm:$0xff] %v7216_v33 }
 0x1e8   : > { %v7166_v18 = vpop.f32.mrf.mxu3 }
 0x1ea   : > { %v7168_v19 = vpop.f32.mrf.mxu0 }
 0x1f0   : > { %v7170_v20 = vpop.f32.mrf.mxu3 }
 0x1f2   : > { %v7172_v21 = vpop.f32.mrf.mxu0 }
 0x1f3   : > { %11144 = vst [vmem:[#allocation18_spill] sm:$0xff] %v7172_v21  ;;  %v11156_v21 = vmov 3  }
 0x1f8   : > { %v7174_v32 = vpop.f32.mrf.mxu3 }
 0x1fa   : > { %v1064_v37 = vpop.f32.mrf.mxu0 }
 0x1fb   : > { %6129 = vmatmul.msk.f32.vlgmr.msra.gmra.mxu1 %vm607_vm2, %v1064_v37  ;;  %6133 = vmatmul.msk.f32.vlgmr.msrb.gmra.mxu2 %vm607_vm2, %v1064_v37  ;;  %v1366_v37 = vld [vmem:[#allocation2 + $0x338] sm:$0xff] }
 0x1fc   : > { %6163 = vmatpush.msk.msra.mxu1 %vm495_vm0, %v7054_v0  ;;  %1428 = vmatpush.msrb.mxu0 %v1366_v37  ;;  %v1500_v37 = vld [vmem:[#allocation2 + $0x380] sm:$0xff] }
 0x1fe   : > { %1429 = vmatpush.msrb.mxu0 %v1364_v40 }
 0x200   : > { %v7178_v42 = vpop.f32.mrf.mxu3  ;;  %1430 = vmatpush.msrb.mxu0 %v1362_v43 }
 0x202   : > { %v1067_v45 = vpop.f32.mrf.mxu0 }
 0x203   : > { %6130 = vmatmul.msk.f32.gmra.mxu1 %vm607_vm2, %v1067_v45  ;;  %6134 = vmatmul.msk.f32.gmra.mxu2 %vm607_vm2, %v1067_v45  ;;  %v1359_v45 = vld [vmem:[#allocation2 + $0x300] sm:$0xff] }
 0x204   : > { %1402 = vmatpush.msra.mxu3 %v1359_v45 }
 0x208   : > { %v7184_v46 = vpop.f32.mrf.mxu3 }
 0x20a   : > { %v1070_v47 = vpop.f32.mrf.mxu0 }
 0x20b   : > { %6131 = vmatmul.msk.f32.gmra.mxu1 %vm607_vm2, %v1070_v47  ;;  %6135 = vmatmul.msk.f32.gmra.mxu2 %vm607_vm2, %v1070_v47  ;;  %v1360_v47 = vld [vmem:[#allocation2 + $0x308] sm:$0xff] }
 0x20c   : > { %1431 = vmatpush.msrb.mxu0 %v1360_v47 }
 0x210   : > { %v7188_v48 = vpop.f32.mrf.mxu3 }
 0x212   : > { %v1073_v49 = vpop.f32.mrf.mxu0 }
 0x213   : > { %6132 = vmatmul.msk.f32.gmra.mxu1 %vm607_vm2, %v1073_v49  ;;  %6136 = vmatmul.msk.f32.gmra.mxu2 %vm607_vm2, %v1073_v49 }
 0x218   : > { %v7192_v55 = vpop.f32.mrf.mxu3 }
 0x219   : > { %11145 = vst [vmem:[#allocation19_spill] sm:$0xff] %v7192_v55 }
 0x21b   : > { %6151 = vmatmul.msk.f32.vlgmr.msra.gmra.mxu2 %vm482_vm1, %v1313_v56 }
 0x220   : > { %v1205_v58 = vpop.f32.mrf.mxu3 }
 0x221   : > { %6142 = vmatmul.msk.f32.vlgmr.msra.gmra.mxu0 %vm607_vm2, %v1205_v58  ;;  %6146 = vmatmul.msk.f32.vlgmr.msrb.gmra.mxu1 %vm607_vm2, %v1205_v58  ;;  %v7232_v58 = vld [vmem:[%s471_s28] sm:$0xff] }
 0x222   : > { %6176 = vmatpush.msk.msra.mxu0 %vm495_vm0, %v7054_v0  ;;  %1827 = vrot.lane.b32.xlu0 %v7232_v58, %s6881_s29 }
 0x223   : > { %6152 = vmatmul.msk.f32.gmra.mxu2 %vm482_vm1, %v1314_v59  ;;  %1805 = vrot.lane.b32.xlu1 %v7232_v58, %s6882_s24 }
 0x224   : > { %1989 = vrot.lane.b32.xlu2 %v7232_v58, %s6883_s26 }
 0x228   : > { %v1208_v62 = vpop.f32.mrf.mxu3 }
 0x229   : > { %6143 = vmatmul.msk.f32.gmra.mxu0 %vm607_vm2, %v1208_v62  ;;  %6147 = vmatmul.msk.f32.gmra.mxu1 %vm607_vm2, %v1208_v62  ;;  %v1514_v62 = vld [vmem:[#allocation2 + $0x3f0] sm:$0xff] }
 0x22a   : > { %1536 = vmatpush.msrb.mxu2 %v1514_v62 }
 0x22b   : > { %6153 = vmatmul.msk.f32.gmra.mxu2 %vm482_vm1, %v1315_v63  ;;  %v1515_v63 = vld [vmem:[#allocation2 + $0x3f8] sm:$0xff] }
 0x22c   : > { %1565 = vmatpush.msrb.mxu3 %v1515_v63 }
 0x230   : > { %v1211_v2 = vpop.f32.mrf.mxu3 }
 0x231   : > { %6144 = vmatmul.msk.f32.gmra.mxu0 %vm607_vm2, %v1211_v2  ;;  %6148 = vmatmul.msk.f32.gmra.mxu1 %vm607_vm2, %v1211_v2  ;;  %v1512_v2 = vld [vmem:[#allocation2 + $0x3e0] sm:$0xff] }
 0x232   : > { %1537 = vmatpush.msrb.mxu2 %v1512_v2  ;;  %v7292_v2 = vld [vmem:[#allocation10 + $0x18] sm:$0xff] }
 0x233   : > { %6154 = vmatmul.msk.f32.gmra.mxu2 %vm482_vm1, %v1316_v3  ;;  %v1513_v3 = vld [vmem:[#allocation2 + $0x3e8] sm:$0xff] }
 0x234   : > { %1566 = vmatpush.msrb.mxu3 %v1513_v3  ;;  %v6889_v3 = vmov 2  }
 0x235   : > { %6588 = vset.pattern.permute.xlu1 %v6889_v3  ;;  %6589 = vset.pattern.permute.xlu2 %v6889_v3 }
 0x238   : > { %v1214_v4 = vpop.f32.mrf.mxu3 }
 0x239   : > { %6145 = vmatmul.msk.f32.gmra.mxu0 %vm607_vm2, %v1214_v4  ;;  %6149 = vmatmul.msk.f32.gmra.mxu1 %vm607_vm2, %v1214_v4  ;;  %v7244_v4 = vld [vmem:[%s471_s28 + $0x8] sm:$0xff] }
 0x23a   : > { %1829 = vrot.lane.b32.xlu0 %v7244_v4, %s6881_s29  ;;  %1807 = vrot.lane.b32.xlu1 %v7244_v4, %s6882_s24 }
 0x23b   : > { %1991 = vrot.lane.b32.xlu2 %v7244_v4, %s6883_s26 }
 0x241   : > { %6164 = vmatmul.msk.f32.vlgmr.msra.gmra.mxu1 %vm482_vm1, %v1454_v5  ;;  %v1510_v5 = vld [vmem:[#allocation2 + $0x3d0] sm:$0xff] }
 0x242   : > { %1538 = vmatpush.msrb.mxu2 %v1510_v5  ;;  %2090 = vrot.lane.b32.xlu1 %v7244_v4, %s6884_s30  ;;  %v1595_v5 = vld [vmem:[#allocation6 + $0x100] sm:$0xff] }
 0x243   : > { %2088 = vrot.lane.b32.xlu0 %v7232_v58, %s6884_s30  ;;  %2270 = vrot.lane.b32.xlu2 %v7232_v58, %s6885_s11 }
 0x244   : > { %1539 = vmatpush.msrb.mxu2 %v1508_v24  ;;  %v7296_v24 = vld [vmem:[#allocation10 + $0x8] sm:$0xff] }
 0x246   : > { %1540 = vmatpush.msrb.mxu2 %v1506_v27 }
 0x248   : > { %1541 = vmatpush.msrb.mxu2 %v1504_v29  ;;  %v1597_v29 = vld [vmem:[#allocation6 + $0x110] sm:$0xff] }
 0x249   : > { %6165 = vmatmul.msk.f32.gmra.mxu1 %vm482_vm1, %v1455_v6  ;;  %v1511_v6 = vld [vmem:[#allocation2 + $0x3d8] sm:$0xff] }
 0x24a   : > { %1567 = vmatpush.msrb.mxu3 %v1511_v6  ;;  %1542 = vmatpush.msrb.mxu2 %v1502_v34  ;;  %v1598_v34 = vld [vmem:[#allocation6 + $0x118] sm:$0xff] }
 0x24b   : > { %2369 = vrot.lane.b32.xlu1 %v7232_v58, %s6886_s15  ;;  %2272 = vrot.lane.b32.xlu0 %v7244_v4, %s6885_s11 }
 0x24c   : > { %1568 = vmatpush.msrb.mxu3 %v1509_v26  ;;  %1543 = vmatpush.msrb.mxu2 %v1500_v37  ;;  %v1596_v26 = vld [vmem:[#allocation6 + $0x108] sm:$0xff] }
 0x24d   : > { %2371 = vrot.lane.b32.xlu2 %v7244_v4, %s6886_s15 }
 0x24e   : > { %1569 = vmatpush.msrb.mxu3 %v1507_v28  ;;  %v7302_v28 = vld [vmem:[#allocation10] sm:$0xff] }
 0x250   : > { %1570 = vmatpush.msrb.mxu3 %v1505_v31 }
 0x251   : > { %6166 = vmatmul.msk.f32.gmra.mxu1 %vm482_vm1, %v1456_v7 }
 0x252   : > { %1571 = vmatpush.msrb.mxu3 %v1503_v35 }
 0x253   : > { %2470 = vrot.lane.b32.xlu1 %v7244_v4, %s6887_s19  ;;  %2468 = vrot.lane.b32.xlu0 %v7232_v58, %s6887_s19 }
 0x254   : > { %1572 = vmatpush.msrb.mxu3 %v1501_v39 }
 0x255   : > { %2567 = vrot.lane.b32.xlu2 %v7232_v58, %s6888_s22 }
 0x259   : > { %6167 = vmatmul.msk.f32.gmra.mxu1 %vm482_vm1, %v1457_v9 }
 0x25b   : > { %2569 = vrot.lane.b32.xlu0 %v7244_v4, %s6888_s22  ;;  %2674 = vperm.xlu1 %6588, %v7292_v2  }
 0x263   : > { %2666 = vperm.xlu1 %6588, %v7296_v24  }
 0x26b   : > { %2662 = vperm.xlu1 %6588, %v7302_v28  }
 0x278   : > { %v7218_v38 = vpop.f32.mrf.mxu1 }
 0x27e   : > { %v7220_v44 = vpop.f32.mrf.mxu2 }
 0x280   : > { %v7224_v49 = vpop.f32.mrf.mxu1 }
 0x286   : > { %v7230_v56 = vpop.f32.mrf.mxu2 }
 0x288   : > { %v7240_v0 = vpop.f32.mrf.mxu1 }
 0x28e   : > { %v7242_v59 = vpop.f32.mrf.mxu2 }
 0x290   : > { %v7252_v7 = vpop.f32.mrf.mxu1 }
 0x291   : > { %11147 = vst [vmem:[#allocation21_spill] sm:$0xff] %v7252_v7 }
 0x294   : > { %v1828_v39 = vpop.permute.xlu0 %1827 }
 0x296   : > { %v7254_v9 = vpop.f32.mrf.mxu2 }
 0x297   : > { %11148 = vst [vmem:[#allocation22_spill] sm:$0xff] %v7254_v9  ;;  %v10975_v9 = vmov 3  }
 0x298   : > { %6593 = vset.pattern.permute.xlu1 %v10975_v9  ;;  %6590 = vset.pattern.permute.xlu0 %v10975_v9  ;;  %v1990_v9 = vpop.permute.xlu2 %1989 }
 0x299   : > { %2686 = vperm.xlu1 %6593, %v7302_v28   ;;  %2698 = vperm.xlu0 %6590, %v7292_v2  }
 0x29e   : > { %v7262_v36 = vpop.f32.mrf.mxu1  ;;  %v1346_v40 = vpop.f32.mrf.mxu2 }
 0x29f   : > { %6155 = vmatmul.msk.f32.vlgmr.msra.gmra.mxu3 %vm607_vm2, %v1346_v40  ;;  %6159 = vmatmul.msk.f32.vlgmr.msrb.gmra.mxu0 %vm607_vm2, %v1346_v40  ;;  %v7313_v37 = vpop.f32.mrf.mxu0 }
 0x2a6   : > { %v7272_v41 = vpop.f32.mrf.mxu1  ;;  %v1349_v43 = vpop.f32.mrf.mxu2 }
 0x2a7   : > { %6156 = vmatmul.msk.f32.gmra.mxu3 %vm607_vm2, %v1349_v43  ;;  %6160 = vmatmul.msk.f32.gmra.mxu0 %vm607_vm2, %v1349_v43  ;;  %v7315_v40 = vpop.f32.mrf.mxu0  ;;  %v1809_v43 = vlaneseq }
 0x2ae   : > { %v7280_v45 = vpop.f32.mrf.mxu1  ;;  %v1352_v47 = vpop.f32.mrf.mxu2 }
 0x2af   : > { %6157 = vmatmul.msk.f32.gmra.mxu3 %vm607_vm2, %v1352_v47  ;;  %6161 = vmatmul.msk.f32.gmra.mxu0 %vm607_vm2, %v1352_v47  ;;  %v1835_v47 = vld [vmem:[#allocation4 + $0x2] sm:$0x3] }
 0x2b0   : > { %v7319_v3 = vperm.slane %v1835_v47, 0 }
 0x2b2   : > { %11151 = vst [vmem:[#allocation25_spill] sm:$0xff] %v7319_v3 }
 0x2b6   : > { %v7284_v62 = vpop.f32.mrf.mxu1  ;;  %v1355_v63 = vpop.f32.mrf.mxu2 }
 0x2b7   : > { %11149 = vst [vmem:[#allocation23_spill] sm:$0xff] %v7284_v62  ;;  %6158 = vmatmul.msk.f32.gmra.mxu3 %vm607_vm2, %v1355_v63  ;;  %6162 = vmatmul.msk.f32.gmra.mxu0 %vm607_vm2, %v1355_v63  ;;  %v7317_v63 = vand.u32 127, %v1809_v43  ;;  %v1656_v43 = vld [vmem:[#allocation2 + $0x478] sm:$0xff]  ;;  %v1654_v62 = vld [vmem:[#allocation2 + $0x468] sm:$0xff] }
 0x2b8   : > { %1706 = vmatpush.msra.mxu2 %v1656_v43  ;;  %v1645_v43 = vld [vmem:[#allocation2 + $0x420] sm:$0xff] }
 0x2b9   : > { %11150 = vst [vmem:[#allocation24_spill] sm:$0xff] %v7317_v63  ;;  %vm1831_vm3 = vcmp.lt.s32.totalorder %v7317_v63, 16  ;;  %vm1993_vm5 = vcmp.lt.s32.totalorder %v7317_v63, 15  ;;  %vm1811_vm6 = vcmp.lt.s32.totalorder %v7317_v63, 17  ;;  %vm2092_vm7 = vcmp.lt.s32.totalorder %v7317_v63, 1 }
 0x2ba   : > { %1707 = vmatpush.msra.mxu2 %v1654_v62  ;;  %v1646_v62 = vld [vmem:[#allocation2 + $0x428] sm:$0xff]  ;;  %vm2373_vm8 = vcmp.lt.s32.totalorder %v7317_v63, 113  ;;  %vm2274_vm9 = vcmp.lt.s32.totalorder %v7317_v63, 127  ;;  %vm2472_vm10 = vcmp.lt.s32.totalorder %v7317_v63, 112  ;;  %vm2571_vm11 = vcmp.lt.s32.totalorder %v7317_v63, 111 }
 0x2be   : > { %v1487_v6 = vpop.f32.mrf.mxu1 }
 0x2bf   : > { %6168 = vmatmul.msk.f32.vlgmr.msrb.gmra.mxu2 %vm607_vm2, %v1487_v6  ;;  %6172 = vmatmul.msk.f32.vlgmr.msrb.gmra.mxu3 %vm607_vm2, %v1487_v6  ;;  %v1830_v6 = vpop.permute.xlu0 %1829 }
 0x2c0   : > { %6177 = vmatmul.msk.f32.vlgmr.msra.gmra.mxu0 %vm482_vm1, %v1595_v5  ;;  %v7321_v5 = vperm.slane %v1835_v47, 1  ;;  %v1653_v47 = vld [vmem:[#allocation2 + $0x460] sm:$0xff] }
 0x2c2   : > { %11152 = vst [vmem:[#allocation26_spill] sm:$0xff] %v7321_v5 }
 0x2c6   : > { %v1490_v27 = vpop.f32.mrf.mxu1 }
 0x2c7   : > { %6169 = vmatmul.msk.f32.gmra.mxu2 %vm607_vm2, %v1490_v27  ;;  %6173 = vmatmul.msk.f32.gmra.mxu3 %vm607_vm2, %v1490_v27  ;;  %v1832_v27 = vsel %vm1831_vm3, %v1828_v39, %v1830_v6 }
 0x2c8   : > { %6178 = vmatmul.msk.f32.gmra.mxu0 %vm482_vm1, %v1596_v26  ;;  %v7324_v26 = vpop.f32.mrf.mxu0 }
 0x2ce   : > { %v1493_v31 = vpop.f32.mrf.mxu1 }
 0x2cf   : > { %6170 = vmatmul.msk.f32.gmra.mxu2 %vm607_vm2, %v1493_v31  ;;  %6174 = vmatmul.msk.f32.gmra.mxu3 %vm607_vm2, %v1493_v31 }
 0x2d0   : > { %6179 = vmatmul.msk.f32.gmra.mxu0 %vm482_vm1, %v1597_v29  ;;  %v1833_v29 = vsel %vm1831_vm3, %v1830_v6, %v1828_v39  ;;  %v1651_v39 = vld [vmem:[#allocation2 + $0x450] sm:$0xff]  ;;  %v1652_v6 = vld [vmem:[#allocation2 + $0x458] sm:$0xff] }
 0x2d1   : > { %v1841_v31 = vmul.f32 %v7319_v3, %v1833_v29  ;;  %1708 = vmatpush.msra.mxu2 %v1652_v6  ;;  %v1650_v29 = vld [vmem:[#allocation2 + $0x448] sm:$0xff]  ;;  %v1643_v6 = vld [vmem:[#allocation2 + $0x410] sm:$0xff] }
 0x2d3   : > { %1871 = vmatpush.msra.mxu3 %v1841_v31  ;;  %v7336_v31 = vpop.f32.mrf.mxu0  ;;  %1709 = vmatpush.msra.mxu2 %v1650_v29  ;;  %v1641_v29 = vld [vmem:[#allocation2 + $0x400] sm:$0xff] }
 0x2d4   : > { %11153 = vst [vmem:[#allocation27_spill] sm:$0xff] %v7336_v31  ;;  %v7373_v31 = vperm.slane %v1814_v22, 1 }
 0x2d6   : > { %v1496_v35 = vpop.f32.mrf.mxu1  ;;  %11158 = vst [vmem:[#allocation31_spill] sm:$0xff] %v7373_v31 }
 0x2d7   : > { %6171 = vmatmul.msk.f32.gmra.mxu2 %vm607_vm2, %v1496_v35  ;;  %6175 = vmatmul.msk.f32.gmra.mxu3 %vm607_vm2, %v1496_v35  ;;  %v1655_v35 = vld [vmem:[#allocation2 + $0x470] sm:$0xff] }
 0x2d8   : > { %6180 = vmatmul.msk.f32.gmra.mxu0 %vm482_vm1, %v1598_v34  ;;  %v1842_v34 = vmul.f32 %v7321_v5, %v1832_v27  ;;  %1677 = vmatpush.msrb.mxu1 %v1655_v35  ;;  %v1649_v27 = vld [vmem:[#allocation2 + $0x440] sm:$0xff]  ;;  %v1648_v35 = vld [vmem:[#allocation2 + $0x438] sm:$0xff] }
 0x2d9   : > { %1710 = vmatpush.msra.mxu2 %v1648_v35  ;;  %v1737_v5 = vld [vmem:[#allocation10 + $0x10] sm:$0xff] }
 0x2da   : > { %1900 = vmatpush.msrb.mxu0 %v1842_v34  ;;  %1678 = vmatpush.msrb.mxu1 %v1653_v47  ;;  %v1647_v34 = vld [vmem:[#allocation2 + $0x430] sm:$0xff]  ;;  %v6189_v47 = vld [vmem:[%s10969_s5 + $0x20] sm:$0xff] }
 0x2db   : > { %1711 = vmatpush.msra.mxu2 %v1646_v62  ;;  %v1806_v62 = vpop.permute.xlu1 %1805  ;;  %2670 = vperm.xlu2 %6589, %v1737_v5  }
 0x2dc   : > { %1679 = vmatpush.msrb.mxu1 %v1651_v39  ;;  %v10978_v39 = vmov 1  }
 0x2dd   : > { %6595 = vset.pattern.permute.xlu1 %v10978_v39 }
 0x2de   : > { %1680 = vmatpush.msrb.mxu1 %v1649_v27  ;;  %v1644_v27 = vld [vmem:[#allocation2 + $0x418] sm:$0xff]  ;;  %1780 = vperm.xlu1 %6595, %v7292_v2  }
 0x2df   : > { %6193 = vmatmul.msk.f32.vlgmr.msra.gmra.mxu3 %vm1843_vm4, %v6189_v47  ;;  %1712 = vmatpush.msra.mxu2 %v1644_v27  ;;  %v1997_v27 = vld [vmem:[#allocation4 + $0x4] sm:$0x3] }
 0x2e0   : > { %1681 = vmatpush.msrb.mxu1 %v1647_v34  ;;  %6197 = vmatmul.msk.f32.vlgmr.msrb.gmra.mxu0 %vm1843_vm4, %v6189_v47  ;;  %v1642_v34 = vld [vmem:[#allocation2 + $0x408] sm:$0xff]  ;;  %v6892_v47 = vmov 0   ;;  %v7361_v3 = vperm.slane %v1997_v27, 0 }
 0x2e1   : > { %1713 = vmatpush.msra.mxu2 %v1642_v34  ;;  %6592 = vset.pattern.permute.xlu0 %v6892_v47  ;;  %v6191_v34 = vld [vmem:[%s10969_s5 + $0x30] sm:$0xff] }
 0x2e2   : > { %1682 = vmatpush.msrb.mxu1 %v1645_v43  ;;  %v6190_v43 = vld [vmem:[%s10969_s5 + $0x28] sm:$0xff]  ;;  %1756 = vperm.xlu0 %6592, %v7292_v2   ;;  %11154 = vst [vmem:[#allocation28_spill] sm:$0xff] %v7361_v3 }
 0x2e3   : > { %v1808_v39 = vpop.permute.xlu1 %1807  ;;  %6591 = vset.pattern.permute.xlu2 %v11156_v21  ;;  %v11159_v21 = vmov 1  }
 0x2e4   : > { %1683 = vmatpush.msrb.mxu1 %v1643_v6  ;;  %v1812_v7 = vsel %vm1811_vm6, %v1806_v62, %v1808_v39  ;;  %2694 = vperm.xlu2 %6591, %v1737_v5  }
 0x2e5   : > { %v1821_v22 = vmul.f32 %v7373_v31, %v1812_v7  ;;  %v6209_v7 = vld [vmem:[%s10969_s5 + $0x40] sm:$0xff] }
 0x2e6   : > { %1684 = vmatpush.msrb.mxu1 %v1641_v29  ;;  %6597 = vset.pattern.permute.xlu1 %v6892_v47  ;;  %v1992_v29 = vpop.permute.xlu2 %1991 }
 0x2e7   : > { %6194 = vmatmul.msk.f32.gmra.mxu3 %vm1843_vm4, %v6190_v43  ;;  %1741 = vperm.xlu1 %6597, %v7302_v28   ;;  %v1994_v2 = vsel %vm1993_vm5, %v1990_v9, %v1992_v29  ;;  %v1995_v55 = vsel %vm1993_vm5, %v1992_v29, %v1990_v9 }
 0x2e8   : > { %6198 = vmatmul.msk.f32.gmra.mxu0 %vm1843_vm4, %v6190_v43  ;;  %v7363_v43 = vperm.slane %v1997_v27, 1  ;;  %v1813_v27 = vsel %vm1811_vm6, %v1808_v39, %v1806_v62  ;;  %v2003_v33 = vmul.f32 %v7361_v3, %v1995_v55  ;;  %1970 = vmatpush.msrb.mxu2 %v1821_v22  ;;  %v6192_v55 = vld [vmem:[%s10969_s5 + $0x38] sm:$0xff] }
 0x2e9   : > { %v1820_v29 = vmul.f32 %v7371_v8, %v1813_v27  ;;  %v2089_v27 = vpop.permute.xlu0 %2088 }
 0x2ea   : > { %11155 = vst [vmem:[#allocation29_spill] sm:$0xff] %v7363_v43  ;;  %v2004_v9 = vmul.f32 %v7363_v43, %v1994_v2  ;;  %6596 = vset.pattern.permute.xlu0 %v11159_v21  ;;  %2032 = vmatpush.msrb.mxu3 %v2003_v33  ;;  %v2096_v2 = vld [vmem:[#allocation4 + $0x6] sm:$0x3] }
 0x2eb   : > { %1776 = vperm.xlu0 %6596, %v1737_v5   ;;  %1941 = vmatpush.msra.mxu1 %v1820_v29  ;;  %v2091_v62 = vpop.permute.xlu1 %2090  ;;  %v7429_v29 = vperm.slane %v2096_v2, 0 }
 0x2ec   : > { %2061 = vmatpush.msra.mxu0 %v2004_v9  ;;  %2214 = vmatpush.msra.mxu3 %v7232_v58  ;;  %v2093_v22 = vsel %vm2092_vm7, %v2089_v27, %v2091_v62 }
 0x2ed   : > { %2690 = vperm.xlu2 %6591, %v7296_v24   ;;  %11160 = vst [vmem:[#allocation32_spill] sm:$0xff] %v7429_v29 }
 0x2ee   : > { %2243 = vmatpush.msrb.mxu0 %v7244_v4  ;;  %v6210_v4 = vld [vmem:[%s10969_s5 + $0x48] sm:$0xff]  ;;  %v2271_v9 = vpop.permute.xlu2 %2270 }
 0x2ef   : > { %6195 = vmatmul.msk.f32.gmra.mxu3 %vm1843_vm4, %v6191_v34  ;;  %6599 = vset.pattern.permute.xlu1 %v11159_v21 }
 0x2f0   : > { %6199 = vmatmul.msk.f32.gmra.mxu0 %vm1843_vm4, %v6191_v34  ;;  %1768 = vperm.xlu1 %6599, %v7302_v28   ;;  %v6212_v34 = vld [vmem:[%s10969_s5 + $0x58] sm:$0xff] }
 0x2f5   : > { %6594 = vset.pattern.permute.xlu2 %v6892_v47 }
 0x2f6   : > { %1751 = vperm.xlu2 %6594, %v1737_v5   ;;  %v6211_v5 = vld [vmem:[%s10969_s5 + $0x50] sm:$0xff] }
 0x2f7   : > { %6196 = vmatmul.msk.f32.gmra.mxu3 %vm1843_vm4, %v6192_v55 }
 0x2f8   : > { %6200 = vmatmul.msk.f32.gmra.mxu0 %vm1843_vm4, %v6192_v55  ;;  %v2094_v55 = vsel %vm2092_vm7, %v2091_v62, %v2089_v27  ;;  %v2377_v62 = vld [vmem:[#allocation4 + $0xc] sm:$0x3] }
 0x2fe   : > { %1746 = vperm.xlu2 %6594, %v7296_v24  }
 0x2ff   : > { %6213 = vmatmul.msk.f32.vlgmr.msrb.gmra.mxu3 %vm1843_vm4, %v6209_v7 }
 0x300   : > { %6217 = vmatmul.msk.f32.vlgmr.msra.gmra.mxu0 %vm1843_vm4, %v6209_v7  ;;  %v2102_v7 = vmul.f32 %v7429_v29, %v2094_v55  ;;  %v2278_v55 = vld [vmem:[#allocation4 + $0xa] sm:$0x3] }
 0x306   : > { %6598 = vset.pattern.permute.xlu2 %v11159_v21 }
 0x307   : > { %6214 = vmatmul.msk.f32.gmra.mxu3 %vm1843_vm4, %v6210_v4  ;;  %1772 = vperm.xlu2 %6598, %v7296_v24   ;;  %v7431_v24 = vperm.slane %v2096_v2, 1  ;;  %v7448_v2 = vperm.slane %v2377_v62, 0 }
 0x308   : > { %6218 = vmatmul.msk.f32.gmra.mxu0 %vm1843_vm4, %v6210_v4 }
 0x309   : > { %11161 = vst [vmem:[#allocation33_spill] sm:$0xff] %v7431_v24 }
 0x30a   : > { %11162 = vst [vmem:[#allocation34_spill] sm:$0xff] %v7448_v2 }
 0x30f   : > { %6215 = vmatmul.msk.f32.gmra.mxu3 %vm1843_vm4, %v6211_v5 }
 0x310   : > { %6219 = vmatmul.msk.f32.gmra.mxu0 %vm1843_vm4, %v6211_v5  ;;  %v6233_v5 = vld [vmem:[%s10969_s5 + $0x80] sm:$0xff] }
 0x317   : > { %6216 = vmatmul.msk.f32.gmra.mxu3 %vm1843_vm4, %v6212_v34 }
 0x318   : > { %6220 = vmatmul.msk.f32.gmra.mxu0 %vm1843_vm4, %v6212_v34  ;;  %v7450_v34 = vperm.slane %v2377_v62, 1 }
 0x31a   : > { %11163 = vst [vmem:[#allocation35_spill] sm:$0xff] %v7450_v34 }
 0x31c   : > { %v7345_v35 = vpop.f32.mrf.mxu0 }
 0x31f   : > { %6237 = vmatmul.msk.f32.vlgmr.msra.gmra.mxu3 %vm1843_vm4, %v6233_v5 }
 0x320   : > { %6241 = vmatmul.msk.f32.vlgmr.msrb.gmra.mxu0 %vm1843_vm4, %v6233_v5 }
 0x322   : > { %v7427_v21 = vpop.f32.mrf.mxu3 }
 0x324   : > { %v7354_v6 = vpop.f32.mrf.mxu0 }
 0x32a   : > { %v7465_v29 = vpop.f32.mrf.mxu3 }
 0x32c   : > { %v7386_v39 = vpop.f32.mrf.mxu0 }
 0x332   : > { %v7482_v5 = vpop.f32.mrf.mxu3 }
 0x334   : > { %v7397_v33 = vpop.f32.mrf.mxu0 }
 0x33d   : > { %v1628_v58 = vpop.f32.mrf.mxu0 }
 0x33e   : > { %6181 = vmatmul.msk.f32.vlgmr.msrb.gmra.mxu1 %vm607_vm2, %v1628_v58  ;;  %6185 = vmatmul.msk.f32.vlgmr.msra.gmra.mxu2 %vm607_vm2, %v1628_v58  ;;  %v2103_v58 = vmul.f32 %v7431_v24, %v2093_v22 }
 0x33f   : > { %2131 = vmatpush.msrb.mxu1 %v2102_v7  ;;  %v2273_v7 = vpop.permute.xlu0 %2272 }
 0x340   : > { %2160 = vmatpush.msra.mxu2 %v2103_v58  ;;  %v7457_v58 = vperm.slane %v2278_v55, 0  ;;  %v2275_v24 = vsel %vm2274_vm9, %v2271_v9, %v2273_v7  ;;  %v2276_v62 = vsel %vm2274_vm9, %v2273_v7, %v2271_v9  ;;  %v6234_v9 = vld [vmem:[%s10969_s5 + $0x88] sm:$0xff]  ;;  %v1804_v7 = vld [vmem:[%s10969_s5 + $0x18] sm:$0xff] }
 0x341   : > { %6238 = vmatmul.msk.f32.gmra.mxu3 %vm1843_vm4, %v6234_v9  ;;  %6242 = vmatmul.msk.f32.gmra.mxu0 %vm1843_vm4, %v6234_v9 }
 0x342   : > { %11164 = vst [vmem:[#allocation36_spill] sm:$0xff] %v7457_v58 }
 0x345   : > { %v1631_v28 = vpop.f32.mrf.mxu0 }
 0x346   : > { %6182 = vmatmul.msk.f32.gmra.mxu1 %vm607_vm2, %v1631_v28  ;;  %6186 = vmatmul.msk.f32.gmra.mxu2 %vm607_vm2, %v1631_v28  ;;  %v2370_v28 = vpop.permute.xlu1 %2369 }
 0x34d   : > { %v1634_v47 = vpop.f32.mrf.mxu0 }
 0x34e   : > { %6183 = vmatmul.msk.f32.gmra.mxu1 %vm607_vm2, %v1634_v47  ;;  %6187 = vmatmul.msk.f32.gmra.mxu2 %vm607_vm2, %v1634_v47  ;;  %v2372_v47 = vpop.permute.xlu2 %2371  ;;  %v2471_v9 = vpop.permute.xlu1 %2470 }
 0x34f   : > { %v2374_v27 = vsel %vm2373_vm8, %v2370_v28, %v2372_v47  ;;  %v2375_v22 = vsel %vm2373_vm8, %v2372_v47, %v2370_v28  ;;  %v1801_v47 = vld [vmem:[%s10969_s5] sm:$0xff] }
 0x350   : > { %v2383_v31 = vmul.f32 %v7448_v2, %v2374_v27  ;;  %v2384_v28 = vmul.f32 %v7450_v34, %v2375_v22  ;;  %v7497_v27 = vpop.f32.mrf.mxu3  ;;  %v6236_v22 = vld [vmem:[%s10969_s5 + $0x98] sm:$0xff] }
 0x352   : > { %2412 = vmatpush.msrb.mxu3 %v2383_v31  ;;  %2441 = vmatpush.msra.mxu0 %v2384_v28  ;;  %v1802_v31 = vld [vmem:[%s10969_s5 + $0x8] sm:$0xff]  ;;  %v2469_v28 = vpop.permute.xlu0 %2468 }
 0x355   : > { %v1637_v4 = vpop.f32.mrf.mxu0 }
 0x356   : > { %6184 = vmatmul.msk.f32.gmra.mxu1 %vm607_vm2, %v1637_v4  ;;  %6188 = vmatmul.msk.f32.gmra.mxu2 %vm607_vm2, %v1637_v4  ;;  %v7459_v4 = vperm.slane %v2278_v55, 1  ;;  %v2284_v55 = vmul.f32 %v7457_v58, %v2275_v24  ;;  %v6235_v24 = vld [vmem:[%s10969_s5 + $0x90] sm:$0xff] }
 0x357   : > { %6239 = vmatmul.msk.f32.gmra.mxu3 %vm1843_vm4, %v6235_v24  ;;  %6243 = vmatmul.msk.f32.gmra.mxu0 %vm1843_vm4, %v6235_v24 }
 0x358   : > { %11165 = vst [vmem:[#allocation37_spill] sm:$0xff] %v7459_v4  ;;  %v2285_v8 = vmul.f32 %v7459_v4, %v2276_v62  ;;  %v2476_v62 = vld [vmem:[#allocation4 + $0xe] sm:$0x3] }
 0x359   : > { %v7519_v24 = vperm.slane %v2476_v62, 1 }
 0x35b   : > { %11167 = vst [vmem:[#allocation39_spill] sm:$0xff] %v7519_v24 }
 0x35e   : > { %6201 = vmatmul.msk.f32.vlgmr.msra.gmra.mxu1 %vm1843_vm4, %v1801_v47  ;;  %6205 = vmatmul.msk.f32.vlgmr.msrb.gmra.mxu2 %vm1843_vm4, %v1801_v47  ;;  %v6257_v47 = vld [vmem:[%s10969_s5 + $0xc0] sm:$0xff] }
 0x35f   : > { %2313 = vmatpush.msra.mxu1 %v2284_v55  ;;  %2342 = vmatpush.msrb.mxu2 %v2285_v8  ;;  %v1803_v8 = vld [vmem:[%s10969_s5 + $0x10] sm:$0xff]  ;;  %v7515_v55 = vpop.f32.mrf.mxu3 }
 0x360   : > { %6240 = vmatmul.msk.f32.gmra.mxu3 %vm1843_vm4, %v6236_v22  ;;  %6244 = vmatmul.msk.f32.gmra.mxu0 %vm1843_vm4, %v6236_v22  ;;  %v2474_v22 = vsel %vm2472_vm10, %v2471_v9, %v2469_v28 }
 0x361   : > { %v2483_v58 = vmul.f32 %v7519_v24, %v2474_v22  ;;  %v2570_v22 = vpop.permute.xlu0 %2569 }
 0x366   : > { %6202 = vmatmul.msk.f32.gmra.mxu1 %vm1843_vm4, %v1802_v31  ;;  %6206 = vmatmul.msk.f32.gmra.mxu2 %vm1843_vm4, %v1802_v31  ;;  %v7517_v31 = vperm.slane %v2476_v62, 0  ;;  %v6258_v62 = vld [vmem:[%s10969_s5 + $0xc8] sm:$0xff] }
 0x368   : > { %11166 = vst [vmem:[#allocation38_spill] sm:$0xff] %v7517_v31  ;;  %6261 = vmatmul.msk.f32.vlgmr.msrb.gmra.mxu3 %vm1843_vm4, %v6257_v47  ;;  %6265 = vmatmul.msk.f32.vlgmr.msra.gmra.mxu0 %vm1843_vm4, %v6257_v47  ;;  %v7541_v47 = vpop.permute.xlu1 %2674 }
 0x369   : > { %11168 = vst [vmem:[#allocation40_spill] sm:$0xff] %v7541_v47  ;;  %v6247_v47 = vld [vmem:[%s10969_s5 + $0xb0] sm:$0xff] }
 0x36e   : > { %6203 = vmatmul.msk.f32.gmra.mxu1 %vm1843_vm4, %v1803_v8  ;;  %6207 = vmatmul.msk.f32.gmra.mxu2 %vm1843_vm4, %v1803_v8  ;;  %v2473_v8 = vsel %vm2472_vm10, %v2469_v28, %v2471_v9  ;;  %v7538_v28 = vpop.f32.mrf.mxu3  ;;  %v6222_v9 = vld [vmem:[%s10969_s5 + $0x68] sm:$0xff] }
 0x36f   : > { %v2482_v4 = vmul.f32 %v7517_v31, %v2473_v8  ;;  %v2568_v8 = vpop.permute.xlu2 %2567 }
 0x370   : > { %6262 = vmatmul.msk.f32.gmra.mxu3 %vm1843_vm4, %v6258_v62  ;;  %6266 = vmatmul.msk.f32.gmra.mxu0 %vm1843_vm4, %v6258_v62  ;;  %v2572_v24 = vsel %vm2571_vm11, %v2568_v8, %v2570_v22  ;;  %v2573_v31 = vsel %vm2571_vm11, %v2570_v22, %v2568_v8  ;;  %v7569_v43 = vpop.permute.xlu1 %2666  ;;  %v1545_v22 = vpop.f32.mrf.mxu2 }
 0x371   : > { %11171 = vst [vmem:[#allocation43_spill] sm:$0xff] %v7569_v43 }
 0x376   : > { %6204 = vmatmul.msk.f32.gmra.mxu1 %vm1843_vm4, %v1804_v7  ;;  %6208 = vmatmul.msk.f32.gmra.mxu2 %vm1843_vm4, %v1804_v7  ;;  %v6221_v7 = vld [vmem:[%s10969_s5 + $0x60] sm:$0xff]  ;;  %v7564_v2 = vpop.f32.mrf.mxu3 }
 0x377   : > { %v7617_v3 = vpop.permute.xlu2 %2670 }
 0x378   : > { %11176 = vst [vmem:[#allocation48_spill] sm:$0xff] %v7617_v3 }
 0x37e   : > { %6225 = vmatmul.msk.f32.vlgmr.msrb.gmra.mxu1 %vm1843_vm4, %v6221_v7  ;;  %6229 = vmatmul.msk.f32.vlgmr.msra.gmra.mxu2 %vm1843_vm4, %v6221_v7  ;;  %v7581_v8 = vpop.f32.mrf.mxu3 }
 0x37f   : > { %2511 = vmatpush.msrb.mxu1 %v2482_v4  ;;  %2540 = vmatpush.msra.mxu2 %v2483_v58  ;;  %v6259_v58 = vld [vmem:[%s10969_s5 + $0xd0] sm:$0xff] }
 0x380   : > { %v2575_v4 = vld [vmem:[#allocation4 + $0x10] sm:$0x3]  ;;  %6263 = vmatmul.msk.f32.gmra.mxu3 %vm1843_vm4, %v6259_v58  ;;  %6267 = vmatmul.msk.f32.gmra.mxu0 %vm1843_vm4, %v6259_v58  ;;  %v7588_v58 = vpop.permute.xlu1 %2662 }
 0x381   : > { %v7552_v7 = vperm.slane %v2575_v4, 0  ;;  %v7554_v62 = vperm.slane %v2575_v4, 1  ;;  %v6223_v4 = vld [vmem:[%s10969_s5 + $0x70] sm:$0xff]  ;;  %11172 = vst [vmem:[#allocation44_spill] sm:$0xff] %v7588_v58 }
 0x383   : > { %11169 = vst [vmem:[#allocation41_spill] sm:$0xff] %v7552_v7  ;;  %v2582_v34 = vmul.f32 %v7554_v62, %v2573_v31  ;;  %v6260_v31 = vld [vmem:[%s10969_s5 + $0xd8] sm:$0xff] }
 0x384   : > { %11170 = vst [vmem:[#allocation42_spill] sm:$0xff] %v7554_v62  ;;  %v7609_v62 = vpop.f32.mrf.mxu0 }
 0x385   : > { %2639 = vmatpush.msrb.mxu0 %v2582_v34  ;;  %v6281_v34 = vld [vmem:[%s10969_s5 + $0x100] sm:$0xff]  ;;  %11174 = vst [vmem:[#allocation46_spill] sm:$0xff] %v7609_v62  ;;  %v7644_v62 = vpop.permute.xlu2 %2694 }
 0x386   : > { %6226 = vmatmul.msk.f32.gmra.mxu1 %vm1843_vm4, %v6222_v9  ;;  %6230 = vmatmul.msk.f32.gmra.mxu2 %vm1843_vm4, %v6222_v9  ;;  %v2581_v9 = vmul.f32 %v7552_v7, %v2572_v24  ;;  %v6224_v24 = vld [vmem:[%s10969_s5 + $0x78] sm:$0xff]  ;;  %v7611_v7 = vpop.f32.mrf.mxu2  ;;  %11178 = vst [vmem:[#allocation50_spill] sm:$0xff] %v7644_v62 }
 0x388   : > { %2610 = vmatpush.msra.mxu3 %v2581_v9  ;;  %6268 = vmatmul.msk.f32.gmra.mxu0 %vm1843_vm4, %v6260_v31  ;;  %v6245_v9 = vld [vmem:[%s10969_s5 + $0xa0] sm:$0xff] }
 0x389   : > { %6264 = vmatmul.msk.f32.gmra.mxu3 %vm1843_vm4, %v6260_v31  ;;  %v7599_v31 = vpop.permute.xlu1 %2686 }
 0x38a   : > { %11173 = vst [vmem:[#allocation45_spill] sm:$0xff] %v7599_v31 }
 0x38c   : > { %v7634_v3 = vpop.f32.mrf.mxu0 }
 0x38e   : > { %6227 = vmatmul.msk.f32.gmra.mxu1 %vm1843_vm4, %v6223_v4  ;;  %6231 = vmatmul.msk.f32.gmra.mxu2 %vm1843_vm4, %v6223_v4  ;;  %v7595_v4 = vpop.f32.mrf.mxu3  ;;  %v7636_v31 = vpop.f32.mrf.mxu2 }
 0x390   : > { %6289 = vmatmul.msk.f32.vlgmr.msrb.gmra.mxu0 %vm1843_vm4, %v6281_v34 }
 0x391   : > { %6285 = vmatmul.msk.f32.vlgmr.msra.gmra.mxu3 %vm1843_vm4, %v6281_v34  ;;  %v6246_v34 = vld [vmem:[%s10969_s5 + $0xa8] sm:$0xff]  ;;  %v7619_v63 = vpop.permute.xlu1 %1780 }
 0x396   : > { %6228 = vmatmul.msk.f32.gmra.mxu1 %vm1843_vm4, %v6224_v24  ;;  %6232 = vmatmul.msk.f32.gmra.mxu2 %vm1843_vm4, %v6224_v24  ;;  %v6282_v24 = vld [vmem:[%s10969_s5 + $0x108] sm:$0xff]  ;;  %v7660_v62 = vpop.f32.mrf.mxu2 }
 0x398   : > { %6290 = vmatmul.msk.f32.gmra.mxu0 %vm1843_vm4, %v6282_v24 }
 0x399   : > { %6286 = vmatmul.msk.f32.gmra.mxu3 %vm1843_vm4, %v6282_v24  ;;  %v6283_v24 = vld [vmem:[%s10969_s5 + $0x110] sm:$0xff] }
 0x39e   : > { %6249 = vmatmul.msk.f32.vlgmr.msra.gmra.mxu1 %vm1843_vm4, %v6245_v9  ;;  %6253 = vmatmul.msk.f32.vlgmr.msrb.gmra.mxu2 %vm1843_vm4, %v6245_v9  ;;  %v7615_v9 = vpop.f32.mrf.mxu3 }
 0x39f   : > { %11175 = vst [vmem:[#allocation47_spill] sm:$0xff] %v7615_v9 }
 0x3a0   : > { %6291 = vmatmul.msk.f32.gmra.mxu0 %vm1843_vm4, %v6283_v24 }
 0x3a1   : > { %6287 = vmatmul.msk.f32.gmra.mxu3 %vm1843_vm4, %v6283_v24  ;;  %v6284_v24 = vld [vmem:[%s10969_s5 + $0x118] sm:$0xff] }
 0x3a6   : > { %6250 = vmatmul.msk.f32.gmra.mxu1 %vm1843_vm4, %v6246_v34  ;;  %6254 = vmatmul.msk.f32.gmra.mxu2 %vm1843_vm4, %v6246_v34  ;;  %v708_v34 = vadd.f32 %v7141_v50, %v7104_v17  ;;  %v7638_v9 = vpop.f32.mrf.mxu3  ;;  %v6248_v17 = vld [vmem:[%s10969_s5 + $0xb8] sm:$0xff]  ;;  %v1742_v50 = vpop.permute.xlu1 %1741 }
 0x3a7   : > { %11177 = vst [vmem:[#allocation49_spill] sm:$0xff] %v7638_v9 }
 0x3a8   : > { %v881_v43 = vadd.f32 %v7162_v15, %v708_v34  ;;  %6292 = vmatmul.msk.f32.gmra.mxu0 %vm1843_vm4, %v6284_v24  ;;  %v7658_v34 = vpop.f32.mrf.mxu0 }
 0x3a9   : > { %6288 = vmatmul.msk.f32.gmra.mxu3 %vm1843_vm4, %v6284_v24 }
 0x3aa   : > { %v1022_v58 = vadd.f32 %v7209_v10, %v881_v43  ;;  %v737_v10 = vadd.f32 %v7098_v57, %v7144_v51  ;;  %v7669_v57 = vpop.permute.xlu2 %2690 }
 0x3ac   : > { %v1163_v15 = vadd.f32 %v7218_v38, %v1022_v58  ;;  %v882_v24 = vadd.f32 %v7158_v11, %v737_v10 }
 0x3ae   : > { %6251 = vmatmul.msk.f32.gmra.mxu1 %vm1843_vm4, %v6247_v47  ;;  %6255 = vmatmul.msk.f32.gmra.mxu2 %vm1843_vm4, %v6247_v47  ;;  %v1304_v47 = vadd.f32 %v7313_v37, %v1163_v15  ;;  %v7662_v9 = vpop.f32.mrf.mxu3  ;;  %v6269_v37 = vld [vmem:[%s10969_s5 + $0xe0] sm:$0xff]  ;;  %v1769_v51 = vpop.permute.xlu1 %1768 }
 0x3af   : > { %11179 = vst [vmem:[#allocation51_spill] sm:$0xff] %v7662_v9 }
 0x3b0   : > { %v1445_v43 = vadd.f32 %v7427_v21, %v1304_v47 }
 0x3b2   : > { %v1586_v38 = vadd.f32 %v1545_v22, %v1445_v43 }
 0x3b6   : > { %6252 = vmatmul.msk.f32.gmra.mxu1 %vm1843_vm4, %v6248_v17  ;;  %6256 = vmatmul.msk.f32.gmra.mxu2 %vm1843_vm4, %v6248_v17  ;;  %v1023_v17 = vadd.f32 %v7178_v42, %v882_v24  ;;  %v7678_v42 = vpop.f32.mrf.mxu0 }
 0x3b8   : > { %v1164_v21 = vadd.f32 %v7220_v44, %v1023_v17  ;;  %v6270_v44 = vld [vmem:[%s10969_s5 + $0xe8] sm:$0xff] }
 0x3ba   : > { %v1305_v11 = vadd.f32 %v7262_v36, %v1164_v21  ;;  %v711_v36 = vadd.f32 %v7146_v52, %v7110_v23  ;;  %v6271_v23 = vld [vmem:[%s10969_s5 + $0xf0] sm:$0xff] }
 0x3bb   : > { %v1686_v58 = vpop.f32.mrf.mxu1 }
 0x3bc   : > { %v1727_v15 = vadd.f32 %v1686_v58, %v1586_v38  ;;  %v1446_v43 = vadd.f32 %v7345_v35, %v1305_v11  ;;  %v7683_v38 = vpop.f32.mrf.mxu3  ;;  %v883_v17 = vadd.f32 %v7166_v18, %v711_v36 }
 0x3be   : > { %v1759_v47 = vmul.f32 %v1742_v50, %v1727_v15  ;;  %6273 = vmatmul.msk.f32.vlgmr.msrb.gmra.mxu1 %vm1843_vm4, %v6269_v37  ;;  %6277 = vmatmul.msk.f32.vlgmr.msra.gmra.mxu2 %vm1843_vm4, %v6269_v37  ;;  %v1587_v58 = vadd.f32 %v7515_v55, %v1446_v43  ;;  %v7696_v37 = vpop.permute.xlu2 %1751  ;;  %v740_v55 = vadd.f32 %v7100_v61, %v7148_v53  ;;  %v7711_v61 = vpop.f32.mrf.mxu0 }
 0x3bf   : > { %v1024_v52 = vadd.f32 %v7212_v13, %v883_v17 }
 0x3c0   : > { %v1783_v22 = vadd.f32 %v1769_v51, %v1759_v47  ;;  %v884_v21 = vadd.f32 %v7164_v16, %v740_v55 }
 0x3c1   : > { %v1715_v10 = vpop.f32.mrf.mxu2  ;;  %v1165_v16 = vadd.f32 %v7224_v49, %v1024_v52 }
 0x3c2   : > { %v7676_v9 = vmax.f32 %v1783_v22, 0.0  ;;  %v1728_v35 = vadd.f32 %v1715_v10, %v1587_v58  ;;  %v1025_v22 = vadd.f32 %v7184_v46, %v884_v21 }
 0x3c3   : > { %v1689_v24 = vpop.f32.mrf.mxu1  ;;  %v1306_v46 = vadd.f32 %v7315_v40, %v1165_v16 }
 0x3c4   : > { %11180 = vst [vmem:[#allocation52_spill] sm:$0xff] %v7676_v9  ;;  %2999 = vrot.lane.b32.xlu0 %v7676_v9, %s6883_s26  ;;  %2721 = vrot.lane.b32.xlu2 %v7676_v9, %s6882_s24  ;;  %v1760_v47 = vmul.f32 %v1742_v50, %v1728_v35  ;;  %v7715_v53 = vpop.f32.mrf.mxu3  ;;  %v1166_v18 = vadd.f32 %v7230_v56, %v1025_v22  ;;  %v6272_v56 = vld [vmem:[%s10969_s5 + $0xf8] sm:$0xff] }
 0x3c5   : > { %2790 = vrot.lane.b32.xlu1 %v7676_v9, %s6881_s29  ;;  %v1447_v58 = vadd.f32 %v7465_v29, %v1306_v46 }
 0x3c6   : > { %6274 = vmatmul.msk.f32.gmra.mxu1 %vm1843_vm4, %v6270_v44  ;;  %6278 = vmatmul.msk.f32.gmra.mxu2 %vm1843_vm4, %v6270_v44  ;;  %v1784_v13 = vadd.f32 %v1769_v51, %v1760_v47  ;;  %v1307_v50 = vadd.f32 %v7272_v41, %v1166_v18  ;;  %v1747_v10 = vpop.permute.xlu2 %1746  ;;  %v714_v41 = vadd.f32 %v7150_v54, %v7113_v25 }
 0x3c7   : > { %v1588_v51 = vadd.f32 %v7611_v7, %v1447_v58 }
 0x3c8   : > { %v1448_v44 = vadd.f32 %v7354_v6, %v1307_v50  ;;  %v7727_v36 = vmax.f32 %v1784_v13, 0.0  ;;  %v7744_v6 = vpop.permute.xlu0 %2698  ;;  %v885_v55 = vadd.f32 %v7170_v20, %v714_v41 }
 0x3c9   : > { %v1718_v15 = vpop.f32.mrf.mxu2  ;;  %v1729_v29 = vadd.f32 %v1689_v24, %v1588_v51 }
 0x3ca   : > { %11181 = vst [vmem:[#allocation53_spill] sm:$0xff] %v7727_v36  ;;  %v1589_v40 = vadd.f32 %v7538_v28, %v1448_v44  ;;  %v7748_v28 = vpop.f32.mrf.mxu0  ;;  %v1026_v54 = vadd.f32 %v7214_v14, %v885_v55 }
 0x3cb   : > { %v1692_v11 = vpop.f32.mrf.mxu1  ;;  %v1761_v21 = vmul.f32 %v1747_v10, %v1729_v29 }
 0x3cc   : > { %3523 = vrot.lane.b32.xlu0 %v7676_v9, %s6886_s15  ;;  %3376 = vrot.lane.b32.xlu2 %v7676_v9, %s6885_s11  ;;  %v1730_v35 = vadd.f32 %v1718_v15, %v1589_v40  ;;  %v7750_v7 = vpop.f32.mrf.mxu3  ;;  %v1167_v20 = vadd.f32 %v7240_v0, %v1026_v54 }
 0x3cd   : > { %3146 = vrot.lane.b32.xlu1 %v7676_v9, %s6884_s30 }
 0x3ce   : > { %6275 = vmatmul.msk.f32.gmra.mxu1 %vm1843_vm4, %v6271_v23  ;;  %6279 = vmatmul.msk.f32.gmra.mxu2 %vm1843_vm4, %v6271_v23  ;;  %v1762_v47 = vmul.f32 %v1747_v10, %v1730_v35  ;;  %v1773_v23 = vpop.permute.xlu2 %1772  ;;  %v1308_v52 = vadd.f32 %v7324_v26, %v1167_v20 }
 0x3cf   : > { %v1785_v24 = vadd.f32 %v1773_v23, %v1761_v21 }
 0x3d0   : > { %v1786_v15 = vadd.f32 %v1773_v23, %v1762_v47  ;;  %v7766_v22 = vpop.permute.xlu0 %1756  ;;  %v1449_v13 = vadd.f32 %v7482_v5, %v1308_v52  ;;  %v743_v5 = vadd.f32 %v7102_v12, %v7152_v60  ;;  %v717_v52 = vadd.f32 %v7154_v1, %v7116_v30  ;;  %v11186_v30 = vld [vmem:[#allocation21_spill] sm:$0xff] }
 0x3d1   : > { %v7723_v43 = vpop.f32.mrf.mxu2  ;;  %v7775_v46 = vmax.f32 %v1785_v24, 0.0 }
 0x3d2   : > { %v7768_v16 = vpop.f32.mrf.mxu0  ;;  %v7777_v50 = vmax.f32 %v1786_v15, 0.0  ;;  %v1590_v0 = vadd.f32 %v7636_v31, %v1449_v13  ;;  %v886_v31 = vadd.f32 %v7168_v19, %v743_v5  ;;  %v887_v13 = vadd.f32 %v7174_v32, %v717_v52  ;;  %v11187_v32 = vld [vmem:[#allocation27_spill] sm:$0xff] }
 0x3d3   : > { %v7729_v49 = vpop.f32.mrf.mxu1  ;;  %11182 = vst [vmem:[#allocation54_spill] sm:$0xff] %v7775_v46 }
 0x3d4   : > { %2737 = vrot.lane.b32.xlu0 %v7727_v36, %s6882_s24  ;;  %2806 = vrot.lane.b32.xlu2 %v7727_v36, %s6881_s29  ;;  %v7772_v18 = vpop.f32.mrf.mxu3  ;;  %11183 = vst [vmem:[#allocation55_spill] sm:$0xff] %v7777_v50  ;;  %v1731_v26 = vadd.f32 %v1692_v11, %v1590_v0  ;;  %v1027_v12 = vadd.f32 %v7188_v48, %v886_v31 }
 0x3d5   : > { %3015 = vrot.lane.b32.xlu1 %v7727_v36, %s6883_s26 }
 0x3d6   : > { %6276 = vmatmul.msk.f32.gmra.mxu1 %vm1843_vm4, %v6272_v56  ;;  %6280 = vmatmul.msk.f32.gmra.mxu2 %vm1843_vm4, %v6272_v56  ;;  %v1763_v58 = vmul.f32 %v7696_v37, %v1731_v26  ;;  %v1168_v11 = vadd.f32 %v7242_v59, %v1027_v12 }
 0x3d8   : > { %v1777_v56 = vpop.permute.xlu0 %1776  ;;  %v1309_v19 = vadd.f32 %v7280_v45, %v1168_v11 }
 0x3d9   : > { %v7753_v17 = vpop.f32.mrf.mxu2  ;;  %v1787_v60 = vadd.f32 %v1777_v56, %v1763_v58 }
 0x3da   : > { %v7793_v51 = vpop.f32.mrf.mxu0  ;;  %v1450_v55 = vadd.f32 %v7386_v39, %v1309_v19 }
 0x3db   : > { %v7755_v25 = vpop.f32.mrf.mxu1  ;;  %v7811_v35 = vmax.f32 %v1787_v60, 0.0 }
 0x3dc   : > { %3392 = vrot.lane.b32.xlu0 %v7727_v36, %s6885_s11  ;;  %3162 = vrot.lane.b32.xlu2 %v7727_v36, %s6884_s30  ;;  %v7798_v41 = vpop.f32.mrf.mxu3  ;;  %v1591_v59 = vadd.f32 %v7564_v2, %v1450_v55 }
 0x3dd   : > { %3539 = vrot.lane.b32.xlu1 %v7727_v36, %s6886_s15  ;;  %11184 = vst [vmem:[#allocation56_spill] sm:$0xff] %v7811_v35 }
 0x3de   : > { %v1732_v47 = vadd.f32 %v7723_v43, %v1591_v59 }
 0x3e0   : > { %v1764_v23 = vmul.f32 %v7696_v37, %v1732_v47 }
 0x3e1   : > { %v7770_v14 = vpop.f32.mrf.mxu2 }
 0x3e2   : > { %v7820_v48 = vpop.f32.mrf.mxu0  ;;  %v1788_v20 = vadd.f32 %v1777_v56, %v1764_v23  ;;  %v11185_v56 = vld [vmem:[#allocation20_spill] sm:$0xff] }
 0x3e3   : > { %v7779_v10 = vpop.f32.mrf.mxu1  ;;  %v1028_v31 = vadd.f32 %v11185_v56, %v887_v13  ;;  %v11190_v56 = vld [vmem:[#allocation18_spill] sm:$0xff] }
 0x3e4   : > { %2808 = vrot.lane.b32.xlu0 %v7777_v50, %s6881_s29  ;;  %2792 = vrot.lane.b32.xlu2 %v7775_v46, %s6881_s29  ;;  %v7825_v45 = vpop.f32.mrf.mxu3  ;;  %v7845_v15 = vmax.f32 %v1788_v20, 0.0  ;;  %v11188_v20 = vld [vmem:[#allocation17_spill] sm:$0xff] }
 0x3e5   : > { %2723 = vrot.lane.b32.xlu1 %v7775_v46, %s6882_s24  ;;  %v1169_v1 = vadd.f32 %v11186_v30, %v1028_v31 }
 0x3e7   : > { %v1310_v12 = vadd.f32 %v11187_v32, %v1169_v1  ;;  %v11191_v1 = vld [vmem:[#allocation19_spill] sm:$0xff] }
 0x3e9   : > { %v7790_v44 = vpop.f32.mrf.mxu2  ;;  %v1451_v11 = vadd.f32 %v7497_v27, %v1310_v12  ;;  %v11189_v27 = vld [vmem:[#allocation16_spill] sm:$0xff] }
 0x3ea   : > { %v7839_v2 = vpop.f32.mrf.mxu0  ;;  %v746_v52 = vadd.f32 %v11189_v27, %v11188_v20  ;;  %v11194_v27 = vld [vmem:[#allocation23_spill] sm:$0xff] }
 0x3eb   : > { %v7796_v40 = vpop.f32.mrf.mxu1  ;;  %v1592_v47 = vadd.f32 %v7660_v62, %v1451_v11  ;;  %v11192_v11 = vld [vmem:[#allocation22_spill] sm:$0xff] }
 0x3ec   : > { %3164 = vrot.lane.b32.xlu0 %v7777_v50, %s6884_s30  ;;  %3148 = vrot.lane.b32.xlu2 %v7775_v46, %s6884_s30  ;;  %v7841_v24 = vpop.f32.mrf.mxu3  ;;  %v888_v31 = vadd.f32 %v11190_v56, %v746_v52 }
 0x3ed   : > { %3001 = vrot.lane.b32.xlu1 %v7775_v46, %s6883_s26  ;;  %v1733_v23 = vadd.f32 %v7729_v49, %v1592_v47 }
 0x3ee   : > { %v1029_v32 = vadd.f32 %v11191_v1, %v888_v31 }
 0x3ef   : > { %v1765_v62 = vmul.f32 %v7766_v22, %v1733_v23 }
 0x3f0   : > { %v1170_v47 = vadd.f32 %v11192_v11, %v1029_v32 }
 0x3f1   : > { %v7809_v29 = vpop.f32.mrf.mxu2  ;;  %v1789_v23 = vadd.f32 %v7619_v63, %v1765_v62 }
 0x3f2   : > { %v7858_v0 = vpop.f32.mrf.mxu0  ;;  %v1311_v52 = vadd.f32 %v11194_v27, %v1170_v47 }
 0x3f3   : > { %v7814_v21 = vpop.f32.mrf.mxu1  ;;  %v7913_v1 = vmax.f32 %v1789_v23, 0.0  ;;  %v1944_v23 = vadd.f32 %v7755_v25, %v7595_v4 }
 0x3f4   : > { %2794 = vrot.lane.b32.xlu0 %v7811_v35, %s6881_s29  ;;  %2739 = vrot.lane.b32.xlu2 %v7777_v50, %s6882_s24  ;;  %v7862_v5 = vpop.f32.mrf.mxu3  ;;  %v1452_v31 = vadd.f32 %v7397_v33, %v1311_v52 }
 0x3f5   : > { %3378 = vrot.lane.b32.xlu1 %v7775_v46, %s6885_s11  ;;  %11195 = vst [vmem:[#allocation21_spill] sm:$0xff] %v7913_v1 }
 0x3f6   : > { %v1593_v9 = vadd.f32 %v7581_v8, %v1452_v31 }
 0x3f8   : > { %v1734_v62 = vadd.f32 %v7753_v17, %v1593_v9  ;;  %v2075_v17 = vadd.f32 %v7683_v38, %v1944_v23 }
 0x3f9   : > { %v7828_v39 = vpop.f32.mrf.mxu2 }
 0x3fa   : > { %v7878_v19 = vpop.f32.mrf.mxu0  ;;  %v1766_v8 = vmul.f32 %v7766_v22, %v1734_v62 }
 0x3fb   : > { %v7831_v54 = vpop.f32.mrf.mxu1 }
 0x3fc   : > { %2725 = vrot.lane.b32.xlu0 %v7811_v35, %s6882_s24  ;;  %3017 = vrot.lane.b32.xlu2 %v7777_v50, %s6883_s26  ;;  %v2414_v59 = vpop.f32.mrf.mxu3  ;;  %v1790_v9 = vadd.f32 %v7619_v63, %v1766_v8  ;;  %v2174_v22 = vadd.f32 %v7831_v54, %v2075_v17 }
 0x3fd   : > { %3525 = vrot.lane.b32.xlu1 %v7775_v46, %s6886_s15 }
 0x3fe   : > { %v7955_v62 = vmax.f32 %v1790_v9, 0.0  ;;  %v2257_v63 = vadd.f32 %v7798_v41, %v2174_v22 }
 0x400   : > { %11198 = vst [vmem:[#allocation16_spill] sm:$0xff] %v7955_v62 }
 0x401   : > { %v7843_v43 = vpop.f32.mrf.mxu2 }
 0x402   : > { %v7901_v12 = vpop.f32.mrf.mxu0 }
 0x403   : > { %v7847_v37 = vpop.f32.mrf.mxu1 }
 0x404   : > { %3150 = vrot.lane.b32.xlu0 %v7811_v35, %s6884_s30  ;;  %3394 = vrot.lane.b32.xlu2 %v7777_v50, %s6885_s11  ;;  %v7905_v49 = vpop.f32.mrf.mxu3 }
 0x405   : > { %2810 = vrot.lane.b32.xlu1 %v7845_v15, %s6881_s29 }
 0x409   : > { %v7860_v26 = vpop.f32.mrf.mxu2 }
 0x40a   : > { %v7927_v33 = vpop.f32.mrf.mxu0 }
 0x40b   : > { %v7864_v58 = vpop.f32.mrf.mxu1 }
 0x40c   : > { %3380 = vrot.lane.b32.xlu0 %v7811_v35, %s6885_s11  ;;  %3541 = vrot.lane.b32.xlu2 %v7777_v50, %s6886_s15  ;;  %v7929_v11 = vpop.f32.mrf.mxu3 }
 0x40d   : > { %2741 = vrot.lane.b32.xlu1 %v7845_v15, %s6882_s24 }
 0x411   : > { %v7875_v60 = vpop.f32.mrf.mxu2 }
 0x412   : > { %v7949_v4 = vpop.f32.mrf.mxu0 }
 0x413   : > { %v7880_v55 = vpop.f32.mrf.mxu1 }
 0x414   : > { %3019 = vrot.lane.b32.xlu0 %v7845_v15, %s6883_s26  ;;  %3003 = vrot.lane.b32.xlu2 %v7811_v35, %s6883_s26  ;;  %v7953_v31 = vpop.f32.mrf.mxu3 }
 0x415   : > { %3166 = vrot.lane.b32.xlu1 %v7845_v15, %s6884_s30 }
 0x419   : > { %v7892_v13 = vpop.f32.mrf.mxu2 }
 0x41a   : > { %v7978_v17 = vpop.f32.mrf.mxu0 }
 0x41b   : > { %v2315_v30 = vpop.f32.mrf.mxu1 }
 0x41c   : > { %3543 = vrot.lane.b32.xlu0 %v7845_v15, %s6886_s15  ;;  %3527 = vrot.lane.b32.xlu2 %v7811_v35, %s6886_s15  ;;  %v2356_v54 = vadd.f32 %v2315_v30, %v2257_v63  ;;  %v11204_v63 = vld [vmem:[#allocation44_spill] sm:$0xff] }
 0x41d   : > { %3396 = vrot.lane.b32.xlu1 %v7845_v15, %s6885_s11 }
 0x41e   : > { %v7909_v20 = vpop.permute.xlu2 %2721  ;;  %v2455_v9 = vadd.f32 %v2414_v59, %v2356_v54  ;;  %v11205_v54 = vld [vmem:[#allocation47_spill] sm:$0xff] }
 0x41f   : > { %11193 = vst [vmem:[#allocation20_spill] sm:$0xff] %v7909_v20 }
 0x421   : > { %v2344_v56 = vpop.f32.mrf.mxu2 }
 0x423   : > { %v7915_v36 = vpop.f32.mrf.mxu1 }
 0x424   : > { %3005 = vrot.lane.b32.xlu0 %v7913_v1, %s6883_s26  ;;  %2727 = vrot.lane.b32.xlu2 %v7913_v1, %s6882_s24 }
 0x425   : > { %2796 = vrot.lane.b32.xlu1 %v7913_v1, %s6881_s29 }
 0x426   : > { %v7925_v32 = vpop.permute.xlu2 %3376 }
 0x427   : > { %11196 = vst [vmem:[#allocation27_spill] sm:$0xff] %v7925_v32  ;;  %v11199_v32 = vld [vmem:[#allocation46_spill] sm:$0xff] }
 0x428   : > { %v1973_v20 = vadd.f32 %v7770_v14, %v11199_v32 }
 0x429   : > { %v7931_v47 = vpop.f32.mrf.mxu2 }
 0x42a   : > { %v2076_v38 = vadd.f32 %v7711_v61, %v1973_v20 }
 0x42b   : > { %v7936_v27 = vpop.f32.mrf.mxu1 }
 0x42c   : > { %3529 = vrot.lane.b32.xlu0 %v7913_v1, %s6886_s15  ;;  %3382 = vrot.lane.b32.xlu2 %v7913_v1, %s6885_s11  ;;  %v2175_v41 = vadd.f32 %v7843_v43, %v2076_v38 }
 0x42d   : > { %3152 = vrot.lane.b32.xlu1 %v7913_v1, %s6884_s30 }
 0x42e   : > { %v7946_v52 = vpop.permute.xlu2 %2806  ;;  %v2258_v46 = vadd.f32 %v7820_v48, %v2175_v41  ;;  %v1947_v41 = vadd.f32 %v7779_v10, %v11205_v54 }
 0x42f   : > { %11197 = vst [vmem:[#allocation17_spill] sm:$0xff] %v7946_v52  ;;  %v2612_v52 = vpop.f32.mrf.mxu3 }
 0x430   : > { %v2357_v61 = vadd.f32 %v2344_v56, %v2258_v46  ;;  %v2077_v56 = vadd.f32 %v7715_v53, %v1947_v41  ;;  %v1976_v53 = vadd.f32 %v7790_v44, %v7634_v3 }
 0x431   : > { %v7951_v25 = vpop.f32.mrf.mxu2 }
 0x433   : > { %v7959_v50 = vpop.f32.mrf.mxu1 }
 0x434   : > { %2743 = vrot.lane.b32.xlu0 %v7955_v62, %s6882_s24  ;;  %2812 = vrot.lane.b32.xlu2 %v7955_v62, %s6881_s29 }
 0x435   : > { %3021 = vrot.lane.b32.xlu1 %v7955_v62, %s6883_s26 }
 0x436   : > { %v7969_v8 = vpop.permute.xlu0 %2999  ;;  %v7971_v23 = vpop.permute.xlu2 %3162 }
 0x437   : > { %11200 = vst [vmem:[#allocation18_spill] sm:$0xff] %v7969_v8  ;;  %v7973_v14 = vpop.permute.xlu1 %2790 }
 0x438   : > { %11201 = vst [vmem:[#allocation19_spill] sm:$0xff] %v7971_v23 }
 0x439   : > { %v7976_v32 = vpop.f32.mrf.mxu2 }
 0x43b   : > { %v2513_v22 = vpop.f32.mrf.mxu1 }
 0x43c   : > { %v2554_v35 = vadd.f32 %v2513_v22, %v2455_v9  ;;  %3398 = vrot.lane.b32.xlu0 %v7955_v62, %s6885_s11  ;;  %3168 = vrot.lane.b32.xlu2 %v7955_v62, %s6884_s30  ;;  %v2456_v9 = vadd.f32 %v7901_v12, %v2357_v61  ;;  %v11206_v22 = vld [vmem:[#allocation45_spill] sm:$0xff]  ;;  %v2176_v12 = vadd.f32 %v7847_v37, %v2077_v56 }
 0x43d   : > { %3545 = vrot.lane.b32.xlu1 %v7955_v62, %s6886_s15 }
 0x43e   : > { %v2653_v43 = vadd.f32 %v2612_v52, %v2554_v35  ;;  %v7987_v30 = vpop.permute.xlu0 %3523  ;;  %v7989_v59 = vpop.permute.xlu2 %2792  ;;  %v2259_v61 = vadd.f32 %v7825_v45, %v2176_v12 }
 0x43f   : > { %11202 = vst [vmem:[#allocation22_spill] sm:$0xff] %v7987_v30  ;;  %v7991_v20 = vpop.permute.xlu1 %3146  ;;  %v2641_v35 = vpop.f32.mrf.mxu0 }
 0x440   : > { %11203 = vst [vmem:[#allocation23_spill] sm:$0xff] %v7991_v20  ;;  %v2677_v48 = vmul.f32 %v11204_v63, %v2653_v43  ;;  %v2358_v54 = vadd.f32 %v7915_v36, %v2259_v61  ;;  %v11216_v61 = vld [vmem:[#allocation43_spill] sm:$0xff]  ;;  %v6894_v20 = vmov 5  }
 0x441   : > { %v2542_v38 = vpop.f32.mrf.mxu2  ;;  %6602 = vset.pattern.permute.xlu0 %v6894_v20 }
 0x442   : > { %v2701_v23 = vadd.f32 %v11206_v22, %v2677_v48  ;;  %v2555_v46 = vadd.f32 %v2542_v38, %v2456_v9  ;;  %v2078_v38 = vadd.f32 %v7748_v28, %v1976_v53  ;;  %v2457_v45 = vadd.f32 %v7905_v49, %v2358_v54 }
 0x443   : > { %v2516_v36 = vpop.f32.mrf.mxu1 }
 0x444   : > { %v7998_v8 = vmax.f32 %v2701_v23, 0.0  ;;  %v2654_v23 = vadd.f32 %v2641_v35, %v2555_v46  ;;  %v2177_v44 = vadd.f32 %v7860_v26, %v2078_v38  ;;  %v2556_v9 = vadd.f32 %v2516_v36, %v2457_v45  ;;  %v2615_v35 = vpop.f32.mrf.mxu3 }
 0x446   : > { %11207 = vst [vmem:[#allocation46_spill] sm:$0xff] %v7998_v8  ;;  %2729 = vrot.lane.b32.xlu0 %v7998_v8, %s6882_s24  ;;  %v8003_v52 = vpop.permute.xlu0 %2737  ;;  %2798 = vrot.lane.b32.xlu2 %v7998_v8, %s6881_s29  ;;  %v8007_v43 = vpop.permute.xlu2 %3148  ;;  %v2678_v48 = vmul.f32 %v11204_v63, %v2654_v23  ;;  %v2260_v63 = vadd.f32 %v7839_v2, %v2177_v44  ;;  %v11215_v23 = vld [vmem:[#allocation49_spill] sm:$0xff] }
 0x447   : > { %11208 = vst [vmem:[#allocation44_spill] sm:$0xff] %v8003_v52  ;;  %3007 = vrot.lane.b32.xlu1 %v7998_v8, %s6883_s26  ;;  %v8011_v10 = vpop.permute.xlu1 %3015  ;;  %v2655_v49 = vadd.f32 %v2615_v35, %v2556_v9  ;;  %v2644_v54 = vpop.f32.mrf.mxu0 }
 0x448   : > { %11209 = vst [vmem:[#allocation47_spill] sm:$0xff] %v8007_v43  ;;  %v2702_v28 = vadd.f32 %v11206_v22, %v2678_v48  ;;  %v2359_v56 = vadd.f32 %v7931_v47, %v2260_v63  ;;  %v1950_v47 = vadd.f32 %v7796_v40, %v11215_v23 }
 0x449   : > { %v2545_v22 = vpop.f32.mrf.mxu2  ;;  %v2679_v48 = vmul.f32 %v11216_v61, %v2655_v49 }
 0x44a   : > { %v8036_v46 = vmax.f32 %v2702_v28, 0.0  ;;  %v2458_v53 = vadd.f32 %v7927_v33, %v2359_v56  ;;  %v2079_v44 = vadd.f32 %v7750_v7, %v1950_v47 }
 0x44b   : > { %v2703_v45 = vadd.f32 %v7669_v57, %v2679_v48  ;;  %v2519_v23 = vpop.f32.mrf.mxu1 }
 0x44c   : > { %11213 = vst [vmem:[#allocation59_spill] sm:$0xff] %v8036_v46  ;;  %v2557_v38 = vadd.f32 %v2545_v22, %v2458_v53  ;;  %v2178_v33 = vadd.f32 %v7864_v58, %v2079_v44  ;;  %v2618_v48 = vpop.f32.mrf.mxu3  ;;  %v11224_v44 = vld [vmem:[#allocation48_spill] sm:$0xff] }
 0x44d   : > { %v8071_v9 = vmax.f32 %v2703_v45, 0.0 }
 0x44e   : > { %3384 = vrot.lane.b32.xlu0 %v7998_v8, %s6885_s11  ;;  %v8022_v41 = vpop.permute.xlu0 %3392  ;;  %3154 = vrot.lane.b32.xlu2 %v7998_v8, %s6884_s30  ;;  %v8026_v37 = vpop.permute.xlu2 %2739  ;;  %v2656_v7 = vadd.f32 %v2644_v54, %v2557_v38  ;;  %v2261_v63 = vadd.f32 %v7841_v24, %v2178_v33 }
 0x44f   : > { %11210 = vst [vmem:[#allocation45_spill] sm:$0xff] %v8022_v41  ;;  %3531 = vrot.lane.b32.xlu1 %v7998_v8, %s6886_s15  ;;  %v8030_v3 = vpop.permute.xlu1 %3539 }
 0x450   : > { %11211 = vst [vmem:[#allocation57_spill] sm:$0xff] %v8026_v37  ;;  %v2680_v35 = vmul.f32 %v11216_v61, %v2656_v7  ;;  %v2360_v56 = vadd.f32 %v7936_v27, %v2261_v63  ;;  %v1979_v27 = vadd.f32 %v7809_v29, %v7658_v34  ;;  %v11278_v37 = vld [vmem:[#allocation26_spill] sm:$0xff] }
 0x451   : > { %11212 = vst [vmem:[#allocation58_spill] sm:$0xff] %v8030_v3  ;;  %v11252_v3 = vld [vmem:[#allocation54_spill] sm:$0xff] }
 0x452   : > { %11219 = vst [vmem:[#allocation61_spill] sm:$0xff] %v8071_v9  ;;  %v2704_v22 = vadd.f32 %v7669_v57, %v2680_v35  ;;  %v2459_v47 = vadd.f32 %v7929_v11, %v2360_v56  ;;  %v2080_v38 = vadd.f32 %v7768_v16, %v1979_v27  ;;  %v2548_v56 = vpop.f32.mrf.mxu2  ;;  %v2647_v27 = vpop.f32.mrf.mxu0 }
 0x454   : > { %v2558_v53 = vadd.f32 %v2519_v23, %v2459_v47  ;;  %v8091_v61 = vmax.f32 %v2704_v22, 0.0  ;;  %v2179_v29 = vadd.f32 %v7875_v60, %v2080_v38 }
 0x456   : > { %2814 = vrot.lane.b32.xlu0 %v8036_v46, %s6881_s29  ;;  %v8041_v12 = vpop.permute.xlu0 %2808  ;;  %3678 = vrot.lane.b32.xlu2 %v7998_v8, %s6887_s19  ;;  %v8045_v26 = vpop.permute.xlu2 %3017  ;;  %11222 = vst [vmem:[#allocation64_spill] sm:$0xff] %v8091_v61  ;;  %v2657_v11 = vadd.f32 %v2618_v48, %v2558_v53  ;;  %v2262_v16 = vadd.f32 %v7858_v0, %v2179_v29  ;;  %v11227_v0 = vld [vmem:[#allocation50_spill] sm:$0xff] }
 0x457   : > { %2745 = vrot.lane.b32.xlu1 %v8036_v46, %s6882_s24  ;;  %v8049_v2 = vpop.permute.xlu1 %2723 }
 0x458   : > { %11214 = vst [vmem:[#allocation60_spill] sm:$0xff] %v8049_v2  ;;  %v2681_v33 = vmul.f32 %v11224_v44, %v2657_v11  ;;  %v2361_v45 = vadd.f32 %v7951_v25, %v2262_v16 }
 0x45a   : > { %v2705_v35 = vadd.f32 %v11227_v0, %v2681_v33  ;;  %v2460_v25 = vadd.f32 %v7949_v4, %v2361_v45  ;;  %v11232_v45 = vld [vmem:[#allocation51_spill] sm:$0xff] }
 0x45c   : > { %v8124_v22 = vmax.f32 %v2705_v35, 0.0  ;;  %v2559_v23 = vadd.f32 %v2548_v56, %v2460_v25 }
 0x45e   : > { %3170 = vrot.lane.b32.xlu0 %v8036_v46, %s6884_s30  ;;  %v8058_v28 = vpop.permute.xlu0 %3164  ;;  %3023 = vrot.lane.b32.xlu2 %v8036_v46, %s6883_s26  ;;  %v8062_v36 = vpop.permute.xlu2 %3394  ;;  %11228 = vst [vmem:[#allocation50_spill] sm:$0xff] %v8124_v22  ;;  %v2658_v4 = vadd.f32 %v2647_v27, %v2559_v23 }
 0x45f   : > { %11217 = vst [vmem:[#allocation49_spill] sm:$0xff] %v8058_v28  ;;  %3400 = vrot.lane.b32.xlu1 %v8036_v46, %s6885_s11  ;;  %v8066_v40 = vpop.permute.xlu1 %3001 }
 0x460   : > { %11218 = vst [vmem:[#allocation43_spill] sm:$0xff] %v8062_v36  ;;  %v2682_v38 = vmul.f32 %v11224_v44, %v2658_v4  ;;  %v1953_v44 = vadd.f32 %v7814_v21, %v11232_v45 }
 0x462   : > { %v2706_v33 = vadd.f32 %v11227_v0, %v2682_v38  ;;  %v2081_v56 = vadd.f32 %v7772_v18, %v1953_v44  ;;  %v2621_v44 = vpop.f32.mrf.mxu3 }
 0x464   : > { %v8154_v35 = vmax.f32 %v2706_v33, 0.0  ;;  %v2180_v21 = vadd.f32 %v7880_v55, %v2081_v56  ;;  %v2522_v55 = vpop.f32.mrf.mxu1 }
 0x466   : > { %2800 = vrot.lane.b32.xlu0 %v8071_v9, %s6881_s29  ;;  %v8077_v49 = vpop.permute.xlu0 %2794  ;;  %3547 = vrot.lane.b32.xlu2 %v8036_v46, %s6886_s15  ;;  %v8081_v58 = vpop.permute.xlu2 %3541  ;;  %11233 = vst [vmem:[#allocation51_spill] sm:$0xff] %v8154_v35  ;;  %v2263_v27 = vadd.f32 %v7862_v5, %v2180_v21  ;;  %v1982_v5 = vadd.f32 %v7828_v39, %v7678_v42 }
 0x467   : > { %11220 = vst [vmem:[#allocation62_spill] sm:$0xff] %v8081_v58  ;;  %2731 = vrot.lane.b32.xlu1 %v8071_v9, %s6882_s24  ;;  %v8085_v24 = vpop.permute.xlu1 %3378 }
 0x468   : > { %11221 = vst [vmem:[#allocation63_spill] sm:$0xff] %v8085_v24  ;;  %v2362_v18 = vadd.f32 %v7959_v50, %v2263_v27  ;;  %v2082_v56 = vadd.f32 %v7793_v51, %v1982_v5 }
 0x46a   : > { %v2461_v50 = vadd.f32 %v7953_v31, %v2362_v18  ;;  %v2181_v42 = vadd.f32 %v7892_v13, %v2082_v56  ;;  %v11239_v18 = vld [vmem:[#allocation40_spill] sm:$0xff] }
 0x46c   : > { %v2560_v45 = vadd.f32 %v2522_v55, %v2461_v50  ;;  %v2264_v51 = vadd.f32 %v7878_v19, %v2181_v42 }
 0x46e   : > { %3009 = vrot.lane.b32.xlu0 %v8071_v9, %s6883_s26  ;;  %v8096_v54 = vpop.permute.xlu0 %2725  ;;  %2747 = vrot.lane.b32.xlu2 %v8091_v61, %s6882_s24  ;;  %v8100_v57 = vpop.permute.xlu2 %3003  ;;  %v2659_v39 = vadd.f32 %v2621_v44, %v2560_v45  ;;  %v2363_v5 = vadd.f32 %v7976_v32, %v2264_v51 }
 0x46f   : > { %3386 = vrot.lane.b32.xlu1 %v8071_v9, %s6885_s11  ;;  %v8104_v34 = vpop.permute.xlu1 %3525  ;;  %v2551_v44 = vpop.f32.mrf.mxu2 }
 0x470   : > { %11223 = vst [vmem:[#allocation65_spill] sm:$0xff] %v8104_v34  ;;  %v2683_v55 = vmul.f32 %v11239_v18, %v2659_v39  ;;  %v2462_v32 = vadd.f32 %v7978_v17, %v2363_v5  ;;  %v2650_v39 = vpop.f32.mrf.mxu0 }
 0x472   : > { %v2707_v45 = vadd.f32 %v7744_v6, %v2683_v55  ;;  %v2561_v42 = vadd.f32 %v2551_v44, %v2462_v32 }
 0x474   : > { %v8218_v56 = vmax.f32 %v2707_v45, 0.0  ;;  %v2660_v51 = vadd.f32 %v2650_v39, %v2561_v42 }
 0x476   : > { %3156 = vrot.lane.b32.xlu0 %v8071_v9, %s6884_s30  ;;  %v8112_v7 = vpop.permute.xlu0 %3150  ;;  %3402 = vrot.lane.b32.xlu2 %v8091_v61, %s6885_s11  ;;  %v8116_v63 = vpop.permute.xlu2 %3527  ;;  %11241 = vst [vmem:[#allocation75_spill] sm:$0xff] %v8218_v56  ;;  %v2684_v17 = vmul.f32 %v11239_v18, %v2660_v51 }
 0x477   : > { %11225 = vst [vmem:[#allocation48_spill] sm:$0xff] %v8112_v7  ;;  %2816 = vrot.lane.b32.xlu1 %v8091_v61, %s6881_s29  ;;  %v8120_v60 = vpop.permute.xlu1 %2810 }
 0x478   : > { %11226 = vst [vmem:[#allocation66_spill] sm:$0xff] %v8116_v63  ;;  %v2708_v5 = vadd.f32 %v7744_v6, %v2684_v17  ;;  %v11255_v63 = vld [vmem:[#allocation52_spill] sm:$0xff] }
 0x47a   : > { %v8246_v42 = vmax.f32 %v2708_v5, 0.0 }
 0x47e   : > { %3533 = vrot.lane.b32.xlu0 %v8071_v9, %s6886_s15  ;;  %v8128_v47 = vpop.permute.xlu0 %3380  ;;  %2733 = vrot.lane.b32.xlu2 %v8124_v22, %s6882_s24  ;;  %v8132_v53 = vpop.permute.xlu2 %2727 }
 0x47f   : > { %11229 = vst [vmem:[#allocation67_spill] sm:$0xff] %v8128_v47  ;;  %3025 = vrot.lane.b32.xlu1 %v8091_v61, %s6883_s26  ;;  %v8136_v48 = vpop.permute.xlu1 %2741 }
 0x486   : > { %3680 = vrot.lane.b32.xlu0 %v8071_v9, %s6887_s19  ;;  %v8141_v29 = vpop.permute.xlu0 %3019  ;;  %3011 = vrot.lane.b32.xlu2 %v8124_v22, %s6883_s26  ;;  %v8145_v11 = vpop.permute.xlu2 %3382 }
 0x487   : > { %11230 = vst [vmem:[#allocation68_spill] sm:$0xff] %v8145_v11  ;;  %3172 = vrot.lane.b32.xlu1 %v8091_v61, %s6884_s30  ;;  %v8149_v16 = vpop.permute.xlu1 %3166 }
 0x488   : > { %11231 = vst [vmem:[#allocation69_spill] sm:$0xff] %v8149_v16 }
 0x48e   : > { %2749 = vrot.lane.b32.xlu0 %v8154_v35, %s6882_s24  ;;  %v8159_v25 = vpop.permute.xlu0 %3543  ;;  %3388 = vrot.lane.b32.xlu2 %v8124_v22, %s6885_s11  ;;  %v8163_v23 = vpop.permute.xlu2 %2812 }
 0x48f   : > { %11234 = vst [vmem:[#allocation70_spill] sm:$0xff] %v8159_v25  ;;  %3549 = vrot.lane.b32.xlu1 %v8091_v61, %s6886_s15  ;;  %v8167_v0 = vpop.permute.xlu1 %3396 }
 0x490   : > { %11235 = vst [vmem:[#allocation71_spill] sm:$0xff] %v8167_v0  ;;  %v11251_v0 = vld [vmem:[#allocation56_spill] sm:$0xff] }
 0x496   : > { %3027 = vrot.lane.b32.xlu0 %v8154_v35, %s6883_s26  ;;  %v8174_v4 = vpop.permute.xlu0 %3005  ;;  %3535 = vrot.lane.b32.xlu2 %v8124_v22, %s6886_s15  ;;  %v8182_v33 = vpop.permute.xlu2 %3168 }
 0x497   : > { %3696 = vrot.lane.b32.xlu1 %v8091_v61, %s6887_s19  ;;  %v8180_v38 = vpop.permute.xlu1 %2796  ;;  %11236 = vst [vmem:[#allocation72_spill] sm:$0xff] %v8182_v33 }
 0x49e   : > { %3404 = vrot.lane.b32.xlu0 %v8154_v35, %s6885_s11  ;;  %v8190_v21 = vpop.permute.xlu0 %3529  ;;  %2818 = vrot.lane.b32.xlu2 %v8154_v35, %s6881_s29 }
 0x49f   : > { %11237 = vst [vmem:[#allocation73_spill] sm:$0xff] %v8190_v21  ;;  %2802 = vrot.lane.b32.xlu1 %v8124_v22, %s6881_s29  ;;  %v8196_v27 = vpop.permute.xlu1 %3152 }
 0x4a0   : > { %11238 = vst [vmem:[#allocation74_spill] sm:$0xff] %v8196_v27  ;;  %v8199_v31 = vpop.permute.xlu2 %2798 }
 0x4a6   : > { %3551 = vrot.lane.b32.xlu0 %v8154_v35, %s6886_s15  ;;  %v8206_v50 = vpop.permute.xlu0 %2743  ;;  %3174 = vrot.lane.b32.xlu2 %v8154_v35, %s6884_s30 }
 0x4a7   : > { %3158 = vrot.lane.b32.xlu1 %v8124_v22, %s6884_s30  ;;  %v8212_v13 = vpop.permute.xlu1 %3021 }
 0x4a8   : > { %v8215_v19 = vpop.permute.xlu2 %3154 }
 0x4a9   : > { %11240 = vst [vmem:[#allocation40_spill] sm:$0xff] %v8215_v19 }
 0x4ae   : > { %2735 = vrot.lane.b32.xlu0 %v8218_v56, %s6882_s24  ;;  %3698 = vrot.lane.b32.xlu2 %v8154_v35, %s6887_s19  ;;  %v8226_v55 = vpop.permute.xlu0 %3398 }
 0x4af   : > { %3682 = vrot.lane.b32.xlu1 %v8124_v22, %s6887_s19  ;;  %11242 = vst [vmem:[#allocation76_spill] sm:$0xff] %v8226_v55  ;;  %v8230_v24 = vpop.permute.xlu1 %3545 }
 0x4b0   : > { %v8228_v41 = vpop.permute.xlu2 %3678  ;;  %11244 = vst [vmem:[#allocation78_spill] sm:$0xff] %v8230_v24 }
 0x4b1   : > { %11243 = vst [vmem:[#allocation77_spill] sm:$0xff] %v8228_v41 }
 0x4b6   : > { %3390 = vrot.lane.b32.xlu0 %v8218_v56, %s6885_s11  ;;  %2804 = vrot.lane.b32.xlu2 %v8218_v56, %s6881_s29 }
 0x4b7   : > { %3013 = vrot.lane.b32.xlu1 %v8218_v56, %s6883_s26 }
 0x4b8   : > { %v8240_v45 = vpop.permute.xlu0 %2729  ;;  %v8242_v44 = vpop.permute.xlu2 %3023 }
 0x4b9   : > { %v8244_v32 = vpop.permute.xlu1 %3007 }
 0x4be   : > { %2820 = vrot.lane.b32.xlu0 %v8246_v42, %s6881_s29  ;;  %3160 = vrot.lane.b32.xlu2 %v8218_v56, %s6884_s30  ;;  %s6895_s29 = smov 32  }
 0x4bf   : > { %3537 = vrot.lane.b32.xlu1 %v8218_v56, %s6886_s15 }
 0x4c0   : > { %v8254_v18 = vpop.permute.xlu0 %3384  ;;  %v8256_v6 = vpop.permute.xlu2 %3547 }
 0x4c1   : > { %11245 = vst [vmem:[#allocation79_spill] sm:$0xff] %v8254_v18  ;;  %v8258_v39 = vpop.permute.xlu1 %3531  ;;  %v11253_v18 = vld [vmem:[#allocation55_spill] sm:$0xff] }
 0x4c2   : > { %11246 = vst [vmem:[#allocation80_spill] sm:$0xff] %v8256_v6 }
 0x4c3   : > { %11247 = vst [vmem:[#allocation81_spill] sm:$0xff] %v8258_v39 }
 0x4c6   : > { %3694 = vrot.lane.b32.xlu0 %v8036_v46, %s6887_s19  ;;  %3684 = vrot.lane.b32.xlu2 %v8218_v56, %s6887_s19 }
 0x4c7   : > { %3676 = vrot.lane.b32.xlu1 %v7913_v1, %s6887_s19 }
 0x4c8   : > { %v8266_v51 = vpop.permute.xlu0 %2814  ;;  %v8268_v17 = vpop.permute.xlu2 %2747 }
 0x4c9   : > { %v8270_v5 = vpop.permute.xlu1 %2745 }
 0x4ce   : > { %3831 = vrot.lane.b32.xlu0 %v8218_v56, %s6888_s22  ;;  %3692 = vrot.lane.b32.xlu2 %v7955_v62, %s6887_s19 }
 0x4cf   : > { %3829 = vrot.lane.b32.xlu1 %v8124_v22, %s6888_s22 }
 0x4d0   : > { %v8278_v41 = vpop.permute.xlu0 %3170  ;;  %v8280_v36 = vpop.permute.xlu2 %3402 }
 0x4d1   : > { %11248 = vst [vmem:[#allocation82_spill] sm:$0xff] %v8278_v41  ;;  %v8282_v47 = vpop.permute.xlu1 %3400 }
 0x4d2   : > { %11249 = vst [vmem:[#allocation83_spill] sm:$0xff] %v8280_v36  ;;  %v6893_v36 = vmov 4  }
 0x4d3   : > { %11250 = vst [vmem:[#allocation84_spill] sm:$0xff] %v8282_v47  ;;  %6600 = vset.pattern.permute.xlu1 %v6893_v36  ;;  %6601 = vset.pattern.permute.xlu2 %v6893_v36 }
 0x4d6   : > { %3690 = vrot.lane.b32.xlu0 %v7845_v15, %s6887_s19  ;;  %3674 = vrot.lane.b32.xlu2 %v11251_v0, %s6887_s19 }
 0x4d7   : > { %2751 = vrot.lane.b32.xlu1 %v8246_v42, %s6882_s24  ;;  %s6896_s24 = smov 34  }
 0x4d8   : > { %v8290_v11 = vpop.permute.xlu0 %2800  ;;  %v8292_v55 = vpop.permute.xlu2 %2733 }
 0x4d9   : > { %v8294_v30 = vpop.permute.xlu1 %2731 }
 0x4de   : > { %3672 = vrot.lane.b32.xlu0 %v11252_v3, %s6887_s19  ;;  %3845 = vrot.lane.b32.xlu2 %v8154_v35, %s6888_s22 }
 0x4df   : > { %3688 = vrot.lane.b32.xlu1 %v11253_v18, %s6887_s19 }
 0x4e0   : > { %v8302_v47 = vpop.permute.xlu0 %3009  ;;  %v8304_v34 = vpop.permute.xlu2 %3011 }
 0x4e1   : > { %v8306_v58 = vpop.permute.xlu1 %3386 }
 0x4e2   : > { %11254 = vst [vmem:[#allocation56_spill] sm:$0xff] %v8306_v58 }
 0x4e6   : > { %3843 = vrot.lane.b32.xlu0 %v8091_v61, %s6888_s22  ;;  %3029 = vrot.lane.b32.xlu2 %v8246_v42, %s6883_s26  ;;  %s6897_s26 = smov 30  }
 0x4e7   : > { %3670 = vrot.lane.b32.xlu1 %v11255_v63, %s6887_s19 }
 0x4e8   : > { %v8314_v25 = vpop.permute.xlu0 %3156  ;;  %v8316_v21 = vpop.permute.xlu2 %3388 }
 0x4e9   : > { %11256 = vst [vmem:[#allocation55_spill] sm:$0xff] %v8314_v25  ;;  %v8318_v24 = vpop.permute.xlu1 %2816  ;;  %v6650_v25 = vld [vmem:[#allocation10 + $0x10] sm:$0xff] }
 0x4ea   : > { %11257 = vst [vmem:[#allocation85_spill] sm:$0xff] %v8316_v21  ;;  %v11260_v21 = vld [vmem:[#allocation53_spill] sm:$0xff] }
 0x4ee   : > { %3825 = vrot.lane.b32.xlu0 %v7998_v8, %s6888_s22  ;;  %3827 = vrot.lane.b32.xlu2 %v8071_v9, %s6888_s22 }
 0x4ef   : > { %3841 = vrot.lane.b32.xlu1 %v8036_v46, %s6888_s22 }
 0x4f0   : > { %v8326_v58 = vpop.permute.xlu0 %3533  ;;  %v8328_v39 = vpop.permute.xlu2 %3535 }
 0x4f1   : > { %11258 = vst [vmem:[#allocation86_spill] sm:$0xff] %v8326_v58  ;;  %v8330_v6 = vpop.permute.xlu1 %3025 }
 0x4f2   : > { %11259 = vst [vmem:[#allocation87_spill] sm:$0xff] %v8328_v39 }
 0x4f6   : > { %3176 = vrot.lane.b32.xlu0 %v8246_v42, %s6884_s30  ;;  %3686 = vrot.lane.b32.xlu2 %v11260_v21, %s6887_s19  ;;  %s6898_s30 = smov 2  }
 0x4f7   : > { %3821 = vrot.lane.b32.xlu1 %v11251_v0, %s6888_s22 }
 0x4f8   : > { %v8338_v28 = vpop.permute.xlu0 %3680  ;;  %v2819_v43 = vpop.permute.xlu2 %2818 }
 0x4f9   : > { %11261 = vst [vmem:[#allocation88_spill] sm:$0xff] %v8338_v28  ;;  %v8340_v16 = vpop.permute.xlu1 %3172  ;;  %v6649_v28 = vld [vmem:[#allocation10 + $0x18] sm:$0xff] }
 0x4fa   : > { %11262 = vst [vmem:[#allocation89_spill] sm:$0xff] %v8340_v16 }
 0x4fe   : > { %3839 = vrot.lane.b32.xlu0 %v7955_v62, %s6888_s22  ;;  %3823 = vrot.lane.b32.xlu2 %v7913_v1, %s6888_s22 }
 0x4ff   : > { %3835 = vrot.lane.b32.xlu1 %v11253_v18, %s6888_s22 }
 0x500   : > { %v8348_v58 = vpop.permute.xlu0 %2749  ;;  %v8350_v39 = vpop.permute.xlu2 %3174 }
 0x501   : > { %11263 = vst [vmem:[#allocation90_spill] sm:$0xff] %v8350_v39  ;;  %v8352_v7 = vpop.permute.xlu1 %3549 }
 0x502   : > { %11264 = vst [vmem:[#allocation91_spill] sm:$0xff] %v8352_v7 }
 0x506   : > { %3819 = vrot.lane.b32.xlu0 %v11252_v3, %s6888_s22  ;;  %3837 = vrot.lane.b32.xlu2 %v7845_v15, %s6888_s22 }
 0x507   : > { %3972 = vperm.xlu1 %6600, %v6649_v28  }
 0x508   : > { %v8358_v33 = vpop.permute.xlu0 %3027  ;;  %v8360_v27 = vpop.permute.xlu2 %3698 }
 0x509   : > { %11265 = vst [vmem:[#allocation92_spill] sm:$0xff] %v8360_v27  ;;  %v8362_v41 = vpop.permute.xlu1 %3696 }
 0x50a   : > { %11266 = vst [vmem:[#allocation93_spill] sm:$0xff] %v8362_v41 }
 0x50e   : > { %3833 = vrot.lane.b32.xlu0 %v11260_v21, %s6888_s22  ;;  %3817 = vrot.lane.b32.xlu2 %v11255_v63, %s6888_s22  ;;  %v6651_v21 = vld [vmem:[#allocation10 + $0x8] sm:$0xff] }
 0x50f   : > { %4297 = vrot.lane.b32.xlu1 %v8218_v56, %s6895_s29  ;;  %v2827_v56 = vsel %vm1831_vm3, %v8290_v11, %v8318_v24 }
 0x510   : > { %v8370_v7 = vpop.permute.xlu0 %3404  ;;  %v2805_v19 = vpop.permute.xlu2 %2804 }
 0x511   : > { %11267 = vst [vmem:[#allocation94_spill] sm:$0xff] %v8370_v7  ;;  %v2803_v16 = vpop.permute.xlu1 %2802 }
 0x516   : > { %3996 = vperm.xlu0 %6602, %v6649_v28   ;;  %3968 = vperm.xlu2 %6601, %v6650_v25  }
 0x517   : > { %3406 = vrot.lane.b32.xlu1 %v8246_v42, %s6885_s11  ;;  %s6899_s11 = smov 126  }
 0x518   : > { %v8374_v41 = vpop.permute.xlu0 %3551  ;;  %v8376_v27 = vpop.permute.xlu2 %3160 }
 0x519   : > { %11268 = vst [vmem:[#allocation95_spill] sm:$0xff] %v8374_v41  ;;  %v8378_v39 = vpop.permute.xlu1 %3158 }
 0x51a   : > { %11269 = vst [vmem:[#allocation96_spill] sm:$0xff] %v8376_v27 }
 0x51b   : > { %11270 = vst [vmem:[#allocation97_spill] sm:$0xff] %v8378_v39  ;;  %v2836_v39 = vsel %vm1831_vm3, %v2819_v43, %v2803_v16 }
 0x51e   : > { %4295 = vrot.lane.b32.xlu0 %v8124_v22, %s6895_s29  ;;  %6603 = vset.pattern.permute.xlu2 %v6894_v20 }
 0x51f   : > { %3964 = vperm.xlu1 %6600, %v6651_v21   ;;  %3992 = vperm.xlu2 %6603, %v6650_v25   ;;  %v6652_v25 = vld [vmem:[#allocation10] sm:$0xff] }
 0x520   : > { %v8382_v7 = vpop.permute.xlu0 %2735  ;;  %v8384_v28 = vpop.permute.xlu2 %3684 }
 0x521   : > { %11271 = vst [vmem:[#allocation98_spill] sm:$0xff] %v8384_v28  ;;  %v8386_v52 = vpop.permute.xlu1 %3682  ;;  %v11276_v28 = vld [vmem:[#allocation24_spill] sm:$0xff] }
 0x522   : > { %11272 = vst [vmem:[#allocation99_spill] sm:$0xff] %v8386_v52  ;;  %vm4315_vm12 = vcmp.lt.s32.totalorder %v11276_v28, 32  ;;  %vm4238_vm13 = vcmp.lt.s32.totalorder %v11276_v28, 34  ;;  %vm4532_vm14 = vcmp.lt.s32.totalorder %v11276_v28, 30  ;;  %vm4687_vm15 = vcmp.lt.s32.totalorder %v11276_v28, 2 }
 0x523   : > { %vm4925_vm0 = vcmp.lt.s32.totalorder %v11276_v28, 126  ;;  %vm5080_vm1 = vcmp.lt.s32.totalorder %v11276_v28, 98  ;;  %vm5235_vm4 = vcmp.lt.s32.totalorder %v11276_v28, 96 }
 0x526   : > { %3988 = vperm.xlu0 %6602, %v6651_v21  }
 0x527   : > { %4311 = vrot.lane.b32.xlu1 %v8154_v35, %s6895_s29  ;;  %3553 = vrot.lane.b32.xlu2 %v8246_v42, %s6886_s15  ;;  %v2828_v35 = vsel %vm1831_vm3, %v2803_v16, %v2819_v43  ;;  %v2834_v43 = vsel %vm1831_vm3, %v8266_v51, %v8199_v31  ;;  %s6900_s15 = smov 98  }
 0x528   : > { %v8392_v41 = vpop.permute.xlu0 %3390  ;;  %v8394_v27 = vpop.permute.xlu2 %3692  ;;  %6604 = vset.pattern.permute.xlu2 %v6893_v36  ;;  %v2851_v16 = vmul.f32 %v2828_v35, %v11278_v37 }
 0x529   : > { %11273 = vst [vmem:[#allocation100_spill] sm:$0xff] %v8392_v41  ;;  %v8396_v20 = vpop.permute.xlu1 %3013 }
 0x52a   : > { %11274 = vst [vmem:[#allocation101_spill] sm:$0xff] %v8394_v27 }
 0x52e   : > { %3700 = vrot.lane.b32.xlu0 %v8246_v42, %s6887_s19  ;;  %s6901_s19 = smov 96  }
 0x52f   : > { %4293 = vrot.lane.b32.xlu1 %v8071_v9, %s6895_s29  ;;  %3960 = vperm.xlu2 %6604, %v6652_v25   ;;  %v11277_v9 = vld [vmem:[#allocation25_spill] sm:$0xff] }
 0x530   : > { %v2821_v21 = vpop.permute.xlu0 %2820  ;;  %v8402_v52 = vpop.permute.xlu2 %3674 }
 0x531   : > { %11275 = vst [vmem:[#allocation102_spill] sm:$0xff] %v8402_v52  ;;  %v2829_v27 = vsel %vm1831_vm3, %v2805_v19, %v2821_v21  ;;  %v2837_v36 = vsel %vm1831_vm3, %v2821_v21, %v2805_v19  ;;  %v8410_v41 = vpop.permute.xlu1 %3537  ;;  %v2835_v52 = vsel %vm1831_vm3, %v8318_v24, %v8290_v11  ;;  %v2850_v19 = vmul.f32 %v2836_v39, %v11277_v9 }
 0x532   : > { %v2852_v22 = vmul.f32 %v2837_v36, %v11277_v9  ;;  %v2853_v2 = vmul.f32 %v2829_v27, %v11278_v37  ;;  %v2826_v27 = vsel %vm1831_vm3, %v8199_v31, %v8266_v51  ;;  %v2848_v24 = vmul.f32 %v2835_v52, %v11277_v9 }
 0x533   : > { %v2825_v11 = vsel %vm1831_vm3, %v8180_v38, %v8163_v23  ;;  %v2846_v31 = vmul.f32 %v2834_v43, %v11277_v9  ;;  %v2823_v36 = vsel %vm1831_vm3, %v7989_v59, %v8041_v12 }
 0x534   : > { %2874 = vmatpush.msra.mxu1 %v2852_v22  ;;  %2903 = vmatpush.msrb.mxu2 %v2853_v2  ;;  %v2833_v2 = vsel %vm1831_vm3, %v8163_v23, %v8180_v38  ;;  %v2849_v22 = vmul.f32 %v2827_v56, %v11278_v37  ;;  %v2832_v56 = vsel %vm1831_vm3, %v8120_v60, %v8077_v49 }
 0x535   : > { %v2847_v23 = vmul.f32 %v2826_v27, %v11278_v37  ;;  %v2824_v38 = vsel %vm1831_vm3, %v8077_v49, %v8120_v60  ;;  %v2844_v51 = vmul.f32 %v2833_v2, %v11277_v9  ;;  %v2845_v21 = vmul.f32 %v2825_v11, %v11278_v37  ;;  %v11279_v49 = vld [vmem:[#allocation17_spill] sm:$0xff]  ;;  %v2786_v2 = vld [vmem:[#allocation7 + $0x20] sm:$0xff] }
 0x536   : > { %3984 = vperm.xlu0 %6602, %v6652_v25   ;;  %2875 = vmatpush.msra.mxu1 %v2850_v19  ;;  %v2831_v25 = vsel %vm1831_vm3, %v8041_v12, %v7989_v59  ;;  %v2842_v19 = vmul.f32 %v2832_v56, %v11277_v9  ;;  %v2830_v60 = vsel %vm1831_vm3, %v11279_v49, %v7973_v14 }
 0x537   : > { %4291 = vrot.lane.b32.xlu1 %v7998_v8, %s6895_s29  ;;  %2904 = vmatpush.msrb.mxu2 %v2851_v16  ;;  %v2843_v43 = vmul.f32 %v2824_v38, %v11278_v37  ;;  %v2822_v16 = vsel %vm1831_vm3, %v7973_v14, %v11279_v49  ;;  %v2840_v59 = vmul.f32 %v2831_v25, %v11277_v9  ;;  %v11280_v38 = vld [vmem:[#allocation28_spill] sm:$0xff]  ;;  %v11281_v25 = vld [vmem:[#allocation29_spill] sm:$0xff]  ;;  %vm4019_vm3 = vcmask 261120  }
 0x538   : > { %4309 = vrot.lane.b32.xlu2 %v8091_v61, %s6895_s29  ;;  %v8448_v52 = vpop.permute.xlu0 %3694  ;;  %v8450_v35 = vpop.permute.xlu2 %3845  ;;  %2876 = vmatpush.msra.mxu1 %v2848_v24  ;;  %v2841_v12 = vmul.f32 %v2823_v36, %v11278_v37  ;;  %v2838_v14 = vmul.f32 %v2830_v60, %v11277_v9  ;;  %v3037_v9 = vsel %vm1993_vm5, %v8304_v34, %v8358_v33 }
 0x539   : > { %2905 = vmatpush.msrb.mxu2 %v2849_v22  ;;  %v8457_v39 = vpop.permute.xlu1 %3676  ;;  %v3045_v22 = vsel %vm1993_vm5, %v8358_v33, %v8304_v34  ;;  %v3043_v33 = vsel %vm1993_vm5, %v8242_v44, %v8244_v32  ;;  %v3060_v36 = vmul.f32 %v3037_v9, %v11281_v25 }
 0x53a   : > { %2877 = vmatpush.msra.mxu1 %v2846_v31  ;;  %v3059_v34 = vmul.f32 %v3045_v22, %v11280_v38  ;;  %v3055_v60 = vmul.f32 %v3043_v33, %v11280_v38  ;;  %v2767_v22 = vsel %vm1811_vm6, %v8348_v58, %v8292_v55 }
 0x53b   : > { %2906 = vmatpush.msrb.mxu2 %v2847_v23  ;;  %v2839_v23 = vmul.f32 %v2822_v16, %v11278_v37  ;;  %v3036_v37 = vsel %vm1993_vm5, %v8302_v47, %v8330_v6  ;;  %v11282_v16 = vld [vmem:[#allocation18_spill] sm:$0xff] }
 0x53c   : > { %2878 = vmatpush.msra.mxu1 %v2844_v51  ;;  %v3058_v49 = vmul.f32 %v3036_v37, %v11281_v25  ;;  %v2766_v37 = vsel %vm1811_vm6, %v8268_v17, %v8294_v30 }
 0x53d   : > { %2907 = vmatpush.msrb.mxu2 %v2845_v21 }
 0x53e   : > { %4289 = vrot.lane.b32.xlu0 %v7913_v1, %s6895_s29  ;;  %2879 = vmatpush.msra.mxu1 %v2842_v19  ;;  %v3035_v19 = vsel %vm1993_vm5, %v8244_v32, %v8242_v44 }
 0x53f   : > { %3847 = vrot.lane.b32.xlu1 %v8246_v42, %s6888_s22  ;;  %2908 = vmatpush.msrb.mxu2 %v2843_v43  ;;  %v2787_v43 = vld [vmem:[#allocation7 + $0x28] sm:$0xff]  ;;  %s6902_s22 = smov 94  }
 0x540   : > { %4307 = vrot.lane.b32.xlu2 %v8036_v46, %s6895_s29  ;;  %v8492_v27 = vpop.permute.xlu0 %3831  ;;  %v3030_v24 = vpop.permute.xlu2 %3029  ;;  %2880 = vmatpush.msra.mxu1 %v2840_v59  ;;  %v3039_v59 = vsel %vm1993_vm5, %v8011_v10, %v11282_v16 }
 0x541   : > { %v3038_v11 = vsel %vm1993_vm5, %v8396_v20, %v3030_v24  ;;  %v3046_v31 = vsel %vm1993_vm5, %v3030_v24, %v8396_v20  ;;  %2909 = vmatpush.msrb.mxu2 %v2841_v12  ;;  %v8505_v56 = vpop.permute.xlu1 %3829  ;;  %v3044_v20 = vsel %vm1993_vm5, %v8330_v6, %v8302_v47  ;;  %v3042_v6 = vsel %vm1993_vm5, %v8212_v13, %v8174_v4 }
 0x542   : > { %v3061_v51 = vmul.f32 %v3046_v31, %v11280_v38  ;;  %v3062_v21 = vmul.f32 %v3038_v11, %v11281_v25  ;;  %2881 = vmatpush.msra.mxu1 %v2838_v14  ;;  %v3057_v47 = vmul.f32 %v3044_v20, %v11280_v38  ;;  %v3041_v12 = vsel %vm1993_vm5, %v8141_v29, %v8100_v57 }
 0x543   : > { %2910 = vmatpush.msrb.mxu2 %v2839_v23  ;;  %6293 = vmatmul.msk.f32.vlgmr.msra.gmra.mxu1 %vm607_vm2, %v2786_v2  ;;  %v3034_v24 = vsel %vm1993_vm5, %v8174_v4, %v8212_v13  ;;  %v3053_v4 = vmul.f32 %v3042_v6, %v11280_v38  ;;  %v2759_v13 = vsel %vm1811_vm6, %v8292_v55, %v8348_v58  ;;  %v11283_v23 = vld [vmem:[#allocation30_spill] sm:$0xff] }
 0x544   : > { %6297 = vmatmul.msk.f32.vlgmr.msrb.gmra.mxu2 %vm607_vm2, %v2786_v2  ;;  %3083 = vmatpush.msrb.mxu1 %v3061_v51  ;;  %v3056_v2 = vmul.f32 %v3035_v19, %v11281_v25  ;;  %v11284_v51 = vld [vmem:[#allocation31_spill] sm:$0xff]  ;;  %v3033_v20 = vsel %vm1993_vm5, %v8100_v57, %v8141_v29  ;;  %v3054_v58 = vmul.f32 %v3034_v24, %v11281_v25 }
 0x545   : > { %3112 = vmatpush.msra.mxu2 %v3062_v21  ;;  %v2758_v55 = vsel %vm1811_vm6, %v8294_v30, %v8268_v17  ;;  %v3040_v57 = vsel %vm1993_vm5, %v8045_v26, %v8066_v40  ;;  %v2782_v29 = vmul.f32 %v2759_v13, %v11284_v51  ;;  %v3051_v33 = vmul.f32 %v3041_v12, %v11280_v38  ;;  %v11289_v13 = vld [vmem:[#allocation51_spill] sm:$0xff] }
 0x546   : > { %4303 = vrot.lane.b32.xlu0 %v7845_v15, %s6895_s29  ;;  %3084 = vmatpush.msrb.mxu1 %v3059_v34  ;;  %v2781_v34 = vmul.f32 %v2767_v22, %v11283_v23  ;;  %v2757_v30 = vsel %vm1811_vm6, %v8240_v45, %v8270_v5  ;;  %v2765_v17 = vsel %vm1811_vm6, %v8270_v5, %v8240_v45  ;;  %v11287_v22 = vld [vmem:[#allocation57_spill] sm:$0xff] }
 0x547   : > { %4305 = vrot.lane.b32.xlu1 %v7955_v62, %s6895_s29  ;;  %3113 = vmatpush.msra.mxu2 %v3060_v36  ;;  %v2780_v45 = vmul.f32 %v2758_v55, %v11284_v51  ;;  %v3049_v5 = vmul.f32 %v3040_v57, %v11280_v38  ;;  %v2764_v12 = vsel %vm1811_vm6, %v8206_v50, %v8132_v53 }
 0x548   : > { %4287 = vrot.lane.b32.xlu2 %v11251_v0, %s6895_s29  ;;  %v8546_v44 = vpop.permute.xlu0 %3690  ;;  %v8548_v32 = vpop.permute.xlu2 %3827  ;;  %3085 = vmatpush.msrb.mxu1 %v3057_v47  ;;  %v2779_v47 = vmul.f32 %v2766_v37, %v11283_v23  ;;  %v11292_v37 = vld [vmem:[#allocation61_spill] sm:$0xff] }
 0x549   : > { %3114 = vmatpush.msra.mxu2 %v3058_v49  ;;  %v2752_v14 = vpop.permute.xlu1 %2751 }
 0x54a   : > { %v2760_v11 = vsel %vm1811_vm6, %v8382_v7, %v2752_v14  ;;  %v2768_v31 = vsel %vm1811_vm6, %v2752_v14, %v8382_v7  ;;  %3086 = vmatpush.msrb.mxu1 %v3055_v60  ;;  %v3032_v7 = vsel %vm1993_vm5, %v8066_v40, %v8045_v26  ;;  %v3052_v26 = vmul.f32 %v3033_v20, %v11281_v25  ;;  %v2788_v14 = vld [vmem:[#allocation7 + $0x30] sm:$0xff]  ;;  %v11290_v20 = vld [vmem:[#allocation20_spill] sm:$0xff] }
 0x54b   : > { %v2783_v9 = vmul.f32 %v2768_v31, %v11283_v23  ;;  %v2784_v21 = vmul.f32 %v2760_v11, %v11284_v51  ;;  %3115 = vmatpush.msra.mxu2 %v3056_v2  ;;  %6294 = vmatmul.msk.f32.gmra.mxu1 %vm607_vm2, %v2787_v43  ;;  %v3031_v40 = vsel %vm1993_vm5, %v11282_v16, %v8011_v10  ;;  %v11286_v2 = vld [vmem:[#allocation60_spill] sm:$0xff]  ;;  %vm5390_vm5 = vcmp.lt.s32.totalorder %v11276_v28, 94  ;;  %v5201_v28 = vld [vmem:[#allocation7 + $0x210] sm:$0xff] }
 0x54c   : > { %6298 = vmatmul.msk.f32.gmra.mxu2 %vm607_vm2, %v2787_v43  ;;  %3087 = vmatpush.msrb.mxu1 %v3053_v4  ;;  %v3050_v6 = vmul.f32 %v3032_v7, %v11281_v25  ;;  %v2777_v10 = vmul.f32 %v2765_v17, %v11283_v23  ;;  %v2778_v60 = vmul.f32 %v2757_v30, %v11284_v51  ;;  %v11288_v4 = vld [vmem:[#allocation50_spill] sm:$0xff]  ;;  %v2789_v17 = vld [vmem:[#allocation7 + $0x38] sm:$0xff] }
 0x54d   : > { %2944 = vmatpush.msrb.mxu3 %v2783_v9  ;;  %2973 = vmatpush.msra.mxu0 %v2784_v21  ;;  %v3047_v43 = vmul.f32 %v3039_v59, %v11280_v38  ;;  %v2756_v16 = vsel %vm1811_vm6, %v8132_v53, %v8206_v50  ;;  %v3048_v24 = vmul.f32 %v3031_v40, %v11281_v25  ;;  %v11285_v25 = vld [vmem:[#allocation75_spill] sm:$0xff]  ;;  %v2717_v40 = vld [vmem:[#allocation7] sm:$0xff] }
 0x54e   : > { %3116 = vmatpush.msra.mxu2 %v3054_v58  ;;  %4283 = vrot.lane.b32.xlu0 %v11255_v63, %s6895_s29  ;;  %v2755_v38 = vsel %vm1811_vm6, %v8096_v54, %v8136_v48  ;;  %v2763_v59 = vsel %vm1811_vm6, %v8136_v48, %v8096_v54  ;;  %v2775_v53 = vmul.f32 %v2764_v12, %v11283_v23  ;;  %v11291_v58 = vld [vmem:[#allocation44_spill] sm:$0xff] }
 0x54f   : > { %4285 = vrot.lane.b32.xlu1 %v11252_v3, %s6895_s29  ;;  %2945 = vmatpush.msrb.mxu3 %v2781_v34  ;;  %v2776_v50 = vmul.f32 %v2756_v16, %v11284_v51  ;;  %v2762_v11 = vsel %vm1811_vm6, %v11287_v22, %v11286_v2  ;;  %v2754_v31 = vsel %vm1811_vm6, %v11286_v2, %v11287_v22  ;;  %v11293_v34 = vld [vmem:[#allocation53_spill] sm:$0xff]  ;;  %v11296_v12 = vld [vmem:[#allocation96_spill] sm:$0xff] }
 0x550   : > { %2974 = vmatpush.msra.mxu0 %v2782_v29  ;;  %3088 = vmatpush.msrb.mxu1 %v3051_v33  ;;  %v8624_v36 = vpop.permute.xlu0 %3672  ;;  %v8626_v19 = vpop.permute.xlu2 %3686  ;;  %v2773_v9 = vmul.f32 %v2763_v59, %v11283_v23  ;;  %v2774_v21 = vmul.f32 %v2755_v38, %v11284_v51  ;;  %v2761_v55 = vsel %vm1811_vm6, %v11291_v58, %v11290_v20  ;;  %v11298_v2 = vld [vmem:[#allocation33_spill] sm:$0xff] }
 0x551   : > { %3117 = vmatpush.msra.mxu2 %v3052_v26  ;;  %4301 = vrot.lane.b32.xlu2 %v11253_v18, %s6895_s29  ;;  %v8634_v49 = vpop.permute.xlu1 %3688  ;;  %v2753_v57 = vsel %vm1811_vm6, %v11290_v20, %v11291_v58  ;;  %v2771_v29 = vmul.f32 %v2762_v11, %v11283_v23  ;;  %v2772_v33 = vmul.f32 %v2754_v31, %v11284_v51  ;;  %v11299_v11 = vld [vmem:[#allocation55_spill] sm:$0xff]  ;;  %v11300_v31 = vld [vmem:[#allocation89_spill] sm:$0xff] }
 0x552   : > { %2946 = vmatpush.msrb.mxu3 %v2779_v47  ;;  %2975 = vmatpush.msra.mxu0 %v2780_v45  ;;  %v2769_v30 = vmul.f32 %v2761_v55, %v11283_v23  ;;  %v2770_v26 = vmul.f32 %v2753_v57, %v11284_v51  ;;  %v2718_v51 = vld [vmem:[#allocation7 + $0x8] sm:$0xff]  ;;  %v2719_v55 = vld [vmem:[#allocation7 + $0x10] sm:$0xff] }
 0x553   : > { %3089 = vmatpush.msrb.mxu1 %v3049_v5  ;;  %3118 = vmatpush.msra.mxu2 %v3050_v6  ;;  %v2995_v5 = vld [vmem:[#allocation7 + $0x40] sm:$0xff] }
 0x554   : > { %2947 = vmatpush.msrb.mxu3 %v2777_v10  ;;  %2976 = vmatpush.msra.mxu0 %v2778_v60  ;;  %v11294_v60 = vld [vmem:[#allocation97_spill] sm:$0xff] }
 0x555   : > { %3090 = vmatpush.msrb.mxu1 %v3047_v43  ;;  %3119 = vmatpush.msra.mxu2 %v3048_v24  ;;  %v11295_v43 = vld [vmem:[#allocation90_spill] sm:$0xff] }
 0x556   : > { %6295 = vmatmul.msk.f32.gmra.mxu1 %vm607_vm2, %v2788_v14  ;;  %6299 = vmatmul.msk.f32.gmra.mxu2 %vm607_vm2, %v2788_v14  ;;  %v3192_v16 = vsel %vm2092_vm7, %v11295_v43, %v11294_v60  ;;  %v3184_v59 = vsel %vm2092_vm7, %v11294_v60, %v11295_v43  ;;  %v11305_v60 = vld [vmem:[#allocation72_spill] sm:$0xff] }
 0x557   : > { %3313 = vmatpush.msra.mxu1 %v11285_v25  ;;  %3342 = vmatpush.msrb.mxu2 %v8246_v42  ;;  %v3207_v58 = vmul.f32 %v3184_v59, %v11298_v2  ;;  %v11307_v59 = vld [vmem:[#allocation69_spill] sm:$0xff] }
 0x558   : > { %2948 = vmatpush.msrb.mxu3 %v2775_v53  ;;  %2977 = vmatpush.msra.mxu0 %v2776_v50  ;;  %v8666_v54 = vpop.permute.xlu0 %3843  ;;  %v8668_v48 = vpop.permute.xlu2 %3823  ;;  %v11297_v53 = vld [vmem:[#allocation32_spill] sm:$0xff] }
 0x559   : > { %3314 = vmatpush.msra.mxu1 %v11288_v4  ;;  %3343 = vmatpush.msrb.mxu2 %v11289_v13  ;;  %v8678_v7 = vpop.permute.xlu1 %3670  ;;  %v3206_v20 = vmul.f32 %v3192_v16, %v11297_v53 }
 0x55a   : > { %4216 = vrot.lane.b32.xlu0 %v11292_v37, %s6896_s24  ;;  %4299 = vrot.lane.b32.xlu1 %v11293_v34, %s6895_s29 }
 0x55b   : > { %2949 = vmatpush.msrb.mxu3 %v2773_v9  ;;  %2978 = vmatpush.msra.mxu0 %v2774_v21  ;;  %v3191_v9 = vsel %vm2092_vm7, %v11300_v31, %v11299_v11  ;;  %v3183_v21 = vsel %vm2092_vm7, %v11299_v11, %v11300_v31 }
 0x55c   : > { %4220 = vrot.lane.b32.xlu2 %v11285_v25, %s6896_s24  ;;  %3315 = vmatpush.msra.mxu1 %v11292_v37  ;;  %v3204_v57 = vmul.f32 %v3191_v9, %v11297_v53 }
 0x55d   : > { %3344 = vmatpush.msrb.mxu2 %v8091_v61  ;;  %2950 = vmatpush.msrb.mxu3 %v2771_v29  ;;  %v11301_v29 = vld [vmem:[#allocation40_spill] sm:$0xff] }
 0x55e   : > { %2979 = vmatpush.msra.mxu0 %v2772_v33  ;;  %3316 = vmatpush.msra.mxu1 %v7998_v8  ;;  %v11302_v33 = vld [vmem:[#allocation82_spill] sm:$0xff] }
 0x55f   : > { %3345 = vmatpush.msrb.mxu2 %v8036_v46  ;;  %2951 = vmatpush.msrb.mxu3 %v2769_v30  ;;  %v3190_v30 = vsel %vm2092_vm7, %v11302_v33, %v11301_v29 }
 0x560   : > { %2980 = vmatpush.msra.mxu0 %v2770_v26  ;;  %6296 = vmatmul.msk.f32.gmra.mxu1 %vm607_vm2, %v2789_v17  ;;  %v8703_v47 = vpop.permute.xlu0 %3825  ;;  %v8705_v45 = vpop.permute.xlu2 %3837  ;;  %v3205_v26 = vmul.f32 %v3183_v21, %v11298_v2  ;;  %v2720_v21 = vld [vmem:[#allocation7 + $0x18] sm:$0xff] }
 0x561   : > { %6300 = vmatmul.msk.f32.gmra.mxu2 %vm607_vm2, %v2789_v17  ;;  %6301 = vmatmul.msk.f32.vlgmr.msrb.gmra.mxu3 %vm607_vm2, %v2717_v40  ;;  %v8709_v23 = vpop.permute.xlu1 %3841  ;;  %v2996_v17 = vld [vmem:[#allocation7 + $0x48] sm:$0xff] }
 0x562   : > { %6305 = vmatmul.msk.f32.vlgmr.msra.gmra.mxu0 %vm607_vm2, %v2717_v40  ;;  %3317 = vmatpush.msra.mxu1 %v7913_v1  ;;  %v3182_v40 = vsel %vm2092_vm7, %v11301_v29, %v11302_v33  ;;  %v2997_v29 = vld [vmem:[#allocation7 + $0x50] sm:$0xff] }
 0x563   : > { %3346 = vmatpush.msrb.mxu2 %v7955_v62  ;;  %4230 = vrot.lane.b32.xlu0 %v8036_v46, %s6896_s24 }
 0x564   : > { %3318 = vmatpush.msra.mxu1 %v11251_v0  ;;  %4218 = vrot.lane.b32.xlu1 %v11288_v4, %s6896_s24 }
 0x565   : > { %3347 = vmatpush.msrb.mxu2 %v7845_v15  ;;  %4234 = vrot.lane.b32.xlu2 %v11289_v13, %s6896_s24 }
 0x566   : > { %3319 = vmatpush.msra.mxu1 %v11252_v3 }
 0x567   : > { %3348 = vmatpush.msrb.mxu2 %v11253_v18 }
 0x568   : > { %3320 = vmatpush.msra.mxu1 %v11255_v63  ;;  %v3177_v6 = vpop.permute.xlu0 %3176  ;;  %v8725_v10 = vpop.permute.xlu2 %3817 }
 0x569   : > { %3349 = vmatpush.msrb.mxu2 %v11293_v34  ;;  %6302 = vmatmul.msk.f32.gmra.mxu3 %vm607_vm2, %v2718_v51  ;;  %v3185_v24 = vsel %vm2092_vm7, %v11296_v12, %v3177_v6  ;;  %v3193_v14 = vsel %vm2092_vm7, %v3177_v6, %v11296_v12  ;;  %v8739_v38 = vpop.permute.xlu1 %3821  ;;  %v11304_v6 = vld [vmem:[#allocation74_spill] sm:$0xff] }
 0x56a   : > { %6306 = vmatmul.msk.f32.gmra.mxu0 %vm607_vm2, %v2718_v51  ;;  %6309 = vmatmul.msk.f32.vlgmr.msrb.gmra.mxu1 %vm607_vm2, %v2995_v5  ;;  %v3208_v50 = vmul.f32 %v3193_v14, %v11297_v53  ;;  %v3209_v22 = vmul.f32 %v3185_v24, %v11298_v2  ;;  %v3189_v43 = vsel %vm2092_vm7, %v11305_v60, %v11304_v6  ;;  %v11306_v14 = vld [vmem:[#allocation48_spill] sm:$0xff] }
 0x56b   : > { %6313 = vmatmul.msk.f32.vlgmr.msra.gmra.mxu2 %vm607_vm2, %v2995_v5  ;;  %4514 = vrot.lane.b32.xlu0 %v11285_v25, %s6897_s26  ;;  %v3181_v12 = vsel %vm2092_vm7, %v11304_v6, %v11305_v60  ;;  %v3202_v24 = vmul.f32 %v3190_v30, %v11297_v53  ;;  %v3180_v11 = vsel %vm2092_vm7, %v11306_v14, %v11307_v59 }
 0x56c   : > { %4232 = vrot.lane.b32.xlu1 %v8091_v61, %s6896_s24  ;;  %3230 = vmatpush.msra.mxu3 %v3208_v50  ;;  %v3188_v50 = vsel %vm2092_vm7, %v11307_v59, %v11306_v14  ;;  %v3200_v31 = vmul.f32 %v3189_v43, %v11297_v53  ;;  %v3201_v9 = vmul.f32 %v3181_v12, %v11298_v2 }
 0x56d   : > { %4214 = vrot.lane.b32.xlu2 %v7998_v8, %s6896_s24  ;;  %3259 = vmatpush.msrb.mxu0 %v3209_v22  ;;  %v3203_v22 = vmul.f32 %v3182_v40, %v11298_v2  ;;  %v3199_v33 = vmul.f32 %v3180_v11, %v11298_v2  ;;  %v11311_v40 = vld [vmem:[#allocation19_spill] sm:$0xff] }
 0x56e   : > { %3231 = vmatpush.msra.mxu3 %v3206_v20  ;;  %v3198_v20 = vmul.f32 %v3188_v50, %v11297_v53  ;;  %v2998_v11 = vld [vmem:[#allocation7 + $0x58] sm:$0xff] }
 0x56f   : > { %3260 = vmatpush.msrb.mxu0 %v3207_v58  ;;  %v11308_v58 = vld [vmem:[#allocation47_spill] sm:$0xff] }
 0x570   : > { %v8776_v51 = vpop.permute.xlu0 %3839  ;;  %3232 = vmatpush.msra.mxu3 %v3204_v57  ;;  %v8778_v5 = vpop.permute.xlu2 %3968 }
 0x571   : > { %11303 = vst [vmem:[#allocation24_spill] sm:$0xff] %v8778_v5  ;;  %6303 = vmatmul.msk.f32.gmra.mxu3 %vm607_vm2, %v2719_v55  ;;  %3261 = vmatpush.msrb.mxu0 %v3205_v26  ;;  %v8785_v16 = vpop.permute.xlu1 %3835  ;;  %v11310_v26 = vld [vmem:[#allocation23_spill] sm:$0xff] }
 0x572   : > { %6307 = vmatmul.msk.f32.gmra.mxu0 %vm607_vm2, %v2719_v55  ;;  %6310 = vmatmul.msk.f32.gmra.mxu1 %vm607_vm2, %v2996_v17  ;;  %v11309_v55 = vld [vmem:[#allocation49_spill] sm:$0xff]  ;;  %v3186_v6 = vsel %vm2092_vm7, %v11311_v40, %v11310_v26  ;;  %v3178_v12 = vsel %vm2092_vm7, %v11310_v26, %v11311_v40  ;;  %v11319_v40 = vld [vmem:[#allocation91_spill] sm:$0xff] }
 0x573   : > { %6314 = vmatmul.msk.f32.gmra.mxu2 %vm607_vm2, %v2996_v17  ;;  %4226 = vrot.lane.b32.xlu0 %v7845_v15, %s6896_s24  ;;  %v3187_v57 = vsel %vm2092_vm7, %v11309_v55, %v11308_v58  ;;  %v3179_v30 = vsel %vm2092_vm7, %v11308_v58, %v11309_v55  ;;  %v3194_v59 = vmul.f32 %v3186_v6, %v11297_v53  ;;  %v11316_v58 = vld [vmem:[#allocation87_spill] sm:$0xff]  ;;  %v11320_v6 = vld [vmem:[#allocation86_spill] sm:$0xff] }
 0x574   : > { %4212 = vrot.lane.b32.xlu1 %v7913_v1, %s6896_s24  ;;  %3233 = vmatpush.msra.mxu3 %v3202_v24  ;;  %v3196_v24 = vmul.f32 %v3187_v57, %v11297_v53  ;;  %v3197_v14 = vmul.f32 %v3179_v30, %v11298_v2  ;;  %v3195_v50 = vmul.f32 %v3178_v12, %v11298_v2  ;;  %v11318_v30 = vld [vmem:[#allocation35_spill] sm:$0xff] }
 0x575   : > { %4228 = vrot.lane.b32.xlu2 %v7955_v62, %s6896_s24  ;;  %3262 = vmatpush.msrb.mxu0 %v3203_v22  ;;  %v3142_v22 = vld [vmem:[#allocation7 + $0x60] sm:$0xff]  ;;  %v3560_v12 = vsel %vm2373_vm8, %v11320_v6, %v11319_v40 }
 0x576   : > { %3234 = vmatpush.msra.mxu3 %v3200_v31 }
 0x577   : > { %3263 = vmatpush.msrb.mxu0 %v3201_v9 }
 0x578   : > { %3235 = vmatpush.msra.mxu3 %v3198_v20  ;;  %v8822_v17 = vpop.permute.xlu0 %3819  ;;  %v11315_v20 = vld [vmem:[#allocation95_spill] sm:$0xff] }
 0x579   : > { %6304 = vmatmul.msk.f32.gmra.mxu3 %vm607_vm2, %v2720_v21  ;;  %3264 = vmatpush.msrb.mxu0 %v3199_v33  ;;  %v8829_v60 = vpop.permute.xlu1 %3972  ;;  %v8831_v43 = vpop.permute.xlu2 %3992  ;;  %v3561_v53 = vsel %vm2373_vm8, %v11316_v58, %v11315_v20  ;;  %v3569_v57 = vsel %vm2373_vm8, %v11315_v20, %v11316_v58  ;;  %v11323_v58 = vld [vmem:[#allocation78_spill] sm:$0xff] }
 0x57a   : > { %11312 = vst [vmem:[#allocation25_spill] sm:$0xff] %v8829_v60  ;;  %6308 = vmatmul.msk.f32.gmra.mxu0 %vm607_vm2, %v2720_v21  ;;  %6311 = vmatmul.msk.f32.gmra.mxu1 %vm607_vm2, %v2997_v29 }
 0x57b   : > { %11313 = vst [vmem:[#allocation26_spill] sm:$0xff] %v8831_v43  ;;  %6315 = vmatmul.msk.f32.gmra.mxu2 %vm607_vm2, %v2997_v29  ;;  %4208 = vrot.lane.b32.xlu0 %v11252_v3, %s6896_s24  ;;  %v11317_v29 = vld [vmem:[#allocation34_spill] sm:$0xff] }
 0x57c   : > { %4512 = vrot.lane.b32.xlu1 %v11288_v4, %s6897_s26  ;;  %3236 = vmatpush.msra.mxu3 %v3196_v24  ;;  %v11321_v24 = vld [vmem:[#allocation80_spill] sm:$0xff]  ;;  %v3581_v20 = vmul.f32 %v3560_v12, %v11317_v29 }
 0x57d   : > { %4210 = vrot.lane.b32.xlu2 %v11251_v0, %s6896_s24  ;;  %3265 = vmatpush.msrb.mxu0 %v3197_v14  ;;  %v11322_v14 = vld [vmem:[#allocation81_spill] sm:$0xff]  ;;  %v11327_v12 = vld [vmem:[#allocation100_spill] sm:$0xff] }
 0x57e   : > { %3237 = vmatpush.msra.mxu3 %v3194_v59  ;;  %v3559_v59 = vsel %vm2373_vm8, %v11322_v14, %v11321_v24 }
 0x57f   : > { %3266 = vmatpush.msrb.mxu0 %v3195_v50  ;;  %v3143_v50 = vld [vmem:[#allocation7 + $0x68] sm:$0xff] }
 0x580   : > { %v8850_v31 = vpop.permute.xlu0 %3833 }
 0x581   : > { %6317 = vmatmul.msk.f32.vlgmr.msra.gmra.mxu3 %vm607_vm2, %v3142_v22  ;;  %v8853_v9 = vpop.permute.xlu1 %4297  ;;  %v3554_v21 = vpop.permute.xlu2 %3553 }
 0x582   : > { %11314 = vst [vmem:[#allocation17_spill] sm:$0xff] %v8853_v9  ;;  %6312 = vmatmul.msk.f32.gmra.mxu1 %vm607_vm2, %v2998_v11  ;;  %6321 = vmatmul.msk.f32.vlgmr.msrb.gmra.mxu0 %vm607_vm2, %v3142_v22  ;;  %v3562_v2 = vsel %vm2373_vm8, %v8410_v41, %v3554_v21  ;;  %v3570_v55 = vsel %vm2373_vm8, %v3554_v21, %v8410_v41  ;;  %v3289_v21 = vld [vmem:[#allocation7 + $0x80] sm:$0xff] }
 0x583   : > { %6316 = vmatmul.msk.f32.gmra.mxu2 %vm607_vm2, %v2998_v11  ;;  %4526 = vrot.lane.b32.xlu0 %v8091_v61, %s6897_s26  ;;  %v3585_v33 = vmul.f32 %v3562_v2, %v11317_v29  ;;  %v3586_v26 = vmul.f32 %v3570_v55, %v11318_v30  ;;  %v3583_v41 = vmul.f32 %v3561_v53, %v11317_v29  ;;  %v11324_v53 = vld [vmem:[#allocation73_spill] sm:$0xff] }
 0x584   : > { %4224 = vrot.lane.b32.xlu1 %v11253_v18, %s6896_s24  ;;  %v3584_v22 = vmul.f32 %v3569_v57, %v11318_v30  ;;  %v3568_v11 = vsel %vm2373_vm8, %v11319_v40, %v11320_v6  ;;  %v3558_v2 = vsel %vm2373_vm8, %v11324_v53, %v11323_v58  ;;  %v3566_v57 = vsel %vm2373_vm8, %v11323_v58, %v11324_v53  ;;  %v11329_v58 = vld [vmem:[#allocation85_spill] sm:$0xff] }
 0x585   : > { %4528 = vrot.lane.b32.xlu2 %v11289_v13, %s6897_s26  ;;  %3607 = vmatpush.msrb.mxu1 %v3585_v33  ;;  %v3567_v33 = vsel %vm2373_vm8, %v11321_v24, %v11322_v14  ;;  %v3579_v6 = vmul.f32 %v3559_v59, %v11317_v29  ;;  %v3582_v14 = vmul.f32 %v3568_v11, %v11318_v30  ;;  %v11330_v59 = vld [vmem:[#allocation36_spill] sm:$0xff]  ;;  %v11331_v53 = vld [vmem:[#allocation37_spill] sm:$0xff] }
 0x586   : > { %3636 = vmatpush.msra.mxu2 %v3586_v26  ;;  %v3580_v11 = vmul.f32 %v3567_v33, %v11318_v30 }
 0x587   : > { %3608 = vmatpush.msrb.mxu1 %v3583_v41 }
 0x588   : > { %3637 = vmatpush.msra.mxu2 %v3584_v22  ;;  %v8899_v55 = vpop.permute.xlu0 %3996  ;;  %v11328_v22 = vld [vmem:[#allocation94_spill] sm:$0xff] }
 0x589   : > { %11325 = vst [vmem:[#allocation28_spill] sm:$0xff] %v8899_v55  ;;  %6318 = vmatmul.msk.f32.gmra.mxu3 %vm607_vm2, %v3143_v50  ;;  %v3407_v26 = vpop.permute.xlu1 %3406  ;;  %v8910_v40 = vpop.permute.xlu2 %3960  ;;  %3609 = vmatpush.msrb.mxu1 %v3581_v20  ;;  %v3414_v20 = vsel %vm2274_vm9, %v11329_v58, %v11328_v22  ;;  %v3290_v55 = vld [vmem:[#allocation7 + $0x88] sm:$0xff] }
 0x58a   : > { %11326 = vst [vmem:[#allocation29_spill] sm:$0xff] %v8910_v40  ;;  %6322 = vmatmul.msk.f32.gmra.mxu0 %vm607_vm2, %v3143_v50  ;;  %6325 = vmatmul.msk.f32.vlgmr.msra.gmra.mxu1 %vm607_vm2, %v3289_v21  ;;  %v3415_v41 = vsel %vm2274_vm9, %v11327_v12, %v3407_v26  ;;  %v3423_v24 = vsel %vm2274_vm9, %v3407_v26, %v11327_v12  ;;  %v3144_v12 = vld [vmem:[#allocation7 + $0x70] sm:$0xff] }
 0x58b   : > { %6329 = vmatmul.msk.f32.vlgmr.msrb.gmra.mxu2 %vm607_vm2, %v3289_v21  ;;  %4508 = vrot.lane.b32.xlu0 %v7998_v8, %s6897_s26  ;;  %v3438_v50 = vmul.f32 %v3415_v41, %v11330_v59  ;;  %v3439_v43 = vmul.f32 %v3423_v24, %v11331_v53  ;;  %v3422_v26 = vsel %vm2274_vm9, %v11328_v22, %v11329_v58  ;;  %v11332_v22 = vld [vmem:[#allocation70_spill] sm:$0xff] }
 0x58c   : > { %4206 = vrot.lane.b32.xlu1 %v11255_v63, %s6896_s24  ;;  %3638 = vmatpush.msra.mxu2 %v3582_v14  ;;  %v3577_v21 = vmul.f32 %v3558_v2, %v11317_v29  ;;  %v3578_v41 = vmul.f32 %v3566_v57, %v11318_v30  ;;  %v3436_v24 = vmul.f32 %v3414_v20, %v11330_v59  ;;  %v11333_v58 = vld [vmem:[#allocation66_spill] sm:$0xff]  ;;  %v11335_v20 = vld [vmem:[#allocation56_spill] sm:$0xff] }
 0x58d   : > { %4510 = vrot.lane.b32.xlu2 %v11292_v37, %s6897_s26  ;;  %3610 = vmatpush.msrb.mxu1 %v3579_v6  ;;  %v3557_v14 = vsel %vm2373_vm8, %v11333_v58, %v11332_v22  ;;  %v3437_v33 = vmul.f32 %v3422_v26, %v11331_v53  ;;  %v3565_v2 = vsel %vm2373_vm8, %v11332_v22, %v11333_v58  ;;  %v11334_v6 = vld [vmem:[#allocation83_spill] sm:$0xff] }
 0x58e   : > { %3639 = vmatpush.msra.mxu2 %v3580_v11  ;;  %3460 = vmatpush.msrb.mxu3 %v3438_v50  ;;  %v3413_v50 = vsel %vm2274_vm9, %v11335_v20, %v11334_v6  ;;  %v11337_v11 = vld [vmem:[#allocation62_spill] sm:$0xff]  ;;  %v3575_v22 = vmul.f32 %v3557_v14, %v11317_v29 }
 0x58f   : > { %3489 = vmatpush.msra.mxu0 %v3439_v43  ;;  %3611 = vmatpush.msrb.mxu1 %v3577_v21  ;;  %v3421_v43 = vsel %vm2274_vm9, %v11334_v6, %v11335_v20  ;;  %v11338_v21 = vld [vmem:[#allocation65_spill] sm:$0xff]  ;;  %v11340_v6 = vld [vmem:[#allocation79_spill] sm:$0xff]  ;;  %v11341_v14 = vld [vmem:[#allocation58_spill] sm:$0xff]  ;;  %v3434_v60 = vmul.f32 %v3413_v50, %v11330_v59 }
 0x590   : > { %3640 = vmatpush.msra.mxu2 %v3578_v41  ;;  %3461 = vmatpush.msrb.mxu3 %v3436_v24  ;;  %v8952_v57 = vpop.permute.xlu0 %4295  ;;  %v3556_v41 = vsel %vm2373_vm8, %v11338_v21, %v11337_v11  ;;  %v3564_v24 = vsel %vm2373_vm8, %v11337_v11, %v11338_v21  ;;  %v11342_v11 = vld [vmem:[#allocation22_spill] sm:$0xff] }
 0x591   : > { %6319 = vmatmul.msk.f32.gmra.mxu3 %vm607_vm2, %v3144_v12  ;;  %3490 = vmatpush.msra.mxu0 %v3437_v33  ;;  %v8963_v26 = vpop.permute.xlu1 %3964  ;;  %v11339_v33 = vld [vmem:[#allocation84_spill] sm:$0xff]  ;;  %v3555_v21 = vsel %vm2373_vm8, %v11342_v11, %v11341_v14 }
 0x592   : > { %11336 = vst [vmem:[#allocation18_spill] sm:$0xff] %v8963_v26  ;;  %6323 = vmatmul.msk.f32.gmra.mxu0 %vm607_vm2, %v3144_v12  ;;  %6326 = vmatmul.msk.f32.gmra.mxu1 %vm607_vm2, %v3290_v55  ;;  %v8976_v58 = vpop.permute.xlu2 %4309  ;;  %v3412_v20 = vsel %vm2274_vm9, %v11340_v6, %v11339_v33  ;;  %v3420_v40 = vsel %vm2274_vm9, %v11339_v33, %v11340_v6  ;;  %v11343_v6 = vld [vmem:[#allocation76_spill] sm:$0xff] }
 0x593   : > { %6330 = vmatmul.msk.f32.gmra.mxu2 %vm607_vm2, %v3290_v55  ;;  %4522 = vrot.lane.b32.xlu0 %v7955_v62, %s6897_s26  ;;  %v3576_v12 = vmul.f32 %v3565_v2, %v11318_v30  ;;  %v3435_v33 = vmul.f32 %v3421_v43, %v11331_v53  ;;  %v3573_v55 = vmul.f32 %v3556_v41, %v11317_v29  ;;  %v11344_v26 = vld [vmem:[#allocation68_spill] sm:$0xff]  ;;  %v3145_v43 = vld [vmem:[#allocation7 + $0x78] sm:$0xff] }
 0x594   : > { %4524 = vrot.lane.b32.xlu1 %v8036_v46, %s6897_s26  ;;  %3612 = vmatpush.msrb.mxu1 %v3575_v22  ;;  %v3574_v2 = vmul.f32 %v3564_v24, %v11318_v30  ;;  %v3411_v5 = vsel %vm2274_vm9, %v11344_v26, %v11343_v6  ;;  %v3432_v22 = vmul.f32 %v3412_v20, %v11330_v59  ;;  %v3291_v24 = vld [vmem:[#allocation7 + $0x90] sm:$0xff] }
 0x595   : > { %4222 = vrot.lane.b32.xlu2 %v11293_v34, %s6896_s24  ;;  %3641 = vmatpush.msra.mxu2 %v3576_v12  ;;  %v3433_v50 = vmul.f32 %v3420_v40, %v11331_v53  ;;  %v3563_v12 = vsel %vm2373_vm8, %v11341_v14, %v11342_v11  ;;  %v3419_v41 = vsel %vm2274_vm9, %v11343_v6, %v11344_v26  ;;  %v11346_v40 = vld [vmem:[#allocation71_spill] sm:$0xff] }
 0x596   : > { %3462 = vmatpush.msrb.mxu3 %v3434_v60  ;;  %3491 = vmatpush.msra.mxu0 %v3435_v33  ;;  %v3571_v60 = vmul.f32 %v3555_v21, %v11317_v29  ;;  %v11347_v33 = vld [vmem:[#allocation67_spill] sm:$0xff]  ;;  %v3430_v26 = vmul.f32 %v3411_v5, %v11330_v59  ;;  %v3572_v11 = vmul.f32 %v3563_v12, %v11318_v30 }
 0x597   : > { %3613 = vmatpush.msrb.mxu1 %v3573_v55  ;;  %3642 = vmatpush.msra.mxu2 %v3574_v2  ;;  %v3410_v9 = vsel %vm2274_vm9, %v11347_v33, %v11346_v40  ;;  %v3418_v14 = vsel %vm2274_vm9, %v11346_v40, %v11347_v33  ;;  %v3431_v21 = vmul.f32 %v3419_v41, %v11331_v53  ;;  %v11348_v2 = vld [vmem:[#allocation43_spill] sm:$0xff] }
 0x598   : > { %3463 = vmatpush.msrb.mxu3 %v3432_v22  ;;  %3492 = vmatpush.msra.mxu0 %v3433_v50  ;;  %v9017_v20 = vpop.permute.xlu0 %3988  ;;  %v11349_v6 = vld [vmem:[#allocation63_spill] sm:$0xff]  ;;  %v3428_v30 = vmul.f32 %v3410_v9, %v11330_v59  ;;  %v3429_v50 = vmul.f32 %v3418_v14, %v11331_v53 }
 0x599   : > { %11345 = vst [vmem:[#allocation30_spill] sm:$0xff] %v9017_v20  ;;  %6320 = vmatmul.msk.f32.gmra.mxu3 %vm607_vm2, %v3145_v43  ;;  %3614 = vmatpush.msrb.mxu1 %v3571_v60  ;;  %v9029_v29 = vpop.permute.xlu1 %4311  ;;  %v3409_v22 = vsel %vm2274_vm9, %v11349_v6, %v11348_v2  ;;  %v3417_v5 = vsel %vm2274_vm9, %v11348_v2, %v11349_v6  ;;  %v11351_v12 = vld [vmem:[#allocation27_spill] sm:$0xff] }
 0x59a   : > { %6324 = vmatmul.msk.f32.gmra.mxu0 %vm607_vm2, %v3145_v43  ;;  %6327 = vmatmul.msk.f32.gmra.mxu1 %vm607_vm2, %v3291_v24  ;;  %v9035_v55 = vpop.permute.xlu2 %4307  ;;  %v11350_v43 = vld [vmem:[#allocation45_spill] sm:$0xff]  ;;  %v3426_v9 = vmul.f32 %v3409_v22, %v11330_v59  ;;  %v3292_v14 = vld [vmem:[#allocation7 + $0x98] sm:$0xff] }
 0x59b   : > { %6331 = vmatmul.msk.f32.gmra.mxu2 %vm607_vm2, %v3291_v24  ;;  %3464 = vmatpush.msrb.mxu3 %v3430_v26  ;;  %v3408_v41 = vsel %vm2274_vm9, %v11351_v12, %v11350_v43  ;;  %v3416_v60 = vsel %vm2274_vm9, %v11350_v43, %v11351_v12  ;;  %v3427_v24 = vmul.f32 %v3417_v5, %v11331_v53  ;;  %v11353_v5 = vld [vmem:[#allocation38_spill] sm:$0xff]  ;;  %v11355_v43 = vld [vmem:[#allocation92_spill] sm:$0xff]  ;;  %v11356_v12 = vld [vmem:[#allocation99_spill] sm:$0xff] }
 0x59c   : > { %3643 = vmatpush.msra.mxu2 %v3572_v11  ;;  %3493 = vmatpush.msra.mxu0 %v3431_v21  ;;  %v3424_v40 = vmul.f32 %v3408_v41, %v11330_v59  ;;  %v3425_v33 = vmul.f32 %v3416_v60, %v11331_v53  ;;  %v3372_v11 = vld [vmem:[#allocation7 + $0xa0] sm:$0xff]  ;;  %v11352_v21 = vld [vmem:[#allocation98_spill] sm:$0xff]  ;;  %v11354_v59 = vld [vmem:[#allocation39_spill] sm:$0xff]  ;;  %v3708_v41 = vsel %vm2472_vm10, %v11356_v12, %v11355_v43 }
 0x59d   : > { %4502 = vrot.lane.b32.xlu0 %v11252_v3, %s6897_s26  ;;  %4504 = vrot.lane.b32.xlu1 %v11251_v0, %s6897_s26  ;;  %v3716_v60 = vsel %vm2472_vm10, %v11355_v43, %v11356_v12  ;;  %v11360_v43 = vld [vmem:[#allocation77_spill] sm:$0xff] }
 0x59e   : > { %3465 = vmatpush.msrb.mxu3 %v3428_v30  ;;  %3494 = vmatpush.msra.mxu0 %v3429_v50  ;;  %v3373_v12 = vld [vmem:[#allocation7 + $0xa8] sm:$0xff] }
 0x59f   : > { %4506 = vrot.lane.b32.xlu2 %v7913_v1, %s6897_s26 }
 0x5a0   : > { %3466 = vmatpush.msrb.mxu3 %v3426_v9  ;;  %3495 = vmatpush.msra.mxu0 %v3427_v24  ;;  %v3701_v26 = vpop.permute.xlu0 %3700  ;;  %v11357_v9 = vld [vmem:[#allocation93_spill] sm:$0xff]  ;;  %v11358_v24 = vld [vmem:[#allocation88_spill] sm:$0xff] }
 0x5a1   : > { %v3709_v2 = vsel %vm2472_vm10, %v11352_v21, %v3701_v26  ;;  %v3717_v6 = vsel %vm2472_vm10, %v3701_v26, %v11352_v21  ;;  %v9072_v22 = vpop.permute.xlu1 %4293  ;;  %v3731_v26 = vmul.f32 %v3716_v60, %v11354_v59  ;;  %v11361_v60 = vld [vmem:[#allocation101_spill] sm:$0xff] }
 0x5a2   : > { %3467 = vmatpush.msrb.mxu3 %v3424_v40  ;;  %3496 = vmatpush.msra.mxu0 %v3425_v33  ;;  %v3732_v30 = vmul.f32 %v3709_v2, %v11353_v5  ;;  %v3733_v50 = vmul.f32 %v3717_v6, %v11354_v59  ;;  %v9076_v53 = vpop.permute.xlu2 %4287  ;;  %v3707_v40 = vsel %vm2472_vm10, %v11358_v24, %v11357_v9 }
 0x5a3   : > { %6328 = vmatmul.msk.f32.gmra.mxu1 %vm607_vm2, %v3292_v14  ;;  %6332 = vmatmul.msk.f32.gmra.mxu2 %vm607_vm2, %v3292_v14  ;;  %v3715_v33 = vsel %vm2472_vm10, %v11357_v9, %v11358_v24  ;;  %v3730_v14 = vmul.f32 %v3708_v41, %v11353_v5  ;;  %v3728_v2 = vmul.f32 %v3707_v40, %v11353_v5 }
 0x5a4   : > { %6333 = vmatmul.msk.f32.vlgmr.msrb.gmra.mxu3 %vm607_vm2, %v3372_v11  ;;  %6337 = vmatmul.msk.f32.vlgmr.msra.gmra.mxu0 %vm607_vm2, %v3372_v11  ;;  %v3519_v11 = vld [vmem:[#allocation7 + $0xc0] sm:$0xff]  ;;  %v3729_v6 = vmul.f32 %v3715_v33, %v11354_v59  ;;  %v3705_v9 = vsel %vm2472_vm10, %v8457_v39, %v11361_v60  ;;  %v3713_v24 = vsel %vm2472_vm10, %v11361_v60, %v8457_v39  ;;  %v3374_v60 = vld [vmem:[#allocation7 + $0xb0] sm:$0xff] }
 0x5a5   : > { %4516 = vrot.lane.b32.xlu0 %v11293_v34, %s6897_s26  ;;  %4518 = vrot.lane.b32.xlu1 %v11253_v18, %s6897_s26 }
 0x5a6   : > { %3754 = vmatpush.msra.mxu3 %v3732_v30  ;;  %3783 = vmatpush.msrb.mxu0 %v3733_v50  ;;  %v3706_v30 = vsel %vm2472_vm10, %v11360_v43, %v8448_v52  ;;  %v3714_v50 = vsel %vm2472_vm10, %v8448_v52, %v11360_v43 }
 0x5a7   : > { %4520 = vrot.lane.b32.xlu2 %v7845_v15, %s6897_s26  ;;  %v3726_v40 = vmul.f32 %v3706_v30, %v11353_v5  ;;  %v3727_v33 = vmul.f32 %v3714_v50, %v11354_v59  ;;  %v3703_v50 = vsel %vm2472_vm10, %v8624_v36, %v8634_v49 }
 0x5a8   : > { %3755 = vmatpush.msra.mxu3 %v3730_v14  ;;  %3784 = vmatpush.msrb.mxu0 %v3731_v26  ;;  %v9106_v21 = vpop.permute.xlu0 %3984  ;;  %v11362_v14 = vld [vmem:[#allocation102_spill] sm:$0xff] }
 0x5a9   : > { %11359 = vst [vmem:[#allocation31_spill] sm:$0xff] %v9106_v21  ;;  %v9118_v41 = vpop.permute.xlu1 %4291  ;;  %v3704_v26 = vsel %vm2472_vm10, %v11362_v14, %v8546_v44  ;;  %v3712_v39 = vsel %vm2472_vm10, %v8546_v44, %v11362_v14 }
 0x5aa   : > { %3756 = vmatpush.msra.mxu3 %v3728_v2  ;;  %3785 = vmatpush.msrb.mxu0 %v3729_v6  ;;  %v3725_v2 = vmul.f32 %v3713_v24, %v11354_v59  ;;  %v3520_v6 = vld [vmem:[#allocation7 + $0xc8] sm:$0xff]  ;;  %v3722_v44 = vmul.f32 %v3704_v26, %v11353_v5  ;;  %v3723_v43 = vmul.f32 %v3712_v39, %v11354_v59 }
 0x5ab   : > { %6341 = vmatmul.msk.f32.vlgmr.msrb.gmra.mxu1 %vm607_vm2, %v3519_v11  ;;  %6345 = vmatmul.msk.f32.vlgmr.msra.gmra.mxu2 %vm607_vm2, %v3519_v11  ;;  %v9132_v52 = vpop.permute.xlu2 %4301  ;;  %v3724_v11 = vmul.f32 %v3705_v9, %v11353_v5  ;;  %v3720_v26 = vmul.f32 %v3703_v50, %v11353_v5 }
 0x5ac   : > { %6334 = vmatmul.msk.f32.gmra.mxu3 %vm607_vm2, %v3373_v12  ;;  %6338 = vmatmul.msk.f32.gmra.mxu0 %vm607_vm2, %v3373_v12  ;;  %v3711_v12 = vsel %vm2472_vm10, %v8634_v49, %v8624_v36  ;;  %v3710_v36 = vsel %vm2472_vm10, %v8626_v19, %v8678_v7  ;;  %v11363_v49 = vld [vmem:[#allocation41_spill] sm:$0xff] }
 0x5ad   : > { %4667 = vrot.lane.b32.xlu0 %v11288_v4, %s6898_s30  ;;  %4669 = vrot.lane.b32.xlu1 %v11285_v25, %s6898_s30  ;;  %v3721_v39 = vmul.f32 %v3711_v12, %v11354_v59  ;;  %v3863_v12 = vsel %vm2571_vm11, %v8450_v35, %v8505_v56 }
 0x5ae   : > { %3757 = vmatpush.msra.mxu3 %v3726_v40  ;;  %3786 = vmatpush.msrb.mxu0 %v3727_v33  ;;  %v3702_v33 = vsel %vm2472_vm10, %v8678_v7, %v8626_v19  ;;  %v11364_v19 = vld [vmem:[#allocation42_spill] sm:$0xff] }
 0x5af   : > { %4500 = vrot.lane.b32.xlu2 %v11255_v63, %s6897_s26 }
 0x5b0   : > { %3758 = vmatpush.msra.mxu3 %v3724_v11  ;;  %3787 = vmatpush.msrb.mxu0 %v3725_v2  ;;  %v4290_v30 = vpop.permute.xlu0 %4289  ;;  %v3718_v2 = vmul.f32 %v3702_v33, %v11353_v5  ;;  %v3854_v5 = vsel %vm2571_vm11, %v8548_v32, %v8666_v54 }
 0x5b1   : > { %v3848_v9 = vpop.permute.xlu1 %3847 }
 0x5b2   : > { %3759 = vmatpush.msra.mxu3 %v3722_v44  ;;  %3788 = vmatpush.msrb.mxu0 %v3723_v43  ;;  %v3856_v24 = vsel %vm2571_vm11, %v8492_v27, %v3848_v9  ;;  %v3864_v40 = vsel %vm2571_vm11, %v3848_v9, %v8492_v27  ;;  %v3855_v27 = vsel %vm2571_vm11, %v8505_v56, %v8450_v35  ;;  %v3521_v43 = vld [vmem:[#allocation7 + $0xd0] sm:$0xff] }
 0x5b3   : > { %6342 = vmatmul.msk.f32.gmra.mxu1 %vm607_vm2, %v3520_v6  ;;  %6346 = vmatmul.msk.f32.gmra.mxu2 %vm607_vm2, %v3520_v6  ;;  %v3879_v14 = vmul.f32 %v3856_v24, %v11363_v49  ;;  %v3880_v7 = vmul.f32 %v3864_v40, %v11364_v19  ;;  %v3719_v6 = vmul.f32 %v3710_v36, %v11354_v59  ;;  %v3375_v59 = vld [vmem:[#allocation7 + $0xb8] sm:$0xff] }
 0x5b4   : > { %6335 = vmatmul.msk.f32.gmra.mxu3 %vm607_vm2, %v3374_v60  ;;  %6339 = vmatmul.msk.f32.gmra.mxu0 %vm607_vm2, %v3374_v60  ;;  %v3877_v44 = vmul.f32 %v3855_v27, %v11363_v49  ;;  %v3862_v35 = vsel %vm2571_vm11, %v8666_v54, %v8548_v32  ;;  %v3853_v56 = vsel %vm2571_vm11, %v8703_v47, %v8709_v23  ;;  %v3522_v27 = vld [vmem:[#allocation7 + $0xd8] sm:$0xff] }
 0x5b5   : > { %4681 = vrot.lane.b32.xlu0 %v8091_v61, %s6898_s30  ;;  %4683 = vrot.lane.b32.xlu1 %v11289_v13, %s6898_s30  ;;  %v3875_v40 = vmul.f32 %v3854_v5, %v11363_v49  ;;  %v3861_v32 = vsel %vm2571_vm11, %v8709_v23, %v8703_v47  ;;  %v3852_v54 = vsel %vm2571_vm11, %v8668_v48, %v8776_v51 }
 0x5b6   : > { %3760 = vmatpush.msra.mxu3 %v3720_v26  ;;  %3789 = vmatpush.msrb.mxu0 %v3721_v39  ;;  %v9192_v11 = vpop.permute.xlu2 %4220  ;;  %v3876_v33 = vmul.f32 %v3862_v35, %v11364_v19  ;;  %v3873_v36 = vmul.f32 %v3853_v56, %v11363_v49  ;;  %v3860_v23 = vsel %vm2571_vm11, %v8776_v51, %v8668_v48 }
 0x5b7   : > { %11365 = vst [vmem:[#allocation75_spill] sm:$0xff] %v9192_v11  ;;  %4665 = vrot.lane.b32.xlu2 %v11292_v37, %s6898_s30  ;;  %3901 = vmatpush.msra.mxu1 %v3879_v14  ;;  %v3874_v14 = vmul.f32 %v3861_v32, %v11364_v19  ;;  %v3871_v26 = vmul.f32 %v3852_v54, %v11363_v49 }
 0x5b8   : > { %3761 = vmatpush.msra.mxu3 %v3718_v2  ;;  %3790 = vmatpush.msrb.mxu0 %v3719_v6  ;;  %v9199_v50 = vpop.permute.xlu0 %4303  ;;  %v3666_v2 = vld [vmem:[#allocation7 + $0xe0] sm:$0xff]  ;;  %v3859_v48 = vsel %vm2571_vm11, %v8705_v45, %v8739_v38  ;;  %v3849_v5 = vsel %vm2571_vm11, %v8725_v10, %v8850_v31 }
 0x5b9   : > { %3930 = vmatpush.msrb.mxu2 %v3880_v7  ;;  %3902 = vmatpush.msra.mxu1 %v3877_v44  ;;  %v4306_v60 = vpop.permute.xlu1 %4305  ;;  %v3851_v7 = vsel %vm2571_vm11, %v8739_v38, %v8705_v45  ;;  %v3872_v45 = vmul.f32 %v3860_v23, %v11364_v19  ;;  %v3858_v38 = vsel %vm2571_vm11, %v8785_v16, %v8822_v17  ;;  %v3814_v23 = vld [vmem:[#allocation7 + $0x108] sm:$0xff] }
 0x5ba   : > { %v9212_v9 = vsel %vm4315_vm12, %v4290_v30, %v4306_v60  ;;  %v9216_v24 = vsel %vm4315_vm12, %v4306_v60, %v4290_v30  ;;  %v3878_v30 = vmul.f32 %v3863_v12, %v11364_v19  ;;  %v3850_v12 = vsel %vm2571_vm11, %v8822_v17, %v8785_v16 }
 0x5bb   : > { %11366 = vst [vmem:[#allocation60_spill] sm:$0xff] %v9212_v9  ;;  %6343 = vmatmul.msk.f32.gmra.mxu1 %vm607_vm2, %v3521_v43  ;;  %6347 = vmatmul.msk.f32.gmra.mxu2 %vm607_vm2, %v3521_v43  ;;  %v3857_v16 = vsel %vm2571_vm11, %v8850_v31, %v8725_v10  ;;  %v3867_v17 = vmul.f32 %v3850_v12, %v11363_v49  ;;  %v3667_v31 = vld [vmem:[#allocation7 + $0xe8] sm:$0xff] }
 0x5bc   : > { %11367 = vst [vmem:[#allocation57_spill] sm:$0xff] %v9216_v24  ;;  %6336 = vmatmul.msk.f32.gmra.mxu3 %vm607_vm2, %v3375_v59  ;;  %6340 = vmatmul.msk.f32.gmra.mxu0 %vm607_vm2, %v3375_v59  ;;  %v3870_v59 = vmul.f32 %v3859_v48, %v11364_v19  ;;  %v3868_v60 = vmul.f32 %v3858_v38, %v11364_v19  ;;  %v3815_v38 = vld [vmem:[#allocation7 + $0x110] sm:$0xff] }
 0x5bd   : > { %4661 = vrot.lane.b32.xlu0 %v7913_v1, %s6898_s30  ;;  %4663 = vrot.lane.b32.xlu1 %v7998_v8, %s6898_s30  ;;  %v3866_v10 = vmul.f32 %v3857_v16, %v11364_v19 }
 0x5be   : > { %3931 = vmatpush.msrb.mxu2 %v3878_v30  ;;  %3903 = vmatpush.msra.mxu1 %v3875_v40  ;;  %v3865_v30 = vmul.f32 %v3849_v5, %v11363_v49  ;;  %v3813_v40 = vld [vmem:[#allocation7 + $0x100] sm:$0xff] }
 0x5bf   : > { %4679 = vrot.lane.b32.xlu2 %v8036_v46, %s6898_s30  ;;  %v9248_v47 = vpop.permute.xlu2 %4234 }
 0x5c0   : > { %3932 = vmatpush.msrb.mxu2 %v3876_v33  ;;  %3904 = vmatpush.msra.mxu1 %v3873_v36  ;;  %v9256_v39 = vpop.f32.mrf.mxu1  ;;  %v4284_v51 = vpop.permute.xlu0 %4283 }
 0x5c1   : > { %v4286_v6 = vpop.permute.xlu1 %4285 }
 0x5c2   : > { %3933 = vmatpush.msrb.mxu2 %v3874_v14  ;;  %3905 = vmatpush.msra.mxu1 %v3871_v26  ;;  %v9269_v44 = vsel %vm4315_vm12, %v4286_v6, %v9132_v52  ;;  %v9274_v43 = vsel %vm4315_vm12, %v9132_v52, %v4286_v6  ;;  %v3869_v52 = vmul.f32 %v3851_v7, %v11363_v49 }
 0x5c3   : > { %11368 = vst [vmem:[#allocation50_spill] sm:$0xff] %v9269_v44  ;;  %6344 = vmatmul.msk.f32.gmra.mxu1 %vm607_vm2, %v3522_v27  ;;  %6348 = vmatmul.msk.f32.gmra.mxu2 %vm607_vm2, %v3522_v27  ;;  %v3668_v27 = vld [vmem:[#allocation7 + $0xf0] sm:$0xff] }
 0x5c4   : > { %11369 = vst [vmem:[#allocation20_spill] sm:$0xff] %v9274_v43  ;;  %6349 = vmatmul.msk.f32.vlgmr.msra.gmra.mxu3 %vm607_vm2, %v3666_v2  ;;  %6353 = vmatmul.msk.f32.vlgmr.msrb.gmra.mxu0 %vm607_vm2, %v3666_v2 }
 0x5c5   : > { %3934 = vmatpush.msrb.mxu2 %v3872_v45  ;;  %4675 = vrot.lane.b32.xlu0 %v7845_v15, %s6898_s30 }
 0x5c6   : > { %4677 = vrot.lane.b32.xlu1 %v7955_v62, %s6898_s30  ;;  %3906 = vmatpush.msra.mxu1 %v3869_v52  ;;  %v3669_v52 = vld [vmem:[#allocation7 + $0xf8] sm:$0xff] }
 0x5c7   : > { %3935 = vmatpush.msrb.mxu2 %v3870_v59  ;;  %4659 = vrot.lane.b32.xlu2 %v11251_v0, %s6898_s30  ;;  %v4215_v35 = vpop.permute.xlu2 %4214  ;;  %v9307_v56 = vpop.f32.mrf.mxu2 }
 0x5c8   : > { %3907 = vmatpush.msra.mxu1 %v3867_v17  ;;  %v9311_v32 = vpop.f32.mrf.mxu1 }
 0x5c9   : > { %3936 = vmatpush.msrb.mxu2 %v3868_v60 }
 0x5ca   : > { %3908 = vmatpush.msra.mxu1 %v3865_v30 }
 0x5cb   : > { %3937 = vmatpush.msrb.mxu2 %v3866_v10  ;;  %6357 = vmatmul.msk.f32.vlgmr.msra.gmra.mxu1 %vm607_vm2, %v3813_v40 }
 0x5cc   : > { %6350 = vmatmul.msk.f32.gmra.mxu3 %vm607_vm2, %v3667_v31  ;;  %6354 = vmatmul.msk.f32.gmra.mxu0 %vm607_vm2, %v3667_v31  ;;  %v4217_v54 = vpop.permute.xlu0 %4216  ;;  %v4300_v33 = vpop.permute.xlu1 %4299 }
 0x5cd   : > { %6361 = vmatmul.msk.f32.vlgmr.msrb.gmra.mxu2 %vm607_vm2, %v3813_v40  ;;  %4655 = vrot.lane.b32.xlu0 %v11255_v63, %s6898_s30  ;;  %v9321_v49 = vsel %vm4315_vm12, %v4284_v51, %v4300_v33  ;;  %v9325_v19 = vsel %vm4315_vm12, %v4300_v33, %v4284_v51  ;;  %v3816_v40 = vld [vmem:[#allocation7 + $0x118] sm:$0xff] }
 0x5ce   : > { %11370 = vst [vmem:[#allocation44_spill] sm:$0xff] %v9321_v49  ;;  %4657 = vrot.lane.b32.xlu1 %v11252_v3, %s6898_s30 }
 0x5cf   : > { %11371 = vst [vmem:[#allocation97_spill] sm:$0xff] %v9325_v19  ;;  %4673 = vrot.lane.b32.xlu2 %v11253_v18, %s6898_s30  ;;  %v4229_v36 = vpop.permute.xlu2 %4228  ;;  %v9331_v14 = vpop.f32.mrf.mxu2 }
 0x5d3   : > { %6358 = vmatmul.msk.f32.gmra.mxu1 %vm607_vm2, %v3814_v23  ;;  %v9335_v26 = vpop.f32.mrf.mxu1 }
 0x5d4   : > { %6351 = vmatmul.msk.f32.gmra.mxu3 %vm607_vm2, %v3668_v27  ;;  %6355 = vmatmul.msk.f32.gmra.mxu0 %vm607_vm2, %v3668_v27 }
 0x5d5   : > { %6362 = vmatmul.msk.f32.gmra.mxu2 %vm607_vm2, %v3814_v23  ;;  %4903 = vrot.lane.b32.xlu0 %v11292_v37, %s6899_s11  ;;  %v4231_v7 = vpop.permute.xlu0 %4230 }
 0x5d6   : > { %4671 = vrot.lane.b32.xlu1 %v11293_v34, %s6898_s30  ;;  %v9346_v2 = vsel %vm4238_vm13, %v4215_v35, %v4231_v7  ;;  %v9350_v6 = vsel %vm4238_vm13, %v4231_v7, %v4215_v35  ;;  %v4219_v48 = vpop.permute.xlu1 %4218 }
 0x5d7   : > { %11372 = vst [vmem:[#allocation90_spill] sm:$0xff] %v9346_v2  ;;  %4907 = vrot.lane.b32.xlu2 %v11285_v25, %s6899_s11  ;;  %v9357_v51 = vsel %vm4238_vm13, %v4219_v48, %v9248_v47  ;;  %v9362_v12 = vsel %vm4238_vm13, %v9248_v47, %v4219_v48  ;;  %v4211_v45 = vpop.permute.xlu2 %4210 }
 0x5d8   : > { %11373 = vst [vmem:[#allocation96_spill] sm:$0xff] %v9350_v6 }
 0x5d9   : > { %11374 = vst [vmem:[#allocation32_spill] sm:$0xff] %v9357_v51  ;;  %v9364_v5 = vpop.f32.mrf.mxu2 }
 0x5da   : > { %11375 = vst [vmem:[#allocation33_spill] sm:$0xff] %v9362_v12 }
 0x5db   : > { %6359 = vmatmul.msk.f32.gmra.mxu1 %vm607_vm2, %v3815_v38 }
 0x5dc   : > { %6352 = vmatmul.msk.f32.gmra.mxu3 %vm607_vm2, %v3669_v52  ;;  %6356 = vmatmul.msk.f32.gmra.mxu0 %vm607_vm2, %v3669_v52 }
 0x5dd   : > { %6363 = vmatmul.msk.f32.gmra.mxu2 %vm607_vm2, %v3815_v38  ;;  %4917 = vrot.lane.b32.xlu0 %v8036_v46, %s6899_s11  ;;  %v9372_v59 = vpop.permute.xlu0 %4514  ;;  %v9374_v47 = vpop.f32.mrf.mxu1 }
 0x5de   : > { %11376 = vst [vmem:[#allocation55_spill] sm:$0xff] %v9372_v59  ;;  %4905 = vrot.lane.b32.xlu1 %v11288_v4, %s6899_s11  ;;  %v4233_v16 = vpop.permute.xlu1 %4232 }
 0x5df   : > { %4921 = vrot.lane.b32.xlu2 %v11289_v13, %s6899_s11  ;;  %v9380_v17 = vpop.f32.mrf.mxu0  ;;  %v9384_v60 = vsel %vm4238_vm13, %v4217_v54, %v4233_v16  ;;  %v9388_v35 = vsel %vm4238_vm13, %v4233_v16, %v4217_v54  ;;  %v4529_v30 = vpop.permute.xlu2 %4528 }
 0x5e0   : > { %11377 = vst [vmem:[#allocation89_spill] sm:$0xff] %v9384_v60 }
 0x5e1   : > { %11378 = vst [vmem:[#allocation40_spill] sm:$0xff] %v9388_v35 }
 0x5e3   : > { %6360 = vmatmul.msk.f32.gmra.mxu1 %vm607_vm2, %v3816_v40 }
 0x5e4   : > { %v9391_v10 = vpop.f32.mrf.mxu2  ;;  %v9393_v31 = vpop.f32.mrf.mxu3 }
 0x5e5   : > { %11379 = vst [vmem:[#allocation82_spill] sm:$0xff] %v9391_v10  ;;  %6364 = vmatmul.msk.f32.gmra.mxu2 %vm607_vm2, %v3816_v40  ;;  %5062 = vrot.lane.b32.xlu0 %v11285_v25, %s6900_s15  ;;  %v4227_v33 = vpop.permute.xlu0 %4226 }
 0x5e6   : > { %4919 = vrot.lane.b32.xlu1 %v8091_v61, %s6899_s11  ;;  %v9402_v54 = vsel %vm4238_vm13, %v4211_v45, %v4227_v33  ;;  %v9406_v23 = vsel %vm4238_vm13, %v4227_v33, %v4211_v45  ;;  %v4213_v27 = vpop.permute.xlu1 %4212 }
 0x5e7   : > { %11380 = vst [vmem:[#allocation74_spill] sm:$0xff] %v9402_v54  ;;  %4901 = vrot.lane.b32.xlu2 %v7998_v8, %s6899_s11  ;;  %v9410_v7 = vpop.f32.mrf.mxu0  ;;  %v9412_v48 = vpop.f32.mrf.mxu1  ;;  %v9416_v38 = vsel %vm4238_vm13, %v4213_v27, %v4229_v36  ;;  %v9420_v52 = vsel %vm4238_vm13, %v4229_v36, %v4213_v27 }
 0x5e8   : > { %11381 = vst [vmem:[#allocation72_spill] sm:$0xff] %v9406_v23  ;;  %v4511_v16 = vpop.permute.xlu2 %4510 }
 0x5e9   : > { %11382 = vst [vmem:[#allocation48_spill] sm:$0xff] %v9416_v38 }
 0x5ea   : > { %11383 = vst [vmem:[#allocation69_spill] sm:$0xff] %v9420_v52 }
 0x5ec   : > { %v9422_v40 = vpop.f32.mrf.mxu3 }
 0x5ed   : > { %4913 = vrot.lane.b32.xlu0 %v7845_v15, %s6899_s11  ;;  %v4209_v45 = vpop.permute.xlu0 %4208 }
 0x5ee   : > { %4899 = vrot.lane.b32.xlu1 %v7913_v1, %s6899_s11  ;;  %v9429_v33 = vpop.f32.mrf.mxu2  ;;  %v4513_v59 = vpop.permute.xlu1 %4512 }
 0x5ef   : > { %4915 = vrot.lane.b32.xlu2 %v7955_v62, %s6899_s11  ;;  %v9433_v36 = vpop.f32.mrf.mxu0  ;;  %v9435_v27 = vpop.f32.mrf.mxu1  ;;  %v9439_v54 = vsel %vm4532_vm14, %v4513_v59, %v4529_v30  ;;  %v9443_v23 = vsel %vm4532_vm14, %v4529_v30, %v4513_v59 }
 0x5f0   : > { %11384 = vst [vmem:[#allocation47_spill] sm:$0xff] %v9439_v54  ;;  %v4223_v38 = vpop.permute.xlu2 %4222 }
 0x5f1   : > { %11385 = vst [vmem:[#allocation49_spill] sm:$0xff] %v9443_v23 }
 0x5f4   : > { %v9445_v52 = vpop.f32.mrf.mxu3 }
 0x5f5   : > { %4895 = vrot.lane.b32.xlu0 %v11252_v3, %s6899_s11  ;;  %v4527_v2 = vpop.permute.xlu0 %4526 }
 0x5f6   : > { %5060 = vrot.lane.b32.xlu1 %v11288_v4, %s6900_s15  ;;  %v9451_v6 = vpop.f32.mrf.mxu2  ;;  %v9455_v60 = vsel %vm4532_vm14, %v4511_v16, %v4527_v2  ;;  %v9459_v59 = vsel %vm4532_vm14, %v4527_v2, %v4511_v16  ;;  %v4225_v30 = vpop.permute.xlu1 %4224 }
 0x5f7   : > { %11386 = vst [vmem:[#allocation23_spill] sm:$0xff] %v9455_v60  ;;  %4897 = vrot.lane.b32.xlu2 %v11251_v0, %s6899_s11  ;;  %v9463_v54 = vpop.f32.mrf.mxu0  ;;  %v9465_v23 = vpop.f32.mrf.mxu1  ;;  %v9469_v35 = vsel %vm4238_vm13, %v4209_v45, %v4225_v30  ;;  %v9473_v51 = vsel %vm4238_vm13, %v4225_v30, %v4209_v45 }
 0x5f8   : > { %11387 = vst [vmem:[#allocation19_spill] sm:$0xff] %v9459_v59 }
 0x5f9   : > { %11388 = vst [vmem:[#allocation95_spill] sm:$0xff] %v9463_v54  ;;  %v4507_v60 = vpop.permute.xlu2 %4506 }
 0x5fa   : > { %11389 = vst [vmem:[#allocation87_spill] sm:$0xff] %v9469_v35 }
 0x5fb   : > { %11390 = vst [vmem:[#allocation34_spill] sm:$0xff] %v9473_v51 }
 0x5fc   : > { %v9475_v12 = vpop.f32.mrf.mxu3 }
 0x5fd   : > { %5074 = vrot.lane.b32.xlu0 %v8091_v61, %s6900_s15  ;;  %v4509_v2 = vpop.permute.xlu0 %4508 }
 0x5fe   : > { %4911 = vrot.lane.b32.xlu1 %v11253_v18, %s6899_s11  ;;  %v9481_v16 = vpop.f32.mrf.mxu2  ;;  %v4207_v59 = vpop.permute.xlu1 %4206 }
 0x5ff   : > { %11391 = vst [vmem:[#allocation35_spill] sm:$0xff] %v9481_v16  ;;  %4313 = vrot.lane.b32.xlu2 %v8246_v42, %s6895_s29  ;;  %v9485_v35 = vpop.f32.mrf.mxu1  ;;  %v9487_v45 = vpop.f32.mrf.mxu0  ;;  %v9491_v30 = vsel %vm4238_vm13, %v4207_v59, %v4223_v38  ;;  %v9495_v51 = vsel %vm4238_vm13, %v4223_v38, %v4207_v59 }
 0x600   : > { %11392 = vst [vmem:[#allocation91_spill] sm:$0xff] %v9487_v45 }
 0x601   : > { %11393 = vst [vmem:[#allocation86_spill] sm:$0xff] %v9491_v30  ;;  %v4521_v11 = vpop.permute.xlu2 %4520 }
 0x602   : > { %11394 = vst [vmem:[#allocation80_spill] sm:$0xff] %v9495_v51 }
 0x604   : > { %v9497_v19 = vpop.f32.mrf.mxu3 }
 0x605   : > { %4236 = vrot.lane.b32.xlu0 %v8246_v42, %s6896_s24  ;;  %v4523_v21 = vpop.permute.xlu0 %4522 }
 0x606   : > { %4893 = vrot.lane.b32.xlu1 %v11255_v63, %s6899_s11  ;;  %v9503_v49 = vpop.f32.mrf.mxu2  ;;  %v9507_v20 = vsel %vm4532_vm14, %v4507_v60, %v4523_v21  ;;  %v9511_v38 = vsel %vm4532_vm14, %v4523_v21, %v4507_v60  ;;  %v4525_v59 = vpop.permute.xlu1 %4524 }
 0x607   : > { %11395 = vst [vmem:[#allocation81_spill] sm:$0xff] %v9503_v49  ;;  %5076 = vrot.lane.b32.xlu2 %v11289_v13, %s6900_s15  ;;  %v9515_v30 = vpop.f32.mrf.mxu0  ;;  %v9517_v51 = vpop.f32.mrf.mxu1  ;;  %v9521_v44 = vsel %vm4532_vm14, %v4509_v2, %v4525_v59  ;;  %v9525_v43 = vsel %vm4532_vm14, %v4525_v59, %v4509_v2 }
 0x608   : > { %11396 = vst [vmem:[#allocation78_spill] sm:$0xff] %v9507_v20 }
 0x609   : > { %11397 = vst [vmem:[#allocation73_spill] sm:$0xff] %v9511_v38  ;;  %v4501_v20 = vpop.permute.xlu2 %4500 }
 0x60a   : > { %11398 = vst [vmem:[#allocation100_spill] sm:$0xff] %v9515_v30 }
 0x60b   : > { %11399 = vst [vmem:[#allocation94_spill] sm:$0xff] %v9521_v44 }
 0x60c   : > { %11400 = vst [vmem:[#allocation85_spill] sm:$0xff] %v9525_v43  ;;  %v9527_v9 = vpop.f32.mrf.mxu3 }
 0x60d   : > { %5056 = vrot.lane.b32.xlu0 %v7998_v8, %s6900_s15 }
 0x60e   : > { %5072 = vrot.lane.b32.xlu1 %v8036_v46, %s6900_s15  ;;  %v9533_v21 = vpop.f32.mrf.mxu2 }
 0x60f   : > { %11401 = vst [vmem:[#allocation36_spill] sm:$0xff] %v9533_v21  ;;  %5058 = vrot.lane.b32.xlu2 %v11292_v37, %s6900_s15  ;;  %v4503_v60 = vpop.permute.xlu0 %4502  ;;  %v9537_v38 = vpop.f32.mrf.mxu0 }
 0x610   : > { %11402 = vst [vmem:[#allocation37_spill] sm:$0xff] %v9537_v38  ;;  %v9539_v44 = vpop.f32.mrf.mxu1  ;;  %v4505_v2 = vpop.permute.xlu1 %4504 }
 0x611   : > { %v9543_v59 = vsel %vm4532_vm14, %v4505_v2, %v4521_v11  ;;  %v9547_v43 = vsel %vm4532_vm14, %v4521_v11, %v4505_v2  ;;  %v4666_v24 = vpop.permute.xlu2 %4665 }
 0x612   : > { %11403 = vst [vmem:[#allocation70_spill] sm:$0xff] %v9543_v59 }
 0x613   : > { %11404 = vst [vmem:[#allocation66_spill] sm:$0xff] %v9547_v43 }
 0x614   : > { %v9549_v30 = vpop.f32.mrf.mxu3 }
 0x615   : > { %5070 = vrot.lane.b32.xlu0 %v7955_v62, %s6900_s15 }
 0x616   : > { %4530 = vrot.lane.b32.xlu1 %v8246_v42, %s6897_s26  ;;  %v9555_v21 = vpop.f32.mrf.mxu2 }
 0x617   : > { %11405 = vst [vmem:[#allocation83_spill] sm:$0xff] %v9555_v21  ;;  %4909 = vrot.lane.b32.xlu2 %v11293_v34, %s6899_s11  ;;  %v4517_v38 = vpop.permute.xlu0 %4516  ;;  %v9559_v59 = vpop.f32.mrf.mxu0 }
 0x618   : > { %11406 = vst [vmem:[#allocation56_spill] sm:$0xff] %v9559_v59  ;;  %v9563_v11 = vsel %vm4532_vm14, %v4501_v20, %v4517_v38  ;;  %v9567_v2 = vsel %vm4532_vm14, %v4517_v38, %v4501_v20  ;;  %v9569_v43 = vpop.f32.mrf.mxu1  ;;  %v4519_v49 = vpop.permute.xlu1 %4518 }
 0x619   : > { %11407 = vst [vmem:[#allocation62_spill] sm:$0xff] %v9563_v11  ;;  %v9573_v21 = vsel %vm4532_vm14, %v4503_v60, %v4519_v49  ;;  %v4680_v45 = vpop.permute.xlu2 %4679  ;;  %v9577_v16 = vsel %vm4532_vm14, %v4519_v49, %v4503_v60 }
 0x61a   : > { %11408 = vst [vmem:[#allocation65_spill] sm:$0xff] %v9567_v2 }
 0x61b   : > { %11409 = vst [vmem:[#allocation84_spill] sm:$0xff] %v9573_v21 }
 0x61c   : > { %11410 = vst [vmem:[#allocation79_spill] sm:$0xff] %v9577_v16  ;;  %v9581_v11 = vpop.f32.mrf.mxu3 }
 0x61d   : > { %5050 = vrot.lane.b32.xlu0 %v11252_v3, %s6900_s15 }
 0x61e   : > { %5052 = vrot.lane.b32.xlu1 %v11251_v0, %s6900_s15  ;;  %v9585_v20 = vpop.f32.mrf.mxu2 }
 0x61f   : > { %11411 = vst [vmem:[#allocation58_spill] sm:$0xff] %v9585_v20  ;;  %5054 = vrot.lane.b32.xlu2 %v7913_v1, %s6900_s15  ;;  %v4668_v38 = vpop.permute.xlu0 %4667 }
 0x620   : > { %v9589_v2 = vpop.f32.mrf.mxu1  ;;  %v9591_v21 = vpop.permute.xlu1 %4669 }
 0x621   : > { %11412 = vst [vmem:[#allocation22_spill] sm:$0xff] %v9589_v2  ;;  %v9593_v49 = vpop.f32.mrf.mxu0  ;;  %v4660_v60 = vpop.permute.xlu2 %4659 }
 0x622   : > { %11413 = vst [vmem:[#allocation76_spill] sm:$0xff] %v9591_v21 }
 0x623   : > { %11414 = vst [vmem:[#allocation68_spill] sm:$0xff] %v9593_v49 }
 0x625   : > { %5064 = vrot.lane.b32.xlu0 %v11293_v34, %s6900_s15 }
 0x626   : > { %5066 = vrot.lane.b32.xlu1 %v11253_v18, %s6900_s15  ;;  %v9600_v16 = vpop.f32.mrf.mxu2 }
 0x627   : > { %11415 = vst [vmem:[#allocation71_spill] sm:$0xff] %v9600_v16  ;;  %v9602_v3 = vpop.f32.mrf.mxu3  ;;  %5068 = vrot.lane.b32.xlu2 %v7845_v15, %s6900_s15  ;;  %v4682_v59 = vpop.permute.xlu0 %4681 }
 0x628   : > { %v9608_v21 = vsel %vm4687_vm15, %v4666_v24, %v4682_v59  ;;  %v9612_v34 = vsel %vm4687_vm15, %v4682_v59, %v4666_v24  ;;  %v9614_v49 = vpop.f32.mrf.mxu1  ;;  %v4684_v20 = vpop.permute.xlu1 %4683 }
 0x629   : > { %11416 = vst [vmem:[#allocation67_spill] sm:$0xff] %v9608_v21  ;;  %v9616_v54 = vpop.f32.mrf.mxu0  ;;  %v9620_v16 = vsel %vm4687_vm15, %v4668_v38, %v4684_v20  ;;  %v9624_v10 = vsel %vm4687_vm15, %v4684_v20, %v4668_v38  ;;  %v4674_v2 = vpop.permute.xlu2 %4673 }
 0x62a   : > { %11417 = vst [vmem:[#allocation43_spill] sm:$0xff] %v9612_v34 }
 0x62b   : > { %11418 = vst [vmem:[#allocation63_spill] sm:$0xff] %v9616_v54 }
 0x62c   : > { %11419 = vst [vmem:[#allocation45_spill] sm:$0xff] %v9620_v16 }
 0x62d   : > { %11420 = vst [vmem:[#allocation27_spill] sm:$0xff] %v9624_v10  ;;  %5215 = vrot.lane.b32.xlu0 %v11288_v4, %s6901_s19 }
 0x62e   : > { %5217 = vrot.lane.b32.xlu1 %v11285_v25, %s6901_s19  ;;  %v9630_v24 = vpop.f32.mrf.mxu2 }
 0x62f   : > { %11421 = vst [vmem:[#allocation98_spill] sm:$0xff] %v9630_v24  ;;  %v9632_v59 = vpop.f32.mrf.mxu3  ;;  %5048 = vrot.lane.b32.xlu2 %v11255_v63, %s6900_s15  ;;  %v4662_v21 = vpop.permute.xlu0 %4661 }
 0x630   : > { %v9636_v34 = vpop.f32.mrf.mxu1  ;;  %v4664_v20 = vpop.permute.xlu1 %4663 }
 0x631   : > { %v9638_v38 = vpop.f32.mrf.mxu0  ;;  %v9642_v16 = vsel %vm4687_vm15, %v4664_v20, %v4680_v45  ;;  %v9646_v10 = vsel %vm4687_vm15, %v4680_v45, %v4664_v20  ;;  %v9648_v24 = vpop.permute.xlu2 %4907 }
 0x632   : > { %11422 = vst [vmem:[#allocation38_spill] sm:$0xff] %v9638_v38 }
 0x633   : > { %11423 = vst [vmem:[#allocation39_spill] sm:$0xff] %v9642_v16 }
 0x634   : > { %11424 = vst [vmem:[#allocation92_spill] sm:$0xff] %v9646_v10 }
 0x635   : > { %11425 = vst [vmem:[#allocation99_spill] sm:$0xff] %v9648_v24  ;;  %5229 = vrot.lane.b32.xlu0 %v8091_v61, %s6901_s19 }
 0x636   : > { %5231 = vrot.lane.b32.xlu1 %v11289_v13, %s6901_s19  ;;  %v9654_v54 = vpop.f32.mrf.mxu2 }
 0x637   : > { %11426 = vst [vmem:[#allocation93_spill] sm:$0xff] %v9654_v54  ;;  %v9656_v63 = vpop.f32.mrf.mxu3  ;;  %4685 = vrot.lane.b32.xlu2 %v8246_v42, %s6898_s30  ;;  %v4676_v16 = vpop.permute.xlu0 %4675 }
 0x638   : > { %v9662_v45 = vsel %vm4687_vm15, %v4660_v60, %v4676_v16  ;;  %v9666_v20 = vsel %vm4687_vm15, %v4676_v16, %v4660_v60  ;;  %v9668_v24 = vpop.f32.mrf.mxu1  ;;  %v4678_v10 = vpop.permute.xlu1 %4677 }
 0x639   : > { %11427 = vst [vmem:[#allocation88_spill] sm:$0xff] %v9662_v45  ;;  %v9672_v61 = vsel %vm4687_vm15, %v4662_v21, %v4678_v10  ;;  %v9676_v54 = vsel %vm4687_vm15, %v4678_v10, %v4662_v21  ;;  %v4922_v38 = vpop.permute.xlu2 %4921  ;;  %v9678_v13 = vpop.f32.mrf.mxu0 }
 0x63a   : > { %11428 = vst [vmem:[#allocation77_spill] sm:$0xff] %v9666_v20 }
 0x63b   : > { %11429 = vst [vmem:[#allocation101_spill] sm:$0xff] %v9672_v61 }
 0x63c   : > { %11430 = vst [vmem:[#allocation102_spill] sm:$0xff] %v9676_v54 }
 0x63d   : > { %11431 = vst [vmem:[#allocation41_spill] sm:$0xff] %v9678_v13  ;;  %5209 = vrot.lane.b32.xlu0 %v7913_v1, %s6901_s19  ;;  %v4333_v13 = vld [vmem:[#allocation4 + $0x14] sm:$0x3] }
 0x63e   : > { %5211 = vrot.lane.b32.xlu1 %v7998_v8, %s6901_s19  ;;  %v9684_v16 = vpop.f32.mrf.mxu2 }
 0x63f   : > { %11432 = vst [vmem:[#allocation42_spill] sm:$0xff] %v9684_v16  ;;  %v9686_v60 = vpop.f32.mrf.mxu3  ;;  %5213 = vrot.lane.b32.xlu2 %v11292_v37, %s6901_s19  ;;  %v4656_v45 = vpop.permute.xlu0 %4655  ;;  %v9735_v16 = vperm.slane %v4333_v13, 1 }
 0x640   : > { %v9690_v20 = vpop.f32.mrf.mxu1  ;;  %v4658_v10 = vpop.permute.xlu1 %4657 }
 0x641   : > { %v9694_v21 = vsel %vm4687_vm15, %v4658_v10, %v4674_v2  ;;  %v9698_v61 = vsel %vm4687_vm15, %v4674_v2, %v4658_v10  ;;  %v4902_v54 = vpop.permute.xlu2 %4901  ;;  %v9700_v1 = vpop.f32.mrf.mxu0  ;;  %v2960_v2 = vadd.f32 %v9445_v52, %v9335_v26  ;;  %v2954_v26 = vadd.f32 %v9393_v31, %v9256_v39 }
 0x642   : > { %11433 = vst [vmem:[#allocation103_spill] sm:$0xff] %v9694_v21  ;;  %v4330_v39 = vsel %vm4315_vm12, %v9029_v29, %v8952_v57 }
 0x643   : > { %11434 = vst [vmem:[#allocation104_spill] sm:$0xff] %v9698_v61  ;;  %v3137_v52 = vadd.f32 %v9465_v23, %v2960_v2  ;;  %v3133_v23 = vadd.f32 %v9412_v48, %v2954_v26 }
 0x644   : > { %11435 = vst [vmem:[#allocation105_spill] sm:$0xff] %v9700_v1  ;;  %v2957_v1 = vadd.f32 %v9422_v40, %v9311_v32 }
 0x645   : > { %4923 = vrot.lane.b32.xlu0 %v8246_v42, %s6899_s11  ;;  %v3280_v48 = vadd.f32 %v9497_v19, %v3133_v23 }
 0x646   : > { %5225 = vrot.lane.b32.xlu1 %v7955_v62, %s6901_s19  ;;  %v9706_v8 = vpop.f32.mrf.mxu2  ;;  %v3135_v32 = vadd.f32 %v9435_v27, %v2957_v1  ;;  %v3284_v1 = vadd.f32 %v9549_v30, %v3137_v52 }
 0x647   : > { %11436 = vst [vmem:[#allocation106_spill] sm:$0xff] %v9706_v8  ;;  %v9708_v37 = vpop.f32.mrf.mxu3  ;;  %5227 = vrot.lane.b32.xlu2 %v8036_v46, %s6901_s19  ;;  %v9712_v21 = vpop.permute.xlu0 %4903 }
 0x648   : > { %v9716_v10 = vpop.f32.mrf.mxu1  ;;  %v4672_v61 = vpop.permute.xlu1 %4671  ;;  %v3282_v40 = vadd.f32 %v9527_v9, %v3135_v32  ;;  %v4321_v9 = vsel %vm4315_vm12, %v9072_v22, %v8976_v58 }
 0x649   : > { %11437 = vst [vmem:[#allocation107_spill] sm:$0xff] %v9716_v10  ;;  %v9722_v62 = vsel %vm4687_vm15, %v4656_v45, %v4672_v61  ;;  %v9726_v8 = vsel %vm4687_vm15, %v4672_v61, %v4656_v45  ;;  %v9728_v46 = vpop.permute.xlu2 %4915  ;;  %v9733_v10 = vperm.slane %v4333_v13, 0  ;;  %v4322_v61 = vsel %vm4315_vm12, %v8952_v57, %v9029_v29  ;;  %v9752_v31 = vpop.f32.mrf.mxu0 }
 0x64a   : > { %v2963_v13 = vadd.f32 %v9475_v12, %v9374_v47  ;;  %v9783_v26 = vmul.f32 %v9735_v16, %v4322_v61  ;;  %v4329_v61 = vsel %vm4315_vm12, %v8976_v58, %v9072_v22  ;;  %v9817_v22 = vmul.f32 %v9735_v16, %v4321_v9  ;;  %v11438_v9 = vld [vmem:[#allocation22_spill] sm:$0xff] }
 0x64b   : > { %v9780_v2 = vmul.f32 %v9733_v10, %v4330_v39  ;;  %v4326_v39 = vsel %vm4315_vm12, %v9199_v50, %v9076_v53 }
 0x64c   : > { %v3139_v52 = vadd.f32 %v9485_v35, %v2963_v13  ;;  %v4328_v35 = vsel %vm4315_vm12, %v9035_v55, %v9118_v41 }
 0x64d   : > { %5370 = vrot.lane.b32.xlu0 %v11288_v4, %s6902_s22 }
 0x64e   : > { %5207 = vrot.lane.b32.xlu1 %v11251_v0, %s6901_s19  ;;  %v3286_v13 = vadd.f32 %v9581_v11, %v3139_v52  ;;  %v9834_v11 = vmul.f32 %v9733_v10, %v4329_v61 }
 0x64f   : > { %v9758_v27 = vpop.f32.mrf.mxu3  ;;  %5372 = vrot.lane.b32.xlu2 %v11285_v25, %s6902_s22  ;;  %v4918_v57 = vpop.permute.xlu0 %4917 }
 0x650   : > { %v9762_v29 = vpop.f32.mrf.mxu2  ;;  %v9766_v12 = vsel %vm4925_vm0, %v4902_v54, %v4918_v57  ;;  %v9770_v47 = vsel %vm4925_vm0, %v4918_v57, %v4902_v54  ;;  %v9772_v30 = vpop.f32.mrf.mxu1  ;;  %v3367_v54 = vadd.f32 %v9569_v43, %v3284_v1  ;;  %v4320_v43 = vsel %vm4315_vm12, %v9118_v41, %v9035_v55 }
 0x651   : > { %v4906_v45 = vpop.permute.xlu1 %4905  ;;  %v9795_v19 = vpop.permute.xlu2 %4897  ;;  %v4318_v1 = vsel %vm4315_vm12, %v9076_v53, %v9199_v50  ;;  %v2983_v55 = vadd.f32 %v9380_v17, %v9307_v56  ;;  %v3363_v41 = vadd.f32 %v9517_v51, %v3280_v48  ;;  %v9837_v53 = vmul.f32 %v9733_v10, %v4328_v35 }
 0x652   : > { %v9789_v32 = vsel %vm4925_vm0, %v4906_v45, %v4922_v38  ;;  %v9793_v57 = vsel %vm4925_vm0, %v4922_v38, %v4906_v45  ;;  %v3365_v38 = vadd.f32 %v9539_v44, %v3282_v40  ;;  %v3514_v58 = vadd.f32 %v9656_v63, %v3367_v54  ;;  %v11441_v54 = vld [vmem:[#allocation35_spill] sm:$0xff] }
 0x653   : > { %v2986_v63 = vadd.f32 %v9410_v7, %v9331_v14  ;;  %v9840_v50 = vmul.f32 %v9735_v16, %v4320_v43  ;;  %v9843_v56 = vmul.f32 %v9733_v10, %v4326_v39  ;;  %v3134_v51 = vadd.f32 %v9429_v33, %v2983_v55  ;;  %v11442_v43 = vld [vmem:[#allocation91_spill] sm:$0xff] }
 0x654   : > { %v3512_v44 = vadd.f32 %v9632_v59, %v3365_v38  ;;  %v2989_v14 = vadd.f32 %v9433_v36, %v9364_v5  ;;  %v3510_v17 = vadd.f32 %v9602_v3, %v3363_v41  ;;  %v9854_v23 = vmul.f32 %v9735_v16, %v4318_v1  ;;  %v11439_v36 = vld [vmem:[#allocation82_spill] sm:$0xff]  ;;  %v11440_v3 = vld [vmem:[#allocation95_spill] sm:$0xff]  ;;  %v11443_v41 = vld [vmem:[#allocation81_spill] sm:$0xff] }
 0x655   : > { %5221 = vrot.lane.b32.xlu0 %v11253_v18, %s6901_s19  ;;  %v3136_v40 = vadd.f32 %v9451_v6, %v2986_v63  ;;  %v3369_v48 = vadd.f32 %v11438_v9, %v3286_v13  ;;  %v3661_v33 = vadd.f32 %v9668_v24, %v3514_v58  ;;  %v2992_v52 = vadd.f32 %v11440_v3, %v11439_v36  ;;  %v3798_v6 = vpop.f32.mrf.mxu0  ;;  %v11447_v36 = vld [vmem:[#allocation36_spill] sm:$0xff] }
 0x656   : > { %5078 = vrot.lane.b32.xlu1 %v8246_v42, %s6900_s15  ;;  %v3138_v61 = vadd.f32 %v11441_v54, %v2989_v14  ;;  %v3281_v35 = vadd.f32 %v11442_v43, %v3134_v51  ;;  %v3659_v38 = vadd.f32 %v9636_v34, %v3512_v44  ;;  %v11444_v51 = vld [vmem:[#allocation37_spill] sm:$0xff]  ;;  %v3657_v44 = vadd.f32 %v9614_v49, %v3510_v17 }
 0x657   : > { %v3769_v7 = vpop.f32.mrf.mxu3  ;;  %5223 = vrot.lane.b32.xlu2 %v7845_v15, %s6901_s19  ;;  %v9851_v59 = vpop.permute.xlu0 %5062  ;;  %v3516_v1 = vadd.f32 %v9686_v60, %v3369_v48  ;;  %v3140_v63 = vadd.f32 %v11443_v41, %v2992_v52  ;;  %v11445_v60 = vld [vmem:[#allocation17_spill] sm:$0xff]  ;;  %v11448_v52 = vld [vmem:[#allocation58_spill] sm:$0xff]  ;;  %v11453_v41 = vld [vmem:[#allocation68_spill] sm:$0xff] }
 0x658   : > { %v9859_v45 = vpop.f32.mrf.mxu2  ;;  %v3916_v5 = vpop.f32.mrf.mxu1  ;;  %v3808_v55 = vadd.f32 %v3769_v7, %v3661_v33  ;;  %v3285_v34 = vadd.f32 %v11444_v51, %v3138_v61  ;;  %v11446_v7 = vld [vmem:[#allocation100_spill] sm:$0xff]  ;;  %v3806_v48 = vadd.f32 %v9758_v27, %v3659_v38  ;;  %v3364_v3 = vadd.f32 %v11447_v36, %v3281_v35 }
 0x659   : > { %v4920_v39 = vpop.permute.xlu1 %4919  ;;  %v4314_v58 = vpop.permute.xlu2 %4313  ;;  %v3283_v9 = vadd.f32 %v11446_v7, %v3136_v40  ;;  %v3804_v49 = vadd.f32 %v9708_v37, %v3657_v44  ;;  %v11449_v61 = vld [vmem:[#allocation52_spill] sm:$0xff]  ;;  %v11450_v40 = vld [vmem:[#allocation83_spill] sm:$0xff]  ;;  %v3663_v27 = vadd.f32 %v9690_v20, %v3516_v1 }
 0x65a   : > { %v9870_v24 = vsel %vm4925_vm0, %v9712_v21, %v4920_v39  ;;  %v9875_v13 = vsel %vm4925_vm0, %v4920_v39, %v9712_v21  ;;  %v4323_v14 = vsel %vm4315_vm12, %v11445_v60, %v4314_v58  ;;  %v4331_v21 = vsel %vm4315_vm12, %v4314_v58, %v11445_v60  ;;  %v11451_v39 = vld [vmem:[#allocation51_spill] sm:$0xff]  ;;  %v11452_v58 = vld [vmem:[#allocation56_spill] sm:$0xff]  ;;  %v11455_v60 = vld [vmem:[#allocation54_spill] sm:$0xff] }
 0x65b   : > { %v4354_v33 = vmul.f32 %v9735_v16, %v4323_v14  ;;  %v3368_v54 = vadd.f32 %v11448_v52, %v3285_v34  ;;  %v4353_v17 = vmul.f32 %v9733_v10, %v4331_v21  ;;  %v3366_v43 = vadd.f32 %v11450_v40, %v3283_v9  ;;  %v11454_v34 = vld [vmem:[#allocation38_spill] sm:$0xff]  ;;  %v11456_v9 = vld [vmem:[#allocation71_spill] sm:$0xff] }
 0x65c   : > { %v3955_v38 = vadd.f32 %v3916_v5, %v3808_v55  ;;  %v3287_v35 = vadd.f32 %v11452_v58, %v3140_v63  ;;  %v3511_v51 = vadd.f32 %v11453_v41, %v3364_v3  ;;  %v3953_v7 = vadd.f32 %v9772_v30, %v3806_v48  ;;  %v11458_v30 = vld [vmem:[#allocation42_spill] sm:$0xff]  ;;  %v11459_v3 = vld [vmem:[#allocation107_spill] sm:$0xff]  ;;  %v11462_v58 = vld [vmem:[#allocation93_spill] sm:$0xff] }
 0x65d   : > { %5203 = vrot.lane.b32.xlu0 %v11449_v61, %s6901_s19  ;;  %4404 = vmatpush.msra.mxu2 %v4354_v33  ;;  %v3515_v37 = vadd.f32 %v11454_v34, %v3368_v54  ;;  %v11457_v33 = vld [vmem:[#allocation63_spill] sm:$0xff]  ;;  %v3951_v52 = vadd.f32 %v11459_v3, %v3804_v49  ;;  %v11460_v54 = vld [vmem:[#allocation24_spill] sm:$0xff]  ;;  %v11461_v49 = vld [vmem:[#allocation57_spill] sm:$0xff] }
 0x65e   : > { %5386 = vrot.lane.b32.xlu1 %v11451_v39, %s6902_s22  ;;  %4375 = vmatpush.msrb.mxu1 %v4353_v17  ;;  %v3370_v21 = vadd.f32 %v11456_v9, %v3287_v35  ;;  %v3513_v36 = vadd.f32 %v11457_v33, %v3366_v43  ;;  %v3979_v17 = vmul.f32 %v11460_v54, %v3955_v38  ;;  %v11463_v38 = vld [vmem:[#allocation41_spill] sm:$0xff]  ;;  %v3801_v9 = vpop.f32.mrf.mxu0 }
 0x65f   : > { %v3772_v44 = vpop.f32.mrf.mxu3  ;;  %5205 = vrot.lane.b32.xlu2 %v11455_v60, %s6901_s19  ;;  %v4914_v14 = vpop.permute.xlu0 %4913  ;;  %4405 = vmatpush.msra.mxu2 %v9783_v26  ;;  %v3662_v48 = vadd.f32 %v11458_v30, %v3515_v37  ;;  %v11464_v37 = vld [vmem:[#allocation60_spill] sm:$0xff]  ;;  %v11467_v33 = vld [vmem:[#allocation25_spill] sm:$0xff]  ;;  %v11468_v30 = vld [vmem:[#allocation106_spill] sm:$0xff] }
 0x660   : > { %v3810_v20 = vadd.f32 %v3772_v44, %v3663_v27  ;;  %v3945_v5 = vpop.f32.mrf.mxu2  ;;  %v9909_v1 = vsel %vm4925_vm0, %v9795_v19, %v4914_v14  ;;  %v9914_v55 = vsel %vm4925_vm0, %v4914_v14, %v9795_v19  ;;  %v3919_v63 = vpop.f32.mrf.mxu1  ;;  %4376 = vmatpush.msrb.mxu1 %v9780_v2  ;;  %v4345_v2 = vmul.f32 %v9733_v10, %v11461_v49  ;;  %v11465_v14 = vld [vmem:[#allocation98_spill] sm:$0xff]  ;;  %v11476_v49 = vld [vmem:[#allocation105_spill] sm:$0xff] }
 0x661   : > { %v4900_v26 = vpop.permute.xlu1 %4899  ;;  %v5077_v43 = vpop.permute.xlu2 %5076  ;;  %4406 = vmatpush.msra.mxu2 %v9817_v22  ;;  %v3660_v35 = vadd.f32 %v11462_v58, %v3513_v36  ;;  %v3517_v41 = vadd.f32 %v11463_v38, %v3370_v21  ;;  %v3809_v34 = vadd.f32 %v3798_v6, %v3662_v48  ;;  %v4346_v44 = vmul.f32 %v9735_v16, %v11464_v37  ;;  %v11470_v6 = vld [vmem:[#allocation29_spill] sm:$0xff]  ;;  %v11477_v58 = vld [vmem:[#allocation64_spill] sm:$0xff] }
 0x662   : > { %v3957_v40 = vadd.f32 %v3919_v63, %v3810_v20  ;;  %v9925_v19 = vsel %vm4925_vm0, %v4900_v26, %v9728_v46  ;;  %v9930_v27 = vsel %vm4925_vm0, %v9728_v46, %v4900_v26  ;;  %4377 = vmatpush.msrb.mxu1 %v9834_v11  ;;  %v3658_v20 = vadd.f32 %v11465_v14, %v3511_v51  ;;  %v11466_v46 = vld [vmem:[#allocation18_spill] sm:$0xff]  ;;  %v11469_v11 = vld [vmem:[#allocation59_spill] sm:$0xff]  ;;  %v11471_v51 = vld [vmem:[#allocation28_spill] sm:$0xff] }
 0x663   : > { %v3977_v63 = vmul.f32 %v11466_v46, %v3953_v7  ;;  %4407 = vmatpush.msra.mxu2 %v9840_v50  ;;  %v3664_v3 = vadd.f32 %v11468_v30, %v3517_v41  ;;  %v3807_v36 = vadd.f32 %v9752_v31, %v3660_v35  ;;  %v3956_v21 = vadd.f32 %v3945_v5, %v3809_v34  ;;  %v11473_v7 = vld [vmem:[#allocation61_spill] sm:$0xff]  ;;  %v11474_v50 = vld [vmem:[#allocation26_spill] sm:$0xff]  ;;  %v11478_v35 = vld [vmem:[#allocation20_spill] sm:$0xff] }
 0x664   : > { %v3981_v22 = vmul.f32 %v11467_v33, %v3957_v40  ;;  %4378 = vmatpush.msrb.mxu1 %v9837_v53  ;;  %v3975_v48 = vmul.f32 %v11470_v6, %v3951_v52  ;;  %v9956_v40 = vadd.f32 %v11474_v50, %v3979_v17  ;;  %v3805_v31 = vadd.f32 %v11476_v49, %v3658_v20  ;;  %v11479_v41 = vld [vmem:[#allocation50_spill] sm:$0xff] }
 0x665   : > { %5382 = vrot.lane.b32.xlu0 %v11469_v11, %s6902_s22  ;;  %4408 = vmatpush.msra.mxu2 %v4346_v44  ;;  %v3954_v5 = vadd.f32 %v9859_v45, %v3807_v36  ;;  %v3811_v53 = vadd.f32 %v3801_v9, %v3664_v3  ;;  %v4341_v38 = vmul.f32 %v9733_v10, %v11478_v35  ;;  %v11480_v45 = vld [vmem:[#allocation30_spill] sm:$0xff] }
 0x666   : > { %v9951_v26 = vadd.f32 %v11471_v51, %v3981_v22  ;;  %5368 = vrot.lane.b32.xlu1 %v11473_v7, %s6902_s22  ;;  %11475 = vst [vmem:[#allocation82_spill] sm:$0xff] %v9956_v40  ;;  %4379 = vmatpush.msrb.mxu1 %v4345_v2  ;;  %v4342_v34 = vmul.f32 %v9735_v16, %v11479_v41  ;;  %v11482_v2 = vld [vmem:[#allocation44_spill] sm:$0xff] }
 0x667   : > { %5384 = vrot.lane.b32.xlu2 %v11477_v58, %s6902_s22  ;;  %v4896_v52 = vpop.permute.xlu0 %4895  ;;  %4409 = vmatpush.msra.mxu2 %v9854_v23  ;;  %v9970_v44 = vadd.f32 %v11480_v45, %v3977_v63  ;;  %v4340_v14 = vmul.f32 %v9735_v16, %v11482_v2  ;;  %v3952_v20 = vadd.f32 %v9762_v29, %v3805_v31  ;;  %v11129_v16 = vmax.f32 %v9956_v40, 0.0  ;;  %v11483_v29 = vld [vmem:[#allocation31_spill] sm:$0xff]  ;;  %v4279_v31 = vld [vmem:[#allocation7 + $0x140] sm:$0xff] }
 0x668   : > { %11472 = vst [vmem:[#allocation22_spill] sm:$0xff] %v9951_v26  ;;  %v11130_v17 = vmax.f32 %v9951_v26, 0.0  ;;  %v3948_v37 = vpop.f32.mrf.mxu2  ;;  %v3980_v9 = vmul.f32 %v11460_v54, %v3956_v21  ;;  %4380 = vmatpush.msrb.mxu1 %v9843_v56  ;;  %v9989_v54 = vadd.f32 %v11483_v29, %v3975_v48  ;;  %v11485_v56 = vld [vmem:[#allocation97_spill] sm:$0xff]  ;;  %v3978_v21 = vmul.f32 %v11466_v46, %v3954_v5  ;;  %v4015_v5 = vld [vmem:[#allocation9] sm:$0xff] }
 0x669   : > { %11481 = vst [vmem:[#allocation95_spill] sm:$0xff] %v9970_v44  ;;  %v3958_v22 = vadd.f32 %v3948_v37, %v3811_v53  ;;  %v5061_v30 = vpop.permute.xlu1 %5060  ;;  %v5059_v63 = vpop.permute.xlu2 %5058  ;;  %4410 = vmatpush.msra.mxu2 %v4342_v34  ;;  %v4339_v36 = vmul.f32 %v9733_v10, %v11485_v56  ;;  %v3976_v53 = vmul.f32 %v11470_v6, %v3952_v20  ;;  %v11488_v46 = vld [vmem:[#allocation53_spill] sm:$0xff] }
 0x66a   : > { %v9979_v3 = vsel %vm5080_vm1, %v5061_v30, %v5077_v43  ;;  %v9983_v23 = vsel %vm5080_vm1, %v5077_v43, %v5061_v30  ;;  %4044 = vmatpush.msrb.mxu3 %v11130_v17  ;;  %11484 = vst [vmem:[#allocation35_spill] sm:$0xff] %v9989_v54  ;;  %4381 = vmatpush.msrb.mxu1 %v4341_v38  ;;  %v11128_v43 = vmax.f32 %v9970_v44, 0.0  ;;  %v11520_v44 = vld [vmem:[#allocation76_spill] sm:$0xff] }
 0x66b   : > { %v3982_v49 = vmul.f32 %v11467_v33, %v3958_v22  ;;  %4411 = vmatpush.msra.mxu2 %v4340_v14  ;;  %v10005_v10 = vadd.f32 %v11474_v50, %v3980_v9  ;;  %v11124_v33 = vmax.f32 %v9989_v54, 0.0  ;;  %v10016_v38 = vadd.f32 %v11480_v45, %v3978_v21  ;;  %v4256_v22 = vld [vmem:[#allocation4 + $0x12] sm:$0x3]  ;;  %v4550_v54 = vld [vmem:[#allocation4 + $0x16] sm:$0x3] }
 0x66c   : > { %4045 = vmatpush.msrb.mxu3 %v11129_v16  ;;  %4382 = vmatpush.msrb.mxu1 %v4339_v36  ;;  %v10035_v45 = vadd.f32 %v11483_v29, %v3976_v53  ;;  %v11492_v29 = vld [vmem:[#allocation21_spill] sm:$0xff]  ;;  %v4258_v56 = vperm.slane %v4256_v22, 0  ;;  %v10055_v36 = vperm.slane %v4256_v22, 1 }
 0x66d   : > { %v10000_v48 = vadd.f32 %v11471_v51, %v3982_v49  ;;  %5388 = vrot.lane.b32.xlu0 %v8246_v42, %s6902_s22  ;;  %11487 = vst [vmem:[#allocation81_spill] sm:$0xff] %v10005_v10  ;;  %v11489_v51 = vld [vmem:[#allocation46_spill] sm:$0xff]  ;;  %6377 = vmatmul.msk.f32.vlgmr.msrb.gmra.mxu1 %vm607_vm2, %v4279_v31  ;;  %v11126_v37 = vmax.f32 %v10005_v10, 0.0  ;;  %v11125_v9 = vmax.f32 %v10016_v38, 0.0  ;;  %v11493_v49 = vld [vmem:[#allocation75_spill] sm:$0xff] }
 0x66e   : > { %4046 = vmatpush.msrb.mxu3 %v11128_v43  ;;  %5219 = vrot.lane.b32.xlu1 %v11488_v46, %s6901_s19  ;;  %11490 = vst [vmem:[#allocation37_spill] sm:$0xff] %v10016_v38  ;;  %v11123_v30 = vmax.f32 %v10035_v45, 0.0  ;;  %v11501_v43 = vld [vmem:[#allocation69_spill] sm:$0xff]  ;;  %v11505_v38 = vld [vmem:[#allocation34_spill] sm:$0xff] }
 0x66f   : > { %11486 = vst [vmem:[#allocation91_spill] sm:$0xff] %v10000_v48  ;;  %v11127_v6 = vmax.f32 %v10000_v48, 0.0  ;;  %5366 = vrot.lane.b32.xlu2 %v11489_v51, %s6902_s22  ;;  %v5075_v35 = vpop.permute.xlu0 %5074  ;;  %6381 = vmatmul.msk.f32.vlgmr.msra.gmra.mxu2 %vm607_vm2, %v4279_v31  ;;  %v4264_v10 = vmul.f32 %v4258_v56, %v11505_v38  ;;  %v4705_v48 = vld [vmem:[#allocation4 + $0x18] sm:$0x3] }
 0x670   : > { %4047 = vmatpush.msrb.mxu3 %v11124_v33  ;;  %v10023_v50 = vsel %vm5080_vm1, %v5059_v63, %v5075_v35  ;;  %v10027_v41 = vsel %vm5080_vm1, %v5075_v35, %v5059_v63  ;;  %11491 = vst [vmem:[#allocation17_spill] sm:$0xff] %v10035_v45  ;;  %v4280_v63 = vld [vmem:[#allocation7 + $0x148] sm:$0xff] }
 0x671   : > { %4073 = vmatpush.msra.mxu0 %v11127_v6  ;;  %6365 = vmatmul.msk.f32.vlgmr.msrb.gmra.mxu3 %vm4019_vm3, %v4015_v5  ;;  %v4912_v34 = vpop.permute.xlu1 %4911  ;;  %v4910_v20 = vpop.permute.xlu2 %4909 }
 0x672   : > { %v10039_v2 = vsel %vm4925_vm0, %v4896_v52, %v4912_v34  ;;  %v10043_v14 = vsel %vm4925_vm0, %v4912_v34, %v4896_v52  ;;  %v4016_v52 = vld [vmem:[#allocation9 + $0x8] sm:$0xff] }
 0x673   : > { %4074 = vmatpush.msra.mxu0 %v11126_v37 }
 0x675   : > { %4075 = vmatpush.msra.mxu0 %v11125_v9  ;;  %5362 = vrot.lane.b32.xlu0 %v11251_v0, %s6902_s22  ;;  %v11496_v9 = vld [vmem:[#allocation40_spill] sm:$0xff] }
 0x676   : > { %5364 = vrot.lane.b32.xlu1 %v11492_v29, %s6902_s22  ;;  %6378 = vmatmul.msk.f32.gmra.mxu1 %vm607_vm2, %v4280_v63  ;;  %v4272_v37 = vmul.f32 %v4258_v56, %v11496_v9 }
 0x677   : > { %4076 = vmatpush.msra.mxu0 %v11123_v30  ;;  %5233 = vrot.lane.b32.xlu2 %v8246_v42, %s6901_s19  ;;  %v4237_v21 = vpop.permute.xlu0 %4236  ;;  %s6484_s19 = sshll.u32 %s11573_s17, 6 }
 0x678   : > { %6369 = vmatmul.msk.f32.vlgmr.msra.gmra.mxu0 %vm4019_vm3, %v4015_v5  ;;  %v4246_v31 = vsel %vm4238_vm13, %v11493_v49, %v4237_v21  ;;  %v4254_v53 = vsel %vm4238_vm13, %v4237_v21, %v11493_v49  ;;  %6382 = vmatmul.msk.f32.gmra.mxu2 %vm607_vm2, %v4280_v63  ;;  %v11494_v21 = vld [vmem:[#allocation33_spill] sm:$0xff]  ;;  %v4281_v63 = vld [vmem:[#allocation7 + $0x150] sm:$0xff]  ;;  %s10951_s21 = scalar_lea.vmem %s10974_s10, %s6484_s19 }
 0x679   : > { %v4276_v35 = vmul.f32 %v4258_v56, %v4254_v53  ;;  %v4277_v34 = vmul.f32 %v10055_v36, %v4246_v31  ;;  %6366 = vmatmul.msk.f32.gmra.mxu3 %vm4019_vm3, %v4016_v52  ;;  %v4894_v22 = vpop.permute.xlu1 %4893  ;;  %v5055_v33 = vpop.permute.xlu2 %5054  ;;  %v4274_v49 = vmul.f32 %v4258_v56, %v11494_v21  ;;  %v11495_v53 = vld [vmem:[#allocation32_spill] sm:$0xff] }
 0x67a   : > { %v10074_v5 = vsel %vm4925_vm0, %v4894_v22, %v4910_v20  ;;  %v10078_v30 = vsel %vm4925_vm0, %v4910_v20, %v4894_v22  ;;  %v4275_v31 = vmul.f32 %v10055_v36, %v11495_v53  ;;  %v4017_v20 = vld [vmem:[#allocation9 + $0x10] sm:$0xff]  ;;  %v11497_v22 = vld [vmem:[#allocation89_spill] sm:$0xff]  ;;  %v11499_v53 = vld [vmem:[#allocation96_spill] sm:$0xff] }
 0x67b   : > { %4445 = vmatpush.msra.mxu3 %v4276_v35  ;;  %4474 = vmatpush.msrb.mxu0 %v4277_v34  ;;  %v4273_v21 = vmul.f32 %v10055_v36, %v11497_v22  ;;  %v11498_v35 = vld [vmem:[#allocation16_spill] sm:$0xff]  ;;  %v4270_v9 = vmul.f32 %v4258_v56, %v11499_v53  ;;  %v4268_v22 = vmul.f32 %v4258_v56, %v11501_v43  ;;  %v11504_v43 = vld [vmem:[#allocation74_spill] sm:$0xff] }
 0x67c   : > { %v11502_v53 = vld [vmem:[#allocation48_spill] sm:$0xff]  ;;  %v4267_v45 = vmul.f32 %v10055_v36, %v11504_v43 }
 0x67d   : > { %5376 = vrot.lane.b32.xlu0 %v11253_v18, %s6902_s22  ;;  %4446 = vmatpush.msra.mxu3 %v4274_v49  ;;  %v11500_v49 = vld [vmem:[#allocation90_spill] sm:$0xff] }
 0x67e   : > { %5378 = vrot.lane.b32.xlu1 %v7845_v15, %s6902_s22  ;;  %4475 = vmatpush.msrb.mxu0 %v4275_v31  ;;  %v4271_v6 = vmul.f32 %v10055_v36, %v11500_v49  ;;  %v4269_v49 = vmul.f32 %v10055_v36, %v11502_v53 }
 0x67f   : > { %5380 = vrot.lane.b32.xlu2 %v11498_v35, %s6902_s22  ;;  %v5057_v34 = vpop.permute.xlu0 %5056  ;;  %4447 = vmatpush.msra.mxu3 %v4272_v37 }
 0x680   : > { %6370 = vmatmul.msk.f32.gmra.mxu0 %vm4019_vm3, %v4016_v52  ;;  %6379 = vmatmul.msk.f32.gmra.mxu1 %vm607_vm2, %v4281_v63 }
 0x681   : > { %6367 = vmatmul.msk.f32.gmra.mxu3 %vm4019_vm3, %v4017_v20  ;;  %4476 = vmatpush.msrb.mxu0 %v4273_v21  ;;  %v5073_v31 = vpop.permute.xlu1 %5072  ;;  %v5069_v52 = vpop.permute.xlu2 %5068  ;;  %v11503_v21 = vld [vmem:[#allocation72_spill] sm:$0xff] }
 0x682   : > { %v10101_v16 = vsel %vm5080_vm1, %v5057_v34, %v5073_v31  ;;  %v10105_v37 = vsel %vm5080_vm1, %v5073_v31, %v5057_v34  ;;  %4448 = vmatpush.msra.mxu3 %v4270_v9  ;;  %6383 = vmatmul.msk.f32.gmra.mxu2 %vm607_vm2, %v4281_v63  ;;  %v4266_v17 = vmul.f32 %v4258_v56, %v11503_v21  ;;  %v4018_v34 = vld [vmem:[#allocation9 + $0x18] sm:$0xff]  ;;  %v11508_v21 = vld [vmem:[#allocation86_spill] sm:$0xff] }
 0x683   : > { %4477 = vmatpush.msrb.mxu0 %v4271_v6  ;;  %v11506_v63 = vld [vmem:[#allocation87_spill] sm:$0xff]  ;;  %v4263_v43 = vmul.f32 %v10055_v36, %v11508_v21 }
 0x684   : > { %4449 = vmatpush.msra.mxu3 %v4268_v22  ;;  %v4265_v9 = vmul.f32 %v10055_v36, %v11506_v63  ;;  %v4282_v31 = vld [vmem:[#allocation7 + $0x158] sm:$0xff]  ;;  %v11507_v22 = vld [vmem:[#allocation80_spill] sm:$0xff] }
 0x685   : > { %4478 = vmatpush.msrb.mxu0 %v4269_v49  ;;  %v4262_v53 = vmul.f32 %v4258_v56, %v11507_v22  ;;  %v10130_v49 = vperm.slane %v4550_v54, 0  ;;  %v11511_v22 = vld [vmem:[#allocation47_spill] sm:$0xff] }
 0x686   : > { %5358 = vrot.lane.b32.xlu1 %v11449_v61, %s6902_s22  ;;  %4450 = vmatpush.msra.mxu3 %v4266_v17 }
 0x687   : > { %4479 = vmatpush.msrb.mxu0 %v4267_v45  ;;  %5360 = vrot.lane.b32.xlu2 %v11455_v60, %s6902_s22  ;;  %v5071_v6 = vpop.permute.xlu0 %5070  ;;  %v10132_v45 = vperm.slane %v4550_v54, 1 }
 0x688   : > { %6371 = vmatmul.msk.f32.gmra.mxu0 %vm4019_vm3, %v4017_v20  ;;  %v10124_v38 = vsel %vm5080_vm1, %v5055_v33, %v5071_v6  ;;  %v10128_v17 = vsel %vm5080_vm1, %v5071_v6, %v5055_v33  ;;  %4451 = vmatpush.msra.mxu3 %v4264_v10  ;;  %v11509_v20 = vld [vmem:[#allocation55_spill] sm:$0xff] }
 0x689   : > { %6368 = vmatmul.msk.f32.gmra.mxu3 %vm4019_vm3, %v4018_v34  ;;  %4480 = vmatpush.msrb.mxu0 %v4265_v9  ;;  %v4531_v56 = vpop.permute.xlu1 %4530  ;;  %v5049_v10 = vpop.permute.xlu2 %5048  ;;  %v11510_v9 = vld [vmem:[#allocation49_spill] sm:$0xff]  ;;  %v4569_v21 = vmul.f32 %v10132_v45, %v11511_v22  ;;  %v10165_v22 = vperm.slane %v4705_v48, 0 }
 0x68a   : > { %v4540_v63 = vsel %vm4532_vm14, %v11509_v20, %v4531_v56  ;;  %v4548_v33 = vsel %vm4532_vm14, %v4531_v56, %v11509_v20  ;;  %4452 = vmatpush.msra.mxu3 %v4262_v53  ;;  %6380 = vmatmul.msk.f32.gmra.mxu1 %vm607_vm2, %v4282_v31  ;;  %v4568_v6 = vmul.f32 %v10130_v49, %v11510_v9  ;;  %v4202_v56 = vld [vmem:[#allocation7 + $0x120] sm:$0xff]  ;;  %v11512_v20 = vld [vmem:[#allocation19_spill] sm:$0xff] }
 0x68b   : > { %v4570_v54 = vmul.f32 %v10130_v49, %v4548_v33  ;;  %v4571_v36 = vmul.f32 %v10132_v45, %v4540_v63  ;;  %4481 = vmatpush.msrb.mxu0 %v4263_v43  ;;  %6384 = vmatmul.msk.f32.gmra.mxu2 %vm607_vm2, %v4282_v31  ;;  %v4566_v53 = vmul.f32 %v10130_v49, %v11512_v20  ;;  %v11514_v43 = vld [vmem:[#allocation23_spill] sm:$0xff]  ;;  %v11515_v63 = vld [vmem:[#allocation85_spill] sm:$0xff] }
 0x68c   : > { %v4567_v31 = vmul.f32 %v10132_v45, %v11514_v43 }
 0x68d   : > { %4592 = vmatpush.msra.mxu1 %v4570_v54  ;;  %4621 = vmatpush.msrb.mxu2 %v4571_v36  ;;  %v4564_v54 = vmul.f32 %v10130_v49, %v11515_v63  ;;  %v11516_v36 = vld [vmem:[#allocation94_spill] sm:$0xff]  ;;  %v11519_v63 = vld [vmem:[#allocation73_spill] sm:$0xff] }
 0x68e   : > { %v4565_v9 = vmul.f32 %v10132_v45, %v11516_v36  ;;  %v4562_v36 = vmul.f32 %v10130_v49, %v11519_v63 }
 0x68f   : > { %4593 = vmatpush.msra.mxu1 %v4568_v6  ;;  %4622 = vmatpush.msrb.mxu2 %v4569_v21  ;;  %v10153_v33 = vpop.permute.xlu0 %5050  ;;  %v10167_v21 = vperm.slane %v4705_v48, 1 }
 0x690   : > { %11513 = vst [vmem:[#allocation100_spill] sm:$0xff] %v10153_v33  ;;  %6372 = vmatmul.msk.f32.gmra.mxu0 %vm4019_vm3, %v4018_v34  ;;  %5374 = vrot.lane.b32.xlu2 %v11488_v46, %s6902_s22 }
 0x691   : > { %6385 = vmatmul.msk.f32.vlgmr.msra.gmra.mxu3 %vm607_vm2, %v4202_v56  ;;  %4594 = vmatpush.msra.mxu1 %v4566_v53  ;;  %v5053_v6 = vpop.permute.xlu1 %5052  ;;  %v4686_v43 = vpop.permute.xlu2 %4685 }
 0x692   : > { %4623 = vmatpush.msrb.mxu2 %v4567_v31  ;;  %v10171_v34 = vsel %vm5080_vm1, %v5053_v6, %v5069_v52  ;;  %v10175_v20 = vsel %vm5080_vm1, %v5069_v52, %v5053_v6  ;;  %v4695_v53 = vsel %vm4687_vm15, %v11520_v44, %v4686_v43  ;;  %v4703_v48 = vsel %vm4687_vm15, %v4686_v43, %v11520_v44  ;;  %v11521_v31 = vld [vmem:[#allocation78_spill] sm:$0xff] }
 0x693   : > { %11517 = vst [vmem:[#allocation36_spill] sm:$0xff] %v10171_v34  ;;  %4595 = vmatpush.msra.mxu1 %v4564_v54  ;;  %v4563_v40 = vmul.f32 %v10132_v45, %v11521_v31  ;;  %v4725_v26 = vmul.f32 %v10165_v22, %v4703_v48  ;;  %v4726_v52 = vmul.f32 %v10167_v21, %v4695_v53  ;;  %v11522_v6 = vld [vmem:[#allocation66_spill] sm:$0xff]  ;;  %v11524_v34 = vld [vmem:[#allocation27_spill] sm:$0xff]  ;;  %v11525_v54 = vld [vmem:[#allocation45_spill] sm:$0xff] }
 0x694   : > { %11518 = vst [vmem:[#allocation58_spill] sm:$0xff] %v10175_v20  ;;  %4624 = vmatpush.msrb.mxu2 %v4565_v9  ;;  %v4560_v63 = vmul.f32 %v10130_v49, %v11522_v6  ;;  %v11523_v20 = vld [vmem:[#allocation70_spill] sm:$0xff]  ;;  %v4723_v44 = vmul.f32 %v10165_v22, %v11524_v34  ;;  %v4724_v43 = vmul.f32 %v10167_v21, %v11525_v54  ;;  %v4203_v53 = vld [vmem:[#allocation7 + $0x128] sm:$0xff]  ;;  %v11526_v9 = vld [vmem:[#allocation79_spill] sm:$0xff] }
 0x695   : > { %4596 = vmatpush.msra.mxu1 %v4562_v36  ;;  %v4561_v33 = vmul.f32 %v10132_v45, %v11523_v20  ;;  %4747 = vmatpush.msrb.mxu3 %v4725_v26  ;;  %v4558_v31 = vmul.f32 %v10130_v49, %v11526_v9  ;;  %v11527_v34 = vld [vmem:[#allocation84_spill] sm:$0xff]  ;;  %v11528_v36 = vld [vmem:[#allocation43_spill] sm:$0xff]  ;;  %v11531_v9 = vld [vmem:[#allocation62_spill] sm:$0xff] }
 0x696   : > { %4625 = vmatpush.msrb.mxu2 %v4563_v40  ;;  %4776 = vmatpush.msra.mxu0 %v4726_v52  ;;  %v4559_v20 = vmul.f32 %v10132_v45, %v11527_v34  ;;  %v4721_v52 = vmul.f32 %v10165_v22, %v11528_v36  ;;  %v4557_v34 = vmul.f32 %v10132_v45, %v11531_v9  ;;  %v11535_v45 = vld [vmem:[#allocation101_spill] sm:$0xff] }
 0x697   : > { %4597 = vmatpush.msra.mxu1 %v4560_v63  ;;  %v5065_v48 = vpop.permute.xlu0 %5064  ;;  %4748 = vmatpush.msrb.mxu3 %v4723_v44  ;;  %v11530_v63 = vld [vmem:[#allocation67_spill] sm:$0xff]  ;;  %v11532_v44 = vld [vmem:[#allocation92_spill] sm:$0xff] }
 0x698   : > { %6389 = vmatmul.msk.f32.vlgmr.msrb.gmra.mxu0 %vm607_vm2, %v4202_v56  ;;  %4626 = vmatpush.msrb.mxu2 %v4561_v33  ;;  %v10202_v40 = vsel %vm5080_vm1, %v5049_v10, %v5065_v48  ;;  %v10206_v26 = vsel %vm5080_vm1, %v5065_v48, %v5049_v10  ;;  %v11529_v56 = vld [vmem:[#allocation65_spill] sm:$0xff]  ;;  %v4722_v54 = vmul.f32 %v10167_v21, %v11530_v63  ;;  %v4496_v48 = vld [vmem:[#allocation7 + $0x160] sm:$0xff] }
 0x699   : > { %4777 = vmatpush.msra.mxu0 %v4724_v43  ;;  %v10212_v6 = vpop.permute.xlu1 %5066  ;;  %v4556_v33 = vmul.f32 %v10130_v49, %v11529_v56  ;;  %6386 = vmatmul.msk.f32.gmra.mxu3 %vm607_vm2, %v4203_v53  ;;  %v10219_v10 = vpop.permute.xlu2 %5213  ;;  %v4719_v43 = vmul.f32 %v10165_v22, %v11532_v44  ;;  %v11533_v49 = vld [vmem:[#allocation39_spill] sm:$0xff] }
 0x69a   : > { %4598 = vmatpush.msra.mxu1 %v4558_v31  ;;  %4627 = vmatpush.msrb.mxu2 %v4559_v20  ;;  %v4720_v36 = vmul.f32 %v10167_v21, %v11533_v49  ;;  %v11534_v31 = vld [vmem:[#allocation102_spill] sm:$0xff]  ;;  %v4718_v20 = vmul.f32 %v10167_v21, %v11535_v45  ;;  %v11540_v45 = vld [vmem:[#allocation99_spill] sm:$0xff] }
 0x69b   : > { %4749 = vmatpush.msrb.mxu3 %v4721_v52  ;;  %4778 = vmatpush.msra.mxu0 %v4722_v54  ;;  %v4717_v56 = vmul.f32 %v10165_v22, %v11534_v31  ;;  %v11537_v54 = vld [vmem:[#allocation88_spill] sm:$0xff] }
 0x69c   : > { %4599 = vmatpush.msra.mxu1 %v4556_v33  ;;  %4628 = vmatpush.msrb.mxu2 %v4557_v34  ;;  %v11536_v33 = vld [vmem:[#allocation77_spill] sm:$0xff]  ;;  %v4716_v9 = vmul.f32 %v10167_v21, %v11537_v54 }
 0x69d   : > { %6393 = vmatmul.msk.f32.vlgmr.msra.gmra.mxu1 %vm607_vm2, %v4496_v48  ;;  %6397 = vmatmul.msk.f32.vlgmr.msrb.gmra.mxu2 %vm607_vm2, %v4496_v48  ;;  %v4715_v63 = vmul.f32 %v10165_v22, %v11536_v33 }
 0x69e   : > { %4750 = vmatpush.msrb.mxu3 %v4719_v43  ;;  %4779 = vmatpush.msra.mxu0 %v4720_v36  ;;  %v11539_v43 = vld [vmem:[#allocation104_spill] sm:$0xff] }
 0x69f   : > { %4830 = vmatpush.msrb.mxu1 %v11285_v25  ;;  %v10234_v52 = vpop.permute.xlu0 %5215  ;;  %4859 = vmatpush.msra.mxu2 %v8246_v42  ;;  %v4204_v25 = vld [vmem:[#allocation7 + $0x130] sm:$0xff]  ;;  %v11538_v42 = vld [vmem:[#allocation103_spill] sm:$0xff]  ;;  %v4713_v49 = vmul.f32 %v10165_v22, %v11539_v43 }
 0x6a0   : > { %4751 = vmatpush.msrb.mxu3 %v4717_v56  ;;  %4780 = vmatpush.msra.mxu0 %v4718_v20  ;;  %v4714_v44 = vmul.f32 %v10167_v21, %v11538_v42  ;;  %v6655_v56 = vld [vmem:[#allocation10] sm:$0xff] }
 0x6a1   : > { %4831 = vmatpush.msrb.mxu1 %v11288_v4  ;;  %v10242_v48 = vpop.permute.xlu1 %5217  ;;  %4860 = vmatpush.msra.mxu2 %v11451_v39  ;;  %v10246_v34 = vpop.permute.xlu2 %5227  ;;  %v4497_v4 = vld [vmem:[#allocation7 + $0x168] sm:$0xff]  ;;  %v4711_v39 = vmul.f32 %v10165_v22, %v9726_v8  ;;  %v4205_v8 = vld [vmem:[#allocation7 + $0x138] sm:$0xff] }
 0x6a2   : > { %6390 = vmatmul.msk.f32.gmra.mxu0 %vm607_vm2, %v4203_v53  ;;  %4752 = vmatpush.msrb.mxu3 %v4715_v63  ;;  %v4712_v53 = vmul.f32 %v10167_v21, %v9722_v62  ;;  %v4943_v22 = vld [vmem:[#allocation4 + $0x1c] sm:$0x3] }
 0x6a3   : > { %4781 = vmatpush.msra.mxu0 %v4716_v9  ;;  %4832 = vmatpush.msrb.mxu1 %v11473_v7  ;;  %v4945_v21 = vperm.slane %v4943_v22, 0  ;;  %v4946_v36 = vperm.slane %v4943_v22, 1 }
 0x6a4   : > { %4861 = vmatpush.msra.mxu2 %v11477_v58  ;;  %6387 = vmatmul.msk.f32.gmra.mxu3 %vm607_vm2, %v4204_v25 }
 0x6a5   : > { %4782 = vmatpush.msra.mxu0 %v4714_v44  ;;  %4753 = vmatpush.msrb.mxu3 %v4713_v49  ;;  %v4962_v44 = vmul.f32 %v4946_v36, %v9793_v57  ;;  %v4961_v43 = vmul.f32 %v4945_v21, %v9789_v32  ;;  %v6656_v49 = vld [vmem:[#allocation10 + $0x8] sm:$0xff]  ;;  %v4957_v57 = vmul.f32 %v4945_v21, %v9766_v12 }
 0x6a6   : > { %4833 = vmatpush.msrb.mxu1 %v11489_v51  ;;  %4862 = vmatpush.msra.mxu2 %v11469_v11  ;;  %v4498_v11 = vld [vmem:[#allocation7 + $0x170] sm:$0xff]  ;;  %v6903_v51 = vmov 6   ;;  %v4956_v32 = vmul.f32 %v4946_v36, %v9930_v27  ;;  %v4954_v12 = vmul.f32 %v4946_v36, %v9914_v55  ;;  %v4952_v27 = vmul.f32 %v4946_v36, %v10043_v14 }
 0x6a7   : > { %6394 = vmatmul.msk.f32.gmra.mxu1 %vm607_vm2, %v4497_v4  ;;  %v10262_v7 = vpop.permute.xlu0 %5229  ;;  %6398 = vmatmul.msk.f32.gmra.mxu2 %vm607_vm2, %v4497_v4  ;;  %v4960_v4 = vmul.f32 %v4946_v36, %v9875_v13  ;;  %v4950_v22 = vmul.f32 %v4946_v36, %v10078_v30  ;;  %v4654_v30 = vld [vmem:[#allocation7 + $0x198] sm:$0xff] }
 0x6a8   : > { %4754 = vmatpush.msrb.mxu3 %v4711_v39  ;;  %4783 = vmatpush.msra.mxu0 %v4712_v53  ;;  %v4806_v39 = vld [vmem:[#allocation7 + $0x1a0] sm:$0xff]  ;;  %v4959_v53 = vmul.f32 %v4945_v21, %v9870_v24  ;;  %v4955_v24 = vmul.f32 %v4945_v21, %v9925_v19  ;;  %v5098_v19 = vld [vmem:[#allocation4 + $0x1e] sm:$0x3] }
 0x6a9   : > { %4834 = vmatpush.msrb.mxu1 %v11492_v29  ;;  %v10266_v58 = vpop.permute.xlu1 %5231  ;;  %4863 = vmatpush.msra.mxu2 %v11498_v35  ;;  %v10270_v62 = vpop.permute.xlu2 %5372  ;;  %v6653_v35 = vld [vmem:[#allocation10 + $0x18] sm:$0xff]  ;;  %v10330_v55 = vperm.slane %v5098_v19, 0  ;;  %v10332_v14 = vperm.slane %v5098_v19, 1 }
 0x6aa   : > { %6391 = vmatmul.msk.f32.gmra.mxu0 %vm607_vm2, %v4204_v25  ;;  %6605 = vset.pattern.permute.xlu0 %v6903_v51  ;;  %v4652_v25 = vld [vmem:[#allocation7 + $0x188] sm:$0xff] }
 0x6ab   : > { %4835 = vmatpush.msrb.mxu1 %v11251_v0  ;;  %4864 = vmatpush.msra.mxu2 %v7845_v15  ;;  %v4651_v0 = vld [vmem:[#allocation7 + $0x180] sm:$0xff] }
 0x6ac   : > { %6388 = vmatmul.msk.f32.gmra.mxu3 %vm607_vm2, %v4205_v8  ;;  %5521 = vperm.xlu0 %6605, %v6653_v35  }
 0x6ad   : > { %4836 = vmatpush.msrb.mxu1 %v11455_v60  ;;  %4865 = vmatpush.msra.mxu2 %v11253_v18  ;;  %v6904_v60 = vmov 7  }
 0x6ae   : > { %6606 = vset.pattern.permute.xlu1 %v6903_v51  ;;  %6607 = vset.pattern.permute.xlu2 %v6904_v60 }
 0x6af   : > { %4837 = vmatpush.msrb.mxu1 %v11449_v61  ;;  %v10278_v29 = vpop.permute.xlu0 %5209  ;;  %4866 = vmatpush.msra.mxu2 %v11488_v46  ;;  %v6654_v61 = vld [vmem:[#allocation10 + $0x10] sm:$0xff]  ;;  %v4499_v46 = vld [vmem:[#allocation7 + $0x178] sm:$0xff] }
 0x6b0   : > { %6395 = vmatmul.msk.f32.gmra.mxu1 %vm607_vm2, %v4498_v11  ;;  %6399 = vmatmul.msk.f32.gmra.mxu2 %vm607_vm2, %v4498_v11 }
 0x6b1   : > { %v10283_v15 = vpop.permute.xlu1 %5211  ;;  %v10286_v18 = vpop.permute.xlu2 %5223  ;;  %5545 = vperm.xlu2 %6607, %v6653_v35   ;;  %5517 = vperm.xlu1 %6606, %v6654_v61   ;;  %v4953_v35 = vmul.f32 %v4945_v21, %v9909_v1  ;;  %v4949_v1 = vmul.f32 %v4945_v21, %v10074_v5 }
 0x6b2   : > { %6392 = vmatmul.msk.f32.gmra.mxu0 %vm607_vm2, %v4205_v8  ;;  %v4958_v8 = vmul.f32 %v4946_v36, %v9770_v47  ;;  %v4653_v47 = vld [vmem:[#allocation7 + $0x190] sm:$0xff] }
 0x6b4   : > { %6401 = vmatmul.msk.f32.vlgmr.msrb.gmra.mxu3 %vm607_vm2, %v4651_v0  ;;  %5509 = vperm.xlu0 %6605, %v6655_v56  }
 0x6b7   : > { %v4924_v31 = vpop.permute.xlu0 %4923 }
 0x6b8   : > { %6396 = vmatmul.msk.f32.gmra.mxu1 %vm607_vm2, %v4499_v46  ;;  %v4933_v20 = vsel %vm4925_vm0, %v11540_v45, %v4924_v31  ;;  %v4941_v33 = vsel %vm4925_vm0, %v4924_v31, %v11540_v45  ;;  %6400 = vmatmul.msk.f32.gmra.mxu2 %vm607_vm2, %v4499_v46  ;;  %v4808_v45 = vld [vmem:[#allocation7 + $0x1b0] sm:$0xff] }
 0x6b9   : > { %v4963_v63 = vmul.f32 %v4945_v21, %v4933_v20  ;;  %v4964_v54 = vmul.f32 %v4946_v36, %v4941_v33  ;;  %v10297_v9 = vpop.permute.xlu1 %5225  ;;  %v10300_v42 = vpop.permute.xlu2 %5205  ;;  %5541 = vperm.xlu2 %6607, %v6654_v61   ;;  %5513 = vperm.xlu1 %6606, %v6656_v49   ;;  %v4951_v61 = vmul.f32 %v4945_v21, %v10039_v2  ;;  %v5253_v33 = vld [vmem:[#allocation4 + $0x20] sm:$0x3] }
 0x6ba   : > { %6405 = vmatmul.msk.f32.vlgmr.msra.gmra.mxu0 %vm607_vm2, %v4651_v0  ;;  %v4807_v0 = vld [vmem:[#allocation7 + $0x1a8] sm:$0xff]  ;;  %v5117_v20 = vmul.f32 %v10332_v14, %v9983_v23 }
 0x6bb   : > { %4985 = vmatpush.msra.mxu3 %v4963_v63  ;;  %5014 = vmatpush.msrb.mxu0 %v4964_v54  ;;  %v5115_v54 = vmul.f32 %v10332_v14, %v10027_v41  ;;  %v4889_v41 = vld [vmem:[#allocation7 + $0x1c0] sm:$0xff] }
 0x6bc   : > { %6402 = vmatmul.msk.f32.gmra.mxu3 %vm607_vm2, %v4652_v25 }
 0x6bd   : > { %5015 = vmatpush.msrb.mxu0 %v4962_v44  ;;  %4986 = vmatpush.msra.mxu3 %v4961_v43  ;;  %v10368_v44 = vperm.slane %v5253_v33, 1 }
 0x6bf   : > { %v10308_v11 = vpop.permute.xlu0 %5370  ;;  %5016 = vmatpush.msrb.mxu0 %v4960_v4  ;;  %4987 = vmatpush.msra.mxu3 %v4959_v53  ;;  %v5111_v4 = vmul.f32 %v10332_v14, %v10128_v17  ;;  %v4809_v17 = vld [vmem:[#allocation7 + $0x1b8] sm:$0xff] }
 0x6c0   : > { %6409 = vmatmul.msk.f32.vlgmr.msrb.gmra.mxu1 %vm607_vm2, %v4806_v39  ;;  %6413 = vmatmul.msk.f32.vlgmr.msra.gmra.mxu2 %vm607_vm2, %v4806_v39  ;;  %v5242_v39 = vsel %vm5235_vm4, %v10234_v52, %v10266_v58 }
 0x6c1   : > { %v10314_v13 = vpop.permute.xlu1 %5207  ;;  %5017 = vmatpush.msrb.mxu0 %v4958_v8  ;;  %v10318_v51 = vpop.permute.xlu2 %5384  ;;  %4988 = vmatpush.msra.mxu3 %v4957_v57  ;;  %v11541_v8 = vld [vmem:[#allocation36_spill] sm:$0xff] }
 0x6c2   : > { %6406 = vmatmul.msk.f32.gmra.mxu0 %vm607_vm2, %v4652_v25  ;;  %5533 = vperm.xlu2 %6607, %v6655_v56   ;;  %v5116_v56 = vmul.f32 %v10330_v55, %v9979_v3  ;;  %v5112_v3 = vmul.f32 %v10330_v55, %v10101_v16  ;;  %v10366_v25 = vperm.slane %v5253_v33, 0  ;;  %v5110_v16 = vmul.f32 %v10330_v55, %v10124_v38 }
 0x6c3   : > { %5018 = vmatpush.msrb.mxu0 %v4956_v32  ;;  %4989 = vmatpush.msra.mxu3 %v4955_v24  ;;  %v5108_v57 = vmul.f32 %v10330_v55, %v11541_v8  ;;  %v11542_v32 = vld [vmem:[#allocation100_spill] sm:$0xff]  ;;  %v11543_v24 = vld [vmem:[#allocation58_spill] sm:$0xff] }
 0x6c4   : > { %6403 = vmatmul.msk.f32.gmra.mxu3 %vm607_vm2, %v4653_v47  ;;  %6608 = vset.pattern.permute.xlu1 %v6904_v60 }
 0x6c5   : > { %5019 = vmatpush.msrb.mxu0 %v4954_v12  ;;  %4990 = vmatpush.msra.mxu3 %v4953_v35  ;;  %v5090_v12 = vsel %vm5080_vm1, %v10212_v6, %v11542_v32  ;;  %v5250_v35 = vsel %vm5235_vm4, %v10266_v58, %v10234_v52  ;;  %v5249_v52 = vsel %vm5235_vm4, %v10262_v7, %v10219_v10 }
 0x6c6   : > { %5537 = vperm.xlu1 %6608, %v6656_v49   ;;  %v5240_v58 = vsel %vm5235_vm4, %v10283_v15, %v10246_v34 }
 0x6c7   : > { %v10326_v46 = vpop.permute.xlu0 %5221  ;;  %5020 = vmatpush.msrb.mxu0 %v4952_v27  ;;  %4991 = vmatpush.msra.mxu3 %v4951_v61  ;;  %v5241_v27 = vsel %vm5235_vm4, %v10219_v10, %v10262_v7  ;;  %v5104_v61 = vmul.f32 %v10330_v55, %v10202_v40  ;;  %v5105_v10 = vmul.f32 %v10332_v14, %v10206_v26  ;;  %v4890_v40 = vld [vmem:[#allocation7 + $0x1c8] sm:$0xff] }
 0x6c8   : > { %6410 = vmatmul.msk.f32.gmra.mxu1 %vm607_vm2, %v4807_v0  ;;  %6414 = vmatmul.msk.f32.gmra.mxu2 %vm607_vm2, %v4807_v0  ;;  %v5271_v0 = vmul.f32 %v10366_v25, %v5242_v39  ;;  %v5269_v7 = vmul.f32 %v10366_v25, %v5241_v27  ;;  %v5239_v26 = vsel %vm5235_vm4, %v10278_v29, %v10297_v9 }
 0x6c9   : > { %v5079_v2 = vpop.permute.xlu1 %5078  ;;  %5021 = vmatpush.msrb.mxu0 %v4950_v22  ;;  %v10342_v21 = vpop.permute.xlu2 %5366  ;;  %4992 = vmatpush.msra.mxu3 %v4949_v1  ;;  %v5107_v22 = vmul.f32 %v10332_v14, %v5090_v12  ;;  %v5272_v1 = vmul.f32 %v10368_v44, %v5250_v35 }
 0x6ca   : > { %6407 = vmatmul.msk.f32.gmra.mxu0 %vm607_vm2, %v4653_v47  ;;  %v5088_v60 = vsel %vm5080_vm1, %v9851_v59, %v5079_v2  ;;  %v5096_v5 = vsel %vm5080_vm1, %v5079_v2, %v9851_v59  ;;  %v5114_v59 = vmul.f32 %v10330_v55, %v10023_v50  ;;  %v5113_v50 = vmul.f32 %v10332_v14, %v10105_v37 }
 0x6cb   : > { %v5118_v36 = vmul.f32 %v10330_v55, %v5088_v60  ;;  %v5119_v31 = vmul.f32 %v10332_v14, %v5096_v5  ;;  %v5109_v47 = vmul.f32 %v10332_v14, %v11543_v24  ;;  %v5267_v60 = vmul.f32 %v10366_v25, %v5240_v58  ;;  %v5408_v14 = vld [vmem:[#allocation4 + $0x22] sm:$0x3] }
 0x6cc   : > { %6404 = vmatmul.msk.f32.gmra.mxu3 %vm607_vm2, %v4654_v30  ;;  %v5246_v5 = vsel %vm5235_vm4, %v10286_v18, %v10314_v13 }
 0x6cd   : > { %5140 = vmatpush.msra.mxu1 %v5118_v36  ;;  %5169 = vmatpush.msrb.mxu2 %v5119_v31  ;;  %v5237_v31 = vsel %vm5235_vm4, %v10300_v42, %v10326_v46 }
 0x6cf   : > { %5141 = vmatpush.msra.mxu1 %v5116_v56  ;;  %v10353_v63 = vpop.permute.xlu0 %5203  ;;  %5170 = vmatpush.msrb.mxu2 %v5117_v20  ;;  %v10462_v56 = vperm.slane %v5408_v14, 0  ;;  %v5264_v20 = vmul.f32 %v10368_v44, %v5246_v5 }
 0x6d0   : > { %6411 = vmatmul.msk.f32.gmra.mxu1 %vm607_vm2, %v4808_v45  ;;  %6415 = vmatmul.msk.f32.gmra.mxu2 %vm607_vm2, %v4808_v45 }
 0x6d1   : > { %5142 = vmatpush.msra.mxu1 %v5114_v59  ;;  %v10362_v23 = vpop.permute.xlu1 %5386  ;;  %5171 = vmatpush.msrb.mxu2 %v5115_v54  ;;  %v5234_v43 = vpop.permute.xlu2 %5233  ;;  %v5245_v59 = vsel %vm5235_vm4, %v10326_v46, %v10300_v42  ;;  %v5261_v54 = vmul.f32 %v10366_v25, %v5237_v31  ;;  %v5200_v31 = vld [vmem:[#allocation7 + $0x208] sm:$0xff] }
 0x6d2   : > { %6408 = vmatmul.msk.f32.gmra.mxu0 %vm607_vm2, %v4654_v30  ;;  %v5243_v49 = vsel %vm5235_vm4, %v10242_v48, %v5234_v43  ;;  %v5251_v37 = vsel %vm5235_vm4, %v5234_v43, %v10242_v48  ;;  %v5082_v48 = vsel %vm5080_vm1, %v11542_v32, %v10212_v6  ;;  %v5248_v30 = vsel %vm5235_vm4, %v10246_v34, %v10283_v15 }
 0x6d3   : > { %5143 = vmatpush.msra.mxu1 %v5112_v3  ;;  %v5273_v53 = vmul.f32 %v10366_v25, %v5243_v49  ;;  %v5274_v38 = vmul.f32 %v10368_v44, %v5251_v37  ;;  %5172 = vmatpush.msrb.mxu2 %v5113_v50  ;;  %v5106_v6 = vmul.f32 %v10330_v55, %v5082_v48 }
 0x6d4   : > { %6417 = vmatmul.msk.f32.vlgmr.msra.gmra.mxu3 %vm607_vm2, %v4889_v41  ;;  %v5270_v55 = vmul.f32 %v10368_v44, %v5249_v52  ;;  %v5247_v34 = vsel %vm5235_vm4, %v10297_v9, %v10278_v29  ;;  %v5238_v15 = vsel %vm5235_vm4, %v10314_v13, %v10286_v18  ;;  %v5268_v36 = vmul.f32 %v10368_v44, %v5248_v30  ;;  %v5044_v29 = vld [vmem:[#allocation7 + $0x1e0] sm:$0xff] }
 0x6d5   : > { %5144 = vmatpush.msra.mxu1 %v5110_v16  ;;  %5173 = vmatpush.msrb.mxu2 %v5111_v4  ;;  %v5265_v9 = vmul.f32 %v10366_v25, %v5239_v26  ;;  %v10464_v18 = vperm.slane %v5408_v14, 1  ;;  %v5266_v13 = vmul.f32 %v10368_v44, %v5247_v34  ;;  %v5263_v45 = vmul.f32 %v10366_v25, %v5238_v15  ;;  %v5047_v14 = vld [vmem:[#allocation7 + $0x1f8] sm:$0xff] }
 0x6d6   : > { %5295 = vmatpush.msrb.mxu3 %v5273_v53  ;;  %5324 = vmatpush.msra.mxu0 %v5274_v38  ;;  %v5397_v42 = vsel %vm5390_vm5, %v10308_v11, %v10362_v23  ;;  %v5405_v16 = vsel %vm5390_vm5, %v10362_v23, %v10308_v11  ;;  %v5262_v4 = vmul.f32 %v10368_v44, %v5245_v59 }
 0x6d7   : > { %5145 = vmatpush.msra.mxu1 %v5108_v57  ;;  %v10409_v19 = vpop.permute.xlu0 %5382  ;;  %5174 = vmatpush.msrb.mxu2 %v5109_v47  ;;  %v5426_v11 = vmul.f32 %v10462_v56, %v5397_v42  ;;  %v5355_v42 = vld [vmem:[#allocation7 + $0x228] sm:$0xff] }
 0x6d8   : > { %6412 = vmatmul.msk.f32.gmra.mxu1 %vm607_vm2, %v4809_v17  ;;  %6416 = vmatmul.msk.f32.gmra.mxu2 %vm607_vm2, %v4809_v17  ;;  %v5395_v8 = vsel %vm5390_vm5, %v10342_v21, %v10409_v19  ;;  %v5403_v57 = vsel %vm5390_vm5, %v10409_v19, %v10342_v21  ;;  %v4892_v21 = vld [vmem:[#allocation7 + $0x1d8] sm:$0xff]  ;;  %v5046_v19 = vld [vmem:[#allocation7 + $0x1f0] sm:$0xff] }
 0x6d9   : > { %5296 = vmatpush.msrb.mxu3 %v5271_v0  ;;  %v10426_v2 = vpop.permute.xlu1 %5368  ;;  %5146 = vmatpush.msra.mxu1 %v5106_v6  ;;  %v5381_v38 = vpop.permute.xlu2 %5380  ;;  %v5422_v17 = vmul.f32 %v10462_v56, %v5395_v8  ;;  %v5423_v47 = vmul.f32 %v10464_v18, %v5403_v57 }
 0x6da   : > { %6421 = vmatmul.msk.f32.vlgmr.msrb.gmra.mxu0 %vm607_vm2, %v4889_v41  ;;  %5175 = vmatpush.msrb.mxu2 %v5107_v22  ;;  %v5396_v23 = vsel %vm5390_vm5, %v10426_v2, %v10318_v51  ;;  %v5199_v22 = vld [vmem:[#allocation7 + $0x200] sm:$0xff] }
 0x6db   : > { %5325 = vmatpush.msra.mxu0 %v5272_v1  ;;  %5297 = vmatpush.msrb.mxu3 %v5269_v7  ;;  %v5424_v32 = vmul.f32 %v10462_v56, %v5396_v23 }
 0x6dc   : > { %5147 = vmatpush.msra.mxu1 %v5104_v61  ;;  %6418 = vmatmul.msk.f32.gmra.mxu3 %vm607_vm2, %v4890_v40 }
 0x6dd   : > { %5326 = vmatpush.msra.mxu0 %v5270_v55  ;;  %5176 = vmatpush.msrb.mxu2 %v5105_v10 }
 0x6de   : > { %5298 = vmatpush.msrb.mxu3 %v5267_v60 }
 0x6df   : > { %5327 = vmatpush.msra.mxu0 %v5268_v36  ;;  %v5389_v33 = vpop.permute.xlu0 %5388 }
 0x6e0   : > { %6425 = vmatmul.msk.f32.vlgmr.msra.gmra.mxu1 %vm607_vm2, %v5044_v29  ;;  %5299 = vmatpush.msrb.mxu3 %v5265_v9  ;;  %v5398_v3 = vsel %vm5390_vm5, %v10270_v62, %v5389_v33  ;;  %v5406_v50 = vsel %vm5390_vm5, %v5389_v33, %v10270_v62  ;;  %v4891_v62 = vld [vmem:[#allocation7 + $0x1d0] sm:$0xff] }
 0x6e1   : > { %6429 = vmatmul.msk.f32.vlgmr.msrb.gmra.mxu2 %vm607_vm2, %v5044_v29  ;;  %5328 = vmatpush.msra.mxu0 %v5266_v13  ;;  %v5428_v46 = vmul.f32 %v10462_v56, %v5398_v3  ;;  %v5429_v41 = vmul.f32 %v10464_v18, %v5406_v50  ;;  %v5220_v43 = vpop.permute.xlu1 %5219  ;;  %v5361_v6 = vpop.permute.xlu2 %5360 }
 0x6e2   : > { %6422 = vmatmul.msk.f32.gmra.mxu0 %vm607_vm2, %v4890_v40  ;;  %5300 = vmatpush.msrb.mxu3 %v5263_v45  ;;  %v5236_v49 = vsel %vm5235_vm4, %v10353_v63, %v5220_v43  ;;  %v5244_v37 = vsel %vm5235_vm4, %v5220_v43, %v10353_v63  ;;  %v5427_v63 = vmul.f32 %v10464_v18, %v5405_v16  ;;  %v5202_v43 = vld [vmem:[#allocation7 + $0x218] sm:$0xff] }
 0x6e3   : > { %5329 = vmatpush.msra.mxu0 %v5264_v20  ;;  %v5259_v39 = vmul.f32 %v10366_v25, %v5236_v49  ;;  %v5260_v53 = vmul.f32 %v10368_v44, %v5244_v37  ;;  %5450 = vmatpush.msrb.mxu1 %v5428_v46  ;;  %v5404_v25 = vsel %vm5390_vm5, %v10318_v51, %v10426_v2  ;;  %v5045_v44 = vld [vmem:[#allocation7 + $0x1e8] sm:$0xff]  ;;  %v5356_v49 = vld [vmem:[#allocation7 + $0x230] sm:$0xff] }
 0x6e4   : > { %5301 = vmatpush.msrb.mxu3 %v5261_v54  ;;  %5479 = vmatpush.msra.mxu2 %v5429_v41  ;;  %v5425_v48 = vmul.f32 %v10464_v18, %v5404_v25  ;;  %v5354_v54 = vld [vmem:[#allocation7 + $0x220] sm:$0xff] }
 0x6e5   : > { %6419 = vmatmul.msk.f32.gmra.mxu3 %vm607_vm2, %v4891_v62  ;;  %5330 = vmatpush.msra.mxu0 %v5262_v4 }
 0x6e6   : > { %5302 = vmatpush.msrb.mxu3 %v5259_v39  ;;  %5451 = vmatpush.msrb.mxu1 %v5426_v11 }
 0x6e7   : > { %5331 = vmatpush.msra.mxu0 %v5260_v53  ;;  %5480 = vmatpush.msra.mxu2 %v5427_v63  ;;  %v5363_v51 = vpop.permute.xlu0 %5362 }
 0x6e8   : > { %6426 = vmatmul.msk.f32.gmra.mxu1 %vm607_vm2, %v5045_v44 }
 0x6e9   : > { %6430 = vmatmul.msk.f32.gmra.mxu2 %vm607_vm2, %v5045_v44  ;;  %5452 = vmatpush.msrb.mxu1 %v5424_v32  ;;  %v5365_v24 = vpop.permute.xlu1 %5364 }
 0x6ea   : > { %6423 = vmatmul.msk.f32.gmra.mxu0 %vm607_vm2, %v4891_v62  ;;  %5481 = vmatpush.msra.mxu2 %v5425_v48  ;;  %v5394_v12 = vsel %vm5390_vm5, %v5365_v24, %v5381_v38  ;;  %v5402_v35 = vsel %vm5390_vm5, %v5381_v38, %v5365_v24  ;;  %v4384_v10 = vpop.f32.mrf.mxu1  ;;  %v5375_v15 = vpop.permute.xlu2 %5374  ;;  %v5357_v38 = vld [vmem:[#allocation7 + $0x238] sm:$0xff] }
 0x6eb   : > { %v5420_v27 = vmul.f32 %v10462_v56, %v5394_v12  ;;  %v5421_v0 = vmul.f32 %v10464_v18, %v5402_v35  ;;  %5453 = vmatpush.msrb.mxu1 %v5422_v17 }
 0x6ec   : > { %5482 = vmatpush.msra.mxu2 %v5423_v47 }
 0x6ed   : > { %6420 = vmatmul.msk.f32.gmra.mxu3 %vm607_vm2, %v4892_v21  ;;  %5454 = vmatpush.msrb.mxu1 %v5420_v27 }
 0x6ee   : > { %5483 = vmatpush.msra.mxu2 %v5421_v0 }
 0x6ef   : > { %v5377_v52 = vpop.permute.xlu0 %5376 }
 0x6f0   : > { %6427 = vmatmul.msk.f32.gmra.mxu1 %vm607_vm2, %v5046_v19  ;;  %v5392_v61 = vsel %vm5390_vm5, %v5361_v6, %v5377_v52  ;;  %v5400_v7 = vsel %vm5390_vm5, %v5377_v52, %v5361_v6 }
 0x6f1   : > { %6431 = vmatmul.msk.f32.gmra.mxu2 %vm607_vm2, %v5046_v19  ;;  %v5379_v58 = vpop.permute.xlu1 %5378  ;;  %v5416_v60 = vmul.f32 %v10462_v56, %v5392_v61  ;;  %v5417_v34 = vmul.f32 %v10464_v18, %v5400_v7 }
 0x6f2   : > { %6424 = vmatmul.msk.f32.gmra.mxu0 %vm607_vm2, %v4892_v21  ;;  %v5393_v1 = vsel %vm5390_vm5, %v5363_v51, %v5379_v58  ;;  %v5401_v2 = vsel %vm5390_vm5, %v5379_v58, %v5363_v51  ;;  %v4413_v36 = vpop.f32.mrf.mxu2 }
 0x6f3   : > { %v5418_v30 = vmul.f32 %v10462_v56, %v5393_v1  ;;  %v5419_v40 = vmul.f32 %v10464_v18, %v5401_v2  ;;  %v4387_v59 = vpop.f32.mrf.mxu1 }
 0x6f4   : > { %v10548_v55 = vpop.f32.mrf.mxu3 }
 0x6f5   : > { %6433 = vmatmul.msk.f32.vlgmr.msrb.gmra.mxu3 %vm607_vm2, %v5199_v22  ;;  %v10552_v26 = vpop.f32.mrf.mxu0  ;;  %5455 = vmatpush.msrb.mxu1 %v5418_v30 }
 0x6f6   : > { %5484 = vmatpush.msra.mxu2 %v5419_v40 }
 0x6f7   : > { %5456 = vmatpush.msrb.mxu1 %v5416_v60 }
 0x6f8   : > { %6428 = vmatmul.msk.f32.gmra.mxu1 %vm607_vm2, %v5047_v14  ;;  %5485 = vmatpush.msra.mxu2 %v5417_v34 }
 0x6f9   : > { %6432 = vmatmul.msk.f32.gmra.mxu2 %vm607_vm2, %v5047_v14  ;;  %v5359_v5 = vpop.permute.xlu1 %5358 }
 0x6fa   : > { %6437 = vmatmul.msk.f32.vlgmr.msra.gmra.mxu0 %vm607_vm2, %v5199_v22  ;;  %v5391_v29 = vsel %vm5390_vm5, %v5359_v5, %v5375_v15  ;;  %v5399_v9 = vsel %vm5390_vm5, %v5375_v15, %v5359_v5 }
 0x6fb   : > { %v5414_v13 = vmul.f32 %v10462_v56, %v5391_v29  ;;  %v5415_v45 = vmul.f32 %v10464_v18, %v5399_v9  ;;  %v4416_v56 = vpop.f32.mrf.mxu2 }
 0x6fc   : > { %v4052_v20 = vpop.f32.mrf.mxu3 }
 0x6fd   : > { %6434 = vmatmul.msk.f32.gmra.mxu3 %vm607_vm2, %v5200_v31  ;;  %v4081_v33 = vpop.f32.mrf.mxu0  ;;  %5457 = vmatpush.msrb.mxu1 %v5414_v13  ;;  %v4390_v41 = vpop.f32.mrf.mxu1 }
 0x6fe   : > { %v4093_v3 = vadd.f32 %v4081_v33, %v4052_v20  ;;  %5486 = vmatpush.msra.mxu2 %v5415_v45 }
 0x700   : > { %6441 = vmatmul.msk.f32.vlgmr.msrb.gmra.mxu1 %vm607_vm2, %v5354_v54  ;;  %4094 = vadd.xlane.f32.xlu0 %v4093_v3 }
 0x701   : > { %6445 = vmatmul.msk.f32.vlgmr.msra.gmra.mxu2 %vm607_vm2, %v5354_v54 }
 0x702   : > { %6438 = vmatmul.msk.f32.gmra.mxu0 %vm607_vm2, %v5200_v31 }
 0x704   : > { %v4055_v50 = vpop.f32.mrf.mxu3 }
 0x705   : > { %6435 = vmatmul.msk.f32.gmra.mxu3 %vm607_vm2, %v5201_v28  ;;  %v4084_v18 = vpop.f32.mrf.mxu0  ;;  %v4419_v37 = vpop.f32.mrf.mxu2 }
 0x706   : > { %v4096_v46 = vadd.f32 %v4084_v18, %v4055_v50 }
 0x707   : > { %v4393_v39 = vpop.f32.mrf.mxu1 }
 0x708   : > { %6442 = vmatmul.msk.f32.gmra.mxu1 %vm607_vm2, %v5355_v42  ;;  %4097 = vadd.xlane.f32.xlu2 %v4096_v46 }
 0x709   : > { %6446 = vmatmul.msk.f32.gmra.mxu2 %vm607_vm2, %v5355_v42 }
 0x70a   : > { %6439 = vmatmul.msk.f32.gmra.mxu0 %vm607_vm2, %v5201_v28 }
 0x70c   : > { %v4058_v16 = vpop.f32.mrf.mxu3 }
 0x70d   : > { %6436 = vmatmul.msk.f32.gmra.mxu3 %vm607_vm2, %v5202_v43  ;;  %v4087_v62 = vpop.f32.mrf.mxu0 }
 0x70e   : > { %v4099_v4 = vadd.f32 %v4087_v62, %v4058_v16  ;;  %v4422_v25 = vpop.f32.mrf.mxu2 }
 0x710   : > { %6443 = vmatmul.msk.f32.gmra.mxu1 %vm607_vm2, %v5356_v49  ;;  %4100 = vadd.xlane.f32.xlu0 %v4099_v4 }
 0x711   : > { %6447 = vmatmul.msk.f32.gmra.mxu2 %vm607_vm2, %v5356_v49 }
 0x712   : > { %6440 = vmatmul.msk.f32.gmra.mxu0 %vm607_vm2, %v5202_v43 }
 0x714   : > { %v4454_v53 = vpop.f32.mrf.mxu3 }
 0x715   : > { %v4455_v11 = vadd.f32 %v4454_v53, %v4384_v10  ;;  %v4483_v23 = vpop.f32.mrf.mxu0 }
 0x716   : > { %v4484_v63 = vadd.f32 %v4483_v23, %v4413_v36 }
 0x718   : > { %6444 = vmatmul.msk.f32.gmra.mxu1 %vm607_vm2, %v5357_v38 }
 0x719   : > { %6448 = vmatmul.msk.f32.gmra.mxu2 %vm607_vm2, %v5357_v38 }
 0x71a   : > { %v4601_v44 = vpop.f32.mrf.mxu1 }
 0x71b   : > { %v4642_v8 = vadd.f32 %v4601_v44, %v4455_v11  ;;  %v6905_v11 = vmov 256.0  }
 0x71c   : > { %v4457_v57 = vpop.f32.mrf.mxu3  ;;  %6615 = vrcp.f32 %v6905_v11 }
 0x71d   : > { %v4458_v32 = vadd.f32 %v4457_v57, %v4387_v59 }
 0x71f   : > { %v4486_v51 = vpop.f32.mrf.mxu0 }
 0x720   : > { %v4487_v48 = vadd.f32 %v4486_v51, %v4416_v56  ;;  %v4630_v17 = vpop.f32.mrf.mxu2 }
 0x721   : > { %v4643_v24 = vadd.f32 %v4630_v17, %v4484_v63  ;;  %v10604_v63 = vpop.permute.xlu2 %5545 }
 0x724   : > { %v4604_v47 = vpop.f32.mrf.mxu1 }
 0x725   : > { %v4644_v21 = vadd.f32 %v4604_v47, %v4458_v32 }
 0x727   : > { %v4489_v12 = vpop.f32.mrf.mxu0  ;;  %v4460_v35 = vpop.f32.mrf.mxu3 }
 0x728   : > { %v4490_v27 = vadd.f32 %v4489_v12, %v4419_v37  ;;  %v4461_v0 = vadd.f32 %v4460_v35, %v4390_v41 }
 0x729   : > { %v10614_v47 = vpop.permute.xlu2 %5541 }
 0x72a   : > { %v4633_v19 = vpop.f32.mrf.mxu2 }
 0x72b   : > { %v4645_v6 = vadd.f32 %v4633_v19, %v4487_v48 }
 0x72d   : > { %v4607_v52 = vpop.f32.mrf.mxu1 }
 0x72e   : > { %v4646_v58 = vadd.f32 %v4607_v52, %v4461_v0 }
 0x72f   : > { %v4492_v61 = vpop.f32.mrf.mxu0  ;;  %v4463_v22 = vpop.f32.mrf.mxu3 }
 0x730   : > { %v4493_v1 = vadd.f32 %v4492_v61, %v4422_v25  ;;  %v4464_v2 = vadd.f32 %v4463_v22, %v4393_v39  ;;  %v6616_v25 = vpop.eup %6615 }
 0x731   : > { %v4103_v32 = vmul.f32 256.0, %v6616_v25  ;;  %vm4107_vm2 = vweird.f32 %v6616_v25 }
 0x733   : > { %v4636_v10 = vpop.f32.mrf.mxu2  ;;  %v4104_v17 = vsub.f32 1.0, %v4103_v32 }
 0x734   : > { %v4647_v7 = vadd.f32 %v4636_v10, %v4490_v27 }
 0x735   : > { %v4610_v30 = vpop.f32.mrf.mxu1  ;;  %v4105_v35 = vmul.f32 %v6616_v25, %v4104_v17 }
 0x736   : > { %v10578_v40 = vadd.f32 %v4610_v30, %v4464_v2 }
 0x737   : > { %v4785_v60 = vpop.f32.mrf.mxu0  ;;  %v4756_v14 = vpop.f32.mrf.mxu3  ;;  %v4106_v19 = vadd.f32 %v6616_v25, %v4105_v35 }
 0x738   : > { %v4798_v34 = vadd.f32 %v4785_v60, %v4643_v24  ;;  %v4797_v15 = vadd.f32 %v4756_v14, %v4642_v8  ;;  %v10608_v8 = vpop.permute.xlu0 %5521 }
 0x739   : > { %v10624_v61 = vsel %vm4107_vm2, %v6616_v25, %v4106_v19 }
 0x73b   : > { %v4639_v5 = vpop.f32.mrf.mxu2 }
 0x73c   : > { %v10580_v36 = vadd.f32 %v4639_v5, %v4493_v1 }
 0x73d   : > { %v4839_v31 = vpop.f32.mrf.mxu1 }
 0x73e   : > { %v10582_v29 = vadd.f32 %v4839_v31, %v4797_v15 }
 0x73f   : > { %v4788_v9 = vpop.f32.mrf.mxu0  ;;  %v4759_v13 = vpop.f32.mrf.mxu3 }
 0x740   : > { %v4800_v45 = vadd.f32 %v4788_v9, %v4645_v6  ;;  %v4799_v20 = vadd.f32 %v4759_v13, %v4644_v21  ;;  %v10616_v12 = vpop.permute.xlu0 %5509 }
 0x743   : > { %v4868_v59 = vpop.f32.mrf.mxu2 }
 0x744   : > { %v10584_v33 = vadd.f32 %v4868_v59, %v4798_v34 }
 0x745   : > { %v4842_v54 = vpop.f32.mrf.mxu1 }
 0x746   : > { %v10586_v3 = vadd.f32 %v4842_v54, %v4799_v20 }
 0x747   : > { %v4791_v28 = vpop.f32.mrf.mxu0  ;;  %v4762_v56 = vpop.f32.mrf.mxu3 }
 0x748   : > { %v4802_v50 = vadd.f32 %v4791_v28, %v4647_v7  ;;  %v4801_v18 = vadd.f32 %v4762_v56, %v4646_v58  ;;  %v10622_v58 = vpop.permute.xlu2 %5533 }
 0x74b   : > { %v4871_v42 = vpop.f32.mrf.mxu2 }
 0x74c   : > { %v10588_v46 = vadd.f32 %v4871_v42, %v4800_v45  ;;  %v10634_v45 = vpop.permute.xlu1 %5517 }
 0x74d   : > { %v4845_v41 = vpop.f32.mrf.mxu1 }
 0x74e   : > { %v10590_v43 = vadd.f32 %v4845_v41, %v4801_v18 }
 0x74f   : > { %v10592_v16 = vpop.f32.mrf.mxu0  ;;  %v10594_v62 = vpop.f32.mrf.mxu3 }
 0x750   : > { %v4803_v17 = vadd.f32 %v10594_v62, %v10578_v40  ;;  %v4804_v40 = vadd.f32 %v10592_v16, %v10580_v36 }
 0x753   : > { %v4874_v49 = vpop.f32.mrf.mxu2 }
 0x754   : > { %v10596_v37 = vadd.f32 %v4874_v49, %v4802_v50  ;;  %v10648_v19 = vpop.permute.xlu1 %5513 }
 0x755   : > { %v10598_v4 = vpop.f32.mrf.mxu1 }
 0x757   : > { %v10600_v39 = vpop.f32.mrf.mxu0  ;;  %v4994_v53 = vpop.f32.mrf.mxu3 }
 0x758   : > { %v5035_v11 = vadd.f32 %v4994_v53, %v10582_v29  ;;  %v4886_v29 = vadd.f32 %v10598_v4, %v4803_v17 }
 0x75b   : > { %v10602_v23 = vpop.f32.mrf.mxu2 }
 0x75c   : > { %v4887_v4 = vadd.f32 %v10602_v23, %v4804_v40 }
 0x75d   : > { %v5149_v38 = vpop.f32.mrf.mxu1 }
 0x75e   : > { %v5190_v25 = vadd.f32 %v5149_v38, %v5035_v11  ;;  %v10679_v11 = vpop.permute.xlu1 %5537 }
 0x75f   : > { %v10606_v44 = vpop.f32.mrf.mxu0  ;;  %v4997_v57 = vpop.f32.mrf.mxu3 }
 0x760   : > { %v5037_v32 = vadd.f32 %v4997_v57, %v10586_v3  ;;  %v5036_v57 = vadd.f32 %v10600_v39, %v10584_v33 }
 0x764   : > { %v10610_v51 = vpop.f32.mrf.mxu2 }
 0x765   : > { %v5152_v48 = vpop.f32.mrf.mxu1 }
 0x767   : > { %v10612_v24 = vpop.f32.mrf.mxu0 }
 0x768   : > { %v5000_v21 = vpop.f32.mrf.mxu3  ;;  %v5040_v33 = vadd.f32 %v10612_v24, %v10596_v37 }
 0x769   : > { %v5039_v35 = vadd.f32 %v5000_v21, %v10590_v43 }
 0x76c   : > { %v10618_v27 = vpop.f32.mrf.mxu2 }
 0x76d   : > { %v5155_v0 = vpop.f32.mrf.mxu1 }
 0x76e   : > { %v5194_v53 = vadd.f32 %v5155_v0, %v5039_v35 }
 0x76f   : > { %v10620_v52 = vpop.f32.mrf.mxu0 }
 0x770   : > { %v5003_v6 = vpop.f32.mrf.mxu3 }
 0x773   : > { %v4095_v22 = vpop.xlane.xlu0 %4094 }
 0x774   : > { %v10626_v1 = vpop.f32.mrf.mxu2  ;;  %v4110_v2 = vmul.f32 %v10624_v61, %v4095_v22 }
 0x775   : > { %v5158_v10 = vpop.f32.mrf.mxu1 }
 0x776   : > { %v6374_v7 = vmul.f32 -1.442695, %v4110_v2 }
 0x777   : > { %v10629_v60 = vpop.f32.mrf.mxu0 }
 0x778   : > { %v5304_v30 = vpop.f32.mrf.mxu3  ;;  %6617 = vpow2.f32 %v6374_v7  ;;  %v5192_v7 = vadd.f32 %v5152_v48, %v5037_v32  ;;  %v5041_v48 = vadd.f32 %v5003_v6, %v4886_v29 }
 0x77a   : > { %v5196_v39 = vadd.f32 %v5158_v10, %v5041_v48 }
 0x77b   : > { %v4098_v14 = vpop.xlane.xlu2 %4097 }
 0x77c   : > { %v10631_v34 = vpop.f32.mrf.mxu2  ;;  %v4111_v15 = vmul.f32 %v10624_v61, %v4098_v14  ;;  %v5345_v14 = vadd.f32 %v5304_v30, %v5190_v25 }
 0x77d   : > { %v5459_v5 = vpop.f32.mrf.mxu1 }
 0x77e   : > { %v6375_v31 = vmul.f32 -1.442695, %v4111_v15  ;;  %v6618_v9 = vpop.eup %6617  ;;  %v5500_v3 = vadd.f32 %v5459_v5, %v5345_v14  ;;  %v5038_v5 = vadd.f32 %v10606_v44, %v10588_v46 }
 0x77f   : > { %v10636_v20 = vadd.f32 1.0, %v6618_v9  ;;  %v5336_v54 = vpop.f32.mrf.mxu0 }
 0x780   : > { %6619 = vpow2.f32 %v6375_v31  ;;  %v5307_v13 = vpop.f32.mrf.mxu3  ;;  %v5524_v23 = vmul.f32 %v10616_v12, %v5500_v3 }
 0x781   : > { %6621 = vrcp.f32 %v10636_v20  ;;  %v5347_v43 = vadd.f32 %v5307_v13, %v5192_v7  ;;  %v5191_v13 = vadd.f32 %v10610_v51, %v5036_v57  ;;  %vm4149_vm7 = vweird.f32 %v10636_v20 }
 0x782   : > { %v10684_v35 = vadd.f32 %v10622_v58, %v5524_v23 }
 0x783   : > { %v4101_v59 = vpop.xlane.xlu0 %4100  ;;  %v5346_v46 = vadd.f32 %v10629_v60, %v5191_v13  ;;  %v4155_v60 = vand.u32 2147483648, %v10636_v20 }
 0x784   : > { %v5488_v28 = vpop.f32.mrf.mxu2  ;;  %v4112_v56 = vmul.f32 %v10624_v61, %v4101_v59  ;;  %v5042_v59 = vadd.f32 %v10620_v52, %v4887_v4 }
 0x785   : > { %v5462_v50 = vpop.f32.mrf.mxu1  ;;  %v5501_v32 = vadd.f32 %v5488_v28, %v5346_v46 }
 0x786   : > { %v6620_v18 = vpop.eup %6619  ;;  %v6376_v42 = vmul.f32 -1.442695, %v4112_v56  ;;  %v5502_v36 = vadd.f32 %v5462_v50, %v5347_v43  ;;  %v5193_v56 = vadd.f32 %v10618_v27, %v5038_v5  ;;  %v5197_v44 = vadd.f32 %v10631_v34, %v5042_v59 }
 0x787   : > { %v10640_v41 = vadd.f32 1.0, %v6620_v18  ;;  %v10650_v2 = vpop.eup %6621  ;;  %v5339_v38 = vpop.f32.mrf.mxu0  ;;  %v5195_v18 = vadd.f32 %v10626_v1, %v5040_v33  ;;  %v4153_v27 = vand.u32 2147483647, %v10636_v20 }
 0x788   : > { %6623 = vpow2.f32 %v6376_v42  ;;  %v5310_v49 = vpop.f32.mrf.mxu3  ;;  %v4145_v0 = vmul.f32 %v10650_v2, %v10636_v20  ;;  %v5526_v37 = vmul.f32 %v10648_v19, %v5502_v36  ;;  %v5348_v51 = vadd.f32 %v5336_v54, %v5193_v56 }
 0x789   : > { %6625 = vrcp.f32 %v10640_v41  ;;  %v5349_v30 = vadd.f32 %v5310_v49, %v5194_v53  ;;  %v5350_v17 = vadd.f32 %v5339_v38, %v5195_v18  ;;  %vm4164_vm6 = vweird.f32 %v10640_v41 }
 0x78a   : > { %v4146_v10 = vsub.f32 1.0, %v4145_v0  ;;  %vm4150_vm10 = vweird.f32 %v10650_v2  ;;  %vm4154_vm1 = vcmp.eq.f32.partialorder %v4153_v27, 8.507059e+37  ;;  %v11552_v27 = vld [vmem:[#allocation95_spill] sm:$0xff] }
 0x78b   : > { %vm10742_vm15 = vmor %vm4149_vm7, %vm4150_vm10 }
 0x78c   : > { %v5491_v22 = vpop.f32.mrf.mxu2  ;;  %v4147_v29 = vmul.f32 %v10650_v2, %v4146_v10  ;;  %v6657_v10 = vld [vmem:[#allocation9] sm:$0xff] }
 0x78d   : > { %v5465_v15 = vpop.f32.mrf.mxu1  ;;  %v5503_v38 = vadd.f32 %v5491_v22, %v5348_v51 }
 0x78e   : > { %v6624_v31 = vpop.eup %6623  ;;  %v5504_v6 = vadd.f32 %v5465_v15, %v5349_v30  ;;  %v10693_v15 = vadd.f32 %v10679_v11, %v5526_v37 }
 0x78f   : > { %v10653_v9 = vpop.eup %6625  ;;  %v10657_v62 = vadd.f32 1.0, %v6624_v31  ;;  %v5342_v7 = vpop.f32.mrf.mxu0  ;;  %v4168_v31 = vand.u32 2147483647, %v10640_v41  ;;  %v5527_v13 = vmul.f32 %v10648_v19, %v5503_v38 }
 0x790   : > { %v4160_v21 = vmul.f32 %v10653_v9, %v10640_v41  ;;  %v5313_v16 = vpop.f32.mrf.mxu3  ;;  %v5528_v52 = vmul.f32 %v10634_v45, %v5504_v6  ;;  %v5352_v43 = vadd.f32 %v5342_v7, %v5197_v44  ;;  %vm4165_vm8 = vweird.f32 %v10653_v9 }
 0x791   : > { %6627 = vrcp.f32 %v10657_v62  ;;  %v5351_v50 = vadd.f32 %v5313_v16, %v5196_v39  ;;  %v4183_v57 = vand.u32 2147483647, %v10657_v62  ;;  %v4185_v48 = vand.u32 2147483648, %v10657_v62  ;;  %vm10717_vm12 = vmor %vm4164_vm6, %vm4165_vm8 }
 0x792   : > { %v4161_v49 = vsub.f32 1.0, %v4160_v21  ;;  %v10701_v3 = vadd.f32 %v10614_v47, %v5528_v52  ;;  %v4170_v16 = vand.u32 2147483648, %v10640_v41  ;;  %vm4179_vm11 = vweird.f32 %v10657_v62 }
 0x793   : > { %v5525_v6 = vmul.f32 %v10616_v12, %v5501_v32  ;;  %v4186_v23 = vor.u32 1.1754944e-38, %v4185_v48  ;;  %v5558_v56 = vmax.f32 %v10693_v15, 0.0  ;;  %vm4184_vm14 = vcmp.eq.f32.partialorder %v4183_v57, 8.507059e+37  ;;  %v6660_v57 = vld [vmem:[#allocation9 + $0x18] sm:$0xff] }
 0x794   : > { %v5494_v42 = vpop.f32.mrf.mxu2  ;;  %v4162_v14 = vmul.f32 %v10653_v9, %v4161_v49  ;;  %v5560_v5 = vmax.f32 %v10701_v3, 0.0  ;;  %v4171_v18 = vor.u32 1.1754944e-38, %v4170_v16  ;;  %vm4169_vm0 = vcmp.eq.f32.partialorder %v4168_v31, 8.507059e+37  ;;  %v6461_v15 = vld [vmem:[%s10971_s7 + $0x20] sm:$0xff] }
 0x795   : > { %v5468_v24 = vpop.f32.mrf.mxu1  ;;  %v5505_v28 = vadd.f32 %v5494_v42, %v5350_v17  ;;  %v10756_v37 = vadd.f32 %v10679_v11, %v5527_v13  ;;  %v10767_v52 = vadd.f32 %v10622_v58, %v5525_v6  ;;  %v11550_v11 = vld [vmem:[#allocation82_spill] sm:$0xff]  ;;  %v11553_v32 = vmax.f32 %v11552_v27, 0.0  ;;  %v11554_v58 = vld [vmem:[#allocation91_spill] sm:$0xff] }
 0x796   : > { %v5506_v25 = vadd.f32 %v5468_v24, %v5351_v50  ;;  %v4163_v22 = vadd.f32 %v10653_v9, %v4162_v14  ;;  %v4156_v24 = vor.u32 1.1754944e-38, %v4155_v60  ;;  %v11556_v14 = vld [vmem:[#allocation81_spill] sm:$0xff]  ;;  %v4090_v6 = vadd.f32 %v10552_v26, %v10548_v55 }
 0x797   : > { %v6628_v1 = vpop.eup %6627  ;;  %v5529_v0 = vmul.f32 %v10634_v45, %v5505_v28  ;;  %v4148_v45 = vadd.f32 %v10650_v2, %v4147_v29  ;;  %v5559_v20 = vmax.f32 %v10756_v37, 0.0  ;;  %v5557_v60 = vmax.f32 %v10767_v52, 0.0  ;;  %v11558_v29 = vld [vmem:[#allocation37_spill] sm:$0xff]  ;;  %v6464_v52 = vld [vmem:[%s10971_s7 + $0x38] sm:$0xff] }
 0x798   : > { %v4175_v34 = vmul.f32 %v6628_v1, %v10657_v62  ;;  %v5530_v54 = vmul.f32 %v10608_v8, %v5506_v25  ;;  %vm4180_vm9 = vweird.f32 %v6628_v1  ;;  %v4167_v62 = vsel %vm10717_vm12, %v10653_v9, %v4163_v22  ;;  %v6463_v37 = vld [vmem:[%s10971_s7 + $0x30] sm:$0xff] }
 0x799   : > { %vm4181_vm13 = vmor %vm4179_vm11, %vm4180_vm9  ;;  %v5556_v9 = vmax.f32 %v10684_v35, 0.0  ;;  %v4172_v44 = vsel %vm4169_vm0, %v4171_v18, %v4167_v62  ;;  %v11551_v25 = vmax.f32 %v11550_v11, 0.0  ;;  %v11557_v28 = vmax.f32 %v11556_v14, 0.0  ;;  %v4191_v35 = vld [vmem:[%s10971_s7 + $0x10] sm:$0xff] }
 0x79a   : > { %v4176_v53 = vsub.f32 1.0, %v4175_v34  ;;  %v10698_v40 = vadd.f32 %v10604_v63, %v5530_v54  ;;  %v11555_v34 = vmax.f32 %v11554_v58, 0.0  ;;  %v6658_v54 = vld [vmem:[#allocation9 + $0x8] sm:$0xff] }
 0x79b   : > { %v4198_v31 = vmul.f32 %v4172_v44, %v11557_v28 }
 0x79c   : > { %v5562_v21 = vmax.f32 %v10698_v40, 0.0  ;;  %v5497_v30 = vpop.f32.mrf.mxu2  ;;  %v4177_v4 = vmul.f32 %v6628_v1, %v4176_v53  ;;  %v11559_v53 = vmax.f32 %v11558_v29, 0.0 }
 0x79d   : > { %v5507_v36 = vadd.f32 %v5497_v30, %v5352_v43  ;;  %v6659_v43 = vld [vmem:[#allocation9 + $0x10] sm:$0xff] }
 0x79e   : > { %5576 = vmatpush.msra.mxu3 %v5562_v21  ;;  %v4178_v33 = vadd.f32 %v6628_v1, %v4177_v4 }
 0x79f   : > { %v5531_v59 = vmul.f32 %v10608_v8, %v5507_v36  ;;  %v10736_v8 = vadd.f32 %v10614_v47, %v5529_v0  ;;  %v4152_v47 = vsel %vm10742_vm15, %v10650_v2, %v4148_v45 }
 0x7a0   : > { %5577 = vmatpush.msra.mxu3 %v5560_v5  ;;  %v4182_v41 = vsel %vm4181_vm13, %v6628_v1, %v4178_v33  ;;  %v4157_v51 = vsel %vm4154_vm1, %v4156_v24, %v4152_v47  ;;  %v4197_v1 = vmul.f32 %v4172_v44, %v11551_v25 }
 0x7a1   : > { %v10733_v12 = vadd.f32 %v10604_v63, %v5531_v59  ;;  %v4187_v19 = vsel %vm4184_vm14, %v4186_v23, %v4182_v41  ;;  %v11548_v63 = vld [vmem:[#allocation22_spill] sm:$0xff]  ;;  %v5561_v2 = vmax.f32 %v10736_v8, 0.0  ;;  %v4195_v17 = vmul.f32 %v4157_v51, %v11553_v32 }
 0x7a2   : > { %5578 = vmatpush.msra.mxu3 %v5558_v56  ;;  %v11549_v42 = vmax.f32 %v11548_v63, 0.0  ;;  %v4200_v7 = vmul.f32 %v4187_v19, %v11555_v34  ;;  %v4196_v38 = vmul.f32 %v4157_v51, %v11559_v53  ;;  %v6907_v8 = vmov 9  }
 0x7a3   : > { %v5563_v46 = vmax.f32 %v10733_v12, 0.0 }
 0x7a4   : > { %v4199_v49 = vmul.f32 %v4187_v19, %v11549_v42  ;;  %5579 = vmatpush.msra.mxu3 %v5556_v9 }
 0x7a5   : > { %5605 = vmatpush.msrb.mxu0 %v5563_v46  ;;  %6449 = vmatmul.msk.f32.vlgmr.msra.gmra.mxu3 %vm4019_vm3, %v6657_v10 }
 0x7a6   : > { %5821 = vmatpush.msrb.mxu3 %v4199_v49 }
 0x7a7   : > { %5606 = vmatpush.msrb.mxu0 %v5561_v2 }
 0x7a8   : > { %5822 = vmatpush.msrb.mxu3 %v4197_v1 }
 0x7a9   : > { %5607 = vmatpush.msrb.mxu0 %v5559_v20 }
 0x7aa   : > { %5823 = vmatpush.msrb.mxu3 %v4195_v17 }
 0x7ab   : > { %5608 = vmatpush.msrb.mxu0 %v5557_v60 }
 0x7ac   : > { %6453 = vmatmul.msk.f32.vlgmr.msrb.gmra.mxu0 %vm4019_vm3, %v6657_v10 }
 0x7ad   : > { %5850 = vmatpush.msra.mxu0 %v4200_v7  ;;  %6450 = vmatmul.msk.f32.gmra.mxu3 %vm4019_vm3, %v6658_v54 }
 0x7af   : > { %5851 = vmatpush.msra.mxu0 %v4198_v31 }
 0x7b1   : > { %5852 = vmatpush.msra.mxu0 %v4196_v38 }
 0x7b4   : > { %6454 = vmatmul.msk.f32.gmra.mxu0 %vm4019_vm3, %v6658_v54 }
 0x7b5   : > { %6451 = vmatmul.msk.f32.gmra.mxu3 %vm4019_vm3, %v6659_v43 }
 0x7bc   : > { %6455 = vmatmul.msk.f32.gmra.mxu0 %vm4019_vm3, %v6659_v43 }
 0x7bd   : > { %6452 = vmatmul.msk.f32.gmra.mxu3 %vm4019_vm3, %v6660_v57 }
 0x7c4   : > { %6456 = vmatmul.msk.f32.gmra.mxu0 %vm4019_vm3, %v6660_v57 }
 0x828   : > { %v5581_v48 = vpop.f32.mrf.mxu3 }
 0x829   : > { %v5610_v30 = vpop.f32.mrf.mxu0 }
 0x82a   : > { %v5622_v4 = vadd.f32 %v5610_v30, %v5581_v48 }
 0x82c   : > { %5623 = vadd.xlane.f32.xlu0 %v5622_v4 }
 0x830   : > { %v5584_v22 = vpop.f32.mrf.mxu3 }
 0x831   : > { %v5613_v0 = vpop.f32.mrf.mxu0 }
 0x832   : > { %v5625_v59 = vadd.f32 %v5613_v0, %v5584_v22 }
 0x838   : > { %v5587_v36 = vpop.f32.mrf.mxu3 }
 0x839   : > { %v5616_v16 = vpop.f32.mrf.mxu0 }
 0x83a   : > { %v5628_v33 = vadd.f32 %v5616_v16, %v5587_v36 }
 0x83c   : > { %5629 = vadd.xlane.f32.xlu2 %v5628_v33 }
 0x840   : > { %v5590_v39 = vpop.f32.mrf.mxu3 }
 0x841   : > { %v5619_v45 = vpop.f32.mrf.mxu0 }
 0x842   : > { %v5631_v13 = vadd.f32 %v5619_v45, %v5590_v39 }
 0x844   : > { %4091 = vadd.xlane.f32.xlu2 %v4090_v6  ;;  %5632 = vadd.xlane.f32.xlu1 %v5631_v13 }
 0x84c   : > { %5626 = vadd.xlane.f32.xlu1 %v5625_v59 }
 0x89f   : > { %v5624_v23 = vpop.xlane.xlu0 %5623 }
 0x8a0   : > { %v5634_v41 = vmul.f32 %v5624_v23, %v10624_v61 }
 0x8a2   : > { %v6457_v62 = vmul.f32 -1.442695, %v5634_v41 }
 0x8a4   : > { %6629 = vpow2.f32 %v6457_v62  ;;  %v6906_v62 = vmov 8  }
 0x8a5   : > { %6609 = vset.pattern.permute.xlu1 %v6906_v62  ;;  %6611 = vset.pattern.permute.xlu0 %v6906_v62 }
 0x8a6   : > { %6610 = vset.pattern.permute.xlu2 %v6906_v62 }
 0x8aa   : > { %v6630_v50 = vpop.eup %6629 }
 0x8ab   : > { %v10798_v42 = vadd.f32 1.0, %v6630_v50 }
 0x8ad   : > { %v5663_v30 = vand.u32 2147483647, %v10798_v42  ;;  %v5665_v4 = vand.u32 2147483648, %v10798_v42  ;;  %vm5659_vm2 = vweird.f32 %v10798_v42 }
 0x8af   : > { %v5630_v19 = vpop.xlane.xlu2 %5629 }
 0x8b0   : > { %v5636_v18 = vmul.f32 %v5630_v19, %v10624_v61 }
 0x8b2   : > { %v6459_v63 = vmul.f32 -1.442695, %v5636_v18 }
 0x8b4   : > { %6631 = vpow2.f32 %v6459_v63  ;;  %v10838_v63 = vld [vmem:[#allocation10] sm:$0xff] }
 0x8b5   : > { %6633 = vrcp.f32 %v10798_v42  ;;  %5868 = vperm.xlu1 %6609, %v10838_v63  }
 0x8b7   : > { %v4092_v49 = vpop.xlane.xlu2 %4091  ;;  %v5633_v55 = vpop.xlane.xlu1 %5632 }
 0x8b8   : > { %v4109_v26 = vmul.f32 %v10624_v61, %v4092_v49  ;;  %v5637_v47 = vmul.f32 %v5633_v55, %v10624_v61 }
 0x8ba   : > { %v6632_v44 = vpop.eup %6631  ;;  %v6373_v24 = vmul.f32 -1.442695, %v4109_v26  ;;  %v6460_v10 = vmul.f32 -1.442695, %v5637_v47 }
 0x8bb   : > { %v10803_v51 = vadd.f32 1.0, %v6632_v44  ;;  %v10806_v11 = vpop.eup %6633  ;;  %v10850_v44 = vld [vmem:[#allocation10 + $0x10] sm:$0xff] }
 0x8bc   : > { %6635 = vpow2.f32 %v6373_v24  ;;  %v5655_v32 = vmul.f32 %v10806_v11, %v10798_v42  ;;  %vm5660_vm4 = vweird.f32 %v10806_v11  ;;  %5876 = vperm.xlu0 %6611, %v10850_v44   ;;  %v10853_v24 = vld [vmem:[#allocation10 + $0x8] sm:$0xff] }
 0x8bd   : > { %6637 = vrcp.f32 %v10803_v51  ;;  %v5693_v36 = vand.u32 2147483647, %v10803_v51  ;;  %vm5689_vm7 = vweird.f32 %v10803_v51  ;;  %v5695_v41 = vand.u32 2147483648, %v10803_v51  ;;  %5872 = vperm.xlu2 %6610, %v10853_v24  }
 0x8be   : > { %6639 = vpow2.f32 %v6460_v10  ;;  %v5656_v28 = vsub.f32 1.0, %v5655_v32 }
 0x8bf   : > { %v5627_v25 = vpop.xlane.xlu1 %5626  ;;  %vm10846_vm14 = vcmp.eq.f32.partialorder %v5693_v36, 8.507059e+37 }
 0x8c0   : > { %v5635_v1 = vmul.f32 %v5627_v25, %v10624_v61  ;;  %v5657_v61 = vmul.f32 %v10806_v11, %v5656_v28  ;;  %v11568_v28 = vld [vmem:[#allocation17_spill] sm:$0xff] }
 0x8c2   : > { %v6636_v27 = vpop.eup %6635  ;;  %v6458_v17 = vmul.f32 -1.442695, %v5635_v1  ;;  %v10825_v16 = vadd.f32 %v10806_v11, %v5657_v61 }
 0x8c3   : > { %v10811_v58 = vpop.eup %6637  ;;  %v4125_v34 = vadd.f32 1.0, %v6636_v27 }
 0x8c4   : > { %v6640_v7 = vpop.eup %6639  ;;  %v5685_v54 = vmul.f32 %v10811_v58, %v10803_v51  ;;  %6641 = vpow2.f32 %v6458_v17  ;;  %vm5690_vm5 = vweird.f32 %v10811_v58  ;;  %v5696_v17 = vor.u32 1.1754944e-38, %v5695_v41  ;;  %6614 = vset.pattern.permute.xlu0 %v6907_v8 }
 0x8c5   : > { %6643 = vrcp.f32 %v4125_v34  ;;  %v5653_v14 = vadd.f32 1.0, %v6640_v7  ;;  %v4138_v33 = vand.u32 2147483647, %v4125_v34  ;;  %v4140_v39 = vand.u32 2147483648, %v4125_v34  ;;  %vm10834_vm10 = vmor %vm5689_vm7, %vm5690_vm5  ;;  %v11566_v7 = vld [vmem:[#allocation35_spill] sm:$0xff]  ;;  %6612 = vset.pattern.permute.xlu2 %v6907_v8 }
 0x8c6   : > { %v5686_v31 = vsub.f32 1.0, %v5685_v54  ;;  %vm4134_vm9 = vweird.f32 %v4125_v34  ;;  %v11567_v54 = vmax.f32 %v11566_v7, 0.0  ;;  %vm10882_vm5 = vmor %vm5659_vm2, %vm5660_vm4  ;;  %vm5664_vm7 = vcmp.eq.f32.partialorder %v5663_v30, 8.507059e+37  ;;  %5892 = vperm.xlu2 %6612, %v10838_v63  }
 0x8c7   : > { %6645 = vrcp.f32 %v5653_v14  ;;  %v5708_v59 = vand.u32 2147483647, %v5653_v14  ;;  %v5710_v23 = vand.u32 2147483648, %v5653_v14  ;;  %vm5704_vm11 = vweird.f32 %v5653_v14 }
 0x8c8   : > { %v5687_v43 = vmul.f32 %v10811_v58, %v5686_v31  ;;  %vm4139_vm13 = vcmp.eq.f32.partialorder %v4138_v33, 8.507059e+37  ;;  %v4141_v26 = vor.u32 1.1754944e-38, %v4140_v39  ;;  %v11569_v31 = vmax.f32 %v11568_v28, 0.0 }
 0x8c9   : > { %vm5709_vm0 = vcmp.eq.f32.partialorder %v5708_v59, 8.507059e+37  ;;  %v5711_v27 = vor.u32 1.1754944e-38, %v5710_v23  ;;  %v5662_v40 = vsel %vm10882_vm5, %v10806_v11, %v10825_v16  ;;  %v5666_v11 = vor.u32 1.1754944e-38, %v5665_v4  ;;  %v6664_v16 = vld [vmem:[#allocation10 + $0x18] sm:$0xff]  ;;  %v4190_v4 = vld [vmem:[%s10971_s7 + $0x8] sm:$0xff] }
 0x8ca   : > { %v6642_v29 = vpop.eup %6641  ;;  %v5688_v45 = vadd.f32 %v10811_v58, %v5687_v43  ;;  %5880 = vperm.xlu1 %6609, %v6664_v16  }
 0x8cb   : > { %v6644_v53 = vpop.eup %6643  ;;  %v10816_v38 = vadd.f32 1.0, %v6642_v29 }
 0x8cc   : > { %v4130_v57 = vmul.f32 %v6644_v53, %v4125_v34  ;;  %vm4135_vm6 = vweird.f32 %v6644_v53  ;;  %v5692_v1 = vsel %vm10834_vm10, %v10811_v58, %v5688_v45 }
 0x8cd   : > { %v6646_v48 = vpop.eup %6645  ;;  %6647 = vrcp.f32 %v10816_v38  ;;  %vm10842_vm12 = vmor %vm4134_vm9, %vm4135_vm6  ;;  %v5697_v58 = vsel %vm10846_vm14, %v5696_v17, %v5692_v1  ;;  %vm5674_vm4 = vweird.f32 %v10816_v38 }
 0x8ce   : > { %v5700_v22 = vmul.f32 %v6646_v48, %v5653_v14  ;;  %v4131_v0 = vsub.f32 1.0, %v4130_v57  ;;  %vm5705_vm8 = vweird.f32 %v6646_v48  ;;  %v5678_v57 = vand.u32 2147483647, %v10816_v38  ;;  %5900 = vperm.xlu2 %6612, %v10850_v44  }
 0x8cf   : > { %vm5706_vm15 = vmor %vm5704_vm11, %vm5705_vm8  ;;  %v5724_v12 = vmul.f32 %v5697_v58, %v5561_v2 }
 0x8d0   : > { %v5701_v6 = vsub.f32 1.0, %v5700_v22  ;;  %v4132_v13 = vmul.f32 %v6644_v53, %v4131_v0  ;;  %v5680_v22 = vand.u32 2147483648, %v10816_v38  ;;  %vm5679_vm6 = vcmp.eq.f32.partialorder %v5678_v57, 8.507059e+37 }
 0x8d2   : > { %v5702_v19 = vmul.f32 %v6646_v48, %v5701_v6  ;;  %v4133_v18 = vadd.f32 %v6644_v53, %v4132_v13  ;;  %v5681_v39 = vor.u32 1.1754944e-38, %v5680_v22  ;;  %6613 = vset.pattern.permute.xlu1 %v6907_v8 }
 0x8d3   : > { %v6648_v49 = vpop.eup %6647  ;;  %5896 = vperm.xlu1 %6613, %v10853_v24  }
 0x8d4   : > { %v5670_v10 = vmul.f32 %v6648_v49, %v10816_v38  ;;  %v5703_v51 = vadd.f32 %v6646_v48, %v5702_v19  ;;  %v4137_v25 = vsel %vm10842_vm12, %v6644_v53, %v4133_v18  ;;  %v4189_v53 = vld [vmem:[%s10971_s7] sm:$0xff]  ;;  %vm5675_vm1 = vweird.f32 %v6648_v49 }
 0x8d5   : > { %v4142_v32 = vsel %vm4139_vm13, %v4141_v26, %v4137_v25  ;;  %vm5676_vm2 = vmor %vm5674_vm4, %vm5675_vm1 }
 0x8d6   : > { %v5707_v34 = vsel %vm5706_vm15, %v6646_v48, %v5703_v51  ;;  %v4193_v14 = vmul.f32 %v4142_v32, %v11567_v54  ;;  %v4194_v29 = vmul.f32 %v4142_v32, %v11569_v31  ;;  %v5671_v61 = vsub.f32 1.0, %v5670_v10 }
 0x8d7   : > { %v5712_v43 = vsel %vm5709_vm0, %v5711_v27, %v5707_v34 }
 0x8d8   : > { %v5725_v48 = vmul.f32 %v5712_v43, %v5562_v21  ;;  %v5726_v0 = vmul.f32 %v5712_v43, %v5563_v46  ;;  %5824 = vmatpush.msrb.mxu3 %v4193_v14  ;;  %5853 = vmatpush.msra.mxu0 %v4194_v29  ;;  %v5672_v36 = vmul.f32 %v6648_v49, %v5671_v61 }
 0x8d9   : > { %6473 = vmatmul.msk.f32.vlgmr.msrb.gmra.mxu3 %vm4019_vm3, %v4189_v53  ;;  %6477 = vmatmul.msk.f32.vlgmr.msra.gmra.mxu0 %vm4019_vm3, %v4189_v53  ;;  %v5723_v21 = vmul.f32 %v5697_v58, %v5560_v5  ;;  %v5667_v5 = vsel %vm5664_vm7, %v5666_v11, %v5662_v40 }
 0x8da   : > { %5751 = vmatpush.msra.mxu1 %v5725_v48  ;;  %5780 = vmatpush.msrb.mxu2 %v5726_v0  ;;  %v5673_v46 = vadd.f32 %v6648_v49, %v5672_v36  ;;  %v5719_v42 = vmul.f32 %v5667_v5, %v5556_v9  ;;  %v5720_v30 = vmul.f32 %v5667_v5, %v5557_v60  ;;  %v4192_v9 = vld [vmem:[%s10971_s7 + $0x18] sm:$0xff] }
 0x8db   : > { %5904 = vperm.xlu1 %6613, %v6664_v16  }
 0x8dc   : > { %5752 = vmatpush.msra.mxu1 %v5723_v21  ;;  %5781 = vmatpush.msrb.mxu2 %v5724_v12  ;;  %v5677_v45 = vsel %vm5676_vm2, %v6648_v49, %v5673_v46 }
 0x8dd   : > { %v5682_v3 = vsel %vm5679_vm6, %v5681_v39, %v5677_v45 }
 0x8de   : > { %v5721_v2 = vmul.f32 %v5682_v3, %v5558_v56  ;;  %v5722_v38 = vmul.f32 %v5682_v3, %v5559_v20  ;;  %v6462_v56 = vld [vmem:[%s10971_s7 + $0x28] sm:$0xff] }
 0x8e0   : > { %5753 = vmatpush.msra.mxu1 %v5721_v2  ;;  %5782 = vmatpush.msrb.mxu2 %v5722_v38 }
 0x8e1   : > { %6474 = vmatmul.msk.f32.gmra.mxu3 %vm4019_vm3, %v4190_v4  ;;  %6478 = vmatmul.msk.f32.gmra.mxu0 %vm4019_vm3, %v4190_v4 }
 0x8e2   : > { %5754 = vmatpush.msra.mxu1 %v5719_v42  ;;  %5783 = vmatpush.msrb.mxu2 %v5720_v30 }
 0x8e3   : > { %6469 = vmatmul.msk.f32.vlgmr.msrb.gmra.mxu2 %vm4019_vm3, %v6461_v15  ;;  %6465 = vmatmul.msk.f32.vlgmr.msra.gmra.mxu1 %vm4019_vm3, %v6461_v15 }
 0x8e9   : > { %6475 = vmatmul.msk.f32.gmra.mxu3 %vm4019_vm3, %v4191_v35  ;;  %6479 = vmatmul.msk.f32.gmra.mxu0 %vm4019_vm3, %v4191_v35 }
 0x8eb   : > { %6470 = vmatmul.msk.f32.gmra.mxu2 %vm4019_vm3, %v6462_v56  ;;  %6466 = vmatmul.msk.f32.gmra.mxu1 %vm4019_vm3, %v6462_v56 }
 0x8f1   : > { %6476 = vmatmul.msk.f32.gmra.mxu3 %vm4019_vm3, %v4192_v9  ;;  %6480 = vmatmul.msk.f32.gmra.mxu0 %vm4019_vm3, %v4192_v9 }
 0x8f3   : > { %6471 = vmatmul.msk.f32.gmra.mxu2 %vm4019_vm3, %v6463_v37  ;;  %6467 = vmatmul.msk.f32.gmra.mxu1 %vm4019_vm3, %v6463_v37 }
 0x8fb   : > { %6472 = vmatmul.msk.f32.gmra.mxu2 %vm4019_vm3, %v6464_v52  ;;  %6468 = vmatmul.msk.f32.gmra.mxu1 %vm4019_vm3, %v6464_v52 }
 0x917   : > { %v5873_v60 = vpop.permute.xlu2 %5872 }
 0x920   : > { %v5893_v62 = vpop.permute.xlu2 %5892 }
 0x927   : > { %v5869_v20 = vpop.permute.xlu1 %5868 }
 0x928   : > { %v5901_v28 = vpop.permute.xlu2 %5900 }
 0x92e   : > { %v5877_v34 = vpop.permute.xlu0 %5876 }
 0x93c   : > { %v5881_v23 = vpop.permute.xlu1 %5880 }
 0x945   : > { %v5897_v24 = vpop.permute.xlu1 %5896 }
 0x94d   : > { %v5905_v40 = vpop.permute.xlu1 %5904 }
 0x956   : > { %v5855_v13 = vpop.f32.mrf.mxu0 }
 0x95c   : > { %v5826_v6 = vpop.f32.mrf.mxu3 }
 0x95e   : > { %v5858_v26 = vpop.f32.mrf.mxu0 }
 0x960   : > { %v5756_v59 = vpop.f32.mrf.mxu1 }
 0x961   : > { %v5827_v41 = vadd.f32 %v5826_v6, %v5756_v59 }
 0x963   : > { %v5883_v19 = vmul.f32 %v5869_v20, %v5827_v41 }
 0x964   : > { %v5829_v18 = vpop.f32.mrf.mxu3 }
 0x965   : > { %v5907_v50 = vadd.f32 %v5893_v62, %v5883_v19 }
 0x966   : > { %v5785_v63 = vpop.f32.mrf.mxu2  ;;  %v5861_v14 = vpop.f32.mrf.mxu0 }
 0x967   : > { %v5856_v49 = vadd.f32 %v5855_v13, %v5785_v63  ;;  %5915 = vst [vmem:[%s10951_s21] sm:$0xff] %v5907_v50 }
 0x968   : > { %v5759_v55 = vpop.f32.mrf.mxu1 }
 0x969   : > { %v5884_v47 = vmul.f32 %v5869_v20, %v5856_v49  ;;  %v5830_v44 = vadd.f32 %v5829_v18, %v5759_v55 }
 0x96b   : > { %v5885_v10 = vmul.f32 %v5873_v60, %v5830_v44  ;;  %v5908_v51 = vadd.f32 %v5893_v62, %v5884_v47 }
 0x96c   : > { %v5832_v25 = vpop.f32.mrf.mxu3 }
 0x96d   : > { %v5909_v1 = vadd.f32 %v5897_v24, %v5885_v10  ;;  %5916 = vst [vmem:[%s10951_s21 + $0x8] sm:$0xff] %v5908_v51 }
 0x96e   : > { %v5788_v27 = vpop.f32.mrf.mxu2  ;;  %v5864_v33 = vpop.f32.mrf.mxu0 }
 0x96f   : > { %v5859_v32 = vadd.f32 %v5858_v26, %v5788_v27  ;;  %5917 = vst [vmem:[%s10951_s21 + $0x10] sm:$0xff] %v5909_v1 }
 0x970   : > { %v5762_v17 = vpop.f32.mrf.mxu1 }
 0x971   : > { %v5833_v7 = vadd.f32 %v5832_v25, %v5762_v17  ;;  %v5886_v54 = vmul.f32 %v5873_v60, %v5859_v32 }
 0x973   : > { %v5910_v31 = vadd.f32 %v5897_v24, %v5886_v54  ;;  %v5887_v29 = vmul.f32 %v5877_v34, %v5833_v7 }
 0x974   : > { %v5835_v43 = vpop.f32.mrf.mxu3 }
 0x975   : > { %5918 = vst [vmem:[%s10951_s21 + $0x18] sm:$0xff] %v5910_v31  ;;  %v5911_v61 = vadd.f32 %v5901_v28, %v5887_v29 }
 0x976   : > { %v5791_v53 = vpop.f32.mrf.mxu2 }
 0x977   : > { %v5862_v58 = vadd.f32 %v5861_v14, %v5791_v53  ;;  %5919 = vst [vmem:[%s10951_s21 + $0x20] sm:$0xff] %v5911_v61 }
 0x978   : > { %v5765_v57 = vpop.f32.mrf.mxu1 }
 0x979   : > { %v5836_v22 = vadd.f32 %v5835_v43, %v5765_v57  ;;  %v5888_v48 = vmul.f32 %v5877_v34, %v5862_v58 }
 0x97b   : > { %v5889_v0 = vmul.f32 %v5881_v23, %v5836_v22  ;;  %v5912_v36 = vadd.f32 %v5901_v28, %v5888_v48 }
 0x97d   : > { %v5913_v21 = vadd.f32 %v5905_v40, %v5889_v0  ;;  %5920 = vst [vmem:[%s10951_s21 + $0x28] sm:$0xff] %v5912_v36 }
 0x97e   : > { %v5794_v12 = vpop.f32.mrf.mxu2 }
 0x97f   : > { %v5865_v46 = vadd.f32 %v5864_v33, %v5794_v12  ;;  %5921 = vst [vmem:[%s10951_s21 + $0x30] sm:$0xff] %v5913_v21 }
 0x981   : > { %v5890_v39 = vmul.f32 %v5881_v23, %v5865_v46 }
 0x983   : > { %v5914_v11 = vadd.f32 %v5905_v40, %v5890_v39 }
 0x985   : > { %5922 = vst [vmem:[%s10951_s21 + $0x38] sm:$0xff] %v5914_v11 }
 0x986 PF: > { %s24_s13 = sadd.s32 1, %s6867_s13  }
 0x987   : > { %p21_p7 = scmp.ge.s32.totalorder %s24_s13, 4  }
 0x989   :  { %23 = sbr.rel (!%p21_p7) target bundleno = 4 (0x4), region = 175 }
 0x98e   :  { %5944 = vsyncpa [#allocation3], 1 }
 0x98f   :  { %5946 = vsyncpa [#allocation3 + $0x1], 1 }
 0x990   :  { %5947 = vsyncpa [#allocation5], 1 }
 0x991   :  { %5948 = vsyncpa [#allocation8], 1 }
 0x992   :  { %5949 = vsyncpa [#allocation11], 1 }

</bundles_post_ra>
